<compile_context>
chip_gen: v7x
topology: tpu7x:2x2x1
jax: 0.10.0
libtpu: 0.0.40
codegen_flags: <defaults>
</compile_context>

<pallas_src>
import functools

import jax
import jax.numpy as jnp
from jax.experimental import pallas as pl
from jax.experimental.pallas import tpu as pltpu


# ----------------------------------------------------------------------------
# Glue helpers (XLA side)
# ----------------------------------------------------------------------------
def _im2col(x_flat, B, H, W, k):
    """x_flat: (B*H*W, Cin) channels-last -> (B*H*W, k*k*Cin) 'same' patches."""
    Cin = x_flat.shape[-1]
    x = x_flat.reshape(B, H, W, Cin)
    p = k // 2
    xp = jnp.pad(x, ((0, 0), (p, k - 1 - p), (p, k - 1 - p), (0, 0)))
    cols = [xp[:, dy:dy + H, dx:dx + W, :] for dy in range(k) for dx in range(k)]
    return jnp.concatenate(cols, axis=-1).reshape(B * H * W, k * k * Cin)


def _tile_m(M, cap=512):
    """Largest M tile (multiple of 8, divides M) that keeps VMEM modest on v7x."""
    if M <= cap:
        return M
    for t in range(cap, 7, -1):
        if t % 8 == 0 and M % t == 0:
            return t
    return M


def _cparams():
    return pltpu.CompilerParams(dimension_semantics=("parallel",))


def _row_spec(tm, n):
    return pl.BlockSpec((tm, n), lambda i: (i, 0))


def _rep_spec(r, n):
    return pl.BlockSpec((r, n), lambda i: (0, 0))


# ----------------------------------------------------------------------------
# Fused Pallas kernels
# ----------------------------------------------------------------------------
def _stlstm_cell_kernel(p_ref, c_ref, m_ref, w_ref, b_ref, wo_ref, bo_ref,
                        out_ref, *, C, fb):
    # p_ref: (TM, K) bf16 patches [x|h|m]; w_ref: (K, 8C) bf16 packed weights.
    g = jnp.dot(p_ref[...], w_ref[...],
                preferred_element_type=jnp.float32) + b_ref[...]
    it, gt, ft, ot = g[:, 0:C], g[:, C:2 * C], g[:, 2 * C:3 * C], g[:, 3 * C:4 * C]
    is_, gs, fs, os_ = g[:, 4 * C:5 * C], g[:, 5 * C:6 * C], g[:, 6 * C:7 * C], g[:, 7 * C:8 * C]
    i = jax.nn.sigmoid(it)
    gg = jnp.tanh(gt)
    f = jax.nn.sigmoid(ft + fb)
    i2 = jax.nn.sigmoid(is_)
    g2 = jnp.tanh(gs)
    f2 = jax.nn.sigmoid(fs + fb)
    o = jax.nn.sigmoid(ot + os_)
    new_c = f * c_ref[...] + i * gg
    new_m = f2 * m_ref[...] + i2 * g2
    cm = jnp.concatenate([new_c, new_m], axis=-1)
    cell = jnp.dot(cm.astype(jnp.bfloat16), wo_ref[...],
                   preferred_element_type=jnp.float32) + bo_ref[...]
    new_h = o * jnp.tanh(cell)
    out_ref[...] = jnp.concatenate([new_h, new_c, new_m], axis=-1)


def _mimn_cell_kernel(p_ref, n_ref, w_ref, b_ref, ctw_ref, ocw_ref,
                      out_ref, *, C, fb):
    # p_ref: (TM, K) bf16 patches [x|diff_h|n]; packed weights [Wx; -Wx; Wh].
    n = n_ref[...]
    g = jnp.dot(p_ref[...], w_ref[...],
                preferred_element_type=jnp.float32) + b_ref[...]
    gi, gg_, gf, go = g[:, 0:C], g[:, C:2 * C], g[:, 2 * C:3 * C], g[:, 3 * C:4 * C]
    ctw = ctw_ref[...]
    i = jax.nn.sigmoid(gi + n * ctw[:, :C])
    f = jax.nn.sigmoid(gf + n * ctw[:, C:] + fb)
    gg = jnp.tanh(gg_)
    n_new = f * n + i * gg
    o = jax.nn.sigmoid(go + n_new * ocw_ref[...])
    n_h = o * jnp.tanh(n_new)
    out_ref[...] = jnp.concatenate([n_h, n_new], axis=-1)


def _mimblock_cell_kernel(p_ref, s_ref, m_ref, w_ref, b_ref, ctw_ref, ocw_ref,
                          wl_ref, bl_ref, out_ref, *, C, fb):
    # p_ref: (TM, K) bf16 patches [n_h|c|x|h|m]; w_ref: (K, 11C) packed weights.
    g = jnp.dot(p_ref[...], w_ref[...],
                preferred_element_type=jnp.float32) + b_ref[...]
    s = s_ref[...]
    # ---- MIM-S (stationary module), carried state s ----
    si, sg, sf, so = g[:, 0:C], g[:, C:2 * C], g[:, 2 * C:3 * C], g[:, 3 * C:4 * C]
    ctw = ctw_ref[...]
    i_s = jax.nn.sigmoid(si + s * ctw[:, :C])
    f_s = jax.nn.sigmoid(sf + s * ctw[:, C:] + fb)
    g_s = jnp.tanh(sg)
    new_s = f_s * s + i_s * g_s
    c_mid = jax.nn.sigmoid(so + new_s * ocw_ref[...]) * jnp.tanh(new_s)
    # ---- MIMBlock gates; A1..A7 pre-summed by the packed matmul ----
    a = lambda j: g[:, (4 + j) * C:(5 + j) * C]
    i = jax.nn.sigmoid(a(0))           # i_x + i_t
    gg = jnp.tanh(a(1))                # g_x + g_t
    o = jax.nn.sigmoid(a(2) + a(6))    # o_x + o_t + o_s
    i2 = jax.nn.sigmoid(a(3))          # i_x + i_s
    g2 = jnp.tanh(a(4))                # g_x + g_s
    f2 = jax.nn.sigmoid(a(5) + fb)     # f_x + f_s + fb
    m = m_ref[...]
    new_m = f2 * m + i2 * g2
    new_c = c_mid + i * gg
    cm = jnp.concatenate([new_c, new_m], axis=-1)
    cell = jnp.dot(cm.astype(jnp.bfloat16), wl_ref[...],
                   preferred_element_type=jnp.float32) + bl_ref[...]
    new_h = o * jnp.tanh(cell)
    out_ref[...] = jnp.concatenate([new_c, new_h, new_m, new_s], axis=-1)


def _matmul_kernel(x_ref, w_ref, o_ref):
    o_ref[...] = jnp.dot(x_ref[...], w_ref[...],
                         preferred_element_type=jnp.float32).astype(o_ref.dtype)


# ----------------------------------------------------------------------------
# Cell-step wrappers (one / two pallas_calls per cell per timestep)
# ----------------------------------------------------------------------------
def stlstm_step(p, x, h, c, m, B, H, W, C, k, fb, tm):
    patches = jnp.concatenate(
        [_im2col(x, B, H, W, k), _im2col(h, B, H, W, k), _im2col(m, B, H, W, k)],
        axis=-1).astype(jnp.bfloat16)
    M, K = patches.shape
    out = pl.pallas_call(
        functools.partial(_stlstm_cell_kernel, C=C, fb=fb),
        out_shape=jax.ShapeDtypeStruct((M, 3 * C), jnp.float32),
        grid=(M // tm,),
        in_specs=[_row_spec(tm, K), _row_spec(tm, C), _row_spec(tm, C),
                  _rep_spec(K, 8 * C), _rep_spec(1, 8 * C),
                  _rep_spec(2 * C, C), _rep_spec(1, C)],
        out_specs=_row_spec(tm, 3 * C),
        compiler_params=_cparams(),
    )(patches, c, m, p["w"], p["b"], p["w_o"], p["b_o"])
    return out[:, :C], out[:, C:2 * C], out[:, 2 * C:3 * C]   # new_h, new_c, new_m


def mimblock_step(pn, pb, x, diff_h, c, h, m, n, s, B, H, W, C, k, fb, tm):
    M = x.shape[0]
    # ---- kernel A: MIM-N on diff = x - diff_h (folded by linearity) ----
    patches_n = jnp.concatenate(
        [_im2col(x, B, H, W, k), _im2col(diff_h, B, H, W, k), _im2col(n, B, H, W, k)],
        axis=-1).astype(jnp.bfloat16)
    Kn = patches_n.shape[1]
    out_n = pl.pallas_call(
        functools.partial(_mimn_cell_kernel, C=C, fb=fb),
        out_shape=jax.ShapeDtypeStruct((M, 2 * C), jnp.float32),
        grid=(M // tm,),
        in_specs=[_row_spec(tm, Kn), _row_spec(tm, C),
                  _rep_spec(Kn, 4 * C), _rep_spec(1, 4 * C),
                  _rep_spec(1, 2 * C), _rep_spec(1, C)],
        out_specs=_row_spec(tm, 2 * C),
        compiler_params=_cparams(),
    )(patches_n, n, pn["w"], pn["b"], pn["ctw"], pn["ocw"])
    n_h, new_n = out_n[:, :C], out_n[:, C:]

    # ---- kernel B: MIM-S + block gates + 1x1 conv + o*tanh(cell) ----
    patches_b = jnp.concatenate(
        [_im2col(n_h, B, H, W, k), _im2col(c, B, H, W, k), _im2col(x, B, H, W, k),
         _im2col(h, B, H, W, k), _im2col(m, B, H, W, k)],
        axis=-1).astype(jnp.bfloat16)
    Kb = patches_b.shape[1]
    out_b = pl.pallas_call(
        functools.partial(_mimblock_cell_kernel, C=C, fb=fb),
        out_shape=jax.ShapeDtypeStruct((M, 4 * C), jnp.float32),
        grid=(M // tm,),
        in_specs=[_row_spec(tm, Kb), _row_spec(tm, C), _row_spec(tm, C),
                  _rep_spec(Kb, 11 * C), _rep_spec(1, 11 * C),
                  _rep_spec(1, 2 * C), _rep_spec(1, C),
                  _rep_spec(2 * C, C), _rep_spec(1, C)],
        out_specs=_row_spec(tm, 4 * C),
        compiler_params=_cparams(),
    )(patches_b, s, m, pb["w"], pb["b"], pb["ctw"], pb["ocw"],
      pb["w_last"], pb["b_last"])
    new_c = out_b[:, :C]
    new_h = out_b[:, C:2 * C]
    new_m = out_b[:, 2 * C:3 * C]
    new_s = out_b[:, 3 * C:]
    return new_c, new_h, new_m, new_n, new_s


def matmul_pallas(x, w, tm):
    """1x1 conv (no bias) as a tiled Pallas matmul; x f32 -> bf16 MXU inputs."""
    M, K = x.shape
    N = w.shape[1]
    return pl.pallas_call(
        _matmul_kernel,
        out_shape=jax.ShapeDtypeStruct((M, N), jnp.float32),
        grid=(M // tm,),
        in_specs=[_row_spec(tm, K), _rep_spec(K, N)],
        out_specs=_row_spec(tm, N),
        compiler_params=_cparams(),
    )(x.astype(w.dtype), w)


# ----------------------------------------------------------------------------
# MIM network forward (mirrors MIM.forward exactly)
# ----------------------------------------------------------------------------
def mim_forward(params, inputs, *, hidden_list, ksize_list, out_len, fb):
    B, T, Cin, H, W = inputs.shape
    P = H * W
    BP = B * P
    layers = len(hidden_list)
    tm = _tile_m(BP)
    C0 = hidden_list[0]

    h = [jnp.zeros((BP, hidden_list[i]), jnp.float32) for i in range(layers)]
    c = [jnp.zeros((BP, hidden_list[i]), jnp.float32) for i in range(layers)]
    h_ = [jnp.zeros((BP, hidden_list[i]), jnp.float32) for i in range(layers)]
    n = [None] + [jnp.zeros((BP, hidden_list[i]), jnp.float32) for i in range(1, layers)]
    s = [None] + [jnp.zeros((BP, hidden_list[i]), jnp.float32) for i in range(1, layers)]
    m = jnp.zeros((BP, C0), jnp.float32)

    # (B,T,Cin,H,W) -> (T, B*H*W, Cin) channels-last, flattened batch+spatial.
    x_seq = jnp.transpose(inputs, (1, 0, 3, 4, 2)).reshape(T, BP, Cin)

    cells = params["cells"]
    pred = []
    x_pred = None
    for t in range(T + out_len):
        x = x_seq[t] if t < T else x_pred
        h[0], c[0], m = stlstm_step(cells[0], x, h[0], c[0], m,
                                    B, H, W, hidden_list[0], ksize_list[0], fb, tm)
        h_[0] = h[0]
        for i in range(1, layers):
            c[i], h[i], m, n[i], s[i] = mimblock_step(
                cells[i]["mimn"], cells[i]["main"],
                h_[i - 1], h[i - 1], c[i], h[i], m, n[i], s[i],
                B, H, W, hidden_list[i], ksize_list[i], fb, tm)
            h_[i] = h[i]
        x_pred = matmul_pallas(h[layers - 1], params["w_conv_last"], tm)
        if t >= T:
            pred.append(x_pred)

    out = jnp.stack(pred, axis=0).reshape(out_len, B, H, W, Cin)
    return jnp.transpose(out, (1, 0, 4, 2, 3))           # (B, out_len, Cin, H, W)


# ----------------------------------------------------------------------------
# Weight packing (done once at init; folds gate sums into the MXU matmuls)
# ----------------------------------------------------------------------------
def _pack_stlstm(w_x, b_x, w_h, b_h, w_m, b_m, w_o, b_o, C):
    Wx = w_x.reshape(-1, 4 * C)
    Wh = w_h.reshape(-1, 4 * C)
    Wm = w_m.reshape(-1, 4 * C)
    g4 = lambda Wmat: [Wmat[:, j * C:(j + 1) * C] for j in range(4)]
    xi, xg, xf, xo = g4(Wx)
    hi, hg, hf, ho = g4(Wh)
    mi, mg, mf, mo = g4(Wm)
    zx, zh, zm = jnp.zeros_like(xi), jnp.zeros_like(hi), jnp.zeros_like(mi)
    col = lambda a, b, d: jnp.concatenate([a, b, d], axis=0)
    # column layout: [i_t, g_t, f_t, o_t, i_s, g_s, f_s, o_s]
    W = jnp.concatenate([col(xi, hi, zm), col(xg, hg, zm), col(xf, hf, zm),
                         col(xo, ho, zm), col(xi, zh, mi), col(xg, zh, mg),
                         col(xf, zh, mf), col(zx, zh, mo)], axis=1)
    bx = [b_x[j * C:(j + 1) * C] for j in range(4)]
    bh = [b_h[j * C:(j + 1) * C] for j in range(4)]
    bm = [b_m[j * C:(j + 1) * C] for j in range(4)]
    b = jnp.concatenate([bx[0] + bh[0], bx[1] + bh[1], bx[2] + bh[2], bx[3] + bh[3],
                         bx[0] + bm[0], bx[1] + bm[1], bx[2] + bm[2], bm[3]])
    return dict(w=W.astype(jnp.bfloat16), b=b.reshape(1, 8 * C),
                w_o=w_o.reshape(2 * C, C).astype(jnp.bfloat16),
                b_o=b_o.reshape(1, C))


def _pack_mimn(w_x, b_x, w_h, b_h, ctw, ocw, C):
    Wx = w_x.reshape(-1, 4 * C)
    Wh = w_h.reshape(-1, 4 * C)
    W = jnp.concatenate([Wx, -Wx, Wh], axis=0)   # rows: x | diff_h | n patches
    b = (b_x + b_h).reshape(1, 4 * C)
    return dict(w=W.astype(jnp.bfloat16), b=b,
                ctw=ctw.reshape(1, 2 * C), ocw=ocw.reshape(1, C))


def _pack_mimblock(w_xs, b_xs, w_hs, b_hs, ctw, ocw,
                   w_x, b_x, w_t, b_t, w_s, b_s, w_last, b_last, C):
    Wnh = w_xs.reshape(-1, 4 * C)    # applied to n_h patches (MIM-S x-conv)
    Wc = w_hs.reshape(-1, 4 * C)     # applied to c patches (MIM-S h-conv)
    Wx = w_x.reshape(-1, 4 * C)
    Wt = w_t.reshape(-1, 3 * C)
    Ws = w_s.reshape(-1, 4 * C)
    g4 = lambda Wmat: [Wmat[:, j * C:(j + 1) * C] for j in range(4)]
    xi, xg, xf, xo = g4(Wx)
    si, sg, sf, so = g4(Ws)
    ti, tg, to = Wt[:, :C], Wt[:, C:2 * C], Wt[:, 2 * C:3 * C]
    z_nh = jnp.zeros((Wnh.shape[0], C))
    z_c = jnp.zeros((Wc.shape[0], C))
    z_x = jnp.zeros((Wx.shape[0], C))
    z_h = jnp.zeros((Wt.shape[0], C))
    z_m = jnp.zeros((Ws.shape[0], C))
    mims_cols = jnp.concatenate(
        [Wnh, Wc, jnp.zeros((Wx.shape[0], 4 * C)),
         jnp.zeros((Wt.shape[0], 4 * C)), jnp.zeros((Ws.shape[0], 4 * C))], axis=0)
    col = lambda xb, hb, mb: jnp.concatenate([z_nh, z_c, xb, hb, mb], axis=0)
    A = jnp.concatenate([
        col(xi, ti, z_m),   # A1 = i_x + i_t
        col(xg, tg, z_m),   # A2 = g_x + g_t
        col(xo, to, z_m),   # A3 = o_x + o_t
        col(xi, z_h, si),   # A4 = i_x + i_s
        col(xg, z_h, sg),   # A5 = g_x + g_s
        col(xf, z_h, sf),   # A6 = f_x + f_s
        col(z_x, z_h, so),  # A7 = o_s
    ], axis=1)
    W = jnp.concatenate([mims_cols, A], axis=1)
    bx = [b_x[j * C:(j + 1) * C] for j in range(4)]
    bt = [b_t[j * C:(j + 1) * C] for j in range(3)]
    bs = [b_s[j * C:(j + 1) * C] for j in range(4)]
    b = jnp.concatenate([b_xs + b_hs,
                         bx[0] + bt[0], bx[1] + bt[1], bx[3] + bt[2],
                         bx[0] + bs[0], bx[1] + bs[1], bx[2] + bs[2], bs[3]])
    return dict(w=W.astype(jnp.bfloat16), b=b.reshape(1, 11 * C),
                ctw=ctw.reshape(1, 2 * C), ocw=ocw.reshape(1, C),
                w_last=w_last.reshape(2 * C, C).astype(jnp.bfloat16),
                b_last=b_last.reshape(1, C))


def init_params(key, in_channels, hidden_list, ksize_list):
    keys = iter(jax.random.split(key, 1024))

    def w(shape):
        return 0.1 * jax.random.normal(next(keys), shape, jnp.float32)

    cells = []
    C0, k0 = hidden_list[0], ksize_list[0]
    cells.append(_pack_stlstm(
        w_x=w((k0, k0, in_channels, 4 * C0)), b_x=w((4 * C0,)),
        w_h=w((k0, k0, C0, 4 * C0)), b_h=w((4 * C0,)),
        w_m=w((k0, k0, C0, 4 * C0)), b_m=w((4 * C0,)),
        w_o=w((1, 1, 2 * C0, C0)), b_o=w((C0,)), C=C0))
    for i in range(1, len(hidden_list)):
        Ci, ki, Cp = hidden_list[i], ksize_list[i], hidden_list[i - 1]
        mimn = _pack_mimn(
            w_x=w((ki, ki, Cp, 4 * Ci)), b_x=w((4 * Ci,)),
            w_h=w((ki, ki, Ci, 4 * Ci)), b_h=w((4 * Ci,)),
            ctw=w((2 * Ci,)), ocw=w((Ci,)), C=Ci)
        main = _pack_mimblock(
            w_xs=w((ki, ki, Ci, 4 * Ci)), b_xs=w((4 * Ci,)),
            w_hs=w((ki, ki, Ci, 4 * Ci)), b_hs=w((4 * Ci,)),
            ctw=w((2 * Ci,)), ocw=w((Ci,)),
            w_x=w((ki, ki, Cp, 4 * Ci)), b_x=w((4 * Ci,)),
            w_t=w((ki, ki, Ci, 3 * Ci)), b_t=w((3 * Ci,)),
            w_s=w((ki, ki, Ci, 4 * Ci)), b_s=w((4 * Ci,)),
            w_last=w((1, 1, 2 * Ci, Ci)), b_last=w((Ci,)), C=Ci)
        cells.append(dict(mimn=mimn, main=main))
    w_conv_last = w((hidden_list[-1], in_channels)).astype(jnp.bfloat16)
    return dict(cells=cells, w_conv_last=w_conv_last)


# ----------------------------------------------------------------------------
if __name__ == "__main__":
    key = jax.random.PRNGKey(0)
    kp, kx = jax.random.split(key)

    in_channels = 2
    hidden_channels_list = (8, 8)      # uniform hidden sizes (m-memory chain)
    kernel_size_list = (3, 3)
    forget_bias = 0.01
    B, T, H, W = 2, 4, 8, 8
    out_len = 3

    params = init_params(kp, in_channels, list(hidden_channels_list), list(kernel_size_list))
    inputs = jax.random.normal(kx, (B, T, in_channels, H, W), jnp.float32)

    fwd = jax.jit(lambda p, x: mim_forward(
        p, x, hidden_list=hidden_channels_list, ksize_list=kernel_size_list,
        out_len=out_len, fb=forget_bias))
    prediction = jax.block_until_ready(fwd(params, inputs))

    assert prediction.shape == (B, out_len, in_channels, H, W), prediction.shape
    assert bool(jnp.all(jnp.isfinite(prediction)))
    print("KERNEL_OK")
</pallas_src>

<mosaic_0001>
module attributes {stable_mosaic.version = 11 : i64} {
  func.func @_stlstm_cell_kernel(%arg0: i32, %arg1: memref<128x162xbf16, #tpu.memory_space<vmem>>, %arg2: memref<128x8xf32, #tpu.memory_space<vmem>>, %arg3: memref<128x8xf32, #tpu.memory_space<vmem>>, %arg4: memref<162x64xbf16, #tpu.memory_space<vmem>>, %arg5: memref<1x64xf32, #tpu.memory_space<vmem>>, %arg6: memref<16x8xbf16, #tpu.memory_space<vmem>>, %arg7: memref<1x8xf32, #tpu.memory_space<vmem>>, %arg8: memref<128x24xf32, #tpu.memory_space<vmem>>) attributes {dimension_semantics = [#tpu.dimension_semantics<parallel>], iteration_bounds = array<i64: 1>, scalar_prefetch = 0 : i64, scratch_operands = 0 : i64, tpu.core_type = #tpu.core_type<tc>, window_params = [{transform_indices = @transform_0, window_bounds = array<i64: 128, 162>}, {transform_indices = @transform_1, window_bounds = array<i64: 128, 8>}, {transform_indices = @transform_2, window_bounds = array<i64: 128, 8>}, {pipeline_mode = #tpu.pipeline_mode<synchronous>, transform_indices = @transform_3, window_bounds = array<i64: 162, 64>}, {pipeline_mode = #tpu.pipeline_mode<synchronous>, transform_indices = @transform_4, window_bounds = array<i64: 1, 64>}, {pipeline_mode = #tpu.pipeline_mode<synchronous>, transform_indices = @transform_5, window_bounds = array<i64: 16, 8>}, {pipeline_mode = #tpu.pipeline_mode<synchronous>, transform_indices = @transform_6, window_bounds = array<i64: 1, 8>}, {transform_indices = @transform_7, window_bounds = array<i64: 128, 24>}]} {
    %c0 = arith.constant 0 : index
    %c0_0 = arith.constant 0 : index
    %0 = vector.load %arg1[%c0, %c0_0] : memref<128x162xbf16, #tpu.memory_space<vmem>>, vector<128x162xbf16>
    %c0_1 = arith.constant 0 : index
    %c0_2 = arith.constant 0 : index
    %1 = vector.load %arg4[%c0_1, %c0_2] : memref<162x64xbf16, #tpu.memory_space<vmem>>, vector<162x64xbf16>
    %cst = arith.constant dense<0.000000e+00> : vector<128x64xf32>
    %2 = tpu.matmul %0, %1, %cst {dimension_numbers = #tpu.dot_dimension_numbers<[1], [0], [0], [1], [0, 0, 1, 1], [], []>} : vector<128x162xbf16>, vector<162x64xbf16>, vector<128x64xf32> -> vector<128x64xf32>
    %c0_3 = arith.constant 0 : index
    %c0_4 = arith.constant 0 : index
    %3 = vector.load %arg5[%c0_3, %c0_4] : memref<1x64xf32, #tpu.memory_space<vmem>>, vector<1x64xf32>
    %4 = vector.broadcast %3 : vector<1x64xf32> to vector<128x64xf32>
    %5 = arith.addf %2, %4 : vector<128x64xf32>
    %6 = vector.extract_strided_slice %5 {offsets = [0, 0], sizes = [128, 8], strides = [1, 1]} : vector<128x64xf32> to vector<128x8xf32>
    %7 = vector.extract_strided_slice %5 {offsets = [0, 8], sizes = [128, 8], strides = [1, 1]} : vector<128x64xf32> to vector<128x8xf32>
    %8 = vector.extract_strided_slice %5 {offsets = [0, 16], sizes = [128, 8], strides = [1, 1]} : vector<128x64xf32> to vector<128x8xf32>
    %9 = vector.extract_strided_slice %5 {offsets = [0, 24], sizes = [128, 8], strides = [1, 1]} : vector<128x64xf32> to vector<128x8xf32>
    %10 = vector.extract_strided_slice %5 {offsets = [0, 32], sizes = [128, 8], strides = [1, 1]} : vector<128x64xf32> to vector<128x8xf32>
    %11 = vector.extract_strided_slice %5 {offsets = [0, 40], sizes = [128, 8], strides = [1, 1]} : vector<128x64xf32> to vector<128x8xf32>
    %12 = vector.extract_strided_slice %5 {offsets = [0, 48], sizes = [128, 8], strides = [1, 1]} : vector<128x64xf32> to vector<128x8xf32>
    %13 = vector.extract_strided_slice %5 {offsets = [0, 56], sizes = [128, 8], strides = [1, 1]} : vector<128x64xf32> to vector<128x8xf32>
    %14 = arith.negf %6 : vector<128x8xf32>
    %15 = math.exp %14 : vector<128x8xf32>
    %cst_5 = arith.constant 1.000000e+00 : f32
    %16 = vector.broadcast %cst_5 : f32 to vector<128x8xf32>
    %17 = arith.addf %16, %15 : vector<128x8xf32>
    %18 = arith.divf %16, %17 : vector<128x8xf32>
    %19 = math.tanh %7 : vector<128x8xf32>
    %cst_6 = arith.constant 0.00999999977 : f32
    %20 = vector.broadcast %cst_6 : f32 to vector<128x8xf32>
    %21 = arith.addf %8, %20 : vector<128x8xf32>
    %22 = arith.negf %21 : vector<128x8xf32>
    %23 = math.exp %22 : vector<128x8xf32>
    %cst_7 = arith.constant 1.000000e+00 : f32
    %24 = vector.broadcast %cst_7 : f32 to vector<128x8xf32>
    %25 = arith.addf %24, %23 : vector<128x8xf32>
    %26 = arith.divf %24, %25 : vector<128x8xf32>
    %27 = arith.negf %10 : vector<128x8xf32>
    %28 = math.exp %27 : vector<128x8xf32>
    %cst_8 = arith.constant 1.000000e+00 : f32
    %29 = vector.broadcast %cst_8 : f32 to vector<128x8xf32>
    %30 = arith.addf %29, %28 : vector<128x8xf32>
    %31 = arith.divf %29, %30 : vector<128x8xf32>
    %32 = math.tanh %11 : vector<128x8xf32>
    %cst_9 = arith.constant 0.00999999977 : f32
    %33 = vector.broadcast %cst_9 : f32 to vector<128x8xf32>
    %34 = arith.addf %12, %33 : vector<128x8xf32>
    %35 = arith.negf %34 : vector<128x8xf32>
    %36 = math.exp %35 : vector<128x8xf32>
    %cst_10 = arith.constant 1.000000e+00 : f32
    %37 = vector.broadcast %cst_10 : f32 to vector<128x8xf32>
    %38 = arith.addf %37, %36 : vector<128x8xf32>
    %39 = arith.divf %37, %38 : vector<128x8xf32>
    %40 = arith.addf %9, %13 : vector<128x8xf32>
    %41 = arith.negf %40 : vector<128x8xf32>
    %42 = math.exp %41 : vector<128x8xf32>
    %cst_11 = arith.constant 1.000000e+00 : f32
    %43 = vector.broadcast %cst_11 : f32 to vector<128x8xf32>
    %44 = arith.addf %43, %42 : vector<128x8xf32>
    %45 = arith.divf %43, %44 : vector<128x8xf32>
    %c0_12 = arith.constant 0 : index
    %c0_13 = arith.constant 0 : index
    %46 = vector.load %arg2[%c0_12, %c0_13] : memref<128x8xf32, #tpu.memory_space<vmem>>, vector<128x8xf32>
    %47 = arith.mulf %26, %46 : vector<128x8xf32>
    %48 = arith.mulf %18, %19 : vector<128x8xf32>
    %49 = arith.addf %47, %48 : vector<128x8xf32>
    %c0_14 = arith.constant 0 : index
    %c0_15 = arith.constant 0 : index
    %50 = vector.load %arg3[%c0_14, %c0_15] : memref<128x8xf32, #tpu.memory_space<vmem>>, vector<128x8xf32>
    %51 = arith.mulf %39, %50 : vector<128x8xf32>
    %52 = arith.mulf %31, %32 : vector<128x8xf32>
    %53 = arith.addf %51, %52 : vector<128x8xf32>
    %54 = tpu.concatenate %49, %53 in 1 : vector<128x8xf32>, vector<128x8xf32> -> vector<128x16xf32>
    %55 = arith.truncf %54 : vector<128x16xf32> to vector<128x16xbf16>
    %c0_16 = arith.constant 0 : index
    %c0_17 = arith.constant 0 : index
    %56 = vector.load %arg6[%c0_16, %c0_17] : memref<16x8xbf16, #tpu.memory_space<vmem>>, vector<16x8xbf16>
    %cst_18 = arith.constant dense<0.000000e+00> : vector<128x8xf32>
    %57 = tpu.matmul %55, %56, %cst_18 {dimension_numbers = #tpu.dot_dimension_numbers<[1], [0], [0], [1], [0, 0, 1, 1], [], []>} : vector<128x16xbf16>, vector<16x8xbf16>, vector<128x8xf32> -> vector<128x8xf32>
    %c0_19 = arith.constant 0 : index
    %c0_20 = arith.constant 0 : index
    %58 = vector.load %arg7[%c0_19, %c0_20] : memref<1x8xf32, #tpu.memory_space<vmem>>, vector<1x8xf32>
    %59 = vector.broadcast %58 : vector<1x8xf32> to vector<128x8xf32>
    %60 = arith.addf %57, %59 : vector<128x8xf32>
    %61 = math.tanh %60 : vector<128x8xf32>
    %62 = arith.mulf %45, %61 : vector<128x8xf32>
    %63 = tpu.concatenate %62, %49, %53 in 1 : vector<128x8xf32>, vector<128x8xf32>, vector<128x8xf32> -> vector<128x24xf32>
    %c0_21 = arith.constant 0 : index
    %c0_22 = arith.constant 0 : index
    %64 = vector.load %arg8[%c0_21, %c0_22] : memref<128x24xf32, #tpu.memory_space<vmem>>, vector<128x24xf32>
    tpu.vector_store %arg8[%c0_21, %c0_22], %63 {strides = array<i32>} : memref<128x24xf32, #tpu.memory_space<vmem>>, vector<128x24xf32>,
    return
  }
  func.func @transform_0(%arg0: i32) -> (i32, i32) {
    %c0_i32 = arith.constant 0 : i32
    %c0_i32_0 = arith.constant 0 : i32
    return %arg0, %c0_i32 : i32, i32
  }
  func.func @transform_1(%arg0: i32) -> (i32, i32) {
    %c0_i32 = arith.constant 0 : i32
    %c0_i32_0 = arith.constant 0 : i32
    return %arg0, %c0_i32 : i32, i32
  }
  func.func @transform_2(%arg0: i32) -> (i32, i32) {
    %c0_i32 = arith.constant 0 : i32
    %c0_i32_0 = arith.constant 0 : i32
    return %arg0, %c0_i32 : i32, i32
  }
  func.func @transform_3(%arg0: i32) -> (i32, i32) {
    %c0_i32 = arith.constant 0 : i32
    %c0_i32_0 = arith.constant 0 : i32
    %c0_i32_1 = arith.constant 0 : i32
    return %c0_i32, %c0_i32_0 : i32, i32
  }
  func.func @transform_4(%arg0: i32) -> (i32, i32) {
    %c0_i32 = arith.constant 0 : i32
    %c0_i32_0 = arith.constant 0 : i32
    %c0_i32_1 = arith.constant 0 : i32
    return %c0_i32, %c0_i32_0 : i32, i32
  }
  func.func @transform_5(%arg0: i32) -> (i32, i32) {
    %c0_i32 = arith.constant 0 : i32
    %c0_i32_0 = arith.constant 0 : i32
    %c0_i32_1 = arith.constant 0 : i32
    return %c0_i32, %c0_i32_0 : i32, i32
  }
  func.func @transform_6(%arg0: i32) -> (i32, i32) {
    %c0_i32 = arith.constant 0 : i32
    %c0_i32_0 = arith.constant 0 : i32
    %c0_i32_1 = arith.constant 0 : i32
    return %c0_i32, %c0_i32_0 : i32, i32
  }
  func.func @transform_7(%arg0: i32) -> (i32, i32) {
    %c0_i32 = arith.constant 0 : i32
    %c0_i32_0 = arith.constant 0 : i32
    return %arg0, %c0_i32 : i32, i32
  }
}

module attributes {stable_mosaic.version = 11 : i64} {
  func.func @_mimn_cell_kernel(%arg0: i32, %arg1: memref<128x216xbf16, #tpu.memory_space<vmem>>, %arg2: memref<128x8xf32, #tpu.memory_space<vmem>>, %arg3: memref<216x32xbf16, #tpu.memory_space<vmem>>, %arg4: memref<1x32xf32, #tpu.memory_space<vmem>>, %arg5: memref<1x16xf32, #tpu.memory_space<vmem>>, %arg6: memref<1x8xf32, #tpu.memory_space<vmem>>, %arg7: memref<128x16xf32, #tpu.memory_space<vmem>>) attributes {dimension_semantics = [#tpu.dimension_semantics<parallel>], iteration_bounds = array<i64: 1>, scalar_prefetch = 0 : i64, scratch_operands = 0 : i64, tpu.core_type = #tpu.core_type<tc>, window_params = [{transform_indices = @transform_0, window_bounds = array<i64: 128, 216>}, {transform_indices = @transform_1, window_bounds = array<i64: 128, 8>}, {pipeline_mode = #tpu.pipeline_mode<synchronous>, transform_indices = @transform_2, window_bounds = array<i64: 216, 32>}, {pipeline_mode = #tpu.pipeline_mode<synchronous>, transform_indices = @transform_3, window_bounds = array<i64: 1, 32>}, {pipeline_mode = #tpu.pipeline_mode<synchronous>, transform_indices = @transform_4, window_bounds = array<i64: 1, 16>}, {pipeline_mode = #tpu.pipeline_mode<synchronous>, transform_indices = @transform_5, window_bounds = array<i64: 1, 8>}, {transform_indices = @transform_6, window_bounds = array<i64: 128, 16>}]} {
    %c0 = arith.constant 0 : index
    %c0_0 = arith.constant 0 : index
    %0 = vector.load %arg2[%c0, %c0_0] : memref<128x8xf32, #tpu.memory_space<vmem>>, vector<128x8xf32>
    %c0_1 = arith.constant 0 : index
    %c0_2 = arith.constant 0 : index
    %1 = vector.load %arg1[%c0_1, %c0_2] : memref<128x216xbf16, #tpu.memory_space<vmem>>, vector<128x216xbf16>
    %c0_3 = arith.constant 0 : index
    %c0_4 = arith.constant 0 : index
    %2 = vector.load %arg3[%c0_3, %c0_4] : memref<216x32xbf16, #tpu.memory_space<vmem>>, vector<216x32xbf16>
    %cst = arith.constant dense<0.000000e+00> : vector<128x32xf32>
    %3 = tpu.matmul %1, %2, %cst {dimension_numbers = #tpu.dot_dimension_numbers<[1], [0], [0], [1], [0, 0, 1, 1], [], []>} : vector<128x216xbf16>, vector<216x32xbf16>, vector<128x32xf32> -> vector<128x32xf32>
    %c0_5 = arith.constant 0 : index
    %c0_6 = arith.constant 0 : index
    %4 = vector.load %arg4[%c0_5, %c0_6] : memref<1x32xf32, #tpu.memory_space<vmem>>, vector<1x32xf32>
    %5 = vector.broadcast %4 : vector<1x32xf32> to vector<128x32xf32>
    %6 = arith.addf %3, %5 : vector<128x32xf32>
    %7 = vector.extract_strided_slice %6 {offsets = [0, 0], sizes = [128, 8], strides = [1, 1]} : vector<128x32xf32> to vector<128x8xf32>
    %8 = vector.extract_strided_slice %6 {offsets = [0, 8], sizes = [128, 8], strides = [1, 1]} : vector<128x32xf32> to vector<128x8xf32>
    %9 = vector.extract_strided_slice %6 {offsets = [0, 16], sizes = [128, 8], strides = [1, 1]} : vector<128x32xf32> to vector<128x8xf32>
    %10 = vector.extract_strided_slice %6 {offsets = [0, 24], sizes = [128, 8], strides = [1, 1]} : vector<128x32xf32> to vector<128x8xf32>
    %c0_7 = arith.constant 0 : index
    %c0_8 = arith.constant 0 : index
    %11 = vector.load %arg5[%c0_7, %c0_8] : memref<1x16xf32, #tpu.memory_space<vmem>>, vector<1x16xf32>
    %12 = vector.extract_strided_slice %11 {offsets = [0, 0], sizes = [1, 8], strides = [1, 1]} : vector<1x16xf32> to vector<1x8xf32>
    %13 = vector.broadcast %12 : vector<1x8xf32> to vector<128x8xf32>
    %14 = arith.mulf %0, %13 : vector<128x8xf32>
    %15 = arith.addf %7, %14 : vector<128x8xf32>
    %16 = arith.negf %15 : vector<128x8xf32>
    %17 = math.exp %16 : vector<128x8xf32>
    %cst_9 = arith.constant 1.000000e+00 : f32
    %18 = vector.broadcast %cst_9 : f32 to vector<128x8xf32>
    %19 = arith.addf %18, %17 : vector<128x8xf32>
    %20 = arith.divf %18, %19 : vector<128x8xf32>
    %21 = vector.extract_strided_slice %11 {offsets = [0, 8], sizes = [1, 8], strides = [1, 1]} : vector<1x16xf32> to vector<1x8xf32>
    %22 = vector.broadcast %21 : vector<1x8xf32> to vector<128x8xf32>
    %23 = arith.mulf %0, %22 : vector<128x8xf32>
    %24 = arith.addf %9, %23 : vector<128x8xf32>
    %cst_10 = arith.constant 0.00999999977 : f32
    %25 = vector.broadcast %cst_10 : f32 to vector<128x8xf32>
    %26 = arith.addf %24, %25 : vector<128x8xf32>
    %27 = arith.negf %26 : vector<128x8xf32>
    %28 = math.exp %27 : vector<128x8xf32>
    %cst_11 = arith.constant 1.000000e+00 : f32
    %29 = vector.broadcast %cst_11 : f32 to vector<128x8xf32>
    %30 = arith.addf %29, %28 : vector<128x8xf32>
    %31 = arith.divf %29, %30 : vector<128x8xf32>
    %32 = math.tanh %8 : vector<128x8xf32>
    %33 = arith.mulf %31, %0 : vector<128x8xf32>
    %34 = arith.mulf %20, %32 : vector<128x8xf32>
    %35 = arith.addf %33, %34 : vector<128x8xf32>
    %c0_12 = arith.constant 0 : index
    %c0_13 = arith.constant 0 : index
    %36 = vector.load %arg6[%c0_12, %c0_13] : memref<1x8xf32, #tpu.memory_space<vmem>>, vector<1x8xf32>
    %37 = vector.broadcast %36 : vector<1x8xf32> to vector<128x8xf32>
    %38 = arith.mulf %35, %37 : vector<128x8xf32>
    %39 = arith.addf %10, %38 : vector<128x8xf32>
    %40 = arith.negf %39 : vector<128x8xf32>
    %41 = math.exp %40 : vector<128x8xf32>
    %cst_14 = arith.constant 1.000000e+00 : f32
    %42 = vector.broadcast %cst_14 : f32 to vector<128x8xf32>
    %43 = arith.addf %42, %41 : vector<128x8xf32>
    %44 = arith.divf %42, %43 : vector<128x8xf32>
    %45 = math.tanh %35 : vector<128x8xf32>
    %46 = arith.mulf %44, %45 : vector<128x8xf32>
    %47 = tpu.concatenate %46, %35 in 1 : vector<128x8xf32>, vector<128x8xf32> -> vector<128x16xf32>
    %c0_15 = arith.constant 0 : index
    %c0_16 = arith.constant 0 : index
    %48 = vector.load %arg7[%c0_15, %c0_16] : memref<128x16xf32, #tpu.memory_space<vmem>>, vector<128x16xf32>
    tpu.vector_store %arg7[%c0_15, %c0_16], %47 {strides = array<i32>} : memref<128x16xf32, #tpu.memory_space<vmem>>, vector<128x16xf32>,
    return
  }
  func.func @transform_0(%arg0: i32) -> (i32, i32) {
    %c0_i32 = arith.constant 0 : i32
    %c0_i32_0 = arith.constant 0 : i32
    return %arg0, %c0_i32 : i32, i32
  }
  func.func @transform_1(%arg0: i32) -> (i32, i32) {
    %c0_i32 = arith.constant 0 : i32
    %c0_i32_0 = arith.constant 0 : i32
    return %arg0, %c0_i32 : i32, i32
  }
  func.func @transform_2(%arg0: i32) -> (i32, i32) {
    %c0_i32 = arith.constant 0 : i32
    %c0_i32_0 = arith.constant 0 : i32
    %c0_i32_1 = arith.constant 0 : i32
    return %c0_i32, %c0_i32_0 : i32, i32
  }
  func.func @transform_3(%arg0: i32) -> (i32, i32) {
    %c0_i32 = arith.constant 0 : i32
    %c0_i32_0 = arith.constant 0 : i32
    %c0_i32_1 = arith.constant 0 : i32
    return %c0_i32, %c0_i32_0 : i32, i32
  }
  func.func @transform_4(%arg0: i32) -> (i32, i32) {
    %c0_i32 = arith.constant 0 : i32
    %c0_i32_0 = arith.constant 0 : i32
    %c0_i32_1 = arith.constant 0 : i32
    return %c0_i32, %c0_i32_0 : i32, i32
  }
  func.func @transform_5(%arg0: i32) -> (i32, i32) {
    %c0_i32 = arith.constant 0 : i32
    %c0_i32_0 = arith.constant 0 : i32
    %c0_i32_1 = arith.constant 0 : i32
    return %c0_i32, %c0_i32_0 : i32, i32
  }
  func.func @transform_6(%arg0: i32) -> (i32, i32) {
    %c0_i32 = arith.constant 0 : i32
    %c0_i32_0 = arith.constant 0 : i32
    return %arg0, %c0_i32 : i32, i32
  }
}

module attributes {stable_mosaic.version = 11 : i64} {
  func.func @_mimblock_cell_kernel(%arg0: i32, %arg1: memref<128x360xbf16, #tpu.memory_space<vmem>>, %arg2: memref<128x8xf32, #tpu.memory_space<vmem>>, %arg3: memref<128x8xf32, #tpu.memory_space<vmem>>, %arg4: memref<360x88xbf16, #tpu.memory_space<vmem>>, %arg5: memref<1x88xf32, #tpu.memory_space<vmem>>, %arg6: memref<1x16xf32, #tpu.memory_space<vmem>>, %arg7: memref<1x8xf32, #tpu.memory_space<vmem>>, %arg8: memref<16x8xbf16, #tpu.memory_space<vmem>>, %arg9: memref<1x8xf32, #tpu.memory_space<vmem>>, %arg10: memref<128x32xf32, #tpu.memory_space<vmem>>) attributes {dimension_semantics = [#tpu.dimension_semantics<parallel>], iteration_bounds = array<i64: 1>, scalar_prefetch = 0 : i64, scratch_operands = 0 : i64, tpu.core_type = #tpu.core_type<tc>, window_params = [{transform_indices = @transform_0, window_bounds = array<i64: 128, 360>}, {transform_indices = @transform_1, window_bounds = array<i64: 128, 8>}, {transform_indices = @transform_2, window_bounds = array<i64: 128, 8>}, {pipeline_mode = #tpu.pipeline_mode<synchronous>, transform_indices = @transform_3, window_bounds = array<i64: 360, 88>}, {pipeline_mode = #tpu.pipeline_mode<synchronous>, transform_indices = @transform_4, window_bounds = array<i64: 1, 88>}, {pipeline_mode = #tpu.pipeline_mode<synchronous>, transform_indices = @transform_5, window_bounds = array<i64: 1, 16>}, {pipeline_mode = #tpu.pipeline_mode<synchronous>, transform_indices = @transform_6, window_bounds = array<i64: 1, 8>}, {pipeline_mode = #tpu.pipeline_mode<synchronous>, transform_indices = @transform_7, window_bounds = array<i64: 16, 8>}, {pipeline_mode = #tpu.pipeline_mode<synchronous>, transform_indices = @transform_8, window_bounds = array<i64: 1, 8>}, {transform_indices = @transform_9, window_bounds = array<i64: 128, 32>}]} {
    %c0 = arith.constant 0 : index
    %c0_0 = arith.constant 0 : index
    %0 = vector.load %arg1[%c0, %c0_0] : memref<128x360xbf16, #tpu.memory_space<vmem>>, vector<128x360xbf16>
    %c0_1 = arith.constant 0 : index
    %c0_2 = arith.constant 0 : index
    %1 = vector.load %arg4[%c0_1, %c0_2] : memref<360x88xbf16, #tpu.memory_space<vmem>>, vector<360x88xbf16>
    %cst = arith.constant dense<0.000000e+00> : vector<128x88xf32>
    %2 = tpu.matmul %0, %1, %cst {dimension_numbers = #tpu.dot_dimension_numbers<[1], [0], [0], [1], [0, 0, 1, 1], [], []>} : vector<128x360xbf16>, vector<360x88xbf16>, vector<128x88xf32> -> vector<128x88xf32>
    %c0_3 = arith.constant 0 : index
    %c0_4 = arith.constant 0 : index
    %3 = vector.load %arg5[%c0_3, %c0_4] : memref<1x88xf32, #tpu.memory_space<vmem>>, vector<1x88xf32>
    %4 = vector.broadcast %3 : vector<1x88xf32> to vector<128x88xf32>
    %5 = arith.addf %2, %4 : vector<128x88xf32>
    %c0_5 = arith.constant 0 : index
    %c0_6 = arith.constant 0 : index
    %6 = vector.load %arg2[%c0_5, %c0_6] : memref<128x8xf32, #tpu.memory_space<vmem>>, vector<128x8xf32>
    %7 = vector.extract_strided_slice %5 {offsets = [0, 0], sizes = [128, 8], strides = [1, 1]} : vector<128x88xf32> to vector<128x8xf32>
    %8 = vector.extract_strided_slice %5 {offsets = [0, 8], sizes = [128, 8], strides = [1, 1]} : vector<128x88xf32> to vector<128x8xf32>
    %9 = vector.extract_strided_slice %5 {offsets = [0, 16], sizes = [128, 8], strides = [1, 1]} : vector<128x88xf32> to vector<128x8xf32>
    %10 = vector.extract_strided_slice %5 {offsets = [0, 24], sizes = [128, 8], strides = [1, 1]} : vector<128x88xf32> to vector<128x8xf32>
    %c0_7 = arith.constant 0 : index
    %c0_8 = arith.constant 0 : index
    %11 = vector.load %arg6[%c0_7, %c0_8] : memref<1x16xf32, #tpu.memory_space<vmem>>, vector<1x16xf32>
    %12 = vector.extract_strided_slice %11 {offsets = [0, 0], sizes = [1, 8], strides = [1, 1]} : vector<1x16xf32> to vector<1x8xf32>
    %13 = vector.broadcast %12 : vector<1x8xf32> to vector<128x8xf32>
    %14 = arith.mulf %6, %13 : vector<128x8xf32>
    %15 = arith.addf %7, %14 : vector<128x8xf32>
    %16 = arith.negf %15 : vector<128x8xf32>
    %17 = math.exp %16 : vector<128x8xf32>
    %cst_9 = arith.constant 1.000000e+00 : f32
    %18 = vector.broadcast %cst_9 : f32 to vector<128x8xf32>
    %19 = arith.addf %18, %17 : vector<128x8xf32>
    %20 = arith.divf %18, %19 : vector<128x8xf32>
    %21 = vector.extract_strided_slice %11 {offsets = [0, 8], sizes = [1, 8], strides = [1, 1]} : vector<1x16xf32> to vector<1x8xf32>
    %22 = vector.broadcast %21 : vector<1x8xf32> to vector<128x8xf32>
    %23 = arith.mulf %6, %22 : vector<128x8xf32>
    %24 = arith.addf %9, %23 : vector<128x8xf32>
    %cst_10 = arith.constant 0.00999999977 : f32
    %25 = vector.broadcast %cst_10 : f32 to vector<128x8xf32>
    %26 = arith.addf %24, %25 : vector<128x8xf32>
    %27 = arith.negf %26 : vector<128x8xf32>
    %28 = math.exp %27 : vector<128x8xf32>
    %cst_11 = arith.constant 1.000000e+00 : f32
    %29 = vector.broadcast %cst_11 : f32 to vector<128x8xf32>
    %30 = arith.addf %29, %28 : vector<128x8xf32>
    %31 = arith.divf %29, %30 : vector<128x8xf32>
    %32 = math.tanh %8 : vector<128x8xf32>
    %33 = arith.mulf %31, %6 : vector<128x8xf32>
    %34 = arith.mulf %20, %32 : vector<128x8xf32>
    %35 = arith.addf %33, %34 : vector<128x8xf32>
    %c0_12 = arith.constant 0 : index
    %c0_13 = arith.constant 0 : index
    %36 = vector.load %arg7[%c0_12, %c0_13] : memref<1x8xf32, #tpu.memory_space<vmem>>, vector<1x8xf32>
    %37 = vector.broadcast %36 : vector<1x8xf32> to vector<128x8xf32>
    %38 = arith.mulf %35, %37 : vector<128x8xf32>
    %39 = arith.addf %10, %38 : vector<128x8xf32>
    %40 = arith.negf %39 : vector<128x8xf32>
    %41 = math.exp %40 : vector<128x8xf32>
    %cst_14 = arith.constant 1.000000e+00 : f32
    %42 = vector.broadcast %cst_14 : f32 to vector<128x8xf32>
    %43 = arith.addf %42, %41 : vector<128x8xf32>
    %44 = arith.divf %42, %43 : vector<128x8xf32>
    %45 = math.tanh %35 : vector<128x8xf32>
    %46 = arith.mulf %44, %45 : vector<128x8xf32>
    %47 = vector.extract_strided_slice %5 {offsets = [0, 32], sizes = [128, 8], strides = [1, 1]} : vector<128x88xf32> to vector<128x8xf32>
    %48 = arith.negf %47 : vector<128x8xf32>
    %49 = math.exp %48 : vector<128x8xf32>
    %cst_15 = arith.constant 1.000000e+00 : f32
    %50 = vector.broadcast %cst_15 : f32 to vector<128x8xf32>
    %51 = arith.addf %50, %49 : vector<128x8xf32>
    %52 = arith.divf %50, %51 : vector<128x8xf32>
    %53 = vector.extract_strided_slice %5 {offsets = [0, 40], sizes = [128, 8], strides = [1, 1]} : vector<128x88xf32> to vector<128x8xf32>
    %54 = math.tanh %53 : vector<128x8xf32>
    %55 = vector.extract_strided_slice %5 {offsets = [0, 48], sizes = [128, 8], strides = [1, 1]} : vector<128x88xf32> to vector<128x8xf32>
    %56 = vector.extract_strided_slice %5 {offsets = [0, 80], sizes = [128, 8], strides = [1, 1]} : vector<128x88xf32> to vector<128x8xf32>
    %57 = arith.addf %55, %56 : vector<128x8xf32>
    %58 = arith.negf %57 : vector<128x8xf32>
    %59 = math.exp %58 : vector<128x8xf32>
    %cst_16 = arith.constant 1.000000e+00 : f32
    %60 = vector.broadcast %cst_16 : f32 to vector<128x8xf32>
    %61 = arith.addf %60, %59 : vector<128x8xf32>
    %62 = arith.divf %60, %61 : vector<128x8xf32>
    %63 = vector.extract_strided_slice %5 {offsets = [0, 56], sizes = [128, 8], strides = [1, 1]} : vector<128x88xf32> to vector<128x8xf32>
    %64 = arith.negf %63 : vector<128x8xf32>
    %65 = math.exp %64 : vector<128x8xf32>
    %cst_17 = arith.constant 1.000000e+00 : f32
    %66 = vector.broadcast %cst_17 : f32 to vector<128x8xf32>
    %67 = arith.addf %66, %65 : vector<128x8xf32>
    %68 = arith.divf %66, %67 : vector<128x8xf32>
    %69 = vector.extract_strided_slice %5 {offsets = [0, 64], sizes = [128, 8], strides = [1, 1]} : vector<128x88xf32> to vector<128x8xf32>
    %70 = math.tanh %69 : vector<128x8xf32>
    %71 = vector.extract_strided_slice %5 {offsets = [0, 72], sizes = [128, 8], strides = [1, 1]} : vector<128x88xf32> to vector<128x8xf32>
    %cst_18 = arith.constant 0.00999999977 : f32
    %72 = vector.broadcast %cst_18 : f32 to vector<128x8xf32>
    %73 = arith.addf %71, %72 : vector<128x8xf32>
    %74 = arith.negf %73 : vector<128x8xf32>
    %75 = math.exp %74 : vector<128x8xf32>
    %cst_19 = arith.constant 1.000000e+00 : f32
    %76 = vector.broadcast %cst_19 : f32 to vector<128x8xf32>
    %77 = arith.addf %76, %75 : vector<128x8xf32>
    %78 = arith.divf %76, %77 : vector<128x8xf32>
    %c0_20 = arith.constant 0 : index
    %c0_21 = arith.constant 0 : index
    %79 = vector.load %arg3[%c0_20, %c0_21] : memref<128x8xf32, #tpu.memory_space<vmem>>, vector<128x8xf32>
    %80 = arith.mulf %78, %79 : vector<128x8xf32>
    %81 = arith.mulf %68, %70 : vector<128x8xf32>
    %82 = arith.addf %80, %81 : vector<128x8xf32>
    %83 = arith.mulf %52, %54 : vector<128x8xf32>
    %84 = arith.addf %46, %83 : vector<128x8xf32>
    %85 = tpu.concatenate %84, %82 in 1 : vector<128x8xf32>, vector<128x8xf32> -> vector<128x16xf32>
    %86 = arith.truncf %85 : vector<128x16xf32> to vector<128x16xbf16>
    %c0_22 = arith.constant 0 : index
    %c0_23 = arith.constant 0 : index
    %87 = vector.load %arg8[%c0_22, %c0_23] : memref<16x8xbf16, #tpu.memory_space<vmem>>, vector<16x8xbf16>
    %cst_24 = arith.constant dense<0.000000e+00> : vector<128x8xf32>
    %88 = tpu.matmul %86, %87, %cst_24 {dimension_numbers = #tpu.dot_dimension_numbers<[1], [0], [0], [1], [0, 0, 1, 1], [], []>} : vector<128x16xbf16>, vector<16x8xbf16>, vector<128x8xf32> -> vector<128x8xf32>
    %c0_25 = arith.constant 0 : index
    %c0_26 = arith.constant 0 : index
    %89 = vector.load %arg9[%c0_25, %c0_26] : memref<1x8xf32, #tpu.memory_space<vmem>>, vector<1x8xf32>
    %90 = vector.broadcast %89 : vector<1x8xf32> to vector<128x8xf32>
    %91 = arith.addf %88, %90 : vector<128x8xf32>
    %92 = math.tanh %91 : vector<128x8xf32>
    %93 = arith.mulf %62, %92 : vector<128x8xf32>
    %94 = tpu.concatenate %84, %93, %82, %35 in 1 : vector<128x8xf32>, vector<128x8xf32>, vector<128x8xf32>, vector<128x8xf32> -> vector<128x32xf32>
    %c0_27 = arith.constant 0 : index
    %c0_28 = arith.constant 0 : index
    %95 = vector.load %arg10[%c0_27, %c0_28] : memref<128x32xf32, #tpu.memory_space<vmem>>, vector<128x32xf32>
    tpu.vector_store %arg10[%c0_27, %c0_28], %94 {strides = array<i32>} : memref<128x32xf32, #tpu.memory_space<vmem>>, vector<128x32xf32>,
    return
  }
  func.func @transform_0(%arg0: i32) -> (i32, i32) {
    %c0_i32 = arith.constant 0 : i32
    %c0_i32_0 = arith.constant 0 : i32
    return %arg0, %c0_i32 : i32, i32
  }
  func.func @transform_1(%arg0: i32) -> (i32, i32) {
    %c0_i32 = arith.constant 0 : i32
    %c0_i32_0 = arith.constant 0 : i32
    return %arg0, %c0_i32 : i32, i32
  }
  func.func @transform_2(%arg0: i32) -> (i32, i32) {
    %c0_i32 = arith.constant 0 : i32
    %c0_i32_0 = arith.constant 0 : i32
    return %arg0, %c0_i32 : i32, i32
  }
  func.func @transform_3(%arg0: i32) -> (i32, i32) {
    %c0_i32 = arith.constant 0 : i32
    %c0_i32_0 = arith.constant 0 : i32
    %c0_i32_1 = arith.constant 0 : i32
    return %c0_i32, %c0_i32_0 : i32, i32
  }
  func.func @transform_4(%arg0: i32) -> (i32, i32) {
    %c0_i32 = arith.constant 0 : i32
    %c0_i32_0 = arith.constant 0 : i32
    %c0_i32_1 = arith.constant 0 : i32
    return %c0_i32, %c0_i32_0 : i32, i32
  }
  func.func @transform_5(%arg0: i32) -> (i32, i32) {
    %c0_i32 = arith.constant 0 : i32
    %c0_i32_0 = arith.constant 0 : i32
    %c0_i32_1 = arith.constant 0 : i32
    return %c0_i32, %c0_i32_0 : i32, i32
  }
  func.func @transform_6(%arg0: i32) -> (i32, i32) {
    %c0_i32 = arith.constant 0 : i32
    %c0_i32_0 = arith.constant 0 : i32
    %c0_i32_1 = arith.constant 0 : i32
    return %c0_i32, %c0_i32_0 : i32, i32
  }
  func.func @transform_7(%arg0: i32) -> (i32, i32) {
    %c0_i32 = arith.constant 0 : i32
    %c0_i32_0 = arith.constant 0 : i32
    %c0_i32_1 = arith.constant 0 : i32
    return %c0_i32, %c0_i32_0 : i32, i32
  }
  func.func @transform_8(%arg0: i32) -> (i32, i32) {
    %c0_i32 = arith.constant 0 : i32
    %c0_i32_0 = arith.constant 0 : i32
    %c0_i32_1 = arith.constant 0 : i32
    return %c0_i32, %c0_i32_0 : i32, i32
  }
  func.func @transform_9(%arg0: i32) -> (i32, i32) {
    %c0_i32 = arith.constant 0 : i32
    %c0_i32_0 = arith.constant 0 : i32
    return %arg0, %c0_i32 : i32, i32
  }
}

module attributes {stable_mosaic.version = 11 : i64} {
  func.func @_matmul_kernel(%arg0: i32, %arg1: memref<128x8xbf16, #tpu.memory_space<vmem>>, %arg2: memref<8x2xbf16, #tpu.memory_space<vmem>>, %arg3: memref<128x2xf32, #tpu.memory_space<vmem>>) attributes {dimension_semantics = [#tpu.dimension_semantics<parallel>], iteration_bounds = array<i64: 1>, scalar_prefetch = 0 : i64, scratch_operands = 0 : i64, tpu.core_type = #tpu.core_type<tc>, window_params = [{transform_indices = @transform_0, window_bounds = array<i64: 128, 8>}, {pipeline_mode = #tpu.pipeline_mode<synchronous>, transform_indices = @transform_1, window_bounds = array<i64: 8, 2>}, {transform_indices = @transform_2, window_bounds = array<i64: 128, 2>}]} {
    %c0 = arith.constant 0 : index
    %c0_0 = arith.constant 0 : index
    %0 = vector.load %arg1[%c0, %c0_0] : memref<128x8xbf16, #tpu.memory_space<vmem>>, vector<128x8xbf16>
    %c0_1 = arith.constant 0 : index
    %c0_2 = arith.constant 0 : index
    %1 = vector.load %arg2[%c0_1, %c0_2] : memref<8x2xbf16, #tpu.memory_space<vmem>>, vector<8x2xbf16>
    %cst = arith.constant dense<0.000000e+00> : vector<128x2xf32>
    %2 = tpu.matmul %0, %1, %cst {dimension_numbers = #tpu.dot_dimension_numbers<[1], [0], [0], [1], [0, 0, 1, 1], [], []>} : vector<128x8xbf16>, vector<8x2xbf16>, vector<128x2xf32> -> vector<128x2xf32>
    %c0_3 = arith.constant 0 : index
    %c0_4 = arith.constant 0 : index
    %3 = vector.load %arg3[%c0_3, %c0_4] : memref<128x2xf32, #tpu.memory_space<vmem>>, vector<128x2xf32>
    tpu.vector_store %arg3[%c0_3, %c0_4], %2 {strides = array<i32>} : memref<128x2xf32, #tpu.memory_space<vmem>>, vector<128x2xf32>,
    return
  }
  func.func @transform_0(%arg0: i32) -> (i32, i32) {
    %c0_i32 = arith.constant 0 : i32
    %c0_i32_0 = arith.constant 0 : i32
    return %arg0, %c0_i32 : i32, i32
  }
  func.func @transform_1(%arg0: i32) -> (i32, i32) {
    %c0_i32 = arith.constant 0 : i32
    %c0_i32_0 = arith.constant 0 : i32
    %c0_i32_1 = arith.constant 0 : i32
    return %c0_i32, %c0_i32_0 : i32, i32
  }
  func.func @transform_2(%arg0: i32) -> (i32, i32) {
    %c0_i32 = arith.constant 0 : i32
    %c0_i32_0 = arith.constant 0 : i32
    return %arg0, %c0_i32 : i32, i32
  }
}

</mosaic_0001>

<bundles_post_ra>
// kernel: _lambda_.26
= control target key start
LH: loop header
LB: loop body
LE: loop exit
PB: predicated region body
PF: predicated region fallthrough
CT: control target
= control target key end

     0   :  { %v1850_v0 = vmov 0   ;;  %s1851_s29 = smov 120   ;;  %vm243_vm0 = vcmask 719872   ;;  %s1852_s19 = smov 16   ;;  %vm268_vm1 = vcmask 1043456   ;;  %vm1396_vm2 = vcmask 64512   ;;  %s2707_s2 = inlined_call_operand.vmem [shape: bf16[216,32], index: 2, kind: input, shape index: {}]   ;;  %s2708_s4 = inlined_call_operand.vmem [shape: f32[1,16], index: 4, kind: input, shape index: {}]   ;;  %s2709_s0 = inlined_call_operand.vmem [shape: bf16[128,216], index: 0, kind: input, shape index: {}]   ;;  %s2710_s1 = inlined_call_operand.vmem [shape: f32[128,8], index: 1, kind: input, shape index: {}]   ;;  %s2711_s3 = inlined_call_operand.vmem [shape: f32[1,32], index: 3, kind: input, shape index: {}]   ;;  %s2712_s5 = inlined_call_operand.vmem [shape: f32[1,8], index: 5, kind: input, shape index: {}]   ;;  %s2713_s6 = inlined_call_operand.vmem [shape: f32[128,16], index: 6, kind: output, shape index: {}]  }
   0x1   :  { %272 = vmatprep.subr.bf16.mxu0 %v1850_v0  ;;  %1523 = vmatprep.subr.bf16.mxu1 %v1850_v0  ;;  %v1556_v1 = vld [vmem:[%s2707_s2] sm:$0xff]   ;;  %v1557_v2 = vld [vmem:[%s2707_s2 + $0x8] sm:$0xff]   ;;  %v1558_v3 = vld [vmem:[%s2707_s2 + $0x10] sm:$0xff]   ;;  %vm1413_vm3 = vcmask 130048  }
   0x2   :  { %273 = vmatpush1.bf16.msra.mxu0 %v1556_v1  ;;  %1537 = vmatpush1.bf16.msra.mxu1 %v1556_v1  ;;  %v1906_v4 = vld [vmem:[%s2708_s4] ss:$0 sm:$0xff]  ;;  %v1559_v5 = vld [vmem:[%s2707_s2 + $0x18] sm:$0xff]   ;;  %v1572_v7 = vld [vmem:[%s2709_s0 + $0x4] ss:$8 sps:$4 sm:$0xff]  }
   0x3   :  { %274 = vmatprep.subr.bf16.mxu0 %v1850_v0  ;;  %1524 = vmatprep.subr.bf16.mxu1 %v1850_v0  ;;  %v1560_v6 = vld [vmem:[%s2707_s2 + $0x20] sm:$0xff]   ;;  %v1561_v9 = vld [vmem:[%s2707_s2 + $0x28] sm:$0xff]   ;;  %v1562_v10 = vld [vmem:[%s2707_s2 + $0x30] sm:$0xff]  }
   0x4   :  { %504 = vrot.lane.b32.xlu0 %v1906_v4, %s1851_s29  ;;  %v1575_v8 = vld [vmem:[%s2709_s0 + $0x44] ss:$8 sps:$4 sm:$0xff]   ;;  %1465 = vmatprep.mubr.msk.bf16.mxu0 %vm243_vm0, %v1572_v7  ;;  %v1563_v13 = vld [vmem:[%s2707_s2 + $0x38] sm:$0xff]   ;;  %v1566_v16 = vld [vmem:[%s2707_s2 + $0x50] sm:$0xff]  }
   0x5   :  { %1469 = vmatprep.mubr.msk.bf16.mxu1 %vm243_vm0, %v1575_v8  ;;  %v1943_v11 = vld [vmem:[%s2710_s1] sm:$0xff]  ;;  %v1950_v12 = vld [vmem:[%s2710_s1 + $0x8] sm:$0xff]  ;;  %v1567_v17 = vld [vmem:[%s2707_s2 + $0x58] sm:$0xff]  }
   0x6   :  { %275 = vmatpush1.bf16.msra.mxu0 %v1557_v2  ;;  %1538 = vmatpush1.bf16.msra.mxu1 %v1557_v2  ;;  %v1564_v14 = vld [vmem:[%s2707_s2 + $0x40] sm:$0xff]   ;;  %v1565_v15 = vld [vmem:[%s2707_s2 + $0x48] sm:$0xff]   ;;  %v1576_v23 = vld [vmem:[%s2709_s0 + $0x14] ss:$8 sps:$4 sm:$0xff]  }
   0x7   :  { %276 = vmatprep.subr.bf16.mxu0 %v1850_v0  ;;  %1525 = vmatprep.subr.bf16.mxu1 %v1850_v0  ;;  %v1568_v18 = vld [vmem:[%s2707_s2 + $0x60] sm:$0xff]   ;;  %v1569_v19 = vld [vmem:[%s2707_s2 + $0x68] ss:$0 sps:$4 sm:$0xff]   ;;  %v1579_v24 = vld [vmem:[%s2709_s0 + $0x54] ss:$8 sps:$4 sm:$0xff]  }
   0x8   :  { %747 = vrot.lane.b32.xlu1 %v1943_v11, %s1852_s19  ;;  %749 = vrot.lane.b32.xlu0 %v1950_v12, %s1852_s19  ;;  %v270_v20 = vsel %vm268_vm1, %v1569_v19, 0  ;;  %v1570_v21 = vld [vmem:[%s2709_s0] ss:$8 sps:$4 sm:$0xff]   ;;  %v1578_v25 = vld [vmem:[%s2709_s0 + $0x10] ss:$8 sps:$4 sm:$0xff]  }
   0x9   :  { %v1573_v22 = vld [vmem:[%s2709_s0 + $0x40] ss:$8 sps:$4 sm:$0xff]   ;;  %v1581_v26 = vld [vmem:[%s2709_s0 + $0x50] ss:$8 sps:$4 sm:$0xff]   ;;  %v1582_v27 = vld [vmem:[%s2709_s0 + $0x24] ss:$8 sps:$4 sm:$0xff]  }
   0xa   :  { %277 = vmatpush1.bf16.msra.mxu0 %v1558_v3  ;;  %1539 = vmatpush1.bf16.msra.mxu1 %v1558_v3  ;;  %v1585_v28 = vld [vmem:[%s2709_s0 + $0x64] ss:$8 sps:$4 sm:$0xff]   ;;  %v1584_v29 = vld [vmem:[%s2709_s0 + $0x20] ss:$8 sps:$4 sm:$0xff]   ;;  %v1588_v31 = vld [vmem:[%s2709_s0 + $0x34] ss:$8 sps:$4 sm:$0xff]  }
   0xb   :  { %278 = vmatprep.subr.bf16.mxu0 %v1850_v0  ;;  %1526 = vmatprep.subr.bf16.mxu1 %v1850_v0  ;;  %v1587_v30 = vld [vmem:[%s2709_s0 + $0x60] ss:$8 sps:$4 sm:$0xff]   ;;  %v1591_v32 = vld [vmem:[%s2709_s0 + $0x74] ss:$8 sps:$4 sm:$0xff]   ;;  %v1590_v33 = vld [vmem:[%s2709_s0 + $0x30] ss:$8 sps:$4 sm:$0xff]  }
   0xc   :  { %v1593_v34 = vld [vmem:[%s2709_s0 + $0x70] ss:$8 sps:$4 sm:$0xff]   ;;  %v2056_v42 = vld [vmem:[%s2710_s1 + $0x20] sm:$0xff]  ;;  %v2061_v43 = vld [vmem:[%s2710_s1 + $0x28] sm:$0xff] }
   0xd   :  { %v2040_v36 = vld [vmem:[%s2710_s1 + $0x10] sm:$0xff]  ;;  %v2045_v37 = vld [vmem:[%s2710_s1 + $0x18] sm:$0xff]  ;;  %v2084_v50 = vld [vmem:[%s2710_s1 + $0x40] sm:$0xff] }
   0xe   :  { %279 = vmatpush1.bf16.msra.mxu0 %v1559_v5  ;;  %1540 = vmatpush1.bf16.msra.mxu1 %v1559_v5  ;;  %v2070_v46 = vld [vmem:[%s2710_s1 + $0x30] sm:$0xff]  ;;  %v2075_v47 = vld [vmem:[%s2710_s1 + $0x38] sm:$0xff]  ;;  %v2089_v51 = vld [vmem:[%s2710_s1 + $0x48] sm:$0xff] }
   0xf   :  { %280 = vmatprep.subr.bf16.mxu0 %v1850_v0  ;;  %1527 = vmatprep.subr.bf16.mxu1 %v1850_v0  ;;  %v2098_v54 = vld [vmem:[%s2710_s1 + $0x58] sm:$0xff]  ;;  %v2103_v55 = vld [vmem:[%s2710_s1 + $0x50] sm:$0xff]  ;;  %v2112_v58 = vld [vmem:[%s2710_s1 + $0x68] sm:$0xff] }
  0x10   :  { %v2117_v59 = vld [vmem:[%s2710_s1 + $0x60] sm:$0xff]  ;;  %v2126_v62 = vld [vmem:[%s2710_s1 + $0x78] sm:$0xff]  ;;  %v2131_v63 = vld [vmem:[%s2710_s1 + $0x70] sm:$0xff] }
  0x11   :  { %v2142_v2 = vld [vmem:[%s2711_s3] ss:$0 sm:$0xff] }
  0x12   :  { %281 = vmatpush1.bf16.msra.mxu0 %v1560_v6  ;;  %1541 = vmatpush1.bf16.msra.mxu1 %v1560_v6 }
  0x13   :  { %282 = vmatprep.subr.bf16.mxu0 %v1850_v0  ;;  %1528 = vmatprep.subr.bf16.mxu1 %v1850_v0 }
  0x16   :  { %283 = vmatpush1.bf16.msra.mxu0 %v1561_v9  ;;  %1542 = vmatpush1.bf16.msra.mxu1 %v1561_v9 }
  0x17   :  { %284 = vmatprep.subr.bf16.mxu0 %v1850_v0  ;;  %1529 = vmatprep.subr.bf16.mxu1 %v1850_v0 }
  0x1a   :  { %285 = vmatpush1.bf16.msra.mxu0 %v1562_v10  ;;  %1543 = vmatpush1.bf16.msra.mxu1 %v1562_v10 }
  0x1b   :  { %286 = vmatprep.subr.bf16.mxu0 %v1850_v0  ;;  %1530 = vmatprep.subr.bf16.mxu1 %v1850_v0 }
  0x1e   :  { %287 = vmatpush1.bf16.msra.mxu0 %v1563_v13  ;;  %1544 = vmatpush1.bf16.msra.mxu1 %v1563_v13 }
  0x1f   :  { %288 = vmatprep.subr.bf16.mxu0 %v1850_v0  ;;  %1531 = vmatprep.subr.bf16.mxu1 %v1850_v0 }
  0x22   :  { %289 = vmatpush1.bf16.msra.mxu0 %v1564_v14  ;;  %1545 = vmatpush1.bf16.msra.mxu1 %v1564_v14 }
  0x23   :  { %290 = vmatprep.subr.bf16.mxu0 %v1850_v0  ;;  %1532 = vmatprep.subr.bf16.mxu1 %v1850_v0 }
  0x26   :  { %291 = vmatpush1.bf16.msra.mxu0 %v1565_v15  ;;  %1546 = vmatpush1.bf16.msra.mxu1 %v1565_v15 }
  0x27   :  { %292 = vmatprep.subr.bf16.mxu0 %v1850_v0  ;;  %1533 = vmatprep.subr.bf16.mxu1 %v1850_v0 }
  0x2a   :  { %293 = vmatpush1.bf16.msra.mxu0 %v1566_v16  ;;  %1547 = vmatpush1.bf16.msra.mxu1 %v1566_v16 }
  0x2b   :  { %294 = vmatprep.subr.bf16.mxu0 %v1850_v0  ;;  %1534 = vmatprep.subr.bf16.mxu1 %v1850_v0 }
  0x2e   :  { %295 = vmatpush1.bf16.msra.mxu0 %v1567_v17  ;;  %1548 = vmatpush1.bf16.msra.mxu1 %v1567_v17 }
  0x2f   :  { %296 = vmatprep.subr.bf16.mxu0 %v1850_v0  ;;  %1535 = vmatprep.subr.bf16.mxu1 %v1850_v0 }
  0x32   :  { %297 = vmatpush1.bf16.msra.mxu0 %v1568_v18  ;;  %1549 = vmatpush1.bf16.msra.mxu1 %v1568_v18 }
  0x33   :  { %298 = vmatprep.subr.bf16.mxu0 %v1850_v0  ;;  %1536 = vmatprep.subr.bf16.mxu1 %v1850_v0 }
  0x36   :  { %299 = vmatpush1.bf16.msra.mxu0 %v270_v20  ;;  %1550 = vmatpush1.bf16.msra.mxu1 %v270_v20 }
  0x39   :  { %305 = vmatmul.mubr.bf16.vlgmr.msra.gmra.mrb[0].mxu0 %v1570_v21  ;;  %337 = vmatmul.mubr.bf16.vlgmr.msra.gmra.mrb[0].mxu1 %v1573_v22 }
  0x3a   :  { %1466 = vmatprep.mubr.msk.bf16.mxu0 %vm243_vm0, %v1576_v23  ;;  %1470 = vmatprep.mubr.msk.bf16.mxu1 %vm243_vm0, %v1579_v24 }
  0x41   :  { %313 = vmatmul.mubr.bf16.gmra.mrb[4].mxu0 %v1578_v25  ;;  %345 = vmatmul.mubr.bf16.gmra.mrb[4].mxu1 %v1581_v26 }
  0x42   :  { %1467 = vmatprep.mubr.msk.bf16.mxu0 %vm243_vm0, %v1582_v27  ;;  %1471 = vmatprep.mubr.msk.bf16.mxu1 %vm243_vm0, %v1585_v28 }
  0x49   :  { %321 = vmatmul.mubr.bf16.gmra.mrb[8].mxu0 %v1584_v29  ;;  %353 = vmatmul.mubr.bf16.gmra.mrb[8].mxu1 %v1587_v30 }
  0x4a   :  { %1468 = vmatprep.mubr.msk.bf16.mxu0 %vm243_vm0, %v1588_v31  ;;  %1472 = vmatprep.mubr.msk.bf16.mxu1 %vm243_vm0, %v1591_v32 }
  0x51   :  { %329 = vmatmul.mubr.bf16.gmra.mrb[12].mxu0 %v1590_v33  ;;  %361 = vmatmul.mubr.bf16.gmra.mrb[12].mxu1 %v1593_v34 }
  0x76   :  { %v505_v35 = vpop.permute.xlu0 %504 }
  0x77   :  { %v507_v38 = vmul.f32 %v505_v35, %v1943_v11  ;;  %v508_v39 = vmul.f32 %v505_v35, %v1950_v12  ;;  %v509_v40 = vmul.f32 %v505_v35, %v2040_v36  ;;  %v510_v41 = vmul.f32 %v505_v35, %v2045_v37 }
  0x78   :  { %v511_v44 = vmul.f32 %v505_v35, %v2056_v42  ;;  %v512_v45 = vmul.f32 %v505_v35, %v2061_v43  ;;  %v513_v48 = vmul.f32 %v505_v35, %v2070_v46  ;;  %v514_v49 = vmul.f32 %v505_v35, %v2075_v47 }
  0x79   :  { %539 = vrot.lane.b32.xlu1 %v507_v38, %s1852_s19  ;;  %541 = vrot.lane.b32.xlu0 %v508_v39, %s1852_s19  ;;  %v515_v52 = vmul.f32 %v505_v35, %v2084_v50  ;;  %v516_v53 = vmul.f32 %v505_v35, %v2089_v51  ;;  %v518_v56 = vmul.f32 %v505_v35, %v2098_v54 }
  0x7a   :  { %v517_v57 = vmul.f32 %v505_v35, %v2103_v55  ;;  %v520_v60 = vmul.f32 %v505_v35, %v2112_v58  ;;  %v519_v61 = vmul.f32 %v505_v35, %v2117_v59  ;;  %v522_v0 = vmul.f32 %v505_v35, %v2126_v62 }
  0x7b   :  { %v521_v1 = vmul.f32 %v505_v35, %v2131_v63 }
  0x7d   :  { %543 = vrot.lane.b32.xlu1 %v509_v40, %s1852_s19  ;;  %545 = vrot.lane.b32.xlu0 %v510_v41, %s1852_s19 }
  0x81   :  { %547 = vrot.lane.b32.xlu1 %v511_v44, %s1852_s19  ;;  %549 = vrot.lane.b32.xlu0 %v512_v45, %s1852_s19 }
  0x85   :  { %551 = vrot.lane.b32.xlu1 %v513_v48, %s1852_s19  ;;  %553 = vrot.lane.b32.xlu0 %v514_v49, %s1852_s19 }
  0x89   :  { %555 = vrot.lane.b32.xlu1 %v515_v52, %s1852_s19  ;;  %557 = vrot.lane.b32.xlu0 %v516_v53, %s1852_s19 }
  0x8d   :  { %561 = vrot.lane.b32.xlu0 %v518_v56, %s1852_s19  ;;  %559 = vrot.lane.b32.xlu1 %v517_v57, %s1852_s19 }
  0x91   :  { %565 = vrot.lane.b32.xlu0 %v520_v60, %s1852_s19  ;;  %563 = vrot.lane.b32.xlu1 %v519_v61, %s1852_s19 }
  0x95   :  { %569 = vrot.lane.b32.xlu0 %v522_v0, %s1852_s19  ;;  %567 = vrot.lane.b32.xlu1 %v521_v1, %s1852_s19 }
 0x10c   :  { %v306_v3 = vpop.f32.mrb[0].mxu0  ;;  %v338_v5 = vpop.f32.mrb[0].mxu1 }
 0x10d   :  { %v2145_v6 = vadd.f32 %v2142_v2, %v306_v3  ;;  %v2148_v7 = vadd.f32 %v2142_v2, %v338_v5  ;;  %v308_v8 = vpop.f32.mrb[1].mxu0  ;;  %v340_v9 = vpop.f32.mrb[1].mxu1 }
 0x10e   :  { %v309_v10 = vpop.f32.mrb[2].mxu0  ;;  %v341_v13 = vpop.f32.mrb[2].mxu1 }
 0x10f   :  { %1594 = vtanh.f32 %v2145_v6  ;;  %v311_v14 = vpop.f32.mrb[3].mxu0  ;;  %v343_v15 = vpop.f32.mrb[3].mxu1  ;;  %v2153_v16 = vadd.f32 %v2142_v2, %v309_v10  ;;  %v2157_v19 = vadd.f32 %v2142_v2, %v341_v13 }
 0x110   :  { %1596 = vtanh.f32 %v2148_v7 }
 0x111   :  { %1598 = vtanh.f32 %v2153_v16 }
 0x112   :  { %1600 = vtanh.f32 %v2157_v19 }
 0x114   :  { %v314_v17 = vpop.f32.mrb[4].mxu0  ;;  %v346_v18 = vpop.f32.mrb[4].mxu1 }
 0x115   :  { %v316_v20 = vpop.f32.mrb[5].mxu0  ;;  %v348_v21 = vpop.f32.mrb[5].mxu1  ;;  %v2160_v27 = vadd.f32 %v2142_v2, %v314_v17  ;;  %v2166_v29 = vadd.f32 %v2142_v2, %v346_v18 }
 0x116   :  { %v317_v22 = vpop.f32.mrb[6].mxu0  ;;  %v349_v23 = vpop.f32.mrb[6].mxu1 }
 0x117   :  { %v319_v24 = vpop.f32.mrb[7].mxu0  ;;  %v351_v25 = vpop.f32.mrb[7].mxu1  ;;  %1602 = vtanh.f32 %v2160_v27  ;;  %v2172_v41 = vadd.f32 %v2142_v2, %v317_v22  ;;  %v2177_v53 = vadd.f32 %v2142_v2, %v349_v23 }
 0x118   :  { %1604 = vtanh.f32 %v2166_v29 }
 0x119   :  { %v1595_v26 = vpop.eup %1594  ;;  %1606 = vtanh.f32 %v2172_v41 }
 0x11a   :  { %v1597_v28 = vpop.eup %1596  ;;  %827 = vrot.lane.b32.xlu0 %v1595_v26, %s1851_s29  ;;  %1608 = vtanh.f32 %v2177_v53 }
 0x11b   :  { %843 = vrot.lane.b32.xlu1 %v1597_v28, %s1851_s29  ;;  %v1599_v32 = vpop.eup %1598 }
 0x11c   :  { %v322_v30 = vpop.f32.mrb[8].mxu0  ;;  %v354_v31 = vpop.f32.mrb[8].mxu1 }
 0x11d   :  { %v324_v33 = vpop.f32.mrb[9].mxu0  ;;  %v356_v35 = vpop.f32.mrb[9].mxu1  ;;  %v2182_v3 = vadd.f32 %v2142_v2, %v322_v30  ;;  %v2185_v5 = vadd.f32 %v2142_v2, %v354_v31 }
 0x11e   :  { %v325_v34 = vpop.f32.mrb[10].mxu0  ;;  %v357_v39 = vpop.f32.mrb[10].mxu1 }
 0x11f   :  { %829 = vrot.lane.b32.xlu1 %v1599_v32, %s1851_s29  ;;  %v327_v38 = vpop.f32.mrb[11].mxu0  ;;  %v359_v40 = vpop.f32.mrb[11].mxu1  ;;  %1610 = vtanh.f32 %v2182_v3  ;;  %v2190_v8 = vadd.f32 %v2142_v2, %v325_v34  ;;  %v2196_v10 = vadd.f32 %v2142_v2, %v357_v39  ;;  %v376_v32 = vmul.f32 %v1906_v4, %v1943_v11 }
 0x120   :  { %v1601_v44 = vpop.eup %1600  ;;  %1612 = vtanh.f32 %v2185_v5  ;;  %v2240_v30 = vpop.permute.xlu1 %747  ;;  %v384_v34 = vmul.f32 %v1906_v4, %v2084_v50  ;;  %v377_v38 = vmul.f32 %v1906_v4, %v1950_v12 }
 0x121   :  { %845 = vrot.lane.b32.xlu0 %v1601_v44, %s1851_s29  ;;  %v1603_v60 = vpop.eup %1602  ;;  %1614 = vtanh.f32 %v2190_v8  ;;  %v392_v35 = vadd.f32 %v376_v32, %v2145_v6 }
 0x122   :  { %v1605_v1 = vpop.eup %1604  ;;  %1616 = vtanh.f32 %v2196_v10  ;;  %v400_v44 = vadd.f32 %v384_v34, %v2148_v7 }
 0x123   :  { %831 = vrot.lane.b32.xlu1 %v1603_v60, %s1851_s29  ;;  %v1607_v9 = vpop.eup %1606  ;;  %v1474_v11 = vmul.f32 -1.442695, %v392_v35  ;;  %v380_v35 = vmul.f32 %v1906_v4, %v2056_v42 }
 0x124   :  { %v330_v45 = vpop.f32.mrb[12].mxu0  ;;  %v362_v48 = vpop.f32.mrb[12].mxu1  ;;  %v1482_v12 = vmul.f32 -1.442695, %v400_v44 }
 0x125   :  { %v332_v49 = vpop.f32.mrb[13].mxu0  ;;  %v364_v52 = vpop.f32.mrb[13].mxu1  ;;  %833 = vrot.lane.b32.xlu0 %v1607_v9, %s1851_s29  ;;  %v2201_v15 = vadd.f32 %v2142_v2, %v330_v45  ;;  %v2205_v18 = vadd.f32 %v2142_v2, %v362_v48  ;;  %v393_v45 = vadd.f32 %v377_v38, %v2153_v16 }
 0x126   :  { %v333_v56 = vpop.f32.mrb[14].mxu0  ;;  %v365_v57 = vpop.f32.mrb[14].mxu1 }
 0x127   :  { %v335_v61 = vpop.f32.mrb[15].mxu0  ;;  %v367_v0 = vpop.f32.mrb[15].mxu1  ;;  %847 = vrot.lane.b32.xlu1 %v1605_v1, %s1851_s29  ;;  %1618 = vtanh.f32 %v2201_v15  ;;  %v2209_v21 = vadd.f32 %v2142_v2, %v333_v56  ;;  %v2216_v23 = vadd.f32 %v2142_v2, %v365_v57  ;;  %v1475_v52 = vmul.f32 -1.442695, %v393_v45 }
 0x128   :  { %v1609_v13 = vpop.eup %1608  ;;  %1620 = vtanh.f32 %v2205_v18  ;;  %v2238_v2 = vpop.permute.xlu0 %749  ;;  %v378_v56 = vmul.f32 %v1906_v4, %v2040_v36  ;;  %v386_v61 = vmul.f32 %v1906_v4, %v2103_v55 }
 0x129   :  { %849 = vrot.lane.b32.xlu0 %v1609_v13, %s1851_s29  ;;  %v1611_v14 = vpop.eup %1610  ;;  %1622 = vtanh.f32 %v2209_v21  ;;  %v2254_v33 = vpop.permute.xlu1 %539 }
 0x12a   :  { %v1613_v17 = vpop.eup %1612  ;;  %1624 = vtanh.f32 %v2216_v23  ;;  %v394_v0 = vadd.f32 %v378_v56, %v2160_v27 }
 0x12b   :  { %835 = vrot.lane.b32.xlu1 %v1611_v14, %s1851_s29  ;;  %v1615_v20 = vpop.eup %1614  ;;  %1626 = vpow2.f32 %v1474_v11  ;;  %v402_v14 = vadd.f32 %v386_v61, %v2166_v29  ;;  %v381_v61 = vmul.f32 %v1906_v4, %v2061_v43 }
 0x12c   :  { %v1617_v22 = vpop.eup %1616  ;;  %v2248_v31 = vpop.permute.xlu0 %541  ;;  %1628 = vpow2.f32 %v1482_v12  ;;  %v1476_v13 = vmul.f32 -1.442695, %v394_v0  ;;  %v388_v12 = vmul.f32 %v1906_v4, %v2117_v59 }
 0x12d   :  { %837 = vrot.lane.b32.xlu0 %v1615_v20, %s1851_s29  ;;  %v2267_v40 = vpop.permute.xlu1 %543  ;;  %1630 = vpow2.f32 %v1475_v52  ;;  %v396_v52 = vadd.f32 %v380_v35, %v2182_v3 }
 0x12f   :  { %851 = vrot.lane.b32.xlu1 %v1613_v17, %s1851_s29 }
 0x130   :  { %v2265_v39 = vpop.permute.xlu0 %545 }
 0x131   :  { %853 = vrot.lane.b32.xlu0 %v1617_v22, %s1851_s29  ;;  %v1619_v24 = vpop.eup %1618  ;;  %v2277_v49 = vpop.permute.xlu1 %547 }
 0x132   :  { %v1621_v25 = vpop.eup %1620 }
 0x133   :  { %839 = vrot.lane.b32.xlu1 %v1619_v24, %s1851_s29  ;;  %v1623_v26 = vpop.eup %1622 }
 0x134   :  { %v1625_v28 = vpop.eup %1624  ;;  %v2275_v48 = vpop.permute.xlu0 %549 }
 0x135   :  { %841 = vrot.lane.b32.xlu0 %v1623_v26, %s1851_s29  ;;  %v1627_v9 = vpop.eup %1626  ;;  %v387_v26 = vmul.f32 %v1906_v4, %v2098_v54 }
 0x136   :  { %v456_v22 = vadd.f32 1.0, %v1627_v9  ;;  %v1629_v24 = vpop.eup %1628  ;;  %v1478_v9 = vmul.f32 -1.442695, %v396_v52 }
 0x137   :  { %855 = vrot.lane.b32.xlu1 %v1621_v25, %s1851_s29  ;;  %v1631_v25 = vpop.eup %1630  ;;  %v403_v44 = vadd.f32 %v387_v26, %v2177_v53 }
 0x138   :  { %v2282_v60 = vpop.permute.xlu0 %553  ;;  %v457_v38 = vadd.f32 1.0, %v1631_v25 }
 0x139   :  { %857 = vrot.lane.b32.xlu0 %v1625_v28, %s1851_s29  ;;  %v1485_v56 = vmul.f32 -1.442695, %v403_v44 }
 0x13b   :  { %751 = vrot.lane.b32.xlu1 %v2040_v36, %s1852_s19  ;;  %v379_v36 = vmul.f32 %v1906_v4, %v2045_v37 }
 0x13c   :  { %v2292_v17 = vpop.permute.xlu0 %557 }
 0x13d   :  { %753 = vrot.lane.b32.xlu0 %v2045_v37, %s1852_s19  ;;  %v395_v28 = vadd.f32 %v379_v36, %v2172_v41  ;;  %v464_v37 = vadd.f32 1.0, %v1629_v24 }
 0x13f   :  { %755 = vrot.lane.b32.xlu1 %v2056_v42, %s1852_s19  ;;  %v1477_v11 = vmul.f32 -1.442695, %v395_v28 }
 0x140   :  { %v2299_v32 = vpop.permute.xlu0 %561 }
 0x141   :  { %757 = vrot.lane.b32.xlu0 %v2061_v43, %s1852_s19 }
 0x143   :  { %759 = vrot.lane.b32.xlu1 %v2070_v46, %s1852_s19 }
 0x144   :  { %v2306_v45 = vpop.permute.xlu0 %565 }
 0x145   :  { %761 = vrot.lane.b32.xlu0 %v2075_v47, %s1852_s19 }
 0x147   :  { %763 = vrot.lane.b32.xlu1 %v2084_v50, %s1852_s19  ;;  %v385_v50 = vmul.f32 %v1906_v4, %v2089_v51 }
 0x148   :  { %v2313_v42 = vpop.permute.xlu0 %569 }
 0x149   :  { %765 = vrot.lane.b32.xlu0 %v2089_v51, %s1852_s19  ;;  %v401_v57 = vadd.f32 %v385_v50, %v2157_v19  ;;  %v2286_v51 = vpop.permute.xlu1 %551 }
 0x14b   :  { %767 = vrot.lane.b32.xlu1 %v2103_v55, %s1852_s19  ;;  %v1483_v1 = vmul.f32 -1.442695, %v401_v57  ;;  %v1484_v55 = vmul.f32 -1.442695, %v402_v14 }
 0x14d   :  { %769 = vrot.lane.b32.xlu0 %v2098_v54, %s1852_s19  ;;  %1632 = vpow2.f32 %v1483_v1  ;;  %v2294_v20 = vpop.permute.xlu1 %555 }
 0x14e   :  { %1634 = vpow2.f32 %v1476_v13  ;;  %v404_v13 = vadd.f32 %v388_v12, %v2185_v5  ;;  %v382_v12 = vmul.f32 %v1906_v4, %v2070_v46  ;;  %v383_v46 = vmul.f32 %v1906_v4, %v2075_v47 }
 0x14f   :  { %771 = vrot.lane.b32.xlu1 %v2117_v59, %s1852_s19  ;;  %1636 = vrcp.f32 %v456_v22  ;;  %v389_v59 = vmul.f32 %v1906_v4, %v2112_v58 }
 0x150   :  { %1638 = vpow2.f32 %v1484_v55  ;;  %v397_v55 = vadd.f32 %v381_v61, %v2190_v8  ;;  %v1486_v43 = vmul.f32 -1.442695, %v404_v13 }
 0x151   :  { %773 = vrot.lane.b32.xlu0 %v2112_v58, %s1852_s19  ;;  %v2301_v34 = vpop.permute.xlu1 %559  ;;  %1640 = vrcp.f32 %v464_v37  ;;  %v405_v35 = vadd.f32 %v389_v59, %v2196_v10 }
 0x152   :  { %1642 = vrcp.f32 %v457_v38  ;;  %v1479_v58 = vmul.f32 -1.442695, %v397_v55 }
 0x153   :  { %775 = vrot.lane.b32.xlu1 %v2131_v63, %s1852_s19  ;;  %1644 = vpow2.f32 %v1477_v11 }
 0x154   :  { %1646 = vpow2.f32 %v1485_v56  ;;  %v1487_v56 = vmul.f32 -1.442695, %v405_v35 }
 0x155   :  { %777 = vrot.lane.b32.xlu0 %v2126_v62, %s1852_s19  ;;  %v2308_v50 = vpop.permute.xlu1 %563 }
 0x157   :  { %v1633_v54 = vpop.eup %1632 }
 0x158   :  { %v1635_v57 = vpop.eup %1634  ;;  %v465_v0 = vadd.f32 1.0, %v1633_v54 }
 0x159   :  { %v2317_v1 = vpop.permute.xlu1 %567  ;;  %v1637_v14 = vpop.eup %1636  ;;  %v458_v36 = vadd.f32 1.0, %v1635_v57 }
 0x15a   :  { %v1639_v24 = vpop.eup %1638  ;;  %1648 = vrcp.f32 %v465_v0  ;;  %v390_v0 = vmul.f32 %v1906_v4, %v2131_v63  ;;  %v391_v63 = vmul.f32 %v1906_v4, %v2126_v62 }
 0x15b   :  { %1650 = vpow2.f32 %v1478_v9  ;;  %v1641_v28 = vpop.eup %1640  ;;  %v466_v37 = vadd.f32 1.0, %v1639_v24  ;;  %v398_v9 = vadd.f32 %v382_v12, %v2201_v15 }
 0x15c   :  { %1652 = vrcp.f32 %v458_v36  ;;  %v1643_v38 = vpop.eup %1642 }
 0x15d   :  { %v1645_v54 = vpop.eup %1644  ;;  %1654 = vpow2.f32 %v1486_v43  ;;  %v1480_v55 = vmul.f32 -1.442695, %v398_v9  ;;  %v399_v43 = vadd.f32 %v383_v46, %v2209_v21 }
 0x15e   :  { %1656 = vrcp.f32 %v466_v37  ;;  %v459_v57 = vadd.f32 1.0, %v1645_v54  ;;  %v1647_v61 = vpop.eup %1646  ;;  %v407_v54 = vadd.f32 %v391_v63, %v2216_v23 }
 0x15f   :  { %1658 = vpow2.f32 %v1479_v58 }
 0x160   :  { %1660 = vpow2.f32 %v1487_v56 }
 0x161   :  { %1662 = vrcp.f32 %v459_v57  ;;  %v1489_v57 = vmul.f32 -1.442695, %v407_v54 }
 0x164   :  { %v1649_v13 = vpop.eup %1648 }
 0x165   :  { %v1651_v36 = vpop.eup %1650 }
 0x166   :  { %v1653_v24 = vpop.eup %1652  ;;  %v460_v37 = vadd.f32 1.0, %v1651_v36 }
 0x167   :  { %v1655_v47 = vpop.eup %1654 }
 0x168   :  { %v1657_v35 = vpop.eup %1656 }
 0x18c   :  { %v828_v22 = vpop.permute.xlu0 %827 }
 0x18d   :  { %v844_v25 = vpop.permute.xlu1 %843  ;;  %v875_v26 = vmul.f32 %v1637_v14, %v828_v22  ;;  %v467_v22 = vadd.f32 1.0, %v1647_v61 }
 0x18e   :  { %v883_v11 = vmul.f32 %v1641_v28, %v844_v25  ;;  %v406_v25 = vadd.f32 %v390_v0, %v2205_v18 }
 0x18f   :  { %907 = vrot.lane.b32.xlu1 %v875_v26, %s1852_s19  ;;  %1664 = vrcp.f32 %v467_v22 }
 0x190   :  { %1666 = vpow2.f32 %v1480_v55 }
 0x191   :  { %v830_v44 = vpop.permute.xlu1 %829  ;;  %1668 = vrcp.f32 %v460_v37 }
 0x192   :  { %v876_v52 = vmul.f32 %v1643_v38, %v830_v44  ;;  %v1488_v38 = vmul.f32 -1.442695, %v406_v25  ;;  %v1481_v44 = vmul.f32 -1.442695, %v399_v43 }
 0x193   :  { %923 = vrot.lane.b32.xlu1 %v883_v11, %s1852_s19  ;;  %v846_v14 = vpop.permute.xlu0 %845  ;;  %v1659_v11 = vpop.eup %1658 }
 0x194   :  { %909 = vrot.lane.b32.xlu0 %v876_v52, %s1852_s19  ;;  %v884_v59 = vmul.f32 %v1649_v13, %v846_v14  ;;  %v468_v52 = vadd.f32 1.0, %v1655_v47  ;;  %v1661_v4 = vpop.eup %1660  ;;  %v461_v62 = vadd.f32 1.0, %v1659_v11  ;;  %1670 = vpow2.f32 %v1488_v38 }
 0x195   :  { %v832_v26 = vpop.permute.xlu1 %831  ;;  %v1663_v56 = vpop.eup %1662  ;;  %1672 = vpow2.f32 %v1481_v44  ;;  %v469_v9 = vadd.f32 1.0, %v1661_v4 }
 0x196   :  { %v877_v28 = vmul.f32 %v1653_v24, %v832_v26  ;;  %1674 = vrcp.f32 %v468_v52 }
 0x197   :  { %v834_v61 = vpop.permute.xlu0 %833  ;;  %1676 = vrcp.f32 %v461_v62 }
 0x198   :  { %925 = vrot.lane.b32.xlu0 %v884_v59, %s1852_s19  ;;  %911 = vrot.lane.b32.xlu1 %v877_v28, %s1852_s19  ;;  %v878_v0 = vmul.f32 %v1663_v56, %v834_v61  ;;  %1678 = vpow2.f32 %v1489_v57 }
 0x199   :  { %v848_v58 = vpop.permute.xlu1 %847  ;;  %v1665_v13 = vpop.eup %1664  ;;  %1680 = vrcp.f32 %v469_v9 }
 0x19a   :  { %v885_v12 = vmul.f32 %v1657_v35, %v848_v58  ;;  %v1667_v14 = vpop.eup %1666 }
 0x19b   :  { %v850_v46 = vpop.permute.xlu0 %849  ;;  %v1669_v36 = vpop.eup %1668  ;;  %v462_v22 = vadd.f32 1.0, %v1667_v14  ;;  %v1506_v14 = vld [vmem:[%s2712_s5] ss:$0 sm:$0xff]  ;;  %s1853_s5 = smov 8  }
 0x19c   :  { %927 = vrot.lane.b32.xlu1 %v885_v12, %s1852_s19  ;;  %913 = vrot.lane.b32.xlu0 %v878_v0, %s1852_s19  ;;  %v886_v59 = vmul.f32 %v1665_v13, %v850_v46 }
 0x19d   :  { %v836_v24 = vpop.permute.xlu1 %835  ;;  %1682 = vrcp.f32 %v462_v22 }
 0x19e   :  { %v1671_v55 = vpop.eup %1670  ;;  %v879_v25 = vmul.f32 %v1669_v36, %v836_v24 }
 0x19f   :  { %v1673_v26 = vpop.eup %1672  ;;  %v470_v28 = vadd.f32 1.0, %v1671_v55  ;;  %v838_v37 = vpop.permute.xlu0 %837 }
 0x1a0   :  { %929 = vrot.lane.b32.xlu0 %v886_v59, %s1852_s19  ;;  %915 = vrot.lane.b32.xlu1 %v879_v25, %s1852_s19  ;;  %v1675_v63 = vpop.eup %1674  ;;  %v463_v38 = vadd.f32 1.0, %v1673_v26 }
 0x1a1   :  { %v852_v43 = vpop.permute.xlu1 %851  ;;  %v1677_v47 = vpop.eup %1676  ;;  %1684 = vrcp.f32 %v470_v28 }
 0x1a2   :  { %v887_v35 = vmul.f32 %v1675_v63, %v852_v43  ;;  %v1679_v58 = vpop.eup %1678  ;;  %v880_v11 = vmul.f32 %v1677_v47, %v838_v37  ;;  %1686 = vrcp.f32 %v463_v38  ;;  %v587_v37 = vadd.f32 %v2254_v33, %v2145_v6 }
 0x1a3   :  { %v1681_v44 = vpop.eup %1680  ;;  %v854_v54 = vpop.permute.xlu0 %853  ;;  %v471_v12 = vadd.f32 1.0, %v1679_v58  ;;  %v588_v38 = vadd.f32 %v2248_v31, %v2153_v16  ;;  %v589_v31 = vadd.f32 %v2267_v40, %v2160_v27 }
 0x1a4   :  { %931 = vrot.lane.b32.xlu1 %v887_v35, %s1852_s19  ;;  %917 = vrot.lane.b32.xlu0 %v880_v11, %s1852_s19  ;;  %v888_v52 = vmul.f32 %v1681_v44, %v854_v54  ;;  %v603_v11 = vadd.f32 0.01, %v587_v37  ;;  %v595_v44 = vadd.f32 %v2294_v20, %v2148_v7 }
 0x1a5   :  { %1688 = vrcp.f32 %v471_v12  ;;  %v840_v62 = vpop.permute.xlu1 %839  ;;  %v604_v54 = vadd.f32 0.01, %v588_v38  ;;  %v600_v38 = vadd.f32 %v2306_v45, %v2196_v10 }
 0x1a6   :  { %v611_v33 = vadd.f32 0.01, %v595_v44 }
 0x1a7   :  { %v1683_v4 = vpop.eup %1682  ;;  %v842_v9 = vpop.permute.xlu0 %841 }
 0x1a8   :  { %933 = vrot.lane.b32.xlu0 %v888_v52, %s1852_s19  ;;  %v881_v56 = vmul.f32 %v1683_v4, %v840_v62  ;;  %v596_v52 = vadd.f32 %v2292_v17, %v2157_v19  ;;  %v1490_v4 = vmul.f32 -1.442695, %v603_v11  ;;  %v598_v17 = vadd.f32 %v2299_v32, %v2177_v53 }
 0x1a9   :  { %v856_v61 = vpop.permute.xlu1 %855 }
 0x1aa   :  { %919 = vrot.lane.b32.xlu1 %v881_v56, %s1852_s19  ;;  %v1491_v56 = vmul.f32 -1.442695, %v604_v54  ;;  %1690 = vpow2.f32 %v1490_v4  ;;  %v592_v4 = vadd.f32 %v2275_v48, %v2190_v8 }
 0x1ab   :  { %v1685_v57 = vpop.eup %1684  ;;  %v858_v36 = vpop.permute.xlu0 %857 }
 0x1ac   :  { %v1687_v0 = vpop.eup %1686  ;;  %v889_v13 = vmul.f32 %v1685_v57, %v856_v61  ;;  %v612_v57 = vadd.f32 0.01, %v596_v52  ;;  %v590_v61 = vadd.f32 %v2265_v39, %v2172_v41  ;;  %1692 = vpow2.f32 %v1491_v56 }
 0x1ad   :  { %v882_v46 = vmul.f32 %v1687_v0, %v842_v9  ;;  %v2356_v24 = vpop.permute.xlu1 %751  ;;  %v1498_v0 = vmul.f32 -1.442695, %v611_v33  ;;  %v605_v9 = vadd.f32 0.01, %v589_v31  ;;  %v616_v33 = vadd.f32 0.01, %v600_v38 }
 0x1ae   :  { %935 = vrot.lane.b32.xlu1 %v889_v13, %s1852_s19  ;;  %v597_v13 = vadd.f32 %v2301_v34, %v2166_v29  ;;  %v606_v40 = vadd.f32 0.01, %v590_v61  ;;  %v591_v34 = vadd.f32 %v2277_v49, %v2182_v3  ;;  %v599_v61 = vadd.f32 %v2308_v50, %v2185_v5 }
 0x1af   :  { %921 = vrot.lane.b32.xlu0 %v882_v46, %s1852_s19  ;;  %v1689_v59 = vpop.eup %1688  ;;  %v2368_v28 = vpop.permute.xlu0 %753  ;;  %1694 = vpow2.f32 %v1498_v0  ;;  %v593_v50 = vadd.f32 %v2286_v51, %v2201_v15 }
 0x1b0   :  { %v890_v22 = vmul.f32 %v1689_v59, %v858_v36  ;;  %v614_v59 = vadd.f32 0.01, %v598_v17  ;;  %v1492_v36 = vmul.f32 -1.442695, %v605_v9  ;;  %v613_v39 = vadd.f32 0.01, %v597_v13 }
 0x1b1   :  { %v2358_v55 = vpop.permute.xlu1 %755  ;;  %v1493_v37 = vmul.f32 -1.442695, %v606_v40  ;;  %v607_v45 = vadd.f32 0.01, %v591_v34  ;;  %v608_v17 = vadd.f32 0.01, %v592_v4  ;;  %v602_v34 = vadd.f32 %v2313_v42, %v2216_v23 }
 0x1b2   :  { %977 = vrot.lane.b32.xlu1 %v1506_v14, %s1852_s19  ;;  %v1499_v14 = vmul.f32 -1.442695, %v612_v57  ;;  %v1501_v11 = vmul.f32 -1.442695, %v614_v59  ;;  %v1500_v54 = vmul.f32 -1.442695, %v613_v39 }
 0x1b3   :  { %937 = vrot.lane.b32.xlu0 %v890_v22, %s1852_s19  ;;  %v2374_v35 = vpop.permute.xlu0 %757  ;;  %v1503_v9 = vmul.f32 -1.442695, %v616_v33  ;;  %v615_v40 = vadd.f32 0.01, %v599_v61  ;;  %v601_v61 = vadd.f32 %v2317_v1, %v2205_v18  ;;  %s1854_s19 = smov 104  }
 0x1b4   :  { %1696 = vpow2.f32 %v1499_v14  ;;  %v1691_v44 = vpop.eup %1690  ;;  %v1494_v14 = vmul.f32 -1.442695, %v607_v45  ;;  %v609_v45 = vadd.f32 0.01, %v593_v50 }
 0x1b5   :  { %v2360_v25 = vpop.permute.xlu1 %759  ;;  %1698 = vpow2.f32 %v1492_v36  ;;  %v667_v31 = vadd.f32 1.0, %v1691_v44  ;;  %v1495_v36 = vmul.f32 -1.442695, %v608_v17  ;;  %v1502_v44 = vmul.f32 -1.442695, %v615_v40 }
 0x1b6   :  { %v1693_v52 = vpop.eup %1692  ;;  %1700 = vpow2.f32 %v1493_v37 }
 0x1b7   :  { %v2382_v12 = vpop.permute.xlu0 %761  ;;  %1702 = vpow2.f32 %v1501_v11  ;;  %v668_v57 = vadd.f32 1.0, %v1693_v52 }
 0x1b8   :  { %1704 = vpow2.f32 %v1500_v54  ;;  %v594_v54 = vadd.f32 %v2282_v60, %v2209_v21 }
 0x1b9   :  { %v2362_v26 = vpop.permute.xlu1 %763  ;;  %v1695_v0 = vpop.eup %1694  ;;  %1706 = vrcp.f32 %v667_v31 }
 0x1ba   :  { %v675_v48 = vadd.f32 1.0, %v1695_v0  ;;  %1708 = vrcp.f32 %v668_v57  ;;  %v618_v57 = vadd.f32 0.01, %v602_v34  ;;  %v610_v42 = vadd.f32 0.01, %v594_v54 }
 0x1bb   :  { %v2392_v20 = vpop.permute.xlu0 %765  ;;  %1710 = vpow2.f32 %v1503_v9 }
 0x1bc   :  { %1712 = vpow2.f32 %v1494_v14  ;;  %v1496_v14 = vmul.f32 -1.442695, %v609_v45 }
 0x1bd   :  { %v2364_v63 = vpop.permute.xlu1 %767  ;;  %1714 = vrcp.f32 %v675_v48 }
 0x1be   :  { %v1697_v13 = vpop.eup %1696  ;;  %1716 = vpow2.f32 %v1495_v36  ;;  %v1505_v36 = vmul.f32 -1.442695, %v618_v57 }
 0x1bf   :  { %v2400_v22 = vpop.permute.xlu0 %769  ;;  %v1699_v39 = vpop.eup %1698  ;;  %v676_v37 = vadd.f32 1.0, %v1697_v13 }
 0x1c0   :  { %v1701_v11 = vpop.eup %1700  ;;  %v669_v33 = vadd.f32 1.0, %v1699_v39  ;;  %v617_v39 = vadd.f32 0.01, %v601_v61 }
 0x1c1   :  { %v2366_v43 = vpop.permute.xlu1 %771  ;;  %v1703_v4 = vpop.eup %1702  ;;  %1718 = vrcp.f32 %v676_v37  ;;  %v670_v51 = vadd.f32 1.0, %v1701_v11  ;;  %v1497_v37 = vmul.f32 -1.442695, %v610_v42 }
 0x1c2   :  { %v1705_v31 = vpop.eup %1704  ;;  %v678_v0 = vadd.f32 1.0, %v1703_v4  ;;  %1720 = vpow2.f32 %v1502_v44 }
 0x1c3   :  { %v2410_v56 = vpop.permute.xlu0 %773  ;;  %v1707_v9 = vpop.eup %1706  ;;  %v677_v13 = vadd.f32 1.0, %v1705_v31  ;;  %1722 = vrcp.f32 %v669_v33  ;;  %v1504_v33 = vmul.f32 -1.442695, %v617_v39 }
 0x1c4   :  { %v1709_v60 = vpop.eup %1708  ;;  %1724 = vrcp.f32 %v670_v51  ;;  %v795_v11 = vmul.f32 %v1707_v9, %v2240_v30 }
 0x1c5   :  { %v2370_v47 = vpop.permute.xlu1 %775  ;;  %v1711_v40 = vpop.eup %1710  ;;  %1726 = vrcp.f32 %v678_v0  ;;  %v796_v34 = vmul.f32 %v1709_v60, %v2238_v2 }
 0x1c6   :  { %v1713_v1 = vpop.eup %1712  ;;  %1728 = vrcp.f32 %v677_v13  ;;  %v680_v54 = vadd.f32 1.0, %v1711_v40 }
 0x1c7   :  { %v2416_v59 = vpop.permute.xlu0 %777  ;;  %v1715_v44 = vpop.eup %1714  ;;  %1730 = vpow2.f32 %v1496_v14  ;;  %v671_v57 = vadd.f32 1.0, %v1713_v1 }
 0x1c8   :  { %v1717_v4 = vpop.eup %1716  ;;  %1732 = vpow2.f32 %v1505_v36  ;;  %v803_v30 = vmul.f32 %v1715_v44, %v2362_v26 }
 0x1c9   :  { %1734 = vpow2.f32 %v1497_v37 }
 0x1ca   :  { %1736 = vrcp.f32 %v680_v54 }
 0x1cb   :  { %v1719_v51 = vpop.eup %1718  ;;  %1738 = vpow2.f32 %v1504_v33 }
 0x1cc   :  { %v804_v2 = vmul.f32 %v1719_v51, %v2392_v20  ;;  %1740 = vrcp.f32 %v671_v57 }
 0x201   :  { %v2378_v58 = vpop.permute.xlu1 %907 }
 0x202   :  { %v2435_v31 = vadd.f32 %v2378_v58, %v795_v11  ;;  %v1721_v58 = vpop.eup %1720 }
 0x203   :  { %v1723_v13 = vpop.eup %1722 }
 0x204   :  { %v1725_v26 = vpop.eup %1724  ;;  %v797_v20 = vmul.f32 %v1723_v13, %v2356_v24 }
 0x205   :  { %v2386_v62 = vpop.permute.xlu1 %923  ;;  %v798_v40 = vmul.f32 %v1725_v26, %v2368_v28  ;;  %v1727_v39 = vpop.eup %1726 }
 0x206   :  { %v910_v52 = vpop.permute.xlu0 %909  ;;  %v2448_v60 = vadd.f32 %v2386_v62, %v803_v30  ;;  %v1729_v1 = vpop.eup %1728  ;;  %v806_v54 = vmul.f32 %v1727_v39, %v2400_v22 }
 0x207   :  { %v2437_v45 = vadd.f32 %v910_v52, %v796_v34  ;;  %v672_v52 = vadd.f32 1.0, %v1717_v4  ;;  %v1731_v24 = vpop.eup %1730  ;;  %v805_v44 = vmul.f32 %v1729_v1, %v2364_v63 }
 0x208   :  { %v1733_v28 = vpop.eup %1732 }
 0x209   :  { %1742 = vrcp.f32 %v672_v52  ;;  %v1735_v33 = vpop.eup %1734 }
 0x20a   :  { %v2398_v46 = vpop.permute.xlu1 %911  ;;  %v926_v48 = vpop.permute.xlu0 %925  ;;  %1744 = vtanh.f32 %v2435_v31 }
 0x20b   :  { %v2450_v14 = vadd.f32 %v926_v48, %v804_v2  ;;  %v679_v48 = vadd.f32 1.0, %v1721_v58  ;;  %v2462_v11 = vadd.f32 %v2398_v46, %v797_v20  ;;  %1746 = vtanh.f32 %v2437_v45  ;;  %v1737_v63 = vpop.eup %1736 }
 0x20c   :  { %v1739_v30 = vpop.eup %1738  ;;  %v673_v2 = vadd.f32 1.0, %v1731_v24 }
 0x20d   :  { %1748 = vrcp.f32 %v679_v48  ;;  %v1741_v58 = vpop.eup %1740 }
 0x20e   :  { %v2404_v32 = vpop.permute.xlu1 %927  ;;  %v914_v61 = vpop.permute.xlu0 %913  ;;  %v799_v26 = vmul.f32 %v1741_v58, %v2358_v55 }
 0x20f   :  { %v2464_v34 = vadd.f32 %v914_v61, %v798_v40  ;;  %v2476_v51 = vadd.f32 %v2404_v32, %v805_v44  ;;  %v682_v61 = vadd.f32 1.0, %v1733_v28  ;;  %v674_v32 = vadd.f32 1.0, %v1735_v33 }
 0x211   :  { %1750 = vrcp.f32 %v682_v61 }
 0x212   :  { %v2414_v49 = vpop.permute.xlu1 %915  ;;  %v930_v37 = vpop.permute.xlu0 %929  ;;  %1752 = vrcp.f32 %v673_v2 }
 0x213   :  { %v2478_v57 = vadd.f32 %v930_v37, %v806_v54  ;;  %v1743_v52 = vpop.eup %1742  ;;  %1754 = vrcp.f32 %v674_v32  ;;  %v2492_v39 = vadd.f32 %v2414_v49, %v799_v26 }
 0x214   :  { %v1745_v13 = vpop.eup %1744  ;;  %v800_v20 = vmul.f32 %v1743_v52, %v2374_v35  ;;  %1756 = vtanh.f32 %v2462_v11  ;;  %v808_v35 = vmul.f32 %v1737_v63, %v2410_v56 }
 0x215   :  { %v1747_v40 = vpop.eup %1746  ;;  %1758 = vtanh.f32 %v2464_v34 }
 0x216   :  { %v2420_v38 = vpop.permute.xlu1 %931  ;;  %v918_v22 = vpop.permute.xlu0 %917 }
 0x217   :  { %v2494_v48 = vadd.f32 %v918_v22, %v800_v20  ;;  %v1749_v37 = vpop.eup %1748 }
 0x218   :  { %v807_v55 = vmul.f32 %v1749_v37, %v2366_v43 }
 0x21a   :  { %v2506_v24 = vadd.f32 %v2420_v38, %v807_v55 }
 0x21b   :  { %v1751_v54 = vpop.eup %1750 }
 0x21c   :  { %v2428_v17 = vpop.permute.xlu1 %919 }
 0x220   :  { %v2430_v50 = vpop.permute.xlu1 %935 }
 0x224   :  { %v2439_v0 = vpop.permute.xlu1 %977 }
 0x225   :  { %v981_v42 = vmul.f32 %v2439_v0, %v2437_v45  ;;  %v980_v9 = vmul.f32 %v2439_v0, %v2435_v31  ;;  %v989_v36 = vmul.f32 %v2439_v0, %v2450_v14  ;;  %v988_v62 = vmul.f32 %v2439_v0, %v2448_v60 }
 0x226   :  { %v983_v4 = vmul.f32 %v2439_v0, %v2464_v34  ;;  %v982_v46 = vmul.f32 %v2439_v0, %v2462_v11  ;;  %v985_v1 = vmul.f32 %v2439_v0, %v2494_v48  ;;  %v984_v49 = vmul.f32 %v2439_v0, %v2492_v39 }
 0x227   :  { %1014 = vrot.lane.b32.xlu1 %v981_v42, %s1853_s5  ;;  %1012 = vrot.lane.b32.xlu0 %v980_v9, %s1853_s5  ;;  %v991_v42 = vmul.f32 %v2439_v0, %v2478_v57  ;;  %v990_v9 = vmul.f32 %v2439_v0, %v2476_v51  ;;  %v992_v56 = vmul.f32 %v2439_v0, %v2506_v24 }
 0x22b   :  { %1030 = vrot.lane.b32.xlu1 %v989_v36, %s1853_s5  ;;  %1028 = vrot.lane.b32.xlu0 %v988_v62, %s1853_s5  ;;  %v681_v36 = vadd.f32 1.0, %v1739_v30  ;;  %v934_v62 = vpop.permute.xlu0 %933  ;;  %v810_v30 = vmul.f32 %v1751_v54, %v2416_v59 }
 0x22c   :  { %v2508_v28 = vadd.f32 %v934_v62, %v808_v35 }
 0x22d   :  { %1760 = vrcp.f32 %v681_v36 }
 0x22e   :  { %v993_v43 = vmul.f32 %v2439_v0, %v2508_v28  ;;  %1762 = vtanh.f32 %v2448_v60 }
 0x22f   :  { %1018 = vrot.lane.b32.xlu1 %v983_v4, %s1853_s5  ;;  %1016 = vrot.lane.b32.xlu0 %v982_v46, %s1853_s5  ;;  %v922_v44 = vpop.permute.xlu0 %921  ;;  %v1753_v4 = vpop.eup %1752  ;;  %1764 = vtanh.f32 %v2450_v14 }
 0x230   :  { %v1755_v38 = vpop.eup %1754  ;;  %v801_v33 = vmul.f32 %v1753_v4, %v2360_v25  ;;  %1766 = vtanh.f32 %v2478_v57 }
 0x231   :  { %v1757_v46 = vpop.eup %1756  ;;  %v802_v63 = vmul.f32 %v1755_v38, %v2382_v12  ;;  %1768 = vtanh.f32 %v2492_v39 }
 0x232   :  { %v1759_v61 = vpop.eup %1758  ;;  %v961_v2 = vadd.f32 %v2428_v17, %v801_v33  ;;  %1770 = vtanh.f32 %v2476_v51 }
 0x233   :  { %1034 = vrot.lane.b32.xlu1 %v991_v42, %s1853_s5  ;;  %1032 = vrot.lane.b32.xlu0 %v990_v9, %s1853_s5  ;;  %v938_v22 = vpop.permute.xlu0 %937  ;;  %v962_v42 = vadd.f32 %v922_v44, %v802_v63  ;;  %1772 = vtanh.f32 %v2506_v24 }
 0x234   :  { %v2527_v58 = vadd.f32 %v938_v22, %v810_v30  ;;  %v986_v59 = vmul.f32 %v2439_v0, %v961_v2  ;;  %1774 = vtanh.f32 %v2494_v48 }
 0x235   :  { %v987_v12 = vmul.f32 %v2439_v0, %v962_v42  ;;  %1776 = vtanh.f32 %v2508_v28 }
 0x236   :  { %1778 = vtanh.f32 %v961_v2 }
 0x237   :  { %1206 = vrot.lane.b32.xlu1 %v1747_v40, %s1853_s5  ;;  %1204 = vrot.lane.b32.xlu0 %v1745_v13, %s1853_s5  ;;  %v1761_v9 = vpop.eup %1760  ;;  %1780 = vtanh.f32 %v962_v42 }
 0x238   :  { %v809_v25 = vmul.f32 %v1761_v9, %v2370_v47  ;;  %v995_v47 = vmul.f32 %v2439_v0, %v2527_v58 }
 0x23a   :  { %v2533_v17 = vadd.f32 %v2430_v50, %v809_v25  ;;  %v1763_v50 = vpop.eup %1762 }
 0x23b   :  { %1022 = vrot.lane.b32.xlu1 %v985_v1, %s1853_s5  ;;  %1020 = vrot.lane.b32.xlu0 %v984_v49, %s1853_s5  ;;  %v1765_v52 = vpop.eup %1764 }
 0x23c   :  { %v994_v32 = vmul.f32 %v2439_v0, %v2533_v17  ;;  %v1767_v13 = vpop.eup %1766  ;;  %1782 = vtanh.f32 %v2533_v17 }
 0x23d   :  { %v1769_v26 = vpop.eup %1768  ;;  %1784 = vtanh.f32 %v2527_v58 }
 0x23e   :  { %v1771_v0 = vpop.eup %1770 }
 0x23f   :  { %1038 = vrot.lane.b32.xlu1 %v993_v43, %s1853_s5  ;;  %1036 = vrot.lane.b32.xlu0 %v992_v56, %s1853_s5  ;;  %v1773_v20 = vpop.eup %1772 }
 0x240   :  { %v1775_v40 = vpop.eup %1774 }
 0x241   :  { %v1777_v36 = vpop.eup %1776 }
 0x243   :  { %1210 = vrot.lane.b32.xlu1 %v1759_v61, %s1853_s5  ;;  %1208 = vrot.lane.b32.xlu0 %v1757_v46, %s1853_s5 }
 0x247   :  { %1026 = vrot.lane.b32.xlu1 %v987_v12, %s1853_s5  ;;  %1024 = vrot.lane.b32.xlu0 %v986_v59, %s1853_s5 }
 0x24b   :  { %1042 = vrot.lane.b32.xlu1 %v995_v47, %s1853_s5  ;;  %1040 = vrot.lane.b32.xlu0 %v994_v32, %s1853_s5 }
 0x24f   :  { %1222 = vrot.lane.b32.xlu1 %v1765_v52, %s1853_s5  ;;  %1220 = vrot.lane.b32.xlu0 %v1763_v50, %s1853_s5 }
 0x253   :  { %1226 = vrot.lane.b32.xlu1 %v1767_v13, %s1853_s5  ;;  %1212 = vrot.lane.b32.xlu0 %v1769_v26, %s1853_s5 }
 0x257   :  { %1350 = vrot.lane.b32.xlu1 %v2437_v45, %s1851_s29  ;;  %1224 = vrot.lane.b32.xlu0 %v1771_v0, %s1853_s5  ;;  %v1779_v45 = vpop.eup %1778 }
 0x258   :  { %v1781_v62 = vpop.eup %1780 }
 0x259   :  { %v1783_v37 = vpop.eup %1782 }
 0x25a   :  { %v1785_v55 = vpop.eup %1784 }
 0x25b   :  { %1214 = vrot.lane.b32.xlu1 %v1775_v40, %s1853_s5  ;;  %1228 = vrot.lane.b32.xlu0 %v1773_v20, %s1853_s5 }
 0x25f   :  { %1230 = vrot.lane.b32.xlu1 %v1777_v36, %s1853_s5  ;;  %1348 = vrot.lane.b32.xlu0 %v2435_v31, %s1851_s29 }
 0x263   :  { %1218 = vrot.lane.b32.xlu1 %v1781_v62, %s1853_s5  ;;  %1216 = vrot.lane.b32.xlu0 %v1779_v45, %s1853_s5 }
 0x267   :  { %1234 = vrot.lane.b32.xlu1 %v1785_v55, %s1853_s5  ;;  %1232 = vrot.lane.b32.xlu0 %v1783_v37, %s1853_s5 }
 0x26b   :  { %1354 = vrot.lane.b32.xlu1 %v2464_v34, %s1851_s29  ;;  %1352 = vrot.lane.b32.xlu0 %v2462_v11, %s1851_s29 }
 0x26f   :  { %1358 = vrot.lane.b32.xlu1 %v2494_v48, %s1851_s29  ;;  %1356 = vrot.lane.b32.xlu0 %v2492_v39, %s1851_s29 }
 0x273   :  { %1362 = vrot.lane.b32.xlu1 %v962_v42, %s1851_s29  ;;  %1360 = vrot.lane.b32.xlu0 %v961_v2, %s1851_s29 }
 0x277   :  { %1366 = vrot.lane.b32.xlu1 %v2450_v14, %s1851_s29  ;;  %1364 = vrot.lane.b32.xlu0 %v2448_v60, %s1851_s29 }
 0x27b   :  { %1370 = vrot.lane.b32.xlu1 %v2478_v57, %s1851_s29  ;;  %1368 = vrot.lane.b32.xlu0 %v2476_v51, %s1851_s29 }
 0x27f   :  { %1374 = vrot.lane.b32.xlu1 %v2508_v28, %s1851_s29  ;;  %1372 = vrot.lane.b32.xlu0 %v2506_v24, %s1851_s29 }
 0x299   :  { %v1015_v31 = vpop.permute.xlu1 %1014  ;;  %v1013_v11 = vpop.permute.xlu0 %1012 }
 0x29a   :  { %v1061_v34 = vadd.f32 %v1015_v31, %v2153_v16  ;;  %v1060_v14 = vadd.f32 %v1013_v11, %v2145_v6 }
 0x29c   :  { %v1508_v39 = vmul.f32 -1.442695, %v1061_v34  ;;  %v1507_v60 = vmul.f32 -1.442695, %v1060_v14 }
 0x29d   :  { %v1031_v48 = vpop.permute.xlu1 %1030  ;;  %v1029_v35 = vpop.permute.xlu0 %1028 }
 0x29e   :  { %1786 = vpow2.f32 %v1508_v39  ;;  %v1069_v57 = vadd.f32 %v1031_v48, %v2157_v19  ;;  %v1068_v51 = vadd.f32 %v1029_v35, %v2148_v7 }
 0x29f   :  { %1788 = vpow2.f32 %v1507_v60 }
 0x2a0   :  { %v1516_v1 = vmul.f32 -1.442695, %v1069_v57  ;;  %v1515_v49 = vmul.f32 -1.442695, %v1068_v51 }
 0x2a1   :  { %v1019_v28 = vpop.permute.xlu1 %1018  ;;  %v1017_v24 = vpop.permute.xlu0 %1016 }
 0x2a2   :  { %1790 = vpow2.f32 %v1516_v1  ;;  %v1063_v44 = vadd.f32 %v1019_v28, %v2172_v41  ;;  %v1062_v16 = vadd.f32 %v1017_v24, %v2160_v27 }
 0x2a3   :  { %1792 = vpow2.f32 %v1515_v49 }
 0x2a4   :  { %v1510_v6 = vmul.f32 -1.442695, %v1063_v44  ;;  %v1509_v43 = vmul.f32 -1.442695, %v1062_v16 }
 0x2a5   :  { %v1035_v56 = vpop.permute.xlu1 %1034  ;;  %v1033_v54 = vpop.permute.xlu0 %1032 }
 0x2a6   :  { %1794 = vpow2.f32 %v1510_v6  ;;  %v1071_v19 = vadd.f32 %v1035_v56, %v2177_v53  ;;  %v1070_v7 = vadd.f32 %v1033_v54, %v2166_v29 }
 0x2a7   :  { %1796 = vpow2.f32 %v1509_v43 }
 0x2a8   :  { %v1787_v4 = vpop.eup %1786  ;;  %v1518_v38 = vmul.f32 -1.442695, %v1071_v19  ;;  %v1517_v27 = vmul.f32 -1.442695, %v1070_v7 }
 0x2a9   :  { %v1789_v46 = vpop.eup %1788  ;;  %v1125_v33 = vadd.f32 1.0, %v1787_v4  ;;  %v1207_v63 = vpop.permute.xlu1 %1206 }
 0x2aa   :  { %v1205_v61 = vpop.permute.xlu0 %1204  ;;  %v1124_v41 = vadd.f32 1.0, %v1789_v46  ;;  %1798 = vpow2.f32 %v1518_v38 }
 0x2ab   :  { %1800 = vrcp.f32 %v1125_v33 }
 0x2ac   :  { %v1791_v22 = vpop.eup %1790  ;;  %1802 = vrcp.f32 %v1124_v41 }
 0x2ad   :  { %v1793_v30 = vpop.eup %1792  ;;  %v1023_v2 = vpop.permute.xlu1 %1022  ;;  %1804 = vpow2.f32 %v1517_v27  ;;  %v1133_v9 = vadd.f32 1.0, %v1791_v22 }
 0x2ae   :  { %v1021_v42 = vpop.permute.xlu0 %1020  ;;  %v1065_v53 = vadd.f32 %v1023_v2, %v2190_v8  ;;  %v1132_v12 = vadd.f32 1.0, %v1793_v30 }
 0x2af   :  { %v1064_v29 = vadd.f32 %v1021_v42, %v2182_v3 }
 0x2b0   :  { %v1795_v25 = vpop.eup %1794  ;;  %v1512_v59 = vmul.f32 -1.442695, %v1065_v53 }
 0x2b1   :  { %v1511_v47 = vmul.f32 -1.442695, %v1064_v29  ;;  %v1039_v32 = vpop.permute.xlu1 %1038  ;;  %v1797_v52 = vpop.eup %1796  ;;  %v1127_v0 = vadd.f32 1.0, %v1795_v25 }
 0x2b2   :  { %v1037_v50 = vpop.permute.xlu0 %1036  ;;  %1806 = vpow2.f32 %v1512_v59  ;;  %v1073_v13 = vadd.f32 %v1039_v32, %v2196_v10  ;;  %v1126_v36 = vadd.f32 1.0, %v1797_v52 }
 0x2b3   :  { %v1072_v26 = vadd.f32 %v1037_v50, %v2185_v5  ;;  %1808 = vrcp.f32 %v1133_v9 }
 0x2b4   :  { %v1799_v20 = vpop.eup %1798  ;;  %1810 = vrcp.f32 %v1132_v12  ;;  %v1520_v8 = vmul.f32 -1.442695, %v1073_v13 }
 0x2b5   :  { %v1519_v40 = vmul.f32 -1.442695, %v1072_v26  ;;  %v1801_v3 = vpop.eup %1800  ;;  %1812 = vpow2.f32 %v1511_v47  ;;  %v1211_v45 = vpop.permute.xlu1 %1210  ;;  %v1135_v5 = vadd.f32 1.0, %v1799_v20 }
 0x2b6   :  { %v1209_v62 = vpop.permute.xlu0 %1208  ;;  %v1803_v37 = vpop.eup %1802  ;;  %v1253_v55 = vmul.f32 %v1801_v3, %v1207_v63  ;;  %1814 = vpow2.f32 %v1520_v8 }
 0x2b7   :  { %1816 = vrcp.f32 %v1127_v0  ;;  %v1252_v31 = vmul.f32 %v1803_v37, %v1205_v61  ;;  %v1805_v11 = vpop.eup %1804 }
 0x2b8   :  { %1818 = vpow2.f32 %v1519_v40  ;;  %1286 = vrot.lane.b32.xlu1 %v1253_v55, %s1854_s19  ;;  %v1134_v60 = vadd.f32 1.0, %v1805_v11 }
 0x2b9   :  { %1820 = vrcp.f32 %v1126_v36  ;;  %1284 = vrot.lane.b32.xlu0 %v1252_v31, %s1854_s19  ;;  %v1027_v10 = vpop.permute.xlu1 %1026 }
 0x2ba   :  { %v1025_v34 = vpop.permute.xlu0 %1024  ;;  %v1067_v14 = vadd.f32 %v1027_v10, %v2209_v21  ;;  %1822 = vrcp.f32 %v1135_v5 }
 0x2bb   :  { %v1066_v39 = vadd.f32 %v1025_v34, %v2201_v15 }
 0x2bc   :  { %v1807_v48 = vpop.eup %1806  ;;  %v1514_v35 = vmul.f32 -1.442695, %v1067_v14 }
 0x2bd   :  { %v1513_v57 = vmul.f32 -1.442695, %v1066_v39  ;;  %v1809_v51 = vpop.eup %1808  ;;  %v1043_v1 = vpop.permute.xlu1 %1042  ;;  %v1129_v6 = vadd.f32 1.0, %v1807_v48 }
 0x2be   :  { %v1041_v49 = vpop.permute.xlu0 %1040  ;;  %v1811_v28 = vpop.eup %1810  ;;  %1824 = vpow2.f32 %v1514_v35  ;;  %v1075_v24 = vadd.f32 %v1043_v1, %v2216_v23 }
 0x2bf   :  { %v1074_v44 = vadd.f32 %v1041_v49, %v2205_v18  ;;  %v1813_v16 = vpop.eup %1812  ;;  %1826 = vrcp.f32 %v1134_v60 }
 0x2c0   :  { %v1815_v21 = vpop.eup %1814  ;;  %v1128_v43 = vadd.f32 1.0, %v1813_v16  ;;  %1828 = vpow2.f32 %v1513_v57  ;;  %v1522_v15 = vmul.f32 -1.442695, %v1075_v24 }
 0x2c1   :  { %v1817_v56 = vpop.eup %1816  ;;  %v1223_v54 = vpop.permute.xlu1 %1222  ;;  %v1521_v4 = vmul.f32 -1.442695, %v1074_v44  ;;  %v1137_v23 = vadd.f32 1.0, %v1815_v21 }
 0x2c2   :  { %v1221_v19 = vpop.permute.xlu0 %1220  ;;  %v1819_v7 = vpop.eup %1818  ;;  %1830 = vrcp.f32 %v1128_v43  ;;  %v1261_v38 = vmul.f32 %v1809_v51, %v1223_v54  ;;  %v1255_v41 = vmul.f32 %v1817_v56, %v1211_v45 }
 0x2c3   :  { %v1260_v46 = vmul.f32 %v1811_v28, %v1221_v19  ;;  %v1821_v33 = vpop.eup %1820  ;;  %1832 = vrcp.f32 %v1129_v6  ;;  %v1136_v63 = vadd.f32 1.0, %v1819_v7 }
 0x2c4   :  { %1834 = vpow2.f32 %v1522_v15  ;;  %1302 = vrot.lane.b32.xlu1 %v1261_v38, %s1854_s19  ;;  %v1254_v27 = vmul.f32 %v1821_v33, %v1209_v62  ;;  %v1823_v22 = vpop.eup %1822 }
 0x2c5   :  { %1300 = vrot.lane.b32.xlu0 %v1260_v46, %s1854_s19  ;;  %1836 = vrcp.f32 %v1136_v63  ;;  %v1227_v18 = vpop.permute.xlu1 %1226 }
 0x2c6   :  { %v1213_v61 = vpop.permute.xlu0 %1212  ;;  %1838 = vpow2.f32 %v1521_v4  ;;  %v1263_v25 = vmul.f32 %v1823_v22, %v1227_v18 }
 0x2c7   :  { %1840 = vrcp.f32 %v1137_v23 }
 0x2c8   :  { %v1825_v30 = vpop.eup %1824  ;;  %1290 = vrot.lane.b32.xlu1 %v1255_v41, %s1854_s19 }
 0x2c9   :  { %1288 = vrot.lane.b32.xlu0 %v1254_v27, %s1854_s19  ;;  %v1827_v2 = vpop.eup %1826  ;;  %v1131_v42 = vadd.f32 1.0, %v1825_v30  ;;  %v2610_v53 = vpop.permute.xlu1 %1350 }
 0x2ca   :  { %v1225_v29 = vpop.permute.xlu0 %1224  ;;  %v1829_v9 = vpop.eup %1828 }
 0x2cb   :  { %v1262_v12 = vmul.f32 %v1827_v2, %v1225_v29  ;;  %1842 = vrcp.f32 %v1131_v42  ;;  %v1130_v59 = vadd.f32 1.0, %v1829_v9 }
 0x2cc   :  { %v1831_v47 = vpop.eup %1830  ;;  %1306 = vrot.lane.b32.xlu1 %v1263_v25, %s1854_s19 }
 0x2cd   :  { %1304 = vrot.lane.b32.xlu0 %v1262_v12, %s1854_s19  ;;  %v1833_v32 = vpop.eup %1832  ;;  %1844 = vrcp.f32 %v1130_v59  ;;  %v1215_v50 = vpop.permute.xlu1 %1214  ;;  %v1256_v26 = vmul.f32 %v1831_v47, %v1213_v61 }
 0x2ce   :  { %v1229_v52 = vpop.permute.xlu0 %1228  ;;  %v1835_v13 = vpop.eup %1834  ;;  %v1257_v0 = vmul.f32 %v1833_v32, %v1215_v50 }
 0x2cf   :  { %v1837_v20 = vpop.eup %1836  ;;  %v1139_v8 = vadd.f32 1.0, %v1835_v13 }
 0x2d0   :  { %v1839_v40 = vpop.eup %1838  ;;  %1294 = vrot.lane.b32.xlu1 %v1257_v0, %s1854_s19  ;;  %v1264_v37 = vmul.f32 %v1837_v20, %v1229_v52 }
 0x2d1   :  { %1292 = vrot.lane.b32.xlu0 %v1256_v26, %s1854_s19  ;;  %v1841_v3 = vpop.eup %1840  ;;  %1846 = vrcp.f32 %v1139_v8  ;;  %v1138_v36 = vadd.f32 1.0, %v1839_v40  ;;  %v1231_v45 = vpop.permute.xlu1 %1230 }
 0x2d2   :  { %v1349_v62 = vpop.permute.xlu0 %1348  ;;  %v1265_v55 = vmul.f32 %v1841_v3, %v1231_v45 }
 0x2d3   :  { %1848 = vrcp.f32 %v1138_v36 }
 0x2d4   :  { %1310 = vrot.lane.b32.xlu1 %v1265_v55, %s1854_s19 }
 0x2d5   :  { %1308 = vrot.lane.b32.xlu0 %v1264_v37, %s1854_s19  ;;  %v1843_v31 = vpop.eup %1842  ;;  %v1219_v11 = vpop.permute.xlu1 %1218 }
 0x2d6   :  { %v1217_v5 = vpop.permute.xlu0 %1216  ;;  %v1259_v10 = vmul.f32 %v1843_v31, %v1219_v11 }
 0x2d7   :  { %v1845_v34 = vpop.eup %1844 }
 0x2d8   :  { %v1258_v14 = vmul.f32 %v1845_v34, %v1217_v5  ;;  %1298 = vrot.lane.b32.xlu1 %v1259_v10, %s1854_s19 }
 0x2d9   :  { %v1235_v39 = vpop.permute.xlu1 %1234 }
 0x2da   :  { %1296 = vrot.lane.b32.xlu0 %v1258_v14, %s1854_s19  ;;  %v1233_v48 = vpop.permute.xlu0 %1232 }
 0x2db   :  { %v1847_v60 = vpop.eup %1846 }
 0x2dc   :  { %v1267_v35 = vmul.f32 %v1847_v60, %v1235_v39 }
 0x2dd   :  { %v1849_v57 = vpop.eup %1848  ;;  %v1355_v1 = vpop.permute.xlu1 %1354 }
 0x2de   :  { %v1266_v51 = vmul.f32 %v1849_v57, %v1233_v48  ;;  %1314 = vrot.lane.b32.xlu1 %v1267_v35, %s1854_s19  ;;  %v1353_v49 = vpop.permute.xlu0 %1352 }
 0x2e0   :  { %1312 = vrot.lane.b32.xlu0 %v1266_v51, %s1854_s19 }
 0x2e1   :  { %v1359_v28 = vpop.permute.xlu1 %1358 }
 0x2e2   :  { %1378 = vrot.lane.b32.xlu1 %v2527_v58, %s1851_s29  ;;  %v1357_v24 = vpop.permute.xlu0 %1356 }
 0x2e4   :  { %1376 = vrot.lane.b32.xlu0 %v2533_v17, %s1851_s29 }
 0x2e5   :  { %v1363_v44 = vpop.permute.xlu1 %1362 }
 0x2e6   :  { %v1361_v16 = vpop.permute.xlu0 %1360 }
 0x2e9   :  { %v1367_v6 = vpop.permute.xlu1 %1366 }
 0x2ea   :  { %v1365_v21 = vpop.permute.xlu0 %1364 }
 0x2ed   :  { %v1371_v43 = vpop.permute.xlu1 %1370 }
 0x2ee   :  { %v1369_v15 = vpop.permute.xlu0 %1368 }
 0x2f1   :  { %v1375_v56 = vpop.permute.xlu1 %1374 }
 0x2f2   :  { %v1373_v54 = vpop.permute.xlu0 %1372 }
 0x32a   :  { %v1287_v19 = vpop.permute.xlu1 %1286 }
 0x32b   :  { %v1398_v58 = vsel %vm1396_vm2, %v1287_v19, %v2610_v53  ;;  %v1285_v7 = vpop.permute.xlu0 %1284 }
 0x32c   :  { %1415 = vst.msk [vmem:[%s2713_s6 + $0x8] sm:$0xff] %vm1413_vm3, %v1398_v58  ;;  %v1397_v17 = vsel %vm1396_vm2, %v1285_v7, %v1349_v62 }
 0x32d   :  { %1414 = vst.msk [vmem:[%s2713_s6] sm:$0xff] %vm1413_vm3, %v1397_v17 }
 0x336   :  { %v1303_v4 = vpop.permute.xlu1 %1302 }
 0x337   :  { %v1301_v38 = vpop.permute.xlu0 %1300  ;;  %v1406_v46 = vsel %vm1396_vm2, %v1303_v4, %v1367_v6 }
 0x338   :  { %v1405_v33 = vsel %vm1396_vm2, %v1301_v38, %v1365_v21  ;;  %1423 = vst.msk [vmem:[%s2713_s6 + $0x48] sm:$0xff] %vm1413_vm3, %v1406_v46 }
 0x339   :  { %1422 = vst.msk [vmem:[%s2713_s6 + $0x40] sm:$0xff] %vm1413_vm3, %v1405_v33 }
 0x33a   :  { %v1291_v23 = vpop.permute.xlu1 %1290 }
 0x33b   :  { %v1289_v63 = vpop.permute.xlu0 %1288  ;;  %v1400_v18 = vsel %vm1396_vm2, %v1291_v23, %v1355_v1 }
 0x33c   :  { %v1399_v61 = vsel %vm1396_vm2, %v1289_v63, %v1353_v49  ;;  %1417 = vst.msk [vmem:[%s2713_s6 + $0x18] sm:$0xff] %vm1413_vm3, %v1400_v18 }
 0x33d   :  { %1416 = vst.msk [vmem:[%s2713_s6 + $0x10] sm:$0xff] %vm1413_vm3, %v1399_v61 }
 0x33e   :  { %v1307_v41 = vpop.permute.xlu1 %1306 }
 0x33f   :  { %v1305_v27 = vpop.permute.xlu0 %1304  ;;  %v1408_v22 = vsel %vm1396_vm2, %v1307_v41, %v1371_v43 }
 0x340   :  { %v1407_v30 = vsel %vm1396_vm2, %v1305_v27, %v1369_v15  ;;  %1425 = vst.msk [vmem:[%s2713_s6 + $0x58] sm:$0xff] %vm1413_vm3, %v1408_v22 }
 0x341   :  { %1424 = vst.msk [vmem:[%s2713_s6 + $0x50] sm:$0xff] %vm1413_vm3, %v1407_v30 }
 0x342   :  { %v1295_v2 = vpop.permute.xlu1 %1294 }
 0x343   :  { %v1293_v42 = vpop.permute.xlu0 %1292  ;;  %v1402_v53 = vsel %vm1396_vm2, %v1295_v2, %v1359_v28 }
 0x344   :  { %v1401_v29 = vsel %vm1396_vm2, %v1293_v42, %v1357_v24  ;;  %1419 = vst.msk [vmem:[%s2713_s6 + $0x28] sm:$0xff] %vm1413_vm3, %v1402_v53 }
 0x345   :  { %1418 = vst.msk [vmem:[%s2713_s6 + $0x20] sm:$0xff] %vm1413_vm3, %v1401_v29 }
 0x346   :  { %v1311_v9 = vpop.permute.xlu1 %1310 }
 0x347   :  { %v1309_v25 = vpop.permute.xlu0 %1308  ;;  %v1410_v12 = vsel %vm1396_vm2, %v1311_v9, %v1375_v56 }
 0x348   :  { %v1409_v59 = vsel %vm1396_vm2, %v1309_v25, %v1373_v54  ;;  %1427 = vst.msk [vmem:[%s2713_s6 + $0x68] sm:$0xff] %vm1413_vm3, %v1410_v12 }
 0x349   :  { %1426 = vst.msk [vmem:[%s2713_s6 + $0x60] sm:$0xff] %vm1413_vm3, %v1409_v59 }
 0x34a   :  { %v1299_v47 = vpop.permute.xlu1 %1298 }
 0x34b   :  { %v1404_v32 = vsel %vm1396_vm2, %v1299_v47, %v1363_v44 }
 0x34c   :  { %1421 = vst.msk [vmem:[%s2713_s6 + $0x38] sm:$0xff] %vm1413_vm3, %v1404_v32  ;;  %v1297_v50 = vpop.permute.xlu0 %1296 }
 0x34d   :  { %v1403_v52 = vsel %vm1396_vm2, %v1297_v50, %v1361_v16 }
 0x34e   :  { %1420 = vst.msk [vmem:[%s2713_s6 + $0x30] sm:$0xff] %vm1413_vm3, %v1403_v52 }
 0x350   :  { %v1315_v13 = vpop.permute.xlu1 %1314 }
 0x352   :  { %v1313_v26 = vpop.permute.xlu0 %1312 }
 0x354   :  { %v1379_v0 = vpop.permute.xlu1 %1378 }
 0x355   :  { %v1412_v20 = vsel %vm1396_vm2, %v1315_v13, %v1379_v0 }
 0x356   :  { %1429 = vst.msk [vmem:[%s2713_s6 + $0x78] sm:$0xff] %vm1413_vm3, %v1412_v20  ;;  %v1377_v8 = vpop.permute.xlu0 %1376 }
 0x357   :  { %v1411_v40 = vsel %vm1396_vm2, %v1313_v26, %v1377_v8 }
 0x358   :  { %1428 = vst.msk [vmem:[%s2713_s6 + $0x70] sm:$0xff] %vm1413_vm3, %v1411_v40 }

// kernel: _lambda_.25
= control target key start
LH: loop header
LB: loop body
LE: loop exit
PB: predicated region body
PF: predicated region fallthrough
CT: control target
= control target key end

     0   :  { %v2223_v0 = vmov 0   ;;  %vm206_vm0 = vcmask 277504   ;;  %s2224_s23 = smov 16   ;;  %s2225_s30 = smov 48   ;;  %vm231_vm1 = vcmask 1040384   ;;  %vm1228_vm2 = vcmask 64512   ;;  %s3220_s3 = inlined_call_operand.vmem [shape: bf16[162,64], index: 3, kind: input, shape index: {}]   ;;  %s3221_s0 = inlined_call_operand.vmem [shape: bf16[128,162], index: 0, kind: input, shape index: {}]   ;;  %s3222_s1 = inlined_call_operand.vmem [shape: f32[128,8], index: 1, kind: input, shape index: {}, may-alias: {1,2}]   ;;  %s3223_s2 = inlined_call_operand.vmem [shape: f32[128,8], index: 2, kind: input, shape index: {}, may-alias: {1,2}]   ;;  %s3224_s4 = inlined_call_operand.vmem [shape: f32[1,64], index: 4, kind: input, shape index: {}]   ;;  %s3225_s5 = inlined_call_operand.vmem [shape: bf16[16,8], index: 5, kind: input, shape index: {}]   ;;  %s3226_s6 = inlined_call_operand.vmem [shape: f32[1,8], index: 6, kind: input, shape index: {}]   ;;  %s3227_s7 = inlined_call_operand.vmem [shape: f32[128,24], index: 7, kind: output, shape index: {}]  }
   0x1   :  { %235 = vmatprep.subr.bf16.mxu0 %v2223_v0  ;;  %1820 = vmatprep.subr.bf16.mxu1 %v2223_v0  ;;  %v1931_v1 = vld [vmem:[%s3220_s3] sm:$0xff]   ;;  %v1932_v2 = vld [vmem:[%s3220_s3 + $0x8] sm:$0xff]   ;;  %v1933_v3 = vld [vmem:[%s3220_s3 + $0x10] sm:$0xff]   ;;  %vm1268_vm3 = vcmask 130048   ;;  %s2230_s11 = smov 24   ;;  %vm1678_vm4 = vcmask 195584  }
   0x2   :  { %236 = vmatpush1.bf16.msra.mxu0 %v1931_v1  ;;  %1831 = vmatpush1.bf16.msra.mxu1 %v1931_v1  ;;  %v1934_v4 = vld [vmem:[%s3220_s3 + $0x18] sm:$0xff]   ;;  %v1944_v5 = vld [vmem:[%s3221_s0 + $0x4] ss:$8 sps:$4 sm:$0xff]   ;;  %v1937_v11 = vld [vmem:[%s3220_s3 + $0x30] sm:$0xff]  }
   0x3   :  { %237 = vmatprep.subr.bf16.mxu0 %v2223_v0  ;;  %1821 = vmatprep.subr.bf16.mxu1 %v2223_v0  ;;  %v1947_v6 = vld [vmem:[%s3221_s0 + $0x64] ss:$8 sps:$4 sm:$0xff]   ;;  %v1938_v14 = vld [vmem:[%s3220_s3 + $0x38] sm:$0xff]   ;;  %v734_v15 = vld [vmem:[%s3222_s1 + $0x10] sm:$0xff] }
   0x4   :  { %1727 = vmatprep.mubr.msk.bf16.mxu0 %vm206_vm0, %v1944_v5  ;;  %v1935_v7 = vld [vmem:[%s3220_s3 + $0x20] sm:$0xff]   ;;  %1733 = vmatprep.mubr.msk.bf16.mxu1 %vm206_vm0, %v1947_v6  ;;  %v1936_v8 = vld [vmem:[%s3220_s3 + $0x28] sm:$0xff]   ;;  %v735_v16 = vld [vmem:[%s3222_s1 + $0x18] sm:$0xff] }
   0x5   :  { %v732_v9 = vld [vmem:[%s3222_s1] sm:$0xff]  ;;  %v733_v10 = vld [vmem:[%s3222_s1 + $0x8] sm:$0xff]  ;;  %v990_v18 = vld [vmem:[%s3223_s2 + $0x10] sm:$0xff] }
   0x6   :  { %238 = vmatpush1.bf16.msra.mxu0 %v1932_v2  ;;  %1832 = vmatpush1.bf16.msra.mxu1 %v1932_v2  ;;  %v988_v12 = vld [vmem:[%s3223_s2] sm:$0xff]  ;;  %v989_v13 = vld [vmem:[%s3223_s2 + $0x8] sm:$0xff]  ;;  %v991_v19 = vld [vmem:[%s3223_s2 + $0x18] sm:$0xff] }
   0x7   :  { %239 = vmatprep.subr.bf16.mxu0 %v2223_v0  ;;  %1822 = vmatprep.subr.bf16.mxu1 %v2223_v0  ;;  %v1939_v17 = vld [vmem:[%s3220_s3 + $0x40] sm:$0xff]   ;;  %v1940_v20 = vld [vmem:[%s3220_s3 + $0x48] sm:$0xff]   ;;  %v1941_v21 = vld [vmem:[%s3220_s3 + $0x50] ss:$0 sps:$4 sm:$0x11]  }
   0x8   :  { %764 = vrot.lane.b32.xlu0 %v732_v9, %s2224_s23  ;;  %766 = vrot.lane.b32.xlu1 %v733_v10, %s2224_s23  ;;  %v736_v22 = vld [vmem:[%s3222_s1 + $0x20] sm:$0xff]  ;;  %v737_v23 = vld [vmem:[%s3222_s1 + $0x28] sm:$0xff]  ;;  %v233_v24 = vsel %vm231_vm1, %v1941_v21, 0 }
   0x9   :  { %v1942_v25 = vld [vmem:[%s3221_s0] ss:$8 sps:$4 sm:$0xff]   ;;  %v1948_v29 = vld [vmem:[%s3221_s0 + $0x14] ss:$8 sps:$4 sm:$0xff]   ;;  %v1950_v33 = vld [vmem:[%s3221_s0 + $0x10] ss:$8 sps:$4 sm:$0xff]  }
   0xa   :  { %240 = vmatpush1.bf16.msra.mxu0 %v1933_v3  ;;  %1833 = vmatpush1.bf16.msra.mxu1 %v1933_v3  ;;  %v1945_v26 = vld [vmem:[%s3221_s0 + $0x60] ss:$8 sps:$4 sm:$0xff]   ;;  %v1951_v30 = vld [vmem:[%s3221_s0 + $0x74] ss:$8 sps:$4 sm:$0xff]   ;;  %v1953_v34 = vld [vmem:[%s3221_s0 + $0x70] ss:$8 sps:$4 sm:$0xff]  }
   0xb   :  { %241 = vmatprep.subr.bf16.mxu0 %v2223_v0  ;;  %1823 = vmatprep.subr.bf16.mxu1 %v2223_v0  ;;  %v992_v27 = vld [vmem:[%s3223_s2 + $0x20] sm:$0xff]  ;;  %v993_v28 = vld [vmem:[%s3223_s2 + $0x28] sm:$0xff]  ;;  %v738_v31 = vld [vmem:[%s3222_s1 + $0x30] sm:$0xff] }
   0xc   :  { %1020 = vrot.lane.b32.xlu0 %v988_v12, %s2225_s30  ;;  %1022 = vrot.lane.b32.xlu1 %v989_v13, %s2225_s30  ;;  %v739_v32 = vld [vmem:[%s3222_s1 + $0x38] sm:$0xff]  ;;  %v1954_v35 = vld [vmem:[%s3221_s0 + $0x24] ss:$8 sps:$4 sm:$0xff]  }
   0xd   :  { %v1956_v36 = vld [vmem:[%s3221_s0 + $0x20] ss:$8 sps:$4 sm:$0xff]   ;;  %v1957_v37 = vld [vmem:[%s3221_s0 + $0x34] ss:$8 sps:$4 sm:$0xff]   ;;  %v1959_v38 = vld [vmem:[%s3221_s0 + $0x30] ss:$8 sps:$4 sm:$0xff]  }
   0xe   :  { %242 = vmatpush1.bf16.msra.mxu0 %v1934_v4  ;;  %1834 = vmatpush1.bf16.msra.mxu1 %v1934_v4  ;;  %v1960_v39 = vld [vmem:[%s3221_s0 + $0x44] ss:$8 sps:$4 sm:$0xff]   ;;  %v1962_v40 = vld [vmem:[%s3221_s0 + $0x40] ss:$8 sps:$4 sm:$0xff]   ;;  %v1963_v41 = vld [vmem:[%s3221_s0 + $0x54] ss:$8 sps:$4 sm:$0xff]  }
   0xf   :  { %243 = vmatprep.subr.bf16.mxu0 %v2223_v0  ;;  %1824 = vmatprep.subr.bf16.mxu1 %v2223_v0  ;;  %v1965_v42 = vld [vmem:[%s3221_s0 + $0x50] ss:$8 sps:$4 sm:$0xff]   ;;  %v2442_v43 = vld [vmem:[%s3224_s4] ss:$0 sm:$0xff]  ;;  %s2226_s0 = smov 120  }
  0x10   :  { %768 = vrot.lane.b32.xlu0 %v734_v15, %s2224_s23  ;;  %770 = vrot.lane.b32.xlu1 %v735_v16, %s2224_s23 }
  0x12   :  { %244 = vmatpush1.bf16.msra.mxu0 %v1935_v7  ;;  %1835 = vmatpush1.bf16.msra.mxu1 %v1935_v7 }
  0x13   :  { %245 = vmatprep.subr.bf16.mxu0 %v2223_v0  ;;  %1825 = vmatprep.subr.bf16.mxu1 %v2223_v0 }
  0x14   :  { %1024 = vrot.lane.b32.xlu0 %v990_v18, %s2225_s30  ;;  %1026 = vrot.lane.b32.xlu1 %v991_v19, %s2225_s30 }
  0x16   :  { %246 = vmatpush1.bf16.msra.mxu0 %v1936_v8  ;;  %1836 = vmatpush1.bf16.msra.mxu1 %v1936_v8 }
  0x17   :  { %247 = vmatprep.subr.bf16.mxu0 %v2223_v0  ;;  %1826 = vmatprep.subr.bf16.mxu1 %v2223_v0 }
  0x18   :  { %772 = vrot.lane.b32.xlu0 %v736_v22, %s2224_s23  ;;  %774 = vrot.lane.b32.xlu1 %v737_v23, %s2224_s23 }
  0x1a   :  { %248 = vmatpush1.bf16.msra.mxu0 %v1937_v11  ;;  %1837 = vmatpush1.bf16.msra.mxu1 %v1937_v11 }
  0x1b   :  { %249 = vmatprep.subr.bf16.mxu0 %v2223_v0  ;;  %1827 = vmatprep.subr.bf16.mxu1 %v2223_v0 }
  0x1c   :  { %1028 = vrot.lane.b32.xlu0 %v992_v27, %s2225_s30  ;;  %1030 = vrot.lane.b32.xlu1 %v993_v28, %s2225_s30 }
  0x1e   :  { %250 = vmatpush1.bf16.msra.mxu0 %v1938_v14  ;;  %1838 = vmatpush1.bf16.msra.mxu1 %v1938_v14 }
  0x1f   :  { %251 = vmatprep.subr.bf16.mxu0 %v2223_v0  ;;  %1828 = vmatprep.subr.bf16.mxu1 %v2223_v0 }
  0x20   :  { %776 = vrot.lane.b32.xlu0 %v738_v31, %s2224_s23  ;;  %778 = vrot.lane.b32.xlu1 %v739_v32, %s2224_s23 }
  0x22   :  { %252 = vmatpush1.bf16.msra.mxu0 %v1939_v17  ;;  %1839 = vmatpush1.bf16.msra.mxu1 %v1939_v17 }
  0x23   :  { %253 = vmatprep.subr.bf16.mxu0 %v2223_v0  ;;  %1829 = vmatprep.subr.bf16.mxu1 %v2223_v0 }
  0x26   :  { %254 = vmatpush1.bf16.msra.mxu0 %v1940_v20  ;;  %1840 = vmatpush1.bf16.msra.mxu1 %v1940_v20 }
  0x27   :  { %255 = vmatprep.subr.bf16.mxu0 %v2223_v0  ;;  %1830 = vmatprep.subr.bf16.mxu1 %v2223_v0 }
  0x2a   :  { %256 = vmatpush1.bf16.msra.mxu0 %v233_v24  ;;  %1841 = vmatpush1.bf16.msra.mxu1 %v233_v24 }
  0x2d   :  { %268 = vmatmul.mubr.bf16.vlgmr.msra.gmra.mrb[0].mxu0 %v1942_v25  ;;  %316 = vmatmul.mubr.bf16.vlgmr.msra.gmra.mrb[0].mxu1 %v1945_v26 }
  0x2e   :  { %1728 = vmatprep.mubr.msk.bf16.mxu0 %vm206_vm0, %v1948_v29  ;;  %1734 = vmatprep.mubr.msk.bf16.mxu1 %vm206_vm0, %v1951_v30 }
  0x35   :  { %276 = vmatmul.mubr.bf16.gmra.mrb[4].mxu0 %v1950_v33  ;;  %324 = vmatmul.mubr.bf16.gmra.mrb[4].mxu1 %v1953_v34 }
  0x36   :  { %1729 = vmatprep.mubr.msk.bf16.mxu0 %vm206_vm0, %v1954_v35 }
  0x3d   :  { %284 = vmatmul.mubr.bf16.gmra.mrb[8].mxu0 %v1956_v36 }
  0x3e   :  { %1730 = vmatprep.mubr.msk.bf16.mxu0 %vm206_vm0, %v1957_v37 }
  0x45   :  { %292 = vmatmul.mubr.bf16.gmra.mrb[12].mxu0 %v1959_v38 }
  0x46   :  { %1731 = vmatprep.mubr.msk.bf16.mxu0 %vm206_vm0, %v1960_v39 }
  0x4d   :  { %300 = vmatmul.mubr.bf16.gmra.mrb[16].mxu0 %v1962_v40 }
  0x4e   :  { %1732 = vmatprep.mubr.msk.bf16.mxu0 %vm206_vm0, %v1963_v41 }
  0x55   :  { %308 = vmatmul.mubr.bf16.gmra.mrb[20].mxu0 %v1965_v42 }
 0x100   :  { %v269_v44 = vpop.f32.mrb[0].mxu0  ;;  %v317_v45 = vpop.f32.mrb[0].mxu1 }
 0x101   :  { %v2445_v46 = vadd.f32 %v2442_v43, %v269_v44  ;;  %v2448_v47 = vadd.f32 %v2442_v43, %v317_v45  ;;  %v271_v48 = vpop.f32.mrb[1].mxu0  ;;  %v319_v49 = vpop.f32.mrb[1].mxu1  ;;  %v994_v44 = vld [vmem:[%s3223_s2 + $0x30] sm:$0xff] }
 0x102   :  { %v272_v50 = vpop.f32.mrb[2].mxu0  ;;  %v320_v51 = vpop.f32.mrb[2].mxu1  ;;  %v740_v48 = vld [vmem:[%s3222_s1 + $0x40] sm:$0xff]  ;;  %v741_v49 = vld [vmem:[%s3222_s1 + $0x48] sm:$0xff] }
 0x103   :  { %3238 = vst [vmem:[#allocation2_spill] sm:$0xff] %v2448_v47  ;;  %1967 = vtanh.f32 %v2445_v46  ;;  %v274_v52 = vpop.f32.mrb[3].mxu0  ;;  %v322_v53 = vpop.f32.mrb[3].mxu1  ;;  %v2453_v54 = vadd.f32 %v2442_v43, %v272_v50  ;;  %v2456_v57 = vadd.f32 %v2442_v43, %v320_v51  ;;  %v996_v50 = vld [vmem:[%s3223_s2 + $0x40] sm:$0xff]  ;;  %v997_v51 = vld [vmem:[%s3223_s2 + $0x48] sm:$0xff] }
 0x104   :  { %1969 = vtanh.f32 %v2448_v47  ;;  %v742_v52 = vld [vmem:[%s3222_s1 + $0x50] sm:$0xff]  ;;  %v743_v53 = vld [vmem:[%s3222_s1 + $0x58] sm:$0xff] }
 0x105   :  { %1971 = vtanh.f32 %v2453_v54 }
 0x106   :  { %1973 = vtanh.f32 %v2456_v57 }
 0x108   :  { %v277_v55 = vpop.f32.mrb[4].mxu0  ;;  %v325_v56 = vpop.f32.mrb[4].mxu1 }
 0x109   :  { %v279_v58 = vpop.f32.mrb[5].mxu0  ;;  %v327_v59 = vpop.f32.mrb[5].mxu1  ;;  %v2460_v0 = vadd.f32 %v2442_v43, %v277_v55  ;;  %v2469_v6 = vadd.f32 %v2442_v43, %v325_v56  ;;  %v998_v55 = vld [vmem:[%s3223_s2 + $0x50] sm:$0xff]  ;;  %v999_v56 = vld [vmem:[%s3223_s2 + $0x58] sm:$0xff] }
 0x10a   :  { %v280_v60 = vpop.f32.mrb[6].mxu0  ;;  %v328_v61 = vpop.f32.mrb[6].mxu1  ;;  %v744_v58 = vld [vmem:[%s3222_s1 + $0x60] sm:$0xff]  ;;  %v745_v59 = vld [vmem:[%s3222_s1 + $0x68] sm:$0xff] }
 0x10b   :  { %v282_v62 = vpop.f32.mrb[7].mxu0  ;;  %v330_v63 = vpop.f32.mrb[7].mxu1  ;;  %1975 = vtanh.f32 %v2460_v0  ;;  %v2466_v4 = vadd.f32 %v2442_v43, %v280_v60  ;;  %v2474_v10 = vadd.f32 %v2442_v43, %v328_v61  ;;  %v1000_v60 = vld [vmem:[%s3223_s2 + $0x60] sm:$0xff] }
 0x10c   :  { %v2576_v61 = vpop.permute.xlu0 %764  ;;  %v1001_v62 = vld [vmem:[%s3223_s2 + $0x68] sm:$0xff]  ;;  %v746_v63 = vld [vmem:[%s3222_s1 + $0x70] sm:$0xff] }
 0x10d   :  { %v1968_v1 = vpop.eup %1967  ;;  %1977 = vtanh.f32 %v2466_v4 }
 0x10e   :  { %844 = vrot.lane.b32.xlu0 %v1968_v1, %s2226_s0  ;;  %v1970_v2 = vpop.eup %1969  ;;  %1979 = vtanh.f32 %v2469_v6  ;;  %v747_v1 = vld [vmem:[%s3222_s1 + $0x78] sm:$0xff]  ;;  %s2227_s1 = smov 112  }
 0x10f   :  { %v1972_v9 = vpop.eup %1971  ;;  %1981 = vtanh.f32 %v2474_v10 }
 0x110   :  { %v285_v3 = vpop.f32.mrb[8].mxu0  ;;  %v1974_v11 = vpop.eup %1973 }
 0x111   :  { %v287_v5 = vpop.f32.mrb[9].mxu0  ;;  %870 = vrot.lane.b32.xlu1 %v1974_v11, %s2226_s0  ;;  %v2480_v12 = vadd.f32 %v2442_v43, %v285_v3  ;;  %v2592_v3 = vpop.permute.xlu0 %1020  ;;  %v1736_v11 = vmul.f32 -1.442695, %v2453_v54 }
 0x112   :  { %v288_v7 = vpop.f32.mrb[10].mxu0  ;;  %868 = vrot.lane.b32.xlu0 %v1970_v2, %s2226_s0  ;;  %v1002_v2 = vld [vmem:[%s3223_s2 + $0x70] sm:$0xff]  ;;  %v1735_v5 = vmul.f32 -1.442695, %v2445_v46 }
 0x113   :  { %v290_v8 = vpop.f32.mrb[11].mxu0  ;;  %v2484_v17 = vadd.f32 %v2442_v43, %v288_v7  ;;  %1983 = vtanh.f32 %v2480_v12  ;;  %v1003_v7 = vld [vmem:[%s3223_s2 + $0x78] sm:$0xff] }
 0x114   :  { %v2600_v8 = vpop.permute.xlu1 %766 }
 0x115   :  { %v1976_v15 = vpop.eup %1975  ;;  %1985 = vtanh.f32 %v2484_v17 }
 0x116   :  { %846 = vrot.lane.b32.xlu0 %v1972_v9, %s2226_s0  ;;  %848 = vrot.lane.b32.xlu1 %v1976_v15, %s2226_s0  ;;  %v2603_v9 = vpop.permute.xlu0 %768 }
 0x117   :  { %v1978_v20 = vpop.eup %1977 }
 0x118   :  { %v293_v13 = vpop.f32.mrb[12].mxu0  ;;  %v1980_v21 = vpop.eup %1979 }
 0x119   :  { %v295_v14 = vpop.f32.mrb[13].mxu0  ;;  %v2489_v19 = vadd.f32 %v2442_v43, %v293_v13  ;;  %v1982_v26 = vpop.eup %1981 }
 0x11a   :  { %v296_v16 = vpop.f32.mrb[14].mxu0  ;;  %850 = vrot.lane.b32.xlu1 %v1978_v20, %s2226_s0  ;;  %872 = vrot.lane.b32.xlu0 %v1980_v21, %s2226_s0  ;;  %v2606_v13 = vpop.permute.xlu1 %1022 }
 0x11b   :  { %v298_v18 = vpop.f32.mrb[15].mxu0  ;;  %3239 = vst [vmem:[#allocation3_spill] sm:$0xff] %v2489_v19  ;;  %1987 = vtanh.f32 %v2489_v19  ;;  %v2496_v24 = vadd.f32 %v2442_v43, %v296_v16  ;;  %v2608_v14 = vpop.permute.xlu0 %1024  ;;  %v1737_v16 = vmul.f32 -1.442695, %v2460_v0 }
 0x11d   :  { %3240 = vst [vmem:[#allocation4_spill] sm:$0xff] %v2496_v24  ;;  %v1984_v28 = vpop.eup %1983  ;;  %1989 = vtanh.f32 %v2496_v24 }
 0x11e   :  { %874 = vrot.lane.b32.xlu1 %v1982_v26, %s2226_s0  ;;  %852 = vrot.lane.b32.xlu0 %v1984_v28, %s2226_s0  ;;  %v2611_v18 = vpop.permute.xlu1 %770 }
 0x11f   :  { %v1986_v31 = vpop.eup %1985  ;;  %v2613_v20 = vpop.permute.xlu0 %772 }
 0x120   :  { %v301_v22 = vpop.f32.mrb[16].mxu0 }
 0x121   :  { %v303_v23 = vpop.f32.mrb[17].mxu0  ;;  %v2501_v29 = vadd.f32 %v2442_v43, %v301_v22  ;;  %v1738_v22 = vmul.f32 -1.442695, %v2466_v4 }
 0x122   :  { %v304_v25 = vpop.f32.mrb[18].mxu0  ;;  %854 = vrot.lane.b32.xlu1 %v1986_v31, %s2226_s0  ;;  %v2616_v23 = vpop.permute.xlu1 %1026 }
 0x123   :  { %v306_v27 = vpop.f32.mrb[19].mxu0  ;;  %3241 = vst [vmem:[#allocation5_spill] sm:$0xff] %v2501_v29  ;;  %1991 = vtanh.f32 %v2501_v29  ;;  %v2506_v33 = vadd.f32 %v2442_v43, %v304_v25  ;;  %v2618_v26 = vpop.permute.xlu0 %1028 }
 0x124   :  { %v1739_v27 = vmul.f32 -1.442695, %v2480_v12 }
 0x125   :  { %3242 = vst [vmem:[#allocation6_spill] sm:$0xff] %v2506_v33  ;;  %v1988_v36 = vpop.eup %1987  ;;  %1993 = vtanh.f32 %v2506_v33 }
 0x126   :  { %856 = vrot.lane.b32.xlu0 %v1988_v36, %s2226_s0 }
 0x127   :  { %v1990_v38 = vpop.eup %1989  ;;  %v2623_v31 = vpop.permute.xlu0 %776 }
 0x128   :  { %v309_v30 = vpop.f32.mrb[20].mxu0  ;;  %858 = vrot.lane.b32.xlu1 %v1990_v38, %s2226_s0 }
 0x129   :  { %v311_v32 = vpop.f32.mrb[21].mxu0  ;;  %v2512_v37 = vadd.f32 %v2442_v43, %v309_v30  ;;  %v2621_v30 = vpop.permute.xlu1 %774 }
 0x12a   :  { %v312_v34 = vpop.f32.mrb[22].mxu0 }
 0x12b   :  { %v314_v35 = vpop.f32.mrb[23].mxu0  ;;  %1995 = vtanh.f32 %v2512_v37  ;;  %v2517_v39 = vadd.f32 %v2442_v43, %v312_v34  ;;  %v995_v43 = vld [vmem:[%s3223_s2 + $0x38] sm:$0xff]  ;;  %v1740_v34 = vmul.f32 -1.442695, %v2484_v17  ;;  %s2228_s2 = smov 88  }
 0x12c   :  { %v1741_v35 = vmul.f32 -1.442695, %v2489_v19 }
 0x12d   :  { %v1992_v40 = vpop.eup %1991  ;;  %1997 = vtanh.f32 %v2517_v39 }
 0x12e   :  { %860 = vrot.lane.b32.xlu0 %v1992_v40, %s2226_s0  ;;  %1999 = vpow2.f32 %v1735_v5 }
 0x12f   :  { %v1994_v41 = vpop.eup %1993  ;;  %2001 = vpow2.f32 %v1736_v11 }
 0x130   :  { %862 = vrot.lane.b32.xlu1 %v1994_v41, %s2226_s0  ;;  %2003 = vpow2.f32 %v1737_v16 }
 0x135   :  { %v1996_v42 = vpop.eup %1995 }
 0x136   :  { %864 = vrot.lane.b32.xlu0 %v1996_v42, %s2226_s0 }
 0x137   :  { %v1998_v45 = vpop.eup %1997 }
 0x138   :  { %866 = vrot.lane.b32.xlu1 %v1998_v45, %s2226_s0  ;;  %v2000_v15 = vpop.eup %1999  ;;  %v1742_v45 = vmul.f32 -1.442695, %v2496_v24 }
 0x139   :  { %v380_v21 = vadd.f32 1.0, %v2000_v15  ;;  %v2002_v25 = vpop.eup %2001 }
 0x13a   :  { %1032 = vrot.lane.b32.xlu0 %v994_v44, %s2225_s30  ;;  %v381_v28 = vadd.f32 1.0, %v2002_v25  ;;  %v2004_v32 = vpop.eup %2003  ;;  %v2627_v44 = vpop.permute.xlu1 %1030 }
 0x13b   :  { %2005 = vrcp.f32 %v380_v21  ;;  %v382_v40 = vadd.f32 1.0, %v2004_v32 }
 0x13c   :  { %1034 = vrot.lane.b32.xlu1 %v995_v43, %s2225_s30  ;;  %2007 = vpow2.f32 %v1738_v22  ;;  %v1747_v22 = vmul.f32 -1.442695, %v2448_v47 }
 0x13d   :  { %2009 = vpow2.f32 %v1739_v27 }
 0x13e   :  { %780 = vrot.lane.b32.xlu0 %v740_v48, %s2224_s23  ;;  %2011 = vrcp.f32 %v381_v28  ;;  %v1746_v28 = vmul.f32 -1.442695, %v2517_v39 }
 0x13f   :  { %2013 = vpow2.f32 %v1740_v34 }
 0x140   :  { %782 = vrot.lane.b32.xlu1 %v741_v49, %s2224_s23  ;;  %2015 = vpow2.f32 %v1741_v35  ;;  %v2633_v49 = vpop.permute.xlu1 %778 }
 0x141   :  { %2017 = vrcp.f32 %v382_v40 }
 0x142   :  { %1036 = vrot.lane.b32.xlu0 %v996_v50, %s2225_s30  ;;  %2019 = vpow2.f32 %v1742_v45 }
 0x144   :  { %1038 = vrot.lane.b32.xlu1 %v997_v51, %s2225_s30 }
 0x145   :  { %v2006_v36 = vpop.eup %2005 }
 0x146   :  { %784 = vrot.lane.b32.xlu0 %v742_v52, %s2224_s23  ;;  %v2008_v41 = vpop.eup %2007  ;;  %v1743_v52 = vmul.f32 -1.442695, %v2501_v29 }
 0x147   :  { %v383_v48 = vadd.f32 1.0, %v2008_v41  ;;  %v2010_v50 = vpop.eup %2009 }
 0x148   :  { %786 = vrot.lane.b32.xlu1 %v743_v53, %s2224_s23  ;;  %v2012_v51 = vpop.eup %2011 }
 0x149   :  { %2021 = vrcp.f32 %v383_v48 }
 0x14a   :  { %1040 = vrot.lane.b32.xlu0 %v998_v55, %s2225_s30  ;;  %2023 = vpow2.f32 %v1743_v52 }
 0x14c   :  { %1042 = vrot.lane.b32.xlu1 %v999_v56, %s2225_s30 }
 0x14e   :  { %788 = vrot.lane.b32.xlu0 %v744_v58, %s2224_s23  ;;  %v2014_v58 = vpop.eup %2013 }
 0x150   :  { %790 = vrot.lane.b32.xlu1 %v745_v59, %s2224_s23  ;;  %v384_v59 = vadd.f32 1.0, %v2010_v50 }
 0x152   :  { %1044 = vrot.lane.b32.xlu0 %v1000_v60, %s2225_s30  ;;  %v1744_v60 = vmul.f32 -1.442695, %v2506_v33  ;;  %2025 = vrcp.f32 %v384_v59 }
 0x154   :  { %1046 = vrot.lane.b32.xlu1 %v1001_v62, %s2225_s30  ;;  %v2016_v62 = vpop.eup %2015  ;;  %2027 = vpow2.f32 %v1744_v60 }
 0x155   :  { %v386_v15 = vadd.f32 1.0, %v2016_v62 }
 0x156   :  { %792 = vrot.lane.b32.xlu0 %v746_v63, %s2224_s23  ;;  %v2018_v63 = vpop.eup %2017 }
 0x157   :  { %v2020_v11 = vpop.eup %2019 }
 0x158   :  { %794 = vrot.lane.b32.xlu1 %v747_v1, %s2224_s23  ;;  %v2022_v16 = vpop.eup %2021  ;;  %v387_v32 = vadd.f32 1.0, %v2020_v11 }
 0x159   :  { %v2024_v34 = vpop.eup %2023 }
 0x15a   :  { %1048 = vrot.lane.b32.xlu0 %v1002_v2, %s2225_s30  ;;  %v385_v2 = vadd.f32 1.0, %v2014_v58 }
 0x15c   :  { %1050 = vrot.lane.b32.xlu1 %v1003_v7, %s2225_s30  ;;  %v1745_v7 = vmul.f32 -1.442695, %v2512_v37  ;;  %2029 = vrcp.f32 %v385_v2  ;;  %v2026_v40 = vpop.eup %2025 }
 0x15e   :  { %2031 = vpow2.f32 %v1745_v7  ;;  %v2028_v45 = vpop.eup %2027 }
 0x15f   :  { %2033 = vrcp.f32 %v386_v15 }
 0x160   :  { %2035 = vpow2.f32 %v1747_v22 }
 0x161   :  { %2037 = vpow2.f32 %v1746_v28 }
 0x162   :  { %2039 = vrcp.f32 %v387_v32 }
 0x166   :  { %v2030_v50 = vpop.eup %2029 }
 0x168   :  { %v2032_v58 = vpop.eup %2031 }
 0x169   :  { %v2034_v59 = vpop.eup %2033 }
 0x180   :  { %v845_v38 = vpop.permute.xlu0 %844 }
 0x181   :  { %v892_v42 = vmul.f32 %v2006_v36, %v845_v38  ;;  %v1748_v36 = vmul.f32 -1.442695, %v2456_v57  ;;  %v1749_v38 = vmul.f32 -1.442695, %v2469_v6 }
 0x183   :  { %924 = vrot.lane.b32.xlu0 %v892_v42, %s2224_s23  ;;  %v2636_v56 = vpop.permute.xlu1 %870  ;;  %v388_v42 = vadd.f32 1.0, %v2024_v34  ;;  %2041 = vpow2.f32 %v1748_v36 }
 0x184   :  { %v2631_v43 = vpop.permute.xlu0 %868  ;;  %2043 = vpow2.f32 %v1749_v38 }
 0x185   :  { %2045 = vrcp.f32 %v388_v42 }
 0x188   :  { %v847_v53 = vpop.permute.xlu0 %846  ;;  %v849_v1 = vpop.permute.xlu1 %848 }
 0x189   :  { %v893_v55 = vmul.f32 %v2012_v51, %v847_v53  ;;  %v894_v5 = vmul.f32 %v2018_v63, %v849_v1  ;;  %v1750_v51 = vmul.f32 -1.442695, %v2474_v10  ;;  %v2036_v63 = vpop.eup %2035  ;;  %v390_v1 = vadd.f32 1.0, %v2032_v58 }
 0x18a   :  { %v2038_v2 = vpop.eup %2037  ;;  %v392_v11 = vadd.f32 1.0, %v2036_v63 }
 0x18b   :  { %926 = vrot.lane.b32.xlu1 %v893_v55, %s2224_s23  ;;  %928 = vrot.lane.b32.xlu0 %v894_v5, %s2224_s23  ;;  %v389_v55 = vadd.f32 1.0, %v2028_v45  ;;  %2047 = vpow2.f32 %v1750_v51  ;;  %v2040_v5 = vpop.eup %2039 }
 0x18c   :  { %v851_v21 = vpop.permute.xlu1 %850  ;;  %v2643_v27 = vpop.permute.xlu0 %872 }
 0x18d   :  { %v895_v25 = vmul.f32 %v2022_v16, %v851_v21  ;;  %2049 = vrcp.f32 %v389_v55  ;;  %v2042_v16 = vpop.eup %2041  ;;  %v391_v21 = vadd.f32 1.0, %v2038_v2 }
 0x18e   :  { %2051 = vrcp.f32 %v390_v1  ;;  %v2044_v22 = vpop.eup %2043  ;;  %v393_v32 = vadd.f32 1.0, %v2042_v16 }
 0x18f   :  { %930 = vrot.lane.b32.xlu1 %v895_v25, %s2224_s23  ;;  %v2046_v25 = vpop.eup %2045  ;;  %2053 = vrcp.f32 %v392_v11  ;;  %v394_v36 = vadd.f32 1.0, %v2044_v22 }
 0x190   :  { %v2647_v35 = vpop.permute.xlu1 %874  ;;  %v853_v41 = vpop.permute.xlu0 %852  ;;  %2055 = vrcp.f32 %v391_v21  ;;  %v445_v21 = vadd.f32 0.01, %v2453_v54 }
 0x191   :  { %v896_v48 = vmul.f32 %v2026_v40, %v853_v41  ;;  %2057 = vrcp.f32 %v393_v32  ;;  %v446_v32 = vadd.f32 0.01, %v2460_v0 }
 0x192   :  { %2059 = vrcp.f32 %v394_v36  ;;  %v447_v36 = vadd.f32 0.01, %v2466_v4 }
 0x193   :  { %932 = vrot.lane.b32.xlu0 %v896_v48, %s2224_s23 }
 0x194   :  { %v855_v52 = vpop.permute.xlu1 %854 }
 0x195   :  { %v897_v53 = vmul.f32 %v2030_v50, %v855_v52  ;;  %v2048_v38 = vpop.eup %2047 }
 0x196   :  { %v395_v45 = vadd.f32 1.0, %v2048_v38 }
 0x197   :  { %934 = vrot.lane.b32.xlu1 %v897_v53, %s2224_s23  ;;  %v2050_v40 = vpop.eup %2049 }
 0x198   :  { %v857_v60 = vpop.permute.xlu0 %856  ;;  %v2052_v48 = vpop.eup %2051  ;;  %2061 = vrcp.f32 %v395_v45 }
 0x199   :  { %v898_v62 = vmul.f32 %v2034_v59, %v857_v60  ;;  %v2054_v52 = vpop.eup %2053 }
 0x19a   :  { %v859_v7 = vpop.permute.xlu1 %858  ;;  %v2056_v53 = vpop.eup %2055  ;;  %v904_v58 = vmul.f32 %v2054_v52, %v2631_v43  ;;  %v449_v52 = vadd.f32 0.01, %v2484_v17 }
 0x19b   :  { %936 = vrot.lane.b32.xlu0 %v898_v62, %s2224_s23  ;;  %v899_v15 = vmul.f32 %v2040_v5, %v859_v7  ;;  %v2058_v60 = vpop.eup %2057 }
 0x19c   :  { %v2060_v62 = vpop.eup %2059  ;;  %v905_v63 = vmul.f32 %v2058_v60, %v2636_v56 }
 0x19d   :  { %938 = vrot.lane.b32.xlu1 %v899_v15, %s2224_s23  ;;  %v906_v1 = vmul.f32 %v2060_v62, %v2643_v27  ;;  %v444_v27 = vadd.f32 0.01, %v2445_v46  ;;  %v1756_v62 = vmul.f32 -1.442695, %v449_v52 }
 0x19f   :  { %v1751_v22 = vmul.f32 -1.442695, %v444_v27 }
 0x1a0   :  { %v861_v28 = vpop.permute.xlu0 %860 }
 0x1a1   :  { %v900_v34 = vmul.f32 %v2046_v25, %v861_v28  ;;  %v1752_v25 = vmul.f32 -1.442695, %v445_v21  ;;  %2063 = vpow2.f32 %v1751_v22 }
 0x1a2   :  { %v863_v41 = vpop.permute.xlu1 %862  ;;  %v2062_v2 = vpop.eup %2061 }
 0x1a3   :  { %940 = vrot.lane.b32.xlu0 %v900_v34, %s2224_s23  ;;  %v901_v42 = vmul.f32 %v2050_v40, %v863_v41  ;;  %v907_v5 = vmul.f32 %v2062_v2, %v2647_v35  ;;  %2065 = vpow2.f32 %v1752_v25  ;;  %v1753_v40 = vmul.f32 -1.442695, %v446_v32 }
 0x1a4   :  { %v1754_v41 = vmul.f32 -1.442695, %v447_v36 }
 0x1a5   :  { %942 = vrot.lane.b32.xlu1 %v901_v42, %s2224_s23  ;;  %2067 = vpow2.f32 %v1753_v40  ;;  %v452_v40 = vadd.f32 0.01, %v2501_v29 }
 0x1a6   :  { %2069 = vpow2.f32 %v1754_v41 }
 0x1a8   :  { %v865_v50 = vpop.permute.xlu0 %864 }
 0x1a9   :  { %v902_v51 = vmul.f32 %v2052_v48, %v865_v50 }
 0x1aa   :  { %v867_v55 = vpop.permute.xlu1 %866 }
 0x1ab   :  { %944 = vrot.lane.b32.xlu0 %v902_v51, %s2224_s23  ;;  %v903_v59 = vmul.f32 %v2056_v53, %v867_v55  ;;  %v2064_v45 = vpop.eup %2063  ;;  %v448_v51 = vadd.f32 0.01, %v2480_v12 }
 0x1ac   :  { %v2668_v43 = vpop.permute.xlu0 %1032  ;;  %v508_v53 = vadd.f32 1.0, %v2064_v45 }
 0x1ad   :  { %946 = vrot.lane.b32.xlu1 %v903_v59, %s2224_s23  ;;  %v2066_v50 = vpop.eup %2065  ;;  %v1755_v59 = vmul.f32 -1.442695, %v448_v51  ;;  %v453_v51 = vadd.f32 0.01, %v2506_v33 }
 0x1ae   :  { %v2670_v7 = vpop.permute.xlu1 %1034  ;;  %v509_v55 = vadd.f32 1.0, %v2066_v50  ;;  %2071 = vrcp.f32 %v508_v53 }
 0x1af   :  { %948 = vrot.lane.b32.xlu0 %v904_v58, %s2224_s23  ;;  %v2068_v2 = vpop.eup %2067 }
 0x1b0   :  { %v2672_v11 = vpop.permute.xlu0 %780  ;;  %2073 = vrcp.f32 %v509_v55  ;;  %v2070_v27 = vpop.eup %2069  ;;  %v510_v32 = vadd.f32 1.0, %v2068_v2  ;;  %v456_v55 = vadd.f32 0.01, %v2448_v47 }
 0x1b1   :  { %950 = vrot.lane.b32.xlu1 %v905_v63, %s2224_s23  ;;  %v450_v63 = vadd.f32 0.01, %v2489_v19  ;;  %2075 = vpow2.f32 %v1755_v59  ;;  %v511_v36 = vadd.f32 1.0, %v2070_v27  ;;  %v1759_v59 = vmul.f32 -1.442695, %v452_v40 }
 0x1b2   :  { %v2674_v15 = vpop.permute.xlu1 %782  ;;  %2077 = vpow2.f32 %v1756_v62 }
 0x1b3   :  { %952 = vrot.lane.b32.xlu0 %v906_v1, %s2224_s23  ;;  %v451_v1 = vadd.f32 0.01, %v2496_v24  ;;  %v1757_v21 = vmul.f32 -1.442695, %v450_v63 }
 0x1b4   :  { %v2676_v56 = vpop.permute.xlu0 %1036 }
 0x1b5   :  { %954 = vrot.lane.b32.xlu1 %v907_v5, %s2224_s23  ;;  %v1758_v22 = vmul.f32 -1.442695, %v451_v1  ;;  %2079 = vpow2.f32 %v1757_v21 }
 0x1b6   :  { %v2679_v16 = vpop.permute.xlu1 %1038 }
 0x1b7   :  { %2081 = vpow2.f32 %v1758_v22  ;;  %v1760_v22 = vmul.f32 -1.442695, %v453_v51 }
 0x1b8   :  { %v2682_v35 = vpop.permute.xlu0 %784  ;;  %v2072_v45 = vpop.eup %2071  ;;  %2083 = vrcp.f32 %v510_v32  ;;  %v454_v32 = vadd.f32 0.01, %v2512_v37 }
 0x1b9   :  { %2085 = vrcp.f32 %v511_v36  ;;  %v812_v1 = vmul.f32 %v2072_v45, %v2576_v61  ;;  %v1068_v27 = vmul.f32 %v2072_v45, %v2592_v3  ;;  %v1763_v45 = vmul.f32 -1.442695, %v456_v55 }
 0x1ba   :  { %v2684_v28 = vpop.permute.xlu1 %786  ;;  %v2074_v50 = vpop.eup %2073  ;;  %2087 = vpow2.f32 %v1759_v59  ;;  %v1761_v51 = vmul.f32 -1.442695, %v454_v32  ;;  %v1966_v59 = vld [vmem:[%s3225_s5] sm:$0xff]   ;;  %v457_v55 = vadd.f32 0.01, %v2456_v57  ;;  %s2229_s5 = smov 96  }
 0x1bb   :  { %v2076_v53 = vpop.eup %2075  ;;  %v813_v2 = vmul.f32 %v2074_v50, %v2600_v8  ;;  %v1069_v21 = vmul.f32 %v2074_v50, %v2606_v13  ;;  %2089 = vpow2.f32 %v1760_v22  ;;  %1802 = vmatprep.subr.bf16.mxu1 %v1966_v59  ;;  %v458_v32 = vadd.f32 0.01, %v2469_v6 }
 0x1bc   :  { %v2687_v34 = vpop.permute.xlu0 %1040  ;;  %v2078_v63 = vpop.eup %2077  ;;  %v512_v36 = vadd.f32 1.0, %v2076_v53  ;;  %v455_v53 = vadd.f32 0.01, %v2517_v39  ;;  %1803 = vmatpush3.bf16.msra.mxu1 %v1966_v59 }
 0x1bd   :  { %v513_v61 = vadd.f32 1.0, %v2078_v63 }
 0x1be   :  { %v2690_v38 = vpop.permute.xlu1 %1042  ;;  %2091 = vrcp.f32 %v512_v36  ;;  %v1762_v36 = vmul.f32 -1.442695, %v455_v53 }
 0x1bf   :  { %v2080_v19 = vpop.eup %2079  ;;  %2093 = vrcp.f32 %v513_v61 }
 0x1c0   :  { %v2692_v42 = vpop.permute.xlu0 %788  ;;  %2095 = vpow2.f32 %v1763_v45 }
 0x1c1   :  { %v2082_v13 = vpop.eup %2081  ;;  %2097 = vpow2.f32 %v1761_v51  ;;  %v1765_v51 = vmul.f32 -1.442695, %v458_v32 }
 0x1c2   :  { %v2694_v48 = vpop.permute.xlu1 %790  ;;  %v2084_v50 = vpop.eup %2083  ;;  %v515_v63 = vadd.f32 1.0, %v2082_v13 }
 0x1c4   :  { %v2698_v58 = vpop.permute.xlu0 %1044 }
 0x1c6   :  { %v2700_v60 = vpop.permute.xlu1 %1046 }
 0x1c8   :  { %v2704_v5 = vpop.permute.xlu0 %792 }
 0x1ca   :  { %v2706_v25 = vpop.permute.xlu1 %794 }
 0x1cc   :  { %v2709_v41 = vpop.permute.xlu0 %1048 }
 0x1ce   :  { %v2712_v52 = vpop.permute.xlu1 %1050 }
 0x1f5   :  { %v925_v62 = vpop.permute.xlu0 %924 }
 0x1f6   :  { %v2720_v29 = vadd.f32 %v925_v62, %v812_v1  ;;  %v2722_v24 = vadd.f32 %v1068_v27, %v925_v62  ;;  %v514_v62 = vadd.f32 1.0, %v2080_v19 }
 0x1f8   :  { %2099 = vrcp.f32 %v514_v62 }
 0x1f9   :  { %2101 = vrcp.f32 %v515_v63 }
 0x1fa   :  { %2103 = vpow2.f32 %v1762_v36 }
 0x1fd   :  { %v927_v33 = vpop.permute.xlu1 %926  ;;  %v929_v1 = vpop.permute.xlu0 %928 }
 0x1fe   :  { %v2724_v40 = vadd.f32 %v927_v33, %v813_v2  ;;  %v2726_v47 = vadd.f32 %v1069_v21, %v927_v33  ;;  %v2086_v33 = vpop.eup %2085  ;;  %v814_v2 = vmul.f32 %v2084_v50, %v2603_v9  ;;  %v1070_v21 = vmul.f32 %v2084_v50, %v2608_v14 }
 0x1ff   :  { %v815_v27 = vmul.f32 %v2086_v33, %v2611_v18  ;;  %v1071_v22 = vmul.f32 %v2086_v33, %v2616_v23  ;;  %v1764_v9 = vmul.f32 -1.442695, %v457_v55  ;;  %v459_v18 = vadd.f32 0.01, %v2474_v10  ;;  %v2088_v14 = vpop.eup %2087 }
 0x200   :  { %v1851_v3 = vpack.i.bf16 %v2724_v40, %v2720_v29  ;;  %v1856_v8 = vpack.i.bf16 %v2726_v47, %v2722_v24  ;;  %v2746_v19 = vadd.f32 %v1070_v21, %v929_v1  ;;  %v2090_v50 = vpop.eup %2089  ;;  %v516_v62 = vadd.f32 1.0, %v2088_v14 }
 0x201   :  { %v931_v61 = vpop.permute.xlu1 %930  ;;  %v2092_v53 = vpop.eup %2091  ;;  %2105 = vpow2.f32 %v1764_v9  ;;  %v1766_v59 = vmul.f32 -1.442695, %v459_v18  ;;  %v517_v63 = vadd.f32 1.0, %v2090_v50 }
 0x202   :  { %1852 = vrot.lane.b32.xlu0 %v1851_v3, %s2227_s1  ;;  %1857 = vrot.lane.b32.xlu1 %v1856_v8, %s2228_s2  ;;  %v2744_v3 = vadd.f32 %v929_v1, %v814_v2  ;;  %v2748_v8 = vadd.f32 %v931_v61, %v815_v27  ;;  %v2750_v13 = vadd.f32 %v1071_v22, %v931_v61  ;;  %v2094_v33 = vpop.eup %2093  ;;  %2107 = vpow2.f32 %v1765_v51 }
 0x203   :  { %v2096_v55 = vpop.eup %2095  ;;  %v816_v2 = vmul.f32 %v2092_v53, %v2613_v20  ;;  %v817_v27 = vmul.f32 %v2094_v33, %v2621_v30  ;;  %v1072_v21 = vmul.f32 %v2092_v53, %v2618_v26  ;;  %v1073_v22 = vmul.f32 %v2094_v33, %v2627_v44 }
 0x204   :  { %v1861_v23 = vpack.i.bf16 %v2748_v8, %v2744_v3  ;;  %v1866_v45 = vpack.i.bf16 %v2750_v13, %v2746_v19  ;;  %v2098_v32 = vpop.eup %2097  ;;  %2109 = vpow2.f32 %v1766_v59 }
 0x205   :  { %v933_v1 = vpop.permute.xlu0 %932  ;;  %2111 = vrcp.f32 %v516_v62 }
 0x206   :  { %1862 = vrot.lane.b32.xlu0 %v1861_v23, %s2227_s1  ;;  %1867 = vrot.lane.b32.xlu1 %v1866_v45, %s2228_s2  ;;  %v2763_v61 = vadd.f32 %v933_v1, %v816_v2  ;;  %v2765_v9 = vadd.f32 %v1072_v21, %v933_v1  ;;  %v2100_v23 = vpop.eup %2099  ;;  %2113 = vrcp.f32 %v517_v63  ;;  %v518_v45 = vadd.f32 1.0, %v2098_v32 }
 0x207   :  { %v2102_v20 = vpop.eup %2101  ;;  %v818_v53 = vmul.f32 %v2100_v23, %v2623_v31  ;;  %v1074_v59 = vmul.f32 %v2100_v23, %v2668_v43  ;;  %v520_v1 = vadd.f32 1.0, %v2096_v55 }
 0x208   :  { %v2104_v44 = vpop.eup %2103  ;;  %v819_v33 = vmul.f32 %v2102_v20, %v2633_v49  ;;  %v1075_v62 = vmul.f32 %v2102_v20, %v2670_v7  ;;  %2115 = vrcp.f32 %v518_v45 }
 0x209   :  { %v935_v36 = vpop.permute.xlu1 %934  ;;  %v519_v63 = vadd.f32 1.0, %v2104_v44 }
 0x20a   :  { %v2767_v18 = vadd.f32 %v935_v36, %v817_v27  ;;  %v2769_v14 = vadd.f32 %v1073_v22, %v935_v36 }
 0x20b   :  { %v2106_v51 = vpop.eup %2105  ;;  %2117 = vrcp.f32 %v519_v63 }
 0x20c   :  { %v1871_v26 = vpack.i.bf16 %v2767_v18, %v2763_v61  ;;  %v1876_v30 = vpack.i.bf16 %v2769_v14, %v2765_v9  ;;  %v2108_v27 = vpop.eup %2107  ;;  %2119 = vrcp.f32 %v520_v1 }
 0x20d   :  { %v937_v50 = vpop.permute.xlu0 %936  ;;  %v522_v23 = vadd.f32 1.0, %v2108_v27 }
 0x20e   :  { %1872 = vrot.lane.b32.xlu0 %v1871_v26, %s2227_s1  ;;  %1877 = vrot.lane.b32.xlu1 %v1876_v30, %s2228_s2  ;;  %v2781_v21 = vadd.f32 %v937_v50, %v818_v53  ;;  %v2783_v22 = vadd.f32 %v1074_v59, %v937_v50  ;;  %v521_v26 = vadd.f32 1.0, %v2106_v51  ;;  %v2110_v31 = vpop.eup %2109 }
 0x20f   :  { %v939_v2 = vpop.permute.xlu1 %938  ;;  %v2112_v7 = vpop.eup %2111  ;;  %v523_v20 = vadd.f32 1.0, %v2110_v31 }
 0x210   :  { %v2785_v32 = vadd.f32 %v939_v2, %v819_v33  ;;  %v2787_v36 = vadd.f32 %v1075_v62, %v939_v2  ;;  %v2114_v55 = vpop.eup %2113  ;;  %2121 = vrcp.f32 %v521_v26  ;;  %v820_v44 = vmul.f32 %v2112_v7, %v2672_v11 }
 0x211   :  { %v821_v45 = vmul.f32 %v2114_v55, %v2674_v15  ;;  %v1076_v50 = vmul.f32 %v2112_v7, %v2676_v56  ;;  %v1077_v51 = vmul.f32 %v2114_v55, %v2679_v16  ;;  %2123 = vrcp.f32 %v522_v23 }
 0x212   :  { %v1881_v49 = vpack.i.bf16 %v2785_v32, %v2781_v21  ;;  %v1886_v43 = vpack.i.bf16 %v2787_v36, %v2783_v22  ;;  %2125 = vrcp.f32 %v523_v20  ;;  %v2116_v1 = vpop.eup %2115 }
 0x213   :  { %v822_v27 = vmul.f32 %v2116_v1, %v2682_v35  ;;  %v1078_v31 = vmul.f32 %v2116_v1, %v2687_v34 }
 0x214   :  { %1882 = vrot.lane.b32.xlu0 %v1881_v49, %s2227_s1  ;;  %1887 = vrot.lane.b32.xlu1 %v1886_v43, %s2228_s2 }
 0x215   :  { %v941_v30 = vpop.permute.xlu0 %940  ;;  %v2118_v16 = vpop.eup %2117 }
 0x216   :  { %v2799_v33 = vadd.f32 %v941_v30, %v820_v44  ;;  %v2801_v59 = vadd.f32 %v1076_v50, %v941_v30  ;;  %v2120_v2 = vpop.eup %2119  ;;  %v823_v26 = vmul.f32 %v2118_v16, %v2684_v28  ;;  %v1079_v49 = vmul.f32 %v2118_v16, %v2690_v38 }
 0x217   :  { %v943_v53 = vpop.permute.xlu1 %942  ;;  %v1080_v28 = vmul.f32 %v2120_v2, %v2698_v58 }
 0x218   :  { %v2803_v62 = vadd.f32 %v943_v53, %v821_v45  ;;  %v2805_v63 = vadd.f32 %v1077_v51, %v943_v53  ;;  %v824_v45 = vmul.f32 %v2120_v2, %v2692_v42 }
 0x21a   :  { %v1891_v11 = vpack.i.bf16 %v2803_v62, %v2799_v33  ;;  %v1896_v15 = vpack.i.bf16 %v2805_v63, %v2801_v59  ;;  %v2122_v43 = vpop.eup %2121 }
 0x21b   :  { %v825_v35 = vmul.f32 %v2122_v43, %v2694_v48  ;;  %v1081_v34 = vmul.f32 %v2122_v43, %v2700_v60  ;;  %v2124_v51 = vpop.eup %2123 }
 0x21c   :  { %1892 = vrot.lane.b32.xlu0 %v1891_v11, %s2227_s1  ;;  %1897 = vrot.lane.b32.xlu1 %v1896_v15, %s2228_s2  ;;  %v2126_v15 = vpop.eup %2125  ;;  %v826_v58 = vmul.f32 %v2124_v51, %v2704_v5  ;;  %v1082_v16 = vmul.f32 %v2124_v51, %v2709_v41  ;;  %v3243_v41 = vld [vmem:[#allocation3_spill] sm:$0xff] }
 0x21d   :  { %v945_v56 = vpop.permute.xlu0 %944  ;;  %v827_v60 = vmul.f32 %v2126_v15, %v2706_v25  ;;  %v1083_v2 = vmul.f32 %v2126_v15, %v2712_v52  ;;  %v3244_v52 = vld [vmem:[#allocation4_spill] sm:$0xff] }
 0x21e   :  { %v2817_v23 = vadd.f32 %v945_v56, %v822_v27  ;;  %v2819_v20 = vadd.f32 %v1078_v31, %v945_v56 }
 0x21f   :  { %v947_v7 = vpop.permute.xlu1 %946 }
 0x220   :  { %v2821_v30 = vadd.f32 %v947_v7, %v823_v26  ;;  %v2823_v44 = vadd.f32 %v1079_v49, %v947_v7 }
 0x221   :  { %v949_v55 = vpop.permute.xlu0 %948 }
 0x222   :  { %v1901_v38 = vpack.i.bf16 %v2821_v30, %v2817_v23  ;;  %v1911_v50 = vpack.i.bf16 %v2823_v44, %v2819_v20  ;;  %v984_v53 = vadd.f32 %v949_v55, %v824_v45  ;;  %v2833_v56 = vadd.f32 %v1080_v28, %v949_v55  ;;  %v3245_v45 = vld [vmem:[#allocation5_spill] sm:$0xff]  ;;  %v3247_v28 = vld [vmem:[#allocation2_spill] sm:$0xff] }
 0x223   :  { %v951_v11 = vpop.permute.xlu1 %950 }
 0x224   :  { %v985_v1 = vadd.f32 %v951_v11, %v825_v35  ;;  %v2835_v42 = vadd.f32 %v1081_v34, %v951_v11  ;;  %1902 = vrot.lane.b32.xlu0 %v1901_v38, %s2227_s1  ;;  %1912 = vrot.lane.b32.xlu1 %v1911_v50, %s2228_s2  ;;  %v3246_v35 = vld [vmem:[#allocation6_spill] sm:$0xff] }
 0x225   :  { %v953_v48 = vpop.permute.xlu0 %952 }
 0x226   :  { %v1906_v27 = vpack.i.bf16 %v985_v1, %v984_v53  ;;  %v1916_v26 = vpack.i.bf16 %v2835_v42, %v2833_v56  ;;  %v986_v31 = vadd.f32 %v953_v48, %v826_v58  ;;  %v2845_v43 = vadd.f32 %v1082_v16, %v953_v48 }
 0x227   :  { %v955_v49 = vpop.permute.xlu1 %954 }
 0x228   :  { %v987_v7 = vadd.f32 %v955_v49, %v827_v60  ;;  %v2847_v55 = vadd.f32 %v1083_v2, %v955_v49  ;;  %1907 = vrot.lane.b32.xlu0 %v1906_v27, %s2227_s1  ;;  %1917 = vrot.lane.b32.xlu1 %v1916_v26, %s2228_s2 }
 0x22a   :  { %v1921_v5 = vpack.i.bf16 %v987_v7, %v986_v31  ;;  %v1926_v25 = vpack.i.bf16 %v2847_v55, %v2845_v43 }
 0x22c   :  { %1922 = vrot.lane.b32.xlu0 %v1921_v5, %s2227_s1  ;;  %1927 = vrot.lane.b32.xlu1 %v1926_v25, %s2228_s2 }
 0x230   :  { %572 = vrot.lane.b32.xlu0 %v2445_v46, %s2229_s5  ;;  %574 = vrot.lane.b32.xlu1 %v2453_v54, %s2229_s5 }
 0x234   :  { %576 = vrot.lane.b32.xlu0 %v2460_v0, %s2229_s5  ;;  %578 = vrot.lane.b32.xlu1 %v2466_v4, %s2229_s5 }
 0x238   :  { %580 = vrot.lane.b32.xlu0 %v2480_v12, %s2229_s5  ;;  %582 = vrot.lane.b32.xlu1 %v2484_v17, %s2229_s5 }
 0x23c   :  { %584 = vrot.lane.b32.xlu0 %v3243_v41, %s2229_s5  ;;  %586 = vrot.lane.b32.xlu1 %v3244_v52, %s2229_s5 }
 0x240   :  { %588 = vrot.lane.b32.xlu0 %v3245_v45, %s2229_s5  ;;  %590 = vrot.lane.b32.xlu1 %v3246_v35, %s2229_s5 }
 0x244   :  { %592 = vrot.lane.b32.xlu0 %v2512_v37, %s2229_s5  ;;  %594 = vrot.lane.b32.xlu1 %v2517_v39, %s2229_s5 }
 0x248   :  { %596 = vrot.lane.b32.xlu0 %v3247_v28, %s2229_s5  ;;  %598 = vrot.lane.b32.xlu1 %v2456_v57, %s2229_s5 }
 0x24c   :  { %600 = vrot.lane.b32.xlu0 %v2469_v6, %s2229_s5  ;;  %602 = vrot.lane.b32.xlu1 %v2474_v10, %s2229_s5 }
 0x250   :  { %1550 = vrot.lane.b32.xlu0 %v2720_v29, %s2226_s0  ;;  %1552 = vrot.lane.b32.xlu1 %v2724_v40, %s2226_s0 }
 0x254   :  { %1554 = vrot.lane.b32.xlu0 %v2744_v3, %s2226_s0  ;;  %1556 = vrot.lane.b32.xlu1 %v2748_v8, %s2226_s0 }
 0x258   :  { %1558 = vrot.lane.b32.xlu0 %v2763_v61, %s2226_s0  ;;  %1560 = vrot.lane.b32.xlu1 %v2767_v18, %s2226_s0 }
 0x25c   :  { %1562 = vrot.lane.b32.xlu0 %v2781_v21, %s2226_s0  ;;  %1564 = vrot.lane.b32.xlu1 %v2785_v32, %s2226_s0 }
 0x260   :  { %1566 = vrot.lane.b32.xlu0 %v2799_v33, %s2226_s0  ;;  %1568 = vrot.lane.b32.xlu1 %v2803_v62, %s2226_s0 }
 0x264   :  { %1570 = vrot.lane.b32.xlu0 %v2817_v23, %s2226_s0  ;;  %1576 = vrot.lane.b32.xlu1 %v985_v1, %s2226_s0 }
 0x268   :  { %1574 = vrot.lane.b32.xlu0 %v984_v53, %s2226_s0  ;;  %1580 = vrot.lane.b32.xlu1 %v987_v7, %s2226_s0 }
 0x26c   :  { %1578 = vrot.lane.b32.xlu0 %v986_v31, %s2226_s0  ;;  %1572 = vrot.lane.b32.xlu1 %v2821_v30, %s2226_s0 }
 0x274   :  { %v1858_v29 = vpop.permute.xlu1 %1857  ;;  %v1853_v40 = vpop.permute.xlu0 %1852 }
 0x275   :  { %v1860_v3 = vunpack.i.h.bf16 %v1858_v29  ;;  %v1859_v8 = vunpack.i.l.bf16 %v1858_v29  ;;  %v1855_v61 = vunpack.i.h.bf16 %v1853_v40  ;;  %v1854_v18 = vunpack.i.l.bf16 %v1853_v40 }
 0x277   :  { %v1230_v21 = vsel %vm1228_vm2, %v1855_v61, %v1860_v3  ;;  %v1229_v32 = vsel %vm1228_vm2, %v1854_v18, %v1859_v8 }
 0x278   :  { %v1245_v33 = vpack.c.bf16 %v1230_v21, %v1229_v32  ;;  %v1868_v62 = vpop.permute.xlu1 %1867  ;;  %v1863_v23 = vpop.permute.xlu0 %1862 }
 0x279   :  { %v1870_v34 = vunpack.i.h.bf16 %v1868_v62  ;;  %v1869_v38 = vunpack.i.l.bf16 %v1868_v62  ;;  %v1865_v50 = vunpack.i.h.bf16 %v1863_v23  ;;  %v1864_v51 = vunpack.i.l.bf16 %v1863_v23 }
 0x27a   :  { %1804 = vmatprep.mubr.msk.bf16.mxu1 %vm1268_vm3, %v1245_v33 }
 0x27b   :  { %v1232_v30 = vsel %vm1228_vm2, %v1865_v50, %v1870_v34  ;;  %v1231_v53 = vsel %vm1228_vm2, %v1864_v51, %v1869_v38 }
 0x27c   :  { %v1246_v11 = vpack.c.bf16 %v1232_v30, %v1231_v53 }
 0x27e   :  { %1805 = vmatmul.mubr.msk.bf16.vlgmr.msra.gmra.mrb[8].mxu1 %vm1268_vm3, %v1246_v11 }
 0x280   :  { %v1878_v15 = vpop.permute.xlu1 %1877  ;;  %v1873_v1 = vpop.permute.xlu0 %1872 }
 0x281   :  { %v1880_v48 = vunpack.i.h.bf16 %v1878_v15  ;;  %v1879_v58 = vunpack.i.l.bf16 %v1878_v15  ;;  %v1875_v60 = vunpack.i.h.bf16 %v1873_v1  ;;  %v1874_v16 = vunpack.i.l.bf16 %v1873_v1 }
 0x283   :  { %v1234_v2 = vsel %vm1228_vm2, %v1875_v60, %v1880_v48  ;;  %v1233_v27 = vsel %vm1228_vm2, %v1874_v16, %v1879_v58 }
 0x284   :  { %v1247_v26 = vpack.c.bf16 %v1234_v2, %v1233_v27 }
 0x286   :  { %1808 = vmatprep.mubr.msk.bf16.mxu1 %vm1268_vm3, %v1247_v26  ;;  %v1888_v31 = vpop.permute.xlu1 %1887  ;;  %v1883_v49 = vpop.permute.xlu0 %1882 }
 0x287   :  { %v1890_v7 = vunpack.i.h.bf16 %v1888_v31  ;;  %v1889_v5 = vunpack.i.l.bf16 %v1888_v31  ;;  %v1885_v25 = vunpack.i.h.bf16 %v1883_v49  ;;  %v1884_v29 = vunpack.i.l.bf16 %v1883_v49 }
 0x289   :  { %v1236_v40 = vsel %vm1228_vm2, %v1885_v25, %v1890_v7  ;;  %v1235_v3 = vsel %vm1228_vm2, %v1884_v29, %v1889_v5 }
 0x28a   :  { %v1248_v8 = vpack.c.bf16 %v1236_v40, %v1235_v3 }
 0x28c   :  { %1809 = vmatmul.mubr.msk.bf16.gmra.mrb[12].mxu1 %vm1268_vm3, %v1248_v8 }
 0x28e   :  { %v1898_v61 = vpop.permute.xlu1 %1897  ;;  %v1893_v18 = vpop.permute.xlu0 %1892 }
 0x28f   :  { %v1900_v21 = vunpack.i.h.bf16 %v1898_v61  ;;  %v1899_v32 = vunpack.i.l.bf16 %v1898_v61  ;;  %v1895_v33 = vunpack.i.h.bf16 %v1893_v18  ;;  %v1894_v62 = vunpack.i.l.bf16 %v1893_v18 }
 0x291   :  { %v1238_v23 = vsel %vm1228_vm2, %v1895_v33, %v1900_v21  ;;  %v1237_v34 = vsel %vm1228_vm2, %v1894_v62, %v1899_v32  ;;  %v2942_v33 = vld [vmem:[%s3226_s6] ss:$0 sm:$0xff]  ;;  %s2231_s6 = smov 104  }
 0x292   :  { %v1249_v38 = vpack.c.bf16 %v1238_v23, %v1237_v34 }
 0x294   :  { %1812 = vmatprep.mubr.msk.bf16.mxu1 %vm1268_vm3, %v1249_v38 }
 0x296   :  { %v1913_v50 = vpop.permute.xlu1 %1912  ;;  %v1903_v51 = vpop.permute.xlu0 %1902 }
 0x297   :  { %v1915_v30 = vunpack.i.h.bf16 %v1913_v50  ;;  %v1914_v53 = vunpack.i.l.bf16 %v1913_v50  ;;  %v1905_v11 = vunpack.i.h.bf16 %v1903_v51  ;;  %v1904_v15 = vunpack.i.l.bf16 %v1903_v51 }
 0x299   :  { %v1240_v1 = vsel %vm1228_vm2, %v1905_v11, %v1915_v30  ;;  %v1239_v48 = vsel %vm1228_vm2, %v1904_v15, %v1914_v53 }
 0x29a   :  { %v1250_v58 = vpack.c.bf16 %v1240_v1, %v1239_v48  ;;  %v1918_v60 = vpop.permute.xlu1 %1917  ;;  %v1908_v16 = vpop.permute.xlu0 %1907 }
 0x29b   :  { %v1920_v2 = vunpack.i.h.bf16 %v1918_v60  ;;  %v1919_v27 = vunpack.i.l.bf16 %v1918_v60  ;;  %v1910_v26 = vunpack.i.h.bf16 %v1908_v16  ;;  %v1909_v31 = vunpack.i.l.bf16 %v1908_v16 }
 0x29c   :  { %1813 = vmatmul.mubr.msk.bf16.gmra.mrb[16].mxu1 %vm1268_vm3, %v1250_v58 }
 0x29d   :  { %v1242_v49 = vsel %vm1228_vm2, %v1910_v26, %v1920_v2  ;;  %v1241_v7 = vsel %vm1228_vm2, %v1909_v31, %v1919_v27 }
 0x29e   :  { %v1251_v5 = vpack.c.bf16 %v1242_v49, %v1241_v7  ;;  %v1928_v25 = vpop.permute.xlu1 %1927  ;;  %v1923_v29 = vpop.permute.xlu0 %1922 }
 0x29f   :  { %v1930_v40 = vunpack.i.h.bf16 %v1928_v25  ;;  %v1929_v3 = vunpack.i.l.bf16 %v1928_v25  ;;  %v1925_v8 = vunpack.i.h.bf16 %v1923_v29  ;;  %v1924_v61 = vunpack.i.l.bf16 %v1923_v29 }
 0x2a0   :  { %1816 = vmatprep.mubr.msk.bf16.mxu1 %vm1268_vm3, %v1251_v5 }
 0x2a1   :  { %v1244_v18 = vsel %vm1228_vm2, %v1925_v8, %v1930_v40  ;;  %v1243_v21 = vsel %vm1228_vm2, %v1924_v61, %v1929_v3 }
 0x2a2   :  { %v1252_v32 = vpack.c.bf16 %v1244_v18, %v1243_v21  ;;  %v2958_v40 = vpop.permute.xlu0 %572  ;;  %v2962_v21 = vpop.permute.xlu1 %574 }
 0x2a4   :  { %1817 = vmatmul.mubr.msk.bf16.gmra.mrb[20].mxu1 %vm1268_vm3, %v1252_v32 }
 0x351   :  { %v1806_v62 = vpop.f32.mrb[8].mxu1 }
 0x352   :  { %v1336_v23 = vadd.f32 %v1806_v62, %v2942_v33  ;;  %v1327_v34 = vpop.f32.mrb[9].mxu1 }
 0x353   :  { %v1807_v38 = vpop.f32.mrb[10].mxu1  ;;  %v1328_v50 = vadd.f32 %v2942_v33, %v1327_v34 }
 0x354   :  { %2127 = vtanh.f32 %v1336_v23  ;;  %v1339_v51 = vadd.f32 %v1807_v38, %v2942_v33  ;;  %v1330_v30 = vpop.f32.mrb[11].mxu1  ;;  %v577_v38 = vpop.permute.xlu0 %576 }
 0x355   :  { %v1331_v53 = vadd.f32 %v2942_v33, %v1330_v30 }
 0x356   :  { %2129 = vtanh.f32 %v1339_v51  ;;  %v579_v51 = vpop.permute.xlu1 %578 }
 0x357   :  { %2131 = vtanh.f32 %v1328_v50 }
 0x358   :  { %2133 = vtanh.f32 %v1331_v53 }
 0x35e   :  { %v2128_v11 = vpop.eup %2127 }
 0x35f   :  { %1426 = vrot.lane.b32.xlu0 %v2128_v11, %s2230_s11  ;;  %v1810_v48 = vpop.f32.mrb[12].mxu1 }
 0x360   :  { %v2130_v15 = vpop.eup %2129  ;;  %v1352_v58 = vadd.f32 %v1810_v48, %v2942_v33  ;;  %v1343_v60 = vpop.f32.mrb[13].mxu1 }
 0x361   :  { %1428 = vrot.lane.b32.xlu1 %v2130_v15, %s2230_s11  ;;  %v2132_v1 = vpop.eup %2131  ;;  %v1811_v2 = vpop.f32.mrb[14].mxu1  ;;  %v1344_v27 = vadd.f32 %v2942_v33, %v1343_v60 }
 0x362   :  { %v2134_v16 = vpop.eup %2133  ;;  %2135 = vtanh.f32 %v1352_v58  ;;  %v1355_v26 = vadd.f32 %v1811_v2, %v2942_v33  ;;  %v1346_v31 = vpop.f32.mrb[15].mxu1 }
 0x363   :  { %1422 = vrot.lane.b32.xlu0 %v2132_v1, %s2230_s11  ;;  %v1347_v49 = vadd.f32 %v2942_v33, %v1346_v31  ;;  %v2971_v60 = vpop.permute.xlu0 %580 }
 0x364   :  { %2137 = vtanh.f32 %v1355_v26 }
 0x365   :  { %1424 = vrot.lane.b32.xlu1 %v2134_v16, %s2230_s11  ;;  %2139 = vtanh.f32 %v1344_v27  ;;  %v2975_v27 = vpop.permute.xlu1 %582 }
 0x366   :  { %2141 = vtanh.f32 %v1347_v49 }
 0x367   :  { %v585_v49 = vpop.permute.xlu0 %584 }
 0x36c   :  { %v2136_v7 = vpop.eup %2135 }
 0x36d   :  { %1434 = vrot.lane.b32.xlu0 %v2136_v7, %s2230_s11 }
 0x36e   :  { %v2138_v5 = vpop.eup %2137 }
 0x36f   :  { %v1814_v25 = vpop.f32.mrb[16].mxu1  ;;  %1436 = vrot.lane.b32.xlu1 %v2138_v5, %s2230_s11  ;;  %v2140_v29 = vpop.eup %2139 }
 0x370   :  { %v1368_v3 = vadd.f32 %v1814_v25, %v2942_v33  ;;  %v1359_v8 = vpop.f32.mrb[17].mxu1  ;;  %v2142_v18 = vpop.eup %2141 }
 0x371   :  { %v1815_v61 = vpop.f32.mrb[18].mxu1  ;;  %1430 = vrot.lane.b32.xlu0 %v2140_v29, %s2230_s11  ;;  %v1360_v32 = vadd.f32 %v2942_v33, %v1359_v8  ;;  %v587_v5 = vpop.permute.xlu1 %586 }
 0x372   :  { %2143 = vtanh.f32 %v1368_v3  ;;  %v1371_v62 = vadd.f32 %v1815_v61, %v2942_v33  ;;  %v1362_v23 = vpop.f32.mrb[19].mxu1  ;;  %v2982_v29 = vpop.permute.xlu0 %588 }
 0x373   :  { %1432 = vrot.lane.b32.xlu1 %v2142_v18, %s2230_s11  ;;  %v1363_v34 = vadd.f32 %v2942_v33, %v1362_v23 }
 0x374   :  { %2145 = vtanh.f32 %v1371_v62 }
 0x375   :  { %2147 = vtanh.f32 %v1360_v32  ;;  %v2985_v8 = vpop.permute.xlu1 %590 }
 0x376   :  { %2149 = vtanh.f32 %v1363_v34  ;;  %v2990_v61 = vpop.permute.xlu0 %592 }
 0x377   :  { %v1818_v50 = vpop.f32.mrb[20].mxu1 }
 0x378   :  { %v1384_v30 = vadd.f32 %v1818_v50, %v2942_v33  ;;  %v1375_v53 = vpop.f32.mrb[21].mxu1 }
 0x379   :  { %v1819_v11 = vpop.f32.mrb[22].mxu1  ;;  %v1376_v15 = vadd.f32 %v2942_v33, %v1375_v53  ;;  %v2994_v18 = vpop.permute.xlu1 %594 }
 0x37a   :  { %2151 = vtanh.f32 %v1384_v30  ;;  %v1387_v1 = vadd.f32 %v1819_v11, %v2942_v33  ;;  %v1378_v48 = vpop.f32.mrb[23].mxu1  ;;  %v3000_v32 = vpop.permute.xlu0 %596  ;;  %v624_v30 = vadd.f32 %v2971_v60, %v2480_v12 }
 0x37b   :  { %v1379_v16 = vadd.f32 %v2942_v33, %v1378_v48  ;;  %v625_v48 = vadd.f32 %v2975_v27, %v2484_v17  ;;  %v630_v27 = vadd.f32 %v2990_v61, %v2512_v37  ;;  %v629_v61 = vadd.f32 %v2985_v8, %v3246_v35 }
 0x37c   :  { %v2144_v58 = vpop.eup %2143  ;;  %2153 = vtanh.f32 %v1387_v1 }
 0x37d   :  { %1442 = vrot.lane.b32.xlu0 %v2144_v58, %s2230_s11  ;;  %2155 = vtanh.f32 %v1376_v15  ;;  %v3004_v62 = vpop.permute.xlu1 %598  ;;  %v1776_v35 = vmul.f32 -1.442695, %v629_v61 }
 0x37e   :  { %v2146_v2 = vpop.eup %2145  ;;  %2157 = vtanh.f32 %v1379_v16 }
 0x37f   :  { %1444 = vrot.lane.b32.xlu1 %v2146_v2, %s2230_s11  ;;  %v2148_v26 = vpop.eup %2147  ;;  %v1771_v2 = vmul.f32 -1.442695, %v624_v30 }
 0x380   :  { %v2150_v31 = vpop.eup %2149 }
 0x381   :  { %1438 = vrot.lane.b32.xlu0 %v2148_v26, %s2230_s11 }
 0x383   :  { %1440 = vrot.lane.b32.xlu1 %v2150_v31, %s2230_s11  ;;  %v1772_v31 = vmul.f32 -1.442695, %v625_v48  ;;  %v632_v48 = vadd.f32 %v3000_v32, %v3247_v28 }
 0x384   :  { %v2152_v7 = vpop.eup %2151 }
 0x385   :  { %1450 = vrot.lane.b32.xlu0 %v2152_v7, %s2230_s11 }
 0x386   :  { %v2154_v33 = vpop.eup %2153 }
 0x387   :  { %1452 = vrot.lane.b32.xlu1 %v2154_v33, %s2230_s11  ;;  %v2156_v25 = vpop.eup %2155  ;;  %v631_v33 = vadd.f32 %v2994_v18, %v2517_v39 }
 0x388   :  { %v2158_v3 = vpop.eup %2157 }
 0x389   :  { %1446 = vrot.lane.b32.xlu0 %v2156_v25, %s2230_s11  ;;  %v1778_v39 = vmul.f32 -1.442695, %v631_v33 }
 0x38b   :  { %1448 = vrot.lane.b32.xlu1 %v2158_v3, %s2230_s11 }
 0x38d   :  { %1598 = vrot.lane.b32.xlu0 %v2722_v24, %s2229_s5  ;;  %v3014_v24 = vpop.permute.xlu1 %602 }
 0x38e   :  { %v635_v8 = vadd.f32 %v3014_v24, %v2474_v10 }
 0x38f   :  { %1600 = vrot.lane.b32.xlu1 %v2726_v47, %s2229_s5  ;;  %v3010_v47 = vpop.permute.xlu0 %600 }
 0x391   :  { %1602 = vrot.lane.b32.xlu0 %v2746_v19, %s2229_s5 }
 0x393   :  { %1604 = vrot.lane.b32.xlu1 %v2750_v13, %s2229_s5  ;;  %v3020_v19 = vpop.permute.xlu0 %1550  ;;  %v3024_v13 = vpop.permute.xlu1 %1552 }
 0x395   :  { %1606 = vrot.lane.b32.xlu0 %v2765_v9, %s2229_s5 }
 0x397   :  { %1608 = vrot.lane.b32.xlu1 %v2769_v14, %s2229_s5  ;;  %v3030_v9 = vpop.permute.xlu0 %1554  ;;  %v3034_v14 = vpop.permute.xlu1 %1556 }
 0x399   :  { %1610 = vrot.lane.b32.xlu0 %v2783_v22, %s2229_s5  ;;  %v622_v22 = vadd.f32 %v577_v38, %v2460_v0 }
 0x39b   :  { %1612 = vrot.lane.b32.xlu1 %v2787_v36, %s2229_s5  ;;  %v3037_v36 = vpop.permute.xlu0 %1558 }
 0x39d   :  { %1614 = vrot.lane.b32.xlu0 %v2801_v59, %s2229_s5  ;;  %v623_v59 = vadd.f32 %v579_v51, %v2466_v4 }
 0x39f   :  { %1616 = vrot.lane.b32.xlu1 %v2805_v63, %s2229_s5  ;;  %v3040_v63 = vpop.permute.xlu1 %1560  ;;  %v1770_v23 = vmul.f32 -1.442695, %v623_v59  ;;  %v3046_v34 = vpop.permute.xlu0 %1562 }
 0x3a1   :  { %1618 = vrot.lane.b32.xlu0 %v2819_v20, %s2229_s5  ;;  %v620_v20 = vadd.f32 %v2958_v40, %v2445_v46  ;;  %v626_v46 = vadd.f32 %v585_v49, %v3243_v41 }
 0x3a3   :  { %1620 = vrot.lane.b32.xlu1 %v2823_v44, %s2229_s5  ;;  %v1769_v44 = vmul.f32 -1.442695, %v622_v22  ;;  %v3048_v50 = vpop.permute.xlu1 %1564  ;;  %v3050_v4 = vpop.permute.xlu0 %1566  ;;  %v1773_v53 = vmul.f32 -1.442695, %v626_v46 }
 0x3a5   :  { %1622 = vrot.lane.b32.xlu0 %v2833_v56, %s2229_s5  ;;  %v621_v56 = vadd.f32 %v2962_v21, %v2453_v54  ;;  %2159 = vpow2.f32 %v1769_v44  ;;  %v627_v54 = vadd.f32 %v587_v5, %v3244_v52  ;;  %v1777_v44 = vmul.f32 -1.442695, %v630_v27 }
 0x3a6   :  { %2161 = vpow2.f32 %v1770_v23 }
 0x3a7   :  { %1624 = vrot.lane.b32.xlu1 %v2835_v42, %s2229_s5  ;;  %v1767_v42 = vmul.f32 -1.442695, %v620_v20  ;;  %v1768_v0 = vmul.f32 -1.442695, %v621_v56  ;;  %v3052_v38 = vpop.permute.xlu1 %1568  ;;  %v3056_v21 = vpop.permute.xlu0 %1570  ;;  %v1774_v58 = vmul.f32 -1.442695, %v627_v54  ;;  %v628_v20 = vadd.f32 %v2982_v29, %v3245_v45 }
 0x3a9   :  { %2163 = vpow2.f32 %v1767_v42  ;;  %v1775_v29 = vmul.f32 -1.442695, %v628_v20 }
 0x3aa   :  { %2165 = vpow2.f32 %v1768_v0 }
 0x3ab   :  { %v3060_v15 = vpop.permute.xlu1 %1576  ;;  %2167 = vpow2.f32 %v1773_v53  ;;  %v3064_v26 = vpop.permute.xlu0 %1574 }
 0x3af   :  { %v2160_v40 = vpop.eup %2159  ;;  %v3066_v60 = vpop.permute.xlu1 %1580 }
 0x3b0   :  { %v2162_v51 = vpop.eup %2161  ;;  %v686_v11 = vadd.f32 1.0, %v2160_v40  ;;  %v3068_v17 = vpop.permute.xlu0 %1578 }
 0x3b1   :  { %v687_v16 = vadd.f32 1.0, %v2162_v51  ;;  %v634_v51 = vadd.f32 %v3010_v47, %v2469_v6  ;;  %v633_v47 = vadd.f32 %v3004_v62, %v2456_v57 }
 0x3b2   :  { %2169 = vrcp.f32 %v686_v11 }
 0x3b3   :  { %v2164_v1 = vpop.eup %2163  ;;  %2171 = vpow2.f32 %v1774_v58  ;;  %v3072_v49 = vpop.permute.xlu1 %1572  ;;  %v1781_v6 = vmul.f32 -1.442695, %v634_v51  ;;  %v1782_v58 = vmul.f32 -1.442695, %v635_v8  ;;  %v1780_v10 = vmul.f32 -1.442695, %v633_v47 }
 0x3b4   :  { %v2166_v41 = vpop.eup %2165  ;;  %v684_v52 = vadd.f32 1.0, %v2164_v1  ;;  %2173 = vrcp.f32 %v687_v16  ;;  %v1779_v16 = vmul.f32 -1.442695, %v632_v48 }
 0x3b5   :  { %v685_v12 = vadd.f32 1.0, %v2166_v41  ;;  %2175 = vpow2.f32 %v1771_v2  ;;  %v2168_v7 = vpop.eup %2167 }
 0x3b6   :  { %2177 = vrcp.f32 %v684_v52  ;;  %v690_v42 = vadd.f32 1.0, %v2168_v7 }
 0x3b7   :  { %2179 = vpow2.f32 %v1772_v31 }
 0x3b8   :  { %2181 = vrcp.f32 %v685_v12 }
 0x3b9   :  { %2183 = vpow2.f32 %v1777_v44 }
 0x3ba   :  { %2185 = vrcp.f32 %v690_v42 }
 0x3bb   :  { %2187 = vpow2.f32 %v1778_v39 }
 0x3bc   :  { %v2170_v5 = vpop.eup %2169 }
 0x3bd   :  { %v2172_v3 = vpop.eup %2171 }
 0x3be   :  { %v2174_v59 = vpop.eup %2173  ;;  %v691_v40 = vadd.f32 1.0, %v2172_v3 }
 0x3bf   :  { %v2176_v23 = vpop.eup %2175 }
 0x3c0   :  { %v2178_v37 = vpop.eup %2177  ;;  %v688_v53 = vadd.f32 1.0, %v2176_v23  ;;  %2189 = vrcp.f32 %v691_v40 }
 0x3c1   :  { %v2180_v46 = vpop.eup %2179  ;;  %2191 = vpow2.f32 %v1775_v29 }
 0x3c2   :  { %v2182_v45 = vpop.eup %2181  ;;  %v689_v1 = vadd.f32 1.0, %v2180_v46  ;;  %2193 = vrcp.f32 %v688_v53 }
 0x3c3   :  { %2195 = vpow2.f32 %v1776_v35  ;;  %v2184_v41 = vpop.eup %2183 }
 0x3c4   :  { %2197 = vrcp.f32 %v689_v1  ;;  %v2186_v24 = vpop.eup %2185  ;;  %v694_v28 = vadd.f32 1.0, %v2184_v41 }
 0x3c5   :  { %2199 = vpow2.f32 %v1781_v6  ;;  %v2188_v52 = vpop.eup %2187 }
 0x3c6   :  { %2201 = vpow2.f32 %v1782_v58  ;;  %v695_v62 = vadd.f32 1.0, %v2188_v52 }
 0x3c7   :  { %2203 = vpow2.f32 %v1779_v16 }
 0x3c8   :  { %2205 = vpow2.f32 %v1780_v10 }
 0x3c9   :  { %2207 = vrcp.f32 %v694_v28 }
 0x3ca   :  { %v2190_v12 = vpop.eup %2189  ;;  %2209 = vrcp.f32 %v695_v62 }
 0x3cb   :  { %v2192_v27 = vpop.eup %2191 }
 0x3cc   :  { %v2194_v57 = vpop.eup %2193 }
 0x3cd   :  { %v2196_v33 = vpop.eup %2195 }
 0x3ce   :  { %v2198_v3 = vpop.eup %2197 }
 0x3cf   :  { %v2200_v20 = vpop.eup %2199 }
 0x3d0   :  { %v2202_v23 = vpop.eup %2201  ;;  %v698_v42 = vadd.f32 1.0, %v2200_v20 }
 0x3d1   :  { %v1427_v25 = vpop.permute.xlu0 %1426 }
 0x3d2   :  { %v1472_v22 = vmul.f32 %v2170_v5, %v1427_v25 }
 0x3d3   :  { %v1429_v56 = vpop.permute.xlu1 %1428 }
 0x3d4   :  { %v1473_v0 = vmul.f32 %v2174_v59, %v1429_v56  ;;  %1506 = vrot.lane.b32.xlu0 %v1472_v22, %s2231_s6  ;;  %v692_v22 = vadd.f32 1.0, %v2192_v27  ;;  %v693_v56 = vadd.f32 1.0, %v2196_v33 }
 0x3d5   :  { %v1423_v18 = vpop.permute.xlu0 %1422 }
 0x3d6   :  { %v1470_v54 = vmul.f32 %v2178_v37, %v1423_v18  ;;  %1508 = vrot.lane.b32.xlu1 %v1473_v0, %s2231_s6  ;;  %2211 = vrcp.f32 %v692_v22  ;;  %v2204_v0 = vpop.eup %2203  ;;  %v699_v37 = vadd.f32 1.0, %v2202_v23 }
 0x3d7   :  { %v1425_v30 = vpop.permute.xlu1 %1424  ;;  %2213 = vrcp.f32 %v693_v56  ;;  %v2206_v61 = vpop.eup %2205  ;;  %v696_v39 = vadd.f32 1.0, %v2204_v0 }
 0x3d8   :  { %v1471_v11 = vmul.f32 %v2182_v45, %v1425_v30  ;;  %1502 = vrot.lane.b32.xlu0 %v1470_v54, %s2231_s6  ;;  %2215 = vrcp.f32 %v698_v42  ;;  %v2208_v18 = vpop.eup %2207  ;;  %v697_v46 = vadd.f32 1.0, %v2206_v61 }
 0x3d9   :  { %2217 = vrcp.f32 %v699_v37  ;;  %v2210_v45 = vpop.eup %2209 }
 0x3da   :  { %1504 = vrot.lane.b32.xlu1 %v1471_v11, %s2231_s6  ;;  %2219 = vrcp.f32 %v696_v39 }
 0x3db   :  { %2221 = vrcp.f32 %v697_v46 }
 0x3df   :  { %v1435_v2 = vpop.permute.xlu0 %1434 }
 0x3e0   :  { %v1476_v31 = vmul.f32 %v2186_v24, %v1435_v2  ;;  %v2212_v30 = vpop.eup %2211 }
 0x3e1   :  { %v1437_v32 = vpop.permute.xlu1 %1436  ;;  %v2214_v35 = vpop.eup %2213 }
 0x3e2   :  { %v1477_v7 = vmul.f32 %v2190_v12, %v1437_v32  ;;  %1514 = vrot.lane.b32.xlu0 %v1476_v31, %s2231_s6  ;;  %v2216_v48 = vpop.eup %2215 }
 0x3e3   :  { %v1431_v5 = vpop.permute.xlu0 %1430  ;;  %v2218_v58 = vpop.eup %2217 }
 0x3e4   :  { %v1474_v25 = vmul.f32 %v2194_v57, %v1431_v5  ;;  %1516 = vrot.lane.b32.xlu1 %v1477_v7, %s2231_s6  ;;  %v2220_v10 = vpop.eup %2219 }
 0x3e5   :  { %v1433_v59 = vpop.permute.xlu1 %1432  ;;  %v2222_v52 = vpop.eup %2221 }
 0x3e6   :  { %v1475_v44 = vmul.f32 %v2198_v3, %v1433_v59  ;;  %1510 = vrot.lane.b32.xlu0 %v1474_v25, %s2231_s6 }
 0x3e8   :  { %1512 = vrot.lane.b32.xlu1 %v1475_v44, %s2231_s6 }
 0x3ef   :  { %v1443_v40 = vpop.permute.xlu0 %1442 }
 0x3f0   :  { %v1480_v54 = vmul.f32 %v2208_v18, %v1443_v40 }
 0x3f1   :  { %v1445_v29 = vpop.permute.xlu1 %1444 }
 0x3f2   :  { %v1481_v51 = vmul.f32 %v2210_v45, %v1445_v29  ;;  %1522 = vrot.lane.b32.xlu0 %v1480_v54, %s2231_s6 }
 0x3f3   :  { %v1439_v53 = vpop.permute.xlu0 %1438 }
 0x3f4   :  { %v1478_v11 = vmul.f32 %v2212_v30, %v1439_v53  ;;  %1524 = vrot.lane.b32.xlu1 %v1481_v51, %s2231_s6 }
 0x3f5   :  { %v1441_v8 = vpop.permute.xlu1 %1440 }
 0x3f6   :  { %v1479_v1 = vmul.f32 %v2214_v35, %v1441_v8  ;;  %1518 = vrot.lane.b32.xlu0 %v1478_v11, %s2231_s6 }
 0x3f7   :  { %v1451_v6 = vpop.permute.xlu0 %1450 }
 0x3f8   :  { %v1484_v47 = vmul.f32 %v2216_v48, %v1451_v6  ;;  %1520 = vrot.lane.b32.xlu1 %v1479_v1, %s2231_s6 }
 0x3f9   :  { %v1453_v16 = vpop.permute.xlu1 %1452 }
 0x3fa   :  { %v1485_v41 = vmul.f32 %v2218_v58, %v1453_v16  ;;  %1530 = vrot.lane.b32.xlu0 %v1484_v47, %s2231_s6 }
 0x3fb   :  { %v1447_v24 = vpop.permute.xlu0 %1446 }
 0x3fc   :  { %v1482_v2 = vmul.f32 %v2220_v10, %v1447_v24  ;;  %1532 = vrot.lane.b32.xlu1 %v1485_v41, %s2231_s6 }
 0x3fd   :  { %v1449_v31 = vpop.permute.xlu1 %1448 }
 0x3fe   :  { %v1483_v12 = vmul.f32 %v2222_v52, %v1449_v31  ;;  %1526 = vrot.lane.b32.xlu0 %v1482_v2, %s2231_s6 }
 0x3ff   :  { %v1599_v28 = vpop.permute.xlu0 %1598 }
 0x400   :  { %1528 = vrot.lane.b32.xlu1 %v1483_v12, %s2231_s6 }
 0x401   :  { %v1601_v32 = vpop.permute.xlu1 %1600 }
 0x402   :  { %1626 = vrot.lane.b32.xlu0 %v2845_v43, %s2229_s5 }
 0x403   :  { %v1603_v27 = vpop.permute.xlu0 %1602 }
 0x404   :  { %1628 = vrot.lane.b32.xlu1 %v2847_v55, %s2229_s5 }
 0x405   :  { %v1605_v7 = vpop.permute.xlu1 %1604 }
 0x407   :  { %v1607_v57 = vpop.permute.xlu0 %1606 }
 0x409   :  { %v1609_v62 = vpop.permute.xlu1 %1608 }
 0x40b   :  { %v1611_v5 = vpop.permute.xlu0 %1610 }
 0x40d   :  { %v1613_v33 = vpop.permute.xlu1 %1612 }
 0x40f   :  { %v1615_v25 = vpop.permute.xlu0 %1614 }
 0x411   :  { %v1617_v3 = vpop.permute.xlu1 %1616 }
 0x413   :  { %v1619_v22 = vpop.permute.xlu0 %1618 }
 0x415   :  { %v1621_v59 = vpop.permute.xlu1 %1620 }
 0x417   :  { %v1623_v20 = vpop.permute.xlu0 %1622 }
 0x419   :  { %v1625_v44 = vpop.permute.xlu1 %1624 }
 0x446   :  { %v1507_v56 = vpop.permute.xlu0 %1506 }
 0x447   :  { %v1648_v43 = vsel %vm1228_vm2, %v1507_v56, %v3030_v9 }
 0x448   :  { %v1664_v55 = vsel %vm1268_vm3, %v1648_v43, %v1603_v27  ;;  %v1509_v23 = vpop.permute.xlu1 %1508 }
 0x449   :  { %1681 = vst.msk [vmem:[%s3227_s7 + $0x10] sm:$0xff] %vm1678_vm4, %v1664_v55  ;;  %v1649_v42 = vsel %vm1228_vm2, %v1509_v23, %v3034_v14 }
 0x44a   :  { %v1665_v0 = vsel %vm1268_vm3, %v1649_v42, %v1605_v7  ;;  %v1503_v37 = vpop.permute.xlu0 %1502 }
 0x44b   :  { %1682 = vst.msk [vmem:[%s3227_s7 + $0x18] sm:$0xff] %vm1678_vm4, %v1665_v0  ;;  %v1646_v9 = vsel %vm1228_vm2, %v1503_v37, %v3020_v19 }
 0x44c   :  { %v1662_v61 = vsel %vm1268_vm3, %v1646_v9, %v1599_v28  ;;  %v1505_v39 = vpop.permute.xlu1 %1504 }
 0x44d   :  { %1679 = vst.msk [vmem:[%s3227_s7] sm:$0xff] %vm1678_vm4, %v1662_v61  ;;  %v1647_v14 = vsel %vm1228_vm2, %v1505_v39, %v3024_v13 }
 0x44e   :  { %v1663_v18 = vsel %vm1268_vm3, %v1647_v14, %v1601_v32 }
 0x44f   :  { %1680 = vst.msk [vmem:[%s3227_s7 + $0x8] sm:$0xff] %vm1678_vm4, %v1663_v18 }
 0x454   :  { %v1515_v46 = vpop.permute.xlu0 %1514 }
 0x455   :  { %v1652_v19 = vsel %vm1228_vm2, %v1515_v46, %v3046_v34 }
 0x456   :  { %v1668_v40 = vsel %vm1268_vm3, %v1652_v19, %v1611_v5  ;;  %v1517_v54 = vpop.permute.xlu1 %1516 }
 0x457   :  { %1685 = vst.msk [vmem:[%s3227_s7 + $0x30] sm:$0xff] %vm1678_vm4, %v1668_v40  ;;  %v1653_v13 = vsel %vm1228_vm2, %v1517_v54, %v3048_v50 }
 0x458   :  { %v1669_v45 = vsel %vm1268_vm3, %v1653_v13, %v1613_v33  ;;  %v1511_v29 = vpop.permute.xlu0 %1510 }
 0x459   :  { %1686 = vst.msk [vmem:[%s3227_s7 + $0x38] sm:$0xff] %vm1678_vm4, %v1669_v45  ;;  %v1650_v34 = vsel %vm1228_vm2, %v1511_v29, %v3037_v36 }
 0x45a   :  { %v1666_v51 = vsel %vm1268_vm3, %v1650_v34, %v1607_v57  ;;  %v1513_v30 = vpop.permute.xlu1 %1512 }
 0x45b   :  { %1683 = vst.msk [vmem:[%s3227_s7 + $0x20] sm:$0xff] %vm1678_vm4, %v1666_v51  ;;  %v1651_v50 = vsel %vm1228_vm2, %v1513_v30, %v3040_v63 }
 0x45c   :  { %v1667_v53 = vsel %vm1268_vm3, %v1651_v50, %v1609_v62 }
 0x45d   :  { %1684 = vst.msk [vmem:[%s3227_s7 + $0x28] sm:$0xff] %vm1678_vm4, %v1667_v53 }
 0x464   :  { %v1523_v11 = vpop.permute.xlu0 %1522 }
 0x465   :  { %v1656_v36 = vsel %vm1228_vm2, %v1523_v11, %v3056_v21 }
 0x466   :  { %v1672_v35 = vsel %vm1268_vm3, %v1656_v36, %v1619_v22  ;;  %v1525_v8 = vpop.permute.xlu1 %1524 }
 0x467   :  { %1689 = vst.msk [vmem:[%s3227_s7 + $0x50] sm:$0xff] %vm1678_vm4, %v1672_v35  ;;  %v1657_v63 = vsel %vm1228_vm2, %v1525_v8, %v3072_v49 }
 0x468   :  { %v1673_v1 = vsel %vm1268_vm3, %v1657_v63, %v1621_v59  ;;  %v1519_v48 = vpop.permute.xlu0 %1518 }
 0x469   :  { %1690 = vst.msk [vmem:[%s3227_s7 + $0x58] sm:$0xff] %vm1678_vm4, %v1673_v1  ;;  %v1654_v21 = vsel %vm1228_vm2, %v1519_v48, %v3050_v4 }
 0x46a   :  { %v1670_v6 = vsel %vm1268_vm3, %v1654_v21, %v1615_v25  ;;  %v1521_v47 = vpop.permute.xlu1 %1520 }
 0x46b   :  { %1687 = vst.msk [vmem:[%s3227_s7 + $0x40] sm:$0xff] %vm1678_vm4, %v1670_v6  ;;  %v1655_v49 = vsel %vm1228_vm2, %v1521_v47, %v3052_v38 }
 0x46c   :  { %v1671_v58 = vsel %vm1268_vm3, %v1655_v49, %v1617_v3  ;;  %v1531_v16 = vpop.permute.xlu0 %1530 }
 0x46d   :  { %1688 = vst.msk [vmem:[%s3227_s7 + $0x48] sm:$0xff] %vm1678_vm4, %v1671_v58  ;;  %v1660_v52 = vsel %vm1228_vm2, %v1531_v16, %v3068_v17 }
 0x46e   :  { %v1533_v4 = vpop.permute.xlu1 %1532 }
 0x46f   :  { %v1661_v28 = vsel %vm1228_vm2, %v1533_v4, %v3066_v60 }
 0x470   :  { %v1527_v41 = vpop.permute.xlu0 %1526 }
 0x471   :  { %v1658_v10 = vsel %vm1228_vm2, %v1527_v41, %v3064_v26 }
 0x472   :  { %v1674_v24 = vsel %vm1268_vm3, %v1658_v10, %v1623_v20  ;;  %v1529_v2 = vpop.permute.xlu1 %1528 }
 0x473   :  { %1691 = vst.msk [vmem:[%s3227_s7 + $0x60] sm:$0xff] %vm1678_vm4, %v1674_v24  ;;  %v1659_v38 = vsel %vm1228_vm2, %v1529_v2, %v3060_v15 }
 0x474   :  { %v1675_v31 = vsel %vm1268_vm3, %v1659_v38, %v1625_v44  ;;  %v1627_v12 = vpop.permute.xlu0 %1626 }
 0x475   :  { %1692 = vst.msk [vmem:[%s3227_s7 + $0x68] sm:$0xff] %vm1678_vm4, %v1675_v31  ;;  %v1676_v26 = vsel %vm1268_vm3, %v1660_v52, %v1627_v12 }
 0x476   :  { %1693 = vst.msk [vmem:[%s3227_s7 + $0x70] sm:$0xff] %vm1678_vm4, %v1676_v26  ;;  %v1629_v15 = vpop.permute.xlu1 %1628 }
 0x477   :  { %v1677_v17 = vsel %vm1268_vm3, %v1661_v28, %v1629_v15 }
 0x478   :  { %1694 = vst.msk [vmem:[%s3227_s7 + $0x78] sm:$0xff] %vm1678_vm4, %v1677_v17 }

// kernel: _lambda_.37
= control target key start
LH: loop header
LB: loop body
LE: loop exit
PB: predicated region body
PF: predicated region fallthrough
CT: control target
= control target key end

     0   :  { %vm94_vm0 = vcmask 1043456   ;;  %vm69_vm1 = vcmask 64512   ;;  %vm195_vm2 = vcmask 15360   ;;  %s385_s1 = inlined_call_operand.vmem [shape: bf16[8,2], index: 1, kind: input, shape index: {}]   ;;  %s386_s0 = inlined_call_operand.vmem [shape: bf16[128,8], index: 0, kind: input, shape index: {}]   ;;  %s387_s2 = inlined_call_operand.vmem [shape: f32[128,2], index: 2, kind: output, shape index: {}]  }
   0x1   :  { %v28_v0 = vld [vmem:[%s385_s1] sm:$0xf]  ;;  %v265_v4 = vld [vmem:[%s386_s0 + $0x8] sm:$0xff]   ;;  %v267_v6 = vld [vmem:[%s386_s0 + $0x10] sm:$0xff]  }
   0x2   :  { %261 = vmatprep.subr.msk.bf16.mxu0 %vm94_vm0, %v28_v0  ;;  %262 = vmatprep.subr.msk.bf16.mxu1 %vm94_vm0, %v28_v0  ;;  %v96_v1 = vsel %vm94_vm0, %v28_v0, 0  ;;  %v263_v2 = vld [vmem:[%s386_s0] sm:$0xff]   ;;  %v266_v5 = vld [vmem:[%s386_s0 + $0x28] sm:$0xff]   ;;  %v268_v7 = vld [vmem:[%s386_s0 + $0x30] sm:$0xff]  }
   0x3   :  { %242 = vmatpush3.bf16.msra.mxu0 %v96_v1  ;;  %260 = vmatpush3.bf16.msra.mxu1 %v96_v1  ;;  %v264_v3 = vld [vmem:[%s386_s0 + $0x20] sm:$0xff]   ;;  %v269_v8 = vld [vmem:[%s386_s0 + $0x18] sm:$0xff]  }
   0x4   :  { %243 = vmatprep.mubr.msk.bf16.mxu0 %vm69_vm1, %v263_v2  ;;  %251 = vmatprep.mubr.msk.bf16.mxu1 %vm69_vm1, %v264_v3  ;;  %v270_v9 = vld [vmem:[%s386_s0 + $0x38] sm:$0xff]  }
   0x6   :  { %244 = vmatmul.mubr.msk.bf16.vlgmr.msra.gmra.mrb[0].mxu0 %vm69_vm1, %v265_v4  ;;  %252 = vmatmul.mubr.msk.bf16.vlgmr.msra.gmra.mrb[0].mxu1 %vm69_vm1, %v266_v5 }
   0x7   :  { %247 = vmatprep.mubr.msk.bf16.mxu0 %vm69_vm1, %v267_v6  ;;  %255 = vmatprep.mubr.msk.bf16.mxu1 %vm69_vm1, %v268_v7 }
   0xe   :  { %248 = vmatmul.mubr.msk.bf16.gmra.mrb[4].mxu0 %vm69_vm1, %v269_v8  ;;  %256 = vmatmul.mubr.msk.bf16.gmra.mrb[4].mxu1 %vm69_vm1, %v270_v9 }
  0xd9   :  { %v245_v10 = vpop.f32.mrb[0].mxu0  ;;  %v253_v11 = vpop.f32.mrb[0].mxu1 }
  0xda   :  { %198 = vst.msk [vmem:[%s387_s2 + $0x10] sm:$0xff] %vm195_vm2, %v245_v10  ;;  %v132_v12 = vpop.f32.mrb[1].mxu0  ;;  %206 = vst.msk [vmem:[%s387_s2 + $0x50] sm:$0xff] %vm195_vm2, %v253_v11  ;;  %v164_v13 = vpop.f32.mrb[1].mxu1 }
  0xdb   :  { %196 = vst.msk [vmem:[%s387_s2] sm:$0xff] %vm195_vm2, %v132_v12  ;;  %v246_v14 = vpop.f32.mrb[2].mxu0  ;;  %204 = vst.msk [vmem:[%s387_s2 + $0x40] sm:$0xff] %vm195_vm2, %v164_v13  ;;  %v254_v15 = vpop.f32.mrb[2].mxu1 }
  0xdc   :  { %199 = vst.msk [vmem:[%s387_s2 + $0x18] sm:$0xff] %vm195_vm2, %v246_v14  ;;  %v135_v16 = vpop.f32.mrb[3].mxu0  ;;  %207 = vst.msk [vmem:[%s387_s2 + $0x58] sm:$0xff] %vm195_vm2, %v254_v15  ;;  %v167_v17 = vpop.f32.mrb[3].mxu1 }
  0xdd   :  { %197 = vst.msk [vmem:[%s387_s2 + $0x8] sm:$0xff] %vm195_vm2, %v135_v16  ;;  %205 = vst.msk [vmem:[%s387_s2 + $0x48] sm:$0xff] %vm195_vm2, %v167_v17 }
  0xe1   :  { %v249_v18 = vpop.f32.mrb[4].mxu0  ;;  %v257_v19 = vpop.f32.mrb[4].mxu1 }
  0xe2   :  { %202 = vst.msk [vmem:[%s387_s2 + $0x30] sm:$0xff] %vm195_vm2, %v249_v18  ;;  %v148_v20 = vpop.f32.mrb[5].mxu0  ;;  %210 = vst.msk [vmem:[%s387_s2 + $0x70] sm:$0xff] %vm195_vm2, %v257_v19  ;;  %v180_v21 = vpop.f32.mrb[5].mxu1 }
  0xe3   :  { %200 = vst.msk [vmem:[%s387_s2 + $0x20] sm:$0xff] %vm195_vm2, %v148_v20  ;;  %v250_v22 = vpop.f32.mrb[6].mxu0  ;;  %208 = vst.msk [vmem:[%s387_s2 + $0x60] sm:$0xff] %vm195_vm2, %v180_v21  ;;  %v258_v23 = vpop.f32.mrb[6].mxu1 }
  0xe4   :  { %203 = vst.msk [vmem:[%s387_s2 + $0x38] sm:$0xff] %vm195_vm2, %v250_v22  ;;  %v151_v24 = vpop.f32.mrb[7].mxu0  ;;  %211 = vst.msk [vmem:[%s387_s2 + $0x78] sm:$0xff] %vm195_vm2, %v258_v23  ;;  %v183_v25 = vpop.f32.mrb[7].mxu1 }
  0xe5   :  { %201 = vst.msk [vmem:[%s387_s2 + $0x28] sm:$0xff] %vm195_vm2, %v151_v24  ;;  %209 = vst.msk [vmem:[%s387_s2 + $0x68] sm:$0xff] %vm195_vm2, %v183_v25 }

// kernel: _lambda_.27
= control target key start
LH: loop header
LB: loop body
LE: loop exit
PB: predicated region body
PF: predicated region fallthrough
CT: control target
= control target key end

     0   :  { %s3669_s20 = smov 120   ;;  %vm397_vm0 = vcmask 1043456   ;;  %vm372_vm1 = vcmask 850944   ;;  %s3670_s17 = smov 16   ;;  %vm2278_vm2 = vcmask 64512   ;;  %vm2318_vm3 = vcmask 130048   ;;  %s5193_s3 = inlined_call_operand.vmem [shape: bf16[360,88], index: 3, kind: input, shape index: {}]   ;;  %s5194_s5 = inlined_call_operand.vmem [shape: f32[1,16], index: 5, kind: input, shape index: {}]   ;;  %s5195_s0 = inlined_call_operand.vmem [shape: bf16[128,360], index: 0, kind: input, shape index: {}]   ;;  %s5196_s1 = inlined_call_operand.vmem [shape: f32[128,8], index: 1, kind: input, shape index: {}]   ;;  %s5197_s6 = inlined_call_operand.vmem [shape: f32[1,8], index: 6, kind: input, shape index: {}]   ;;  %s5198_s2 = inlined_call_operand.vmem [shape: f32[128,8], index: 2, kind: input, shape index: {}]   ;;  %s5199_s4 = inlined_call_operand.vmem [shape: f32[1,88], index: 4, kind: input, shape index: {}]   ;;  %s5200_s7 = inlined_call_operand.vmem [shape: bf16[16,8], index: 7, kind: input, shape index: {}]   ;;  %s5201_s8 = inlined_call_operand.vmem [shape: f32[1,8], index: 8, kind: input, shape index: {}]   ;;  %s5202_s9 = inlined_call_operand.vmem [shape: f32[128,32], index: 9, kind: output, shape index: {}]  }
   0x1   :  { %v3132_v0 = vld [vmem:[%s5193_s3 + $0x40] sm:$0xff]   ;;  %v3134_v2 = vld [vmem:[%s5193_s3 + $0x48] sm:$0xff]   ;;  %v3137_v5 = vld [vmem:[%s5193_s3 + $0x50] sm:$0xff]   ;;  %s3671_s11 = smov 72   ;;  %s3677_s30 = smov 88   ;;  %vm2744_vm4 = vcmask 195584  }
   0x2   :  { %v3133_v1 = vld [vmem:[%s5193_s3] sm:$0xff]   ;;  %2946 = vmatprep.subr.bf16.mxu0 %v3132_v0  ;;  %v3135_v3 = vld [vmem:[%s5193_s3 + $0x8] sm:$0xff]   ;;  %v3138_v6 = vld [vmem:[%s5193_s3 + $0x10] sm:$0xff]   ;;  %vm2761_vm5 = vcmask 261120  }
   0x3   :  { %2947 = vmatpush3.bf16.msra.mxu0 %v3133_v1  ;;  %v3136_v4 = vld [vmem:[%s5193_s3 + $0x80] sm:$0xff]   ;;  %v3139_v7 = vld [vmem:[%s5193_s3 + $0x88] sm:$0xff]   ;;  %v3140_v8 = vld [vmem:[%s5193_s3 + $0x58] sm:$0xff]  }
   0x4   :  { %2948 = vmatprep.subr.bf16.mxu0 %v3134_v2  ;;  %3034 = vmatprep.subr.bf16.mxu1 %v3136_v4  ;;  %v3142_v9 = vld [vmem:[%s5193_s3 + $0x90] sm:$0xff]   ;;  %v3141_v10 = vld [vmem:[%s5193_s3 + $0x18] sm:$0xff]   ;;  %v3143_v11 = vld [vmem:[%s5193_s3 + $0x60] sm:$0xff]  }
   0x5   :  { %3035 = vmatpush3.bf16.msra.mxu1 %v3136_v4  ;;  %v3145_v12 = vld [vmem:[%s5193_s3 + $0x98] sm:$0xff]   ;;  %v3770_v13 = vld [vmem:[%s5194_s5] ss:$0 sm:$0xff]  ;;  %v3146_v15 = vld [vmem:[%s5193_s3 + $0x68] sm:$0xff]  }
   0x6   :  { %3036 = vmatprep.subr.bf16.mxu1 %v3139_v7  ;;  %v3144_v14 = vld [vmem:[%s5193_s3 + $0x20] sm:$0xff]   ;;  %746 = vrot.lane.b32.xlu0 %v3770_v13, %s3669_s20  ;;  %v3147_v17 = vld [vmem:[%s5193_s3 + $0x28] sm:$0xff]   ;;  %v3149_v18 = vld [vmem:[%s5193_s3 + $0x70] sm:$0xff]  }
   0x7   :  { %2949 = vmatpush3.bf16.msra.mxu0 %v3135_v3  ;;  %v3148_v16 = vld [vmem:[%s5193_s3 + $0xa0] sm:$0xff]   ;;  %v3151_v19 = vld [vmem:[%s5193_s3 + $0xa8] sm:$0xff]   ;;  %v3150_v20 = vld [vmem:[%s5193_s3 + $0x30] sm:$0xff]  }
   0x8   :  { %2950 = vmatprep.subr.bf16.mxu0 %v3137_v5  ;;  %v3152_v21 = vld [vmem:[%s5193_s3 + $0x78] sm:$0xff]   ;;  %v3154_v22 = vld [vmem:[%s5193_s3 + $0xb0] ss:$0 sps:$4 sm:$0xff]   ;;  %v3158_v24 = vld [vmem:[%s5195_s0 + $0x8] ss:$12 sps:$4 sm:$0xff]  }
   0x9   :  { %3037 = vmatpush3.bf16.msra.mxu1 %v3139_v7  ;;  %v3157_v23 = vld [vmem:[%s5195_s0 + $0x4] ss:$12 sps:$4 sm:$0xff]   ;;  %v3153_v25 = vld [vmem:[%s5193_s3 + $0x38] sm:$0xff]   ;;  %v399_v26 = vsel %vm397_vm0, %v3154_v22, 0  ;;  %v3155_v27 = vld [vmem:[%s5195_s0] ss:$12 sps:$4 sm:$0xff]   ;;  %3048 = vmatprep.mubr.msk.bf16.mxu1 %vm372_vm1, %v3158_v24 }
   0xa   :  { %3038 = vmatprep.subr.bf16.mxu1 %v3142_v9  ;;  %433 = vmatprep.mubr.bf16.mxu0 %v3157_v23  ;;  %v3159_v28 = vld [vmem:[%s5195_s0 + $0x20] ss:$12 sps:$4 sm:$0xff]   ;;  %v3160_v29 = vld [vmem:[%s5195_s0 + $0x1c] ss:$12 sps:$4 sm:$0xff]   ;;  %v3166_v30 = vld [vmem:[%s5195_s0 + $0x38] ss:$12 sps:$4 sm:$0xff]  }
   0xb   :  { %2951 = vmatpush3.bf16.msra.mxu0 %v3138_v6  ;;  %v3162_v31 = vld [vmem:[%s5195_s0 + $0x18] ss:$12 sps:$4 sm:$0xff]   ;;  %v3163_v33 = vld [vmem:[%s5195_s0 + $0x34] ss:$12 sps:$4 sm:$0xff]   ;;  %v3167_v34 = vld [vmem:[%s5195_s0 + $0x50] ss:$12 sps:$4 sm:$0xff]  }
   0xc   :  { %2952 = vmatprep.subr.bf16.mxu0 %v3140_v8  ;;  %v3831_v32 = vld [vmem:[%s5196_s1] sm:$0xff]  ;;  %v3174_v35 = vld [vmem:[%s5195_s0 + $0x68] ss:$12 sps:$4 sm:$0xff]   ;;  %v3859_v38 = vld [vmem:[%s5196_s1 + $0x18] sm:$0xff] }
   0xd   :  { %3039 = vmatpush3.bf16.msra.mxu1 %v3142_v9  ;;  %989 = vrot.lane.b32.xlu1 %v3831_v32, %s3670_s17  ;;  %v3847_v36 = vld [vmem:[%s5196_s1 + $0x8] sm:$0xff]  ;;  %v3854_v37 = vld [vmem:[%s5196_s1 + $0x10] sm:$0xff]  ;;  %v2871_v39 = vld [vmem:[%s5197_s6] ss:$0 sm:$0xff] }
   0xe   :  { %3040 = vmatprep.subr.bf16.mxu1 %v3145_v12  ;;  %991 = vrot.lane.b32.xlu0 %v3847_v36, %s3670_s17  ;;  %v3873_v40 = vld [vmem:[%s5196_s1 + $0x20] sm:$0xff]  ;;  %v3165_v41 = vld [vmem:[%s5195_s0 + $0x30] ss:$12 sps:$4 sm:$0xff]   ;;  %v3168_v43 = vld [vmem:[%s5195_s0 + $0x4c] ss:$12 sps:$4 sm:$0xff]  }
   0xf   :  { %2953 = vmatpush3.bf16.msra.mxu0 %v3141_v10  ;;  %v3175_v42 = vld [vmem:[%s5195_s0 + $0x80] ss:$12 sps:$4 sm:$0xff]   ;;  %v3182_v44 = vld [vmem:[%s5195_s0 + $0x98] ss:$12 sps:$4 sm:$0xff]   ;;  %v3898_v46 = vld [vmem:[%s5196_s1 + $0x30] sm:$0xff] }
  0x10   :  { %2954 = vmatprep.subr.bf16.mxu0 %v3143_v11  ;;  %v3893_v45 = vld [vmem:[%s5196_s1 + $0x28] sm:$0xff]  ;;  %v3909_v47 = vld [vmem:[%s5196_s1 + $0x38] sm:$0xff]  ;;  %v3914_v48 = vld [vmem:[%s5196_s1 + $0x40] sm:$0xff] }
  0x11   :  { %3041 = vmatpush3.bf16.msra.mxu1 %v3145_v12  ;;  %993 = vrot.lane.b32.xlu1 %v3854_v37, %s3670_s17  ;;  %v3170_v49 = vld [vmem:[%s5195_s0 + $0x48] ss:$12 sps:$4 sm:$0xff]   ;;  %v3183_v50 = vld [vmem:[%s5195_s0 + $0xb0] ss:$12 sps:$4 sm:$0xff]   ;;  %v3952_v55 = vld [vmem:[%s5196_s1 + $0x60] sm:$0xff] }
  0x12   :  { %3042 = vmatprep.subr.bf16.mxu1 %v3148_v16  ;;  %995 = vrot.lane.b32.xlu0 %v3859_v38, %s3670_s17  ;;  %v3171_v51 = vld [vmem:[%s5195_s0 + $0x64] ss:$12 sps:$4 sm:$0xff]   ;;  %v3932_v52 = vld [vmem:[%s5196_s1 + $0x48] sm:$0xff]  ;;  %v3947_v54 = vld [vmem:[%s5196_s1 + $0x58] sm:$0xff] }
  0x13   :  { %2955 = vmatpush3.bf16.msra.mxu0 %v3144_v14  ;;  %v3937_v53 = vld [vmem:[%s5196_s1 + $0x50] sm:$0xff]  ;;  %v3173_v56 = vld [vmem:[%s5195_s0 + $0x60] ss:$12 sps:$4 sm:$0xff]   ;;  %v3176_v57 = vld [vmem:[%s5195_s0 + $0x7c] ss:$12 sps:$4 sm:$0xff]  }
  0x14   :  { %2956 = vmatprep.subr.bf16.mxu0 %v3146_v15  ;;  %v3967_v58 = vld [vmem:[%s5196_s1 + $0x68] sm:$0xff]  ;;  %v3972_v59 = vld [vmem:[%s5196_s1 + $0x70] sm:$0xff]  ;;  %v3981_v60 = vld [vmem:[%s5196_s1 + $0x78] sm:$0xff] }
  0x15   :  { %3043 = vmatpush3.bf16.msra.mxu1 %v3148_v16  ;;  %1219 = vrot.lane.b32.xlu1 %v2871_v39, %s3670_s17  ;;  %v1894_v61 = vld [vmem:[%s5198_s2] sm:$0xff]  ;;  %v1895_v0 = vld [vmem:[%s5198_s2 + $0x8] sm:$0xff]  ;;  %v1896_v1 = vld [vmem:[%s5198_s2 + $0x10] sm:$0xff] }
  0x16   :  { %3044 = vmatprep.subr.bf16.mxu1 %v3151_v19  ;;  %997 = vrot.lane.b32.xlu0 %v3873_v40, %s3670_s17  ;;  %v3178_v62 = vld [vmem:[%s5195_s0 + $0x78] ss:$12 sps:$4 sm:$0xff]   ;;  %v3179_v63 = vld [vmem:[%s5195_s0 + $0x94] ss:$12 sps:$4 sm:$0xff]   ;;  %v3181_v4 = vld [vmem:[%s5195_s0 + $0x90] ss:$12 sps:$4 sm:$0xff]  }
  0x17   :  { %2957 = vmatpush3.bf16.msra.mxu0 %v3147_v17  ;;  %v1897_v2 = vld [vmem:[%s5198_s2 + $0x18] sm:$0xff]  ;;  %v1898_v3 = vld [vmem:[%s5198_s2 + $0x20] sm:$0xff]  ;;  %v1899_v6 = vld [vmem:[%s5198_s2 + $0x28] sm:$0xff] }
  0x18   :  { %2958 = vmatprep.subr.bf16.mxu0 %v3149_v18  ;;  %v3184_v5 = vld [vmem:[%s5195_s0 + $0xac] ss:$12 sps:$4 sm:$0xff]   ;;  %v1900_v7 = vld [vmem:[%s5198_s2 + $0x30] sm:$0xff]  ;;  %v1902_v9 = vld [vmem:[%s5198_s2 + $0x40] sm:$0xff] }
  0x19   :  { %3045 = vmatpush3.bf16.msra.mxu1 %v3151_v19  ;;  %999 = vrot.lane.b32.xlu1 %v3893_v45, %s3670_s17  ;;  %v1901_v8 = vld [vmem:[%s5198_s2 + $0x38] sm:$0xff]  ;;  %v3186_v10 = vld [vmem:[%s5195_s0 + $0xa8] ss:$12 sps:$4 sm:$0xff]   ;;  %v4083_v39 = vld [vmem:[%s5199_s4] ss:$0 sm:$0xff] }
  0x1a   :  { %3082 = vmatprep.subr.msk.bf16.mxu1 %vm397_vm0, %v3154_v22  ;;  %1001 = vrot.lane.b32.xlu0 %v3898_v46, %s3670_s17  ;;  %v1903_v11 = vld [vmem:[%s5198_s2 + $0x48] sm:$0xff]  ;;  %v1904_v12 = vld [vmem:[%s5198_s2 + $0x50] sm:$0xff]  ;;  %v1905_v14 = vld [vmem:[%s5198_s2 + $0x58] sm:$0xff] }
  0x1b   :  { %2959 = vmatpush3.bf16.msra.mxu0 %v3150_v20 }
  0x1c   :  { %2960 = vmatprep.subr.bf16.mxu0 %v3152_v21 }
  0x1d   :  { %3047 = vmatpush3.bf16.msra.mxu1 %v399_v26  ;;  %1003 = vrot.lane.b32.xlu1 %v3909_v47, %s3670_s17 }
  0x1e   :  { %1005 = vrot.lane.b32.xlu0 %v3914_v48, %s3670_s17 }
  0x1f   :  { %2961 = vmatpush3.bf16.msra.mxu0 %v3153_v25 }
  0x20   :  { %3049 = vmatmul.mubr.msk.bf16.vlgmr.msra.gmra.mrb[0].mxu1 %vm372_vm1, %v3159_v28 }
  0x21   :  { %3052 = vmatprep.mubr.msk.bf16.mxu1 %vm372_vm1, %v3166_v30  ;;  %1007 = vrot.lane.b32.xlu1 %v3932_v52, %s3670_s17 }
  0x22   :  { %434 = vmatmul.mubr.bf16.vlgmr.msra.gmra.mrb[0].mxu0 %v3155_v27  ;;  %1009 = vrot.lane.b32.xlu0 %v3937_v53, %s3670_s17 }
  0x23   :  { %441 = vmatprep.mubr.bf16.mxu0 %v3160_v29 }
  0x25   :  { %1011 = vrot.lane.b32.xlu1 %v3947_v54, %s3670_s17 }
  0x26   :  { %1013 = vrot.lane.b32.xlu0 %v3952_v55, %s3670_s17 }
  0x28   :  { %3053 = vmatmul.mubr.msk.bf16.gmra.mrb[4].mxu1 %vm372_vm1, %v3167_v34 }
  0x29   :  { %3056 = vmatprep.mubr.msk.bf16.mxu1 %vm372_vm1, %v3174_v35  ;;  %1015 = vrot.lane.b32.xlu1 %v3967_v58, %s3670_s17 }
  0x2a   :  { %442 = vmatmul.mubr.bf16.gmra.mrb[4].mxu0 %v3162_v31  ;;  %1017 = vrot.lane.b32.xlu0 %v3972_v59, %s3670_s17 }
  0x2b   :  { %449 = vmatprep.mubr.bf16.mxu0 %v3163_v33 }
  0x2d   :  { %1019 = vrot.lane.b32.xlu1 %v3981_v60, %s3670_s17 }
  0x2e   :  { %1926 = vrot.lane.b32.xlu0 %v1894_v61, %s3671_s11 }
  0x30   :  { %3057 = vmatmul.mubr.msk.bf16.gmra.mrb[8].mxu1 %vm372_vm1, %v3175_v42 }
  0x31   :  { %3060 = vmatprep.mubr.msk.bf16.mxu1 %vm372_vm1, %v3182_v44  ;;  %1928 = vrot.lane.b32.xlu1 %v1895_v0, %s3671_s11 }
  0x32   :  { %450 = vmatmul.mubr.bf16.gmra.mrb[8].mxu0 %v3165_v41  ;;  %1930 = vrot.lane.b32.xlu0 %v1896_v1, %s3671_s11 }
  0x33   :  { %457 = vmatprep.mubr.bf16.mxu0 %v3168_v43 }
  0x35   :  { %1932 = vrot.lane.b32.xlu1 %v1897_v2, %s3671_s11 }
  0x36   :  { %1934 = vrot.lane.b32.xlu0 %v1898_v3, %s3671_s11 }
  0x38   :  { %3061 = vmatmul.mubr.msk.bf16.gmra.mrb[12].mxu1 %vm372_vm1, %v3183_v50 }
  0x39   :  { %1936 = vrot.lane.b32.xlu1 %v1899_v6, %s3671_s11 }
  0x3a   :  { %458 = vmatmul.mubr.bf16.gmra.mrb[12].mxu0 %v3170_v49  ;;  %1938 = vrot.lane.b32.xlu0 %v1900_v7, %s3671_s11 }
  0x3b   :  { %465 = vmatprep.mubr.bf16.mxu0 %v3171_v51 }
  0x3d   :  { %1940 = vrot.lane.b32.xlu1 %v1901_v8, %s3671_s11 }
  0x3e   :  { %1942 = vrot.lane.b32.xlu0 %v1902_v9, %s3671_s11 }
  0x41   :  { %1944 = vrot.lane.b32.xlu1 %v1903_v11, %s3671_s11 }
  0x42   :  { %466 = vmatmul.mubr.bf16.gmra.mrb[16].mxu0 %v3173_v56  ;;  %1946 = vrot.lane.b32.xlu0 %v1904_v12, %s3671_s11 }
  0x43   :  { %473 = vmatprep.mubr.bf16.mxu0 %v3176_v57 }
  0x45   :  { %1948 = vrot.lane.b32.xlu1 %v1905_v14, %s3671_s11 }
  0x4a   :  { %474 = vmatmul.mubr.bf16.gmra.mrb[20].mxu0 %v3178_v62 }
  0x4b   :  { %481 = vmatprep.mubr.bf16.mxu0 %v3179_v63 }
  0x52   :  { %482 = vmatmul.mubr.bf16.gmra.mrb[24].mxu0 %v3181_v4 }
  0x53   :  { %489 = vmatprep.mubr.bf16.mxu0 %v3184_v5 }
  0x5a   :  { %490 = vmatmul.mubr.bf16.gmra.mrb[28].mxu0 %v3186_v10 }
  0x78   :  { %v747_v15 = vpop.permute.xlu0 %746 }
  0x79   :  { %v749_v16 = vmul.f32 %v747_v15, %v3831_v32  ;;  %v750_v17 = vmul.f32 %v747_v15, %v3847_v36  ;;  %v751_v18 = vmul.f32 %v747_v15, %v3854_v37  ;;  %v752_v19 = vmul.f32 %v747_v15, %v3859_v38 }
  0x7a   :  { %v753_v20 = vmul.f32 %v747_v15, %v3873_v40  ;;  %v754_v21 = vmul.f32 %v747_v15, %v3893_v45  ;;  %v755_v22 = vmul.f32 %v747_v15, %v3898_v46  ;;  %v756_v23 = vmul.f32 %v747_v15, %v3909_v47 }
  0x7b   :  { %781 = vrot.lane.b32.xlu1 %v749_v16, %s3670_s17  ;;  %783 = vrot.lane.b32.xlu0 %v750_v17, %s3670_s17  ;;  %v757_v24 = vmul.f32 %v747_v15, %v3914_v48  ;;  %v758_v25 = vmul.f32 %v747_v15, %v3932_v52  ;;  %v759_v26 = vmul.f32 %v747_v15, %v3937_v53 }
  0x7c   :  { %v760_v27 = vmul.f32 %v747_v15, %v3947_v54  ;;  %v761_v28 = vmul.f32 %v747_v15, %v3952_v55  ;;  %v762_v29 = vmul.f32 %v747_v15, %v3967_v58  ;;  %v763_v30 = vmul.f32 %v747_v15, %v3972_v59 }
  0x7d   :  { %v764_v31 = vmul.f32 %v747_v15, %v3981_v60 }
  0x7f   :  { %785 = vrot.lane.b32.xlu1 %v751_v18, %s3670_s17  ;;  %787 = vrot.lane.b32.xlu0 %v752_v19, %s3670_s17  ;;  %v4089_v62 = vpop.permute.xlu1 %989 }
  0x80   :  { %v4094_v1 = vpop.permute.xlu0 %991 }
  0x83   :  { %789 = vrot.lane.b32.xlu1 %v753_v20, %s3670_s17  ;;  %791 = vrot.lane.b32.xlu0 %v754_v21, %s3670_s17  ;;  %v4101_v15 = vpop.permute.xlu1 %993 }
  0x84   :  { %v4105_v18 = vpop.permute.xlu0 %995 }
  0x87   :  { %793 = vrot.lane.b32.xlu1 %v755_v22, %s3670_s17  ;;  %795 = vrot.lane.b32.xlu0 %v756_v23, %s3670_s17 }
  0x8b   :  { %797 = vrot.lane.b32.xlu1 %v757_v24, %s3670_s17  ;;  %799 = vrot.lane.b32.xlu0 %v758_v25, %s3670_s17 }
  0x8f   :  { %801 = vrot.lane.b32.xlu1 %v759_v26, %s3670_s17  ;;  %803 = vrot.lane.b32.xlu0 %v760_v27, %s3670_s17 }
  0x93   :  { %805 = vrot.lane.b32.xlu1 %v761_v28, %s3670_s17  ;;  %807 = vrot.lane.b32.xlu0 %v762_v29, %s3670_s17 }
  0x97   :  { %809 = vrot.lane.b32.xlu1 %v763_v30, %s3670_s17  ;;  %811 = vrot.lane.b32.xlu0 %v764_v31, %s3670_s17 }
  0xf3   :  { %v3050_v34 = vpop.f32.mrb[0].mxu1 }
  0xf4   :  { %v532_v41 = vpop.f32.mrb[1].mxu1 }
  0xf5   :  { %v2962_v33 = vpop.f32.mrb[0].mxu0  ;;  %v3051_v44 = vpop.f32.mrb[2].mxu1 }
  0xf6   :  { %v2963_v35 = vpop.f32.mrb[1].mxu0  ;;  %v535_v50 = vpop.f32.mrb[3].mxu1 }
  0xf7   :  { %v2964_v42 = vadd.f32 %v2963_v35, %v2962_v33  ;;  %v2965_v43 = vpop.f32.mrb[2].mxu0 }
  0xf8   :  { %v2966_v49 = vpop.f32.mrb[3].mxu0 }
  0xf9   :  { %v436_v51 = vadd.f32 %v2964_v42, %v4083_v39  ;;  %v2967_v56 = vadd.f32 %v2966_v49, %v2965_v43  ;;  %v4123_v42 = vpop.permute.xlu0 %997 }
  0xfb   :  { %v4086_v57 = vadd.f32 %v532_v41, %v436_v51  ;;  %v439_v61 = vadd.f32 %v2967_v56, %v4083_v39  ;;  %v3054_v5 = vpop.f32.mrb[4].mxu1 }
  0xfc   :  { %v548_v7 = vpop.f32.mrb[5].mxu1 }
  0xfd   :  { %v4091_v63 = vadd.f32 %v535_v50, %v439_v61  ;;  %v2968_v0 = vpop.f32.mrb[4].mxu0  ;;  %3188 = vtanh.f32 %v4086_v57  ;;  %v3055_v10 = vpop.f32.mrb[6].mxu1 }
  0xfe   :  { %v2969_v2 = vpop.f32.mrb[5].mxu0  ;;  %v551_v11 = vpop.f32.mrb[7].mxu1 }
  0xff   :  { %v2970_v3 = vadd.f32 %v2969_v2, %v2968_v0  ;;  %v2971_v4 = vpop.f32.mrb[6].mxu0  ;;  %3190 = vtanh.f32 %v4091_v63 }
 0x100   :  { %v2972_v6 = vpop.f32.mrb[7].mxu0 }
 0x101   :  { %v444_v8 = vadd.f32 %v2970_v3, %v4083_v39  ;;  %v2973_v9 = vadd.f32 %v2972_v6, %v2971_v4 }
 0x103   :  { %v4098_v12 = vadd.f32 %v3050_v34, %v444_v8  ;;  %v447_v14 = vadd.f32 %v2973_v9, %v4083_v39  ;;  %v4109_v23 = vpop.f32.mrb[8].mxu1  ;;  %v4119_v34 = vpop.permute.xlu1 %1219 }
 0x104   :  { %v564_v25 = vpop.f32.mrb[9].mxu1 }
 0x105   :  { %v4103_v16 = vadd.f32 %v3051_v44, %v447_v14  ;;  %v2974_v17 = vpop.f32.mrb[8].mxu0  ;;  %3192 = vtanh.f32 %v4098_v12  ;;  %v4113_v29 = vpop.f32.mrb[10].mxu1 }
 0x106   :  { %v2975_v19 = vpop.f32.mrb[9].mxu0  ;;  %v567_v30 = vpop.f32.mrb[11].mxu1 }
 0x107   :  { %v3189_v20 = vpop.eup %3188  ;;  %v2976_v21 = vadd.f32 %v2975_v19, %v2974_v17  ;;  %v2977_v22 = vpop.f32.mrb[10].mxu0  ;;  %3194 = vtanh.f32 %v4103_v16 }
 0x108   :  { %v2978_v24 = vpop.f32.mrb[11].mxu0  ;;  %1069 = vrot.lane.b32.xlu0 %v3189_v20, %s3669_s20  ;;  %v4139_v9 = vpop.permute.xlu1 %999 }
 0x109   :  { %v3191_v26 = vpop.eup %3190  ;;  %v2979_v27 = vadd.f32 %v2978_v24, %v2977_v22  ;;  %v452_v28 = vadd.f32 %v2976_v21, %v4083_v39  ;;  %5222 = vst [vmem:[#allocation2_spill] sm:$0xff] %v4139_v9  ;;  %v4143_v17 = vpop.permute.xlu0 %1001 }
 0x10a   :  { %1071 = vrot.lane.b32.xlu1 %v3191_v26, %s3669_s20  ;;  %5223 = vst [vmem:[#allocation3_spill] sm:$0xff] %v4143_v17 }
 0x10b   :  { %v4116_v31 = vadd.f32 %v548_v7, %v452_v28  ;;  %v455_v33 = vadd.f32 %v2979_v27, %v4083_v39  ;;  %v4127_v50 = vpop.f32.mrb[12].mxu1 }
 0x10c   :  { %v4129_v61 = vpop.f32.mrb[13].mxu1 }
 0x10d   :  { %v4121_v35 = vadd.f32 %v551_v11, %v455_v33  ;;  %v2980_v41 = vpop.f32.mrb[12].mxu0  ;;  %3196 = vtanh.f32 %v4116_v31  ;;  %v4133_v4 = vpop.f32.mrb[14].mxu1 }
 0x10e   :  { %v2981_v43 = vpop.f32.mrb[13].mxu0  ;;  %v583_v6 = vpop.f32.mrb[15].mxu1 }
 0x10f   :  { %v2982_v44 = vadd.f32 %v2981_v43, %v2980_v41  ;;  %v2983_v49 = vpop.f32.mrb[14].mxu0  ;;  %3198 = vtanh.f32 %v4121_v35  ;;  %v3193_v51 = vpop.eup %3192 }
 0x110   :  { %v2984_v56 = vpop.f32.mrb[15].mxu0  ;;  %1073 = vrot.lane.b32.xlu1 %v3193_v51, %s3669_s20  ;;  %v4155_v41 = vpop.permute.xlu0 %1005 }
 0x111   :  { %v3195_v0 = vpop.eup %3194  ;;  %v460_v2 = vadd.f32 %v2982_v44, %v4083_v39  ;;  %v2985_v3 = vadd.f32 %v2984_v56, %v2983_v49  ;;  %5225 = vst [vmem:[#allocation5_spill] sm:$0xff] %v4155_v41 }
 0x112   :  { %1075 = vrot.lane.b32.xlu0 %v3195_v0, %s3669_s20 }
 0x113   :  { %v4136_v7 = vadd.f32 %v3054_v5, %v460_v2  ;;  %v463_v8 = vadd.f32 %v2985_v3, %v4083_v39 }
 0x115   :  { %v4141_v11 = vadd.f32 %v3055_v10, %v463_v8  ;;  %v2986_v14 = vpop.f32.mrb[16].mxu0  ;;  %3200 = vtanh.f32 %v4136_v7  ;;  %v4149_v10 = vpop.permute.xlu1 %1003 }
 0x116   :  { %v2987_v19 = vpop.f32.mrb[17].mxu0  ;;  %5224 = vst [vmem:[#allocation4_spill] sm:$0xff] %v4149_v10 }
 0x117   :  { %v2988_v20 = vadd.f32 %v2987_v19, %v2986_v14  ;;  %v2989_v21 = vpop.f32.mrb[18].mxu0  ;;  %3202 = vtanh.f32 %v4141_v11  ;;  %v3197_v22 = vpop.eup %3196 }
 0x118   :  { %v2990_v24 = vpop.f32.mrb[19].mxu0  ;;  %1077 = vrot.lane.b32.xlu1 %v3197_v22, %s3669_s20 }
 0x119   :  { %v3199_v5 = vpop.eup %3198  ;;  %v2991_v26 = vadd.f32 %v2990_v24, %v2989_v21  ;;  %v468_v27 = vadd.f32 %v2988_v20, %v4083_v39  ;;  %v4161_v2 = vpop.permute.xlu1 %1007 }
 0x11a   :  { %1079 = vrot.lane.b32.xlu0 %v3199_v5, %s3669_s20  ;;  %5226 = vst [vmem:[#allocation6_spill] sm:$0xff] %v4161_v2 }
 0x11b   :  { %v4152_v28 = vadd.f32 %v564_v25, %v468_v27  ;;  %v471_v33 = vadd.f32 %v2991_v26, %v4083_v39 }
 0x11d   :  { %v4157_v43 = vadd.f32 %v567_v30, %v471_v33  ;;  %v2992_v44 = vpop.f32.mrb[20].mxu0  ;;  %3204 = vtanh.f32 %v4152_v28  ;;  %v4165_v30 = vpop.permute.xlu0 %1009 }
 0x11e   :  { %v2993_v49 = vpop.f32.mrb[21].mxu0  ;;  %5227 = vst [vmem:[#allocation7_spill] sm:$0xff] %v4165_v30  ;;  %v4175_v24 = vpop.permute.xlu1 %1011 }
 0x11f   :  { %v2994_v51 = vadd.f32 %v2993_v49, %v2992_v44  ;;  %v2995_v56 = vpop.f32.mrb[22].mxu0  ;;  %3206 = vtanh.f32 %v4157_v43  ;;  %v3201_v0 = vpop.eup %3200  ;;  %5228 = vst [vmem:[#allocation8_spill] sm:$0xff] %v4175_v24 }
 0x120   :  { %v2996_v3 = vpop.f32.mrb[23].mxu0  ;;  %1081 = vrot.lane.b32.xlu1 %v3201_v0, %s3669_s20 }
 0x121   :  { %v3203_v25 = vpop.eup %3202  ;;  %v476_v8 = vadd.f32 %v2994_v51, %v4083_v39  ;;  %v2997_v14 = vadd.f32 %v2996_v3, %v2995_v56  ;;  %v4179_v44 = vpop.permute.xlu0 %1013 }
 0x122   :  { %1083 = vrot.lane.b32.xlu0 %v3203_v25, %s3669_s20  ;;  %5229 = vst [vmem:[#allocation9_spill] sm:$0xff] %v4179_v44  ;;  %v4188_v3 = vpop.permute.xlu1 %1015 }
 0x123   :  { %v4169_v19 = vadd.f32 %v4109_v23, %v476_v8  ;;  %v479_v20 = vadd.f32 %v2997_v14, %v4083_v39  ;;  %5230 = vst [vmem:[#allocation10_spill] sm:$0xff] %v4188_v3 }
 0x125   :  { %v4173_v21 = vadd.f32 %v4113_v29, %v479_v20  ;;  %v2998_v22 = vpop.f32.mrb[24].mxu0  ;;  %3208 = vtanh.f32 %v4169_v19  ;;  %v4192_v14 = vpop.permute.xlu0 %1017 }
 0x126   :  { %v2999_v5 = vpop.f32.mrb[25].mxu0  ;;  %5231 = vst [vmem:[#allocation11_spill] sm:$0xff] %v4192_v14 }
 0x127   :  { %v3000_v26 = vadd.f32 %v2999_v5, %v2998_v22  ;;  %v3001_v27 = vpop.f32.mrb[26].mxu0  ;;  %3210 = vtanh.f32 %v4173_v21  ;;  %v3205_v33 = vpop.eup %3204 }
 0x128   :  { %v3002_v23 = vpop.f32.mrb[27].mxu0  ;;  %1085 = vrot.lane.b32.xlu1 %v3205_v33, %s3669_s20 }
 0x129   :  { %v3207_v49 = vpop.eup %3206  ;;  %v3003_v51 = vadd.f32 %v3002_v23, %v3001_v27  ;;  %v484_v29 = vadd.f32 %v3000_v26, %v4083_v39 }
 0x12a   :  { %1087 = vrot.lane.b32.xlu0 %v3207_v49, %s3669_s20 }
 0x12b   :  { %v4185_v56 = vadd.f32 %v4129_v61, %v484_v29  ;;  %v487_v0 = vadd.f32 %v3003_v51, %v4083_v39  ;;  %v4205_v29 = vpop.permute.xlu0 %1926 }
 0x12c   :  { %5233 = vst [vmem:[#allocation13_spill] sm:$0xff] %v4205_v29 }
 0x12d   :  { %v4190_v25 = vadd.f32 %v583_v6, %v487_v0  ;;  %v3004_v8 = vpop.f32.mrb[28].mxu0  ;;  %3212 = vtanh.f32 %v4185_v56  ;;  %v4198_v6 = vpop.permute.xlu1 %1019 }
 0x12e   :  { %v3005_v20 = vpop.f32.mrb[29].mxu0  ;;  %5232 = vst [vmem:[#allocation12_spill] sm:$0xff] %v4198_v6 }
 0x12f   :  { %v3006_v22 = vadd.f32 %v3005_v20, %v3004_v8  ;;  %v3007_v5 = vpop.f32.mrb[30].mxu0  ;;  %3214 = vtanh.f32 %v4190_v25  ;;  %v3209_v26 = vpop.eup %3208 }
 0x130   :  { %v3008_v27 = vpop.f32.mrb[31].mxu0  ;;  %1089 = vrot.lane.b32.xlu1 %v3209_v26, %s3669_s20 }
 0x131   :  { %v3211_v61 = vpop.eup %3210  ;;  %v492_v33 = vadd.f32 %v3006_v22, %v4083_v39  ;;  %v3009_v23 = vadd.f32 %v3008_v27, %v3007_v5  ;;  %v4212_v20 = vpop.permute.xlu1 %1928 }
 0x132   :  { %1091 = vrot.lane.b32.xlu0 %v3211_v61, %s3669_s20  ;;  %5234 = vst [vmem:[#allocation14_spill] sm:$0xff] %v4212_v20  ;;  %v4215_v5 = vpop.permute.xlu0 %1930 }
 0x133   :  { %v4202_v49 = vadd.f32 %v4127_v50, %v492_v33  ;;  %v495_v51 = vadd.f32 %v3009_v23, %v4083_v39  ;;  %5235 = vst [vmem:[#allocation15_spill] sm:$0xff] %v4215_v5 }
 0x135   :  { %v4208_v0 = vadd.f32 %v4133_v4, %v495_v51  ;;  %3216 = vtanh.f32 %v4202_v49  ;;  %v4218_v39 = vpop.permute.xlu1 %1932 }
 0x136   :  { %5236 = vst [vmem:[#allocation16_spill] sm:$0xff] %v4218_v39  ;;  %v4220_v26 = vpop.permute.xlu0 %1934 }
 0x137   :  { %3218 = vtanh.f32 %v4208_v0  ;;  %v3213_v8 = vpop.eup %3212  ;;  %5237 = vst [vmem:[#allocation17_spill] sm:$0xff] %v4220_v26 }
 0x138   :  { %1093 = vrot.lane.b32.xlu1 %v3213_v8, %s3669_s20 }
 0x139   :  { %v3215_v22 = vpop.eup %3214  ;;  %v4224_v27 = vpop.permute.xlu1 %1936 }
 0x13a   :  { %1095 = vrot.lane.b32.xlu0 %v3215_v22, %s3669_s20  ;;  %5238 = vst [vmem:[#allocation18_spill] sm:$0xff] %v4224_v27  ;;  %v4226_v61 = vpop.permute.xlu0 %1938  ;;  %v618_v22 = vmul.f32 %v3770_v13, %v3831_v32  ;;  %v2888_v27 = vmul.f32 -1.442695, %v4086_v57  ;;  %v2889_v32 = vmul.f32 -1.442695, %v4091_v63 }
 0x13b   :  { %5239 = vst [vmem:[#allocation19_spill] sm:$0xff] %v4226_v61 }
 0x13c   :  { %3220 = vpow2.f32 %v2888_v27  ;;  %v621_v27 = vmul.f32 %v3770_v13, %v3859_v38  ;;  %v2891_v38 = vmul.f32 -1.442695, %v4103_v16 }
 0x13d   :  { %v4228_v33 = vpop.permute.xlu1 %1940 }
 0x13e   :  { %5240 = vst [vmem:[#allocation20_spill] sm:$0xff] %v4228_v33  ;;  %v4230_v23 = vpop.permute.xlu0 %1942  ;;  %v619_v33 = vmul.f32 %v3770_v13, %v3847_v36  ;;  %v637_v14 = vadd.f32 %v621_v27, %v4103_v16 }
 0x13f   :  { %v3217_v50 = vpop.eup %3216  ;;  %5241 = vst [vmem:[#allocation21_spill] sm:$0xff] %v4230_v23 }
 0x140   :  { %1097 = vrot.lane.b32.xlu1 %v3217_v50, %s3669_s20  ;;  %v634_v50 = vadd.f32 %v618_v22, %v4086_v57  ;;  %v635_v22 = vadd.f32 %v619_v33, %v4091_v63 }
 0x141   :  { %v3219_v4 = vpop.eup %3218  ;;  %v4232_v51 = vpop.permute.xlu1 %1944 }
 0x142   :  { %1099 = vrot.lane.b32.xlu0 %v3219_v4, %s3669_s20  ;;  %5242 = vst [vmem:[#allocation22_spill] sm:$0xff] %v4232_v51  ;;  %v4234_v8 = vpop.permute.xlu0 %1946  ;;  %v2839_v61 = vmul.f32 -1.442695, %v634_v50  ;;  %v620_v51 = vmul.f32 %v3770_v13, %v3854_v37  ;;  %v2840_v50 = vmul.f32 -1.442695, %v635_v22 }
 0x143   :  { %5243 = vst [vmem:[#allocation23_spill] sm:$0xff] %v4234_v8 }
 0x144   :  { %3222 = vpow2.f32 %v2839_v61  ;;  %v636_v36 = vadd.f32 %v620_v51, %v4098_v12  ;;  %v2890_v61 = vmul.f32 -1.442695, %v4098_v12  ;;  %v622_v51 = vmul.f32 %v3770_v13, %v3873_v40 }
 0x145   :  { %v4238_v26 = vpop.permute.xlu1 %1948  ;;  %3224 = vpow2.f32 %v2889_v32  ;;  %v2842_v40 = vmul.f32 -1.442695, %v637_v14 }
 0x146   :  { %5244 = vst [vmem:[#allocation24_spill] sm:$0xff] %v4238_v26  ;;  %v4241_v4 = vpop.permute.xlu0 %783  ;;  %v2841_v37 = vmul.f32 -1.442695, %v636_v36  ;;  %v3221_v20 = vpop.eup %3220  ;;  %3226 = vpow2.f32 %v2840_v50  ;;  %v623_v36 = vmul.f32 %v3770_v13, %v3893_v45 }
 0x147   :  { %v1558_v22 = vadd.f32 1.0, %v3221_v20 }
 0x148   :  { %3228 = vpow2.f32 %v2841_v37  ;;  %v638_v37 = vadd.f32 %v622_v51, %v4116_v31  ;;  %v639_v20 = vadd.f32 %v623_v36, %v4121_v35 }
 0x149   :  { %v4248_v23 = vpop.permute.xlu1 %781  ;;  %3230 = vpow2.f32 %v2890_v61 }
 0x14a   :  { %v4250_v8 = vpop.permute.xlu0 %787  ;;  %3232 = vrcp.f32 %v1558_v22  ;;  %v2843_v61 = vmul.f32 -1.442695, %v638_v37  ;;  %v2844_v51 = vmul.f32 -1.442695, %v639_v20  ;;  %v2893_v37 = vmul.f32 -1.442695, %v4121_v35 }
 0x14b   :  { %3234 = vpow2.f32 %v2891_v38 }
 0x14d   :  { %v4254_v26 = vpop.permute.xlu1 %785 }
 0x14e   :  { %v4256_v5 = vpop.permute.xlu0 %791  ;;  %v3223_v6 = vpop.eup %3222 }
 0x14f   :  { %v698_v3 = vadd.f32 1.0, %v3223_v6  ;;  %v3225_v44 = vpop.eup %3224  ;;  %v624_v6 = vmul.f32 %v3770_v13, %v3898_v46  ;;  %v625_v46 = vmul.f32 %v3770_v13, %v3909_v47 }
 0x150   :  { %v1559_v45 = vadd.f32 1.0, %v3225_v44  ;;  %v3227_v27 = vpop.eup %3226  ;;  %v2892_v44 = vmul.f32 -1.442695, %v4116_v31 }
 0x151   :  { %v4259_v29 = vpop.permute.xlu1 %789  ;;  %3236 = vrcp.f32 %v698_v3  ;;  %v699_v14 = vadd.f32 1.0, %v3227_v27  ;;  %v640_v3 = vadd.f32 %v624_v6, %v4136_v7  ;;  %v641_v6 = vadd.f32 %v625_v46, %v4141_v11 }
 0x152   :  { %v4261_v39 = vpop.permute.xlu0 %795  ;;  %v3229_v2 = vpop.eup %3228  ;;  %3238 = vpow2.f32 %v2842_v40  ;;  %v2894_v46 = vmul.f32 -1.442695, %v4136_v7 }
 0x153   :  { %3240 = vrcp.f32 %v1559_v45  ;;  %v3231_v22 = vpop.eup %3230  ;;  %v700_v36 = vadd.f32 1.0, %v3229_v2  ;;  %v2845_v17 = vmul.f32 -1.442695, %v640_v3 }
 0x154   :  { %3242 = vpow2.f32 %v2843_v61  ;;  %v3233_v40 = vpop.eup %3232  ;;  %v1560_v45 = vadd.f32 1.0, %v3231_v22 }
 0x155   :  { %v4266_v33 = vpop.permute.xlu1 %793  ;;  %3244 = vpow2.f32 %v2844_v51  ;;  %v3235_v27 = vpop.eup %3234 }
 0x156   :  { %v4270_v32 = vpop.permute.xlu0 %799  ;;  %3246 = vrcp.f32 %v699_v14  ;;  %v1561_v51 = vadd.f32 1.0, %v3235_v27 }
 0x157   :  { %3248 = vrcp.f32 %v700_v36 }
 0x158   :  { %3250 = vpow2.f32 %v2892_v44 }
 0x159   :  { %v4276_v50 = vpop.permute.xlu1 %797  ;;  %3252 = vpow2.f32 %v2893_v37  ;;  %v626_v37 = vmul.f32 %v3770_v13, %v3914_v48 }
 0x15a   :  { %v4279_v24 = vpop.permute.xlu0 %803  ;;  %3254 = vrcp.f32 %v1560_v45 }
 0x15b   :  { %v3237_v2 = vpop.eup %3236  ;;  %3256 = vpow2.f32 %v2845_v17 }
 0x15c   :  { %3258 = vrcp.f32 %v1561_v51 }
 0x15d   :  { %v4282_v30 = vpop.permute.xlu1 %801 }
 0x15e   :  { %v4286_v41 = vpop.permute.xlu0 %807 }
 0x15f   :  { %5245 = vst [vmem:[#allocation25_spill] sm:$0xff] %v4286_v41  ;;  %v3239_v41 = vpop.eup %3238 }
 0x160   :  { %v3241_v14 = vpop.eup %3240  ;;  %v701_v44 = vadd.f32 1.0, %v3239_v41  ;;  %v2895_v41 = vmul.f32 -1.442695, %v4141_v11 }
 0x161   :  { %v4288_v10 = vpop.permute.xlu1 %805  ;;  %v3243_v22 = vpop.eup %3242 }
 0x162   :  { %v4290_v38 = vpop.permute.xlu0 %811  ;;  %v3245_v3 = vpop.eup %3244  ;;  %v702_v45 = vadd.f32 1.0, %v3243_v22 }
 0x163   :  { %5246 = vst [vmem:[#allocation26_spill] sm:$0xff] %v4290_v38  ;;  %v703_v48 = vadd.f32 1.0, %v3245_v3 }
 0x165   :  { %v4297_v20 = vpop.permute.xlu1 %809 }
 0x166   :  { %5247 = vst [vmem:[#allocation27_spill] sm:$0xff] %v4297_v20  ;;  %v2846_v20 = vmul.f32 -1.442695, %v641_v6 }
 0x168   :  { %3260 = vpow2.f32 %v2846_v20 }
 0x169   :  { %3262 = vrcp.f32 %v701_v44 }
 0x16a   :  { %3264 = vpow2.f32 %v2894_v46 }
 0x16b   :  { %3266 = vrcp.f32 %v702_v45 }
 0x16c   :  { %3268 = vpow2.f32 %v2895_v41 }
 0x16d   :  { %3270 = vrcp.f32 %v703_v48 }
 0x17a   :  { %v1070_v61 = vpop.permute.xlu0 %1069 }
 0x17b   :  { %v1117_v38 = vmul.f32 %v3237_v2, %v1070_v61  ;;  %v1990_v9 = vmul.f32 %v3233_v40, %v1070_v61  ;;  %v3247_v40 = vpop.eup %3246 }
 0x17c   :  { %v1072_v47 = vpop.permute.xlu1 %1071  ;;  %v3249_v27 = vpop.eup %3248 }
 0x17d   :  { %2022 = vrot.lane.b32.xlu0 %v1990_v9, %s3670_s17  ;;  %1149 = vrot.lane.b32.xlu1 %v1117_v38, %s3670_s17  ;;  %v1991_v36 = vmul.f32 %v3241_v14, %v1072_v47  ;;  %v627_v38 = vmul.f32 %v3770_v13, %v3932_v52  ;;  %v1118_v17 = vmul.f32 %v3247_v40, %v1072_v47  ;;  %v3251_v2 = vpop.eup %3250 }
 0x17e   :  { %v3253_v6 = vpop.eup %3252  ;;  %v1562_v47 = vadd.f32 1.0, %v3251_v2  ;;  %v2896_v2 = vmul.f32 -1.442695, %v4152_v28 }
 0x17f   :  { %v3255_v51 = vpop.eup %3254  ;;  %v643_v13 = vadd.f32 %v627_v38, %v4157_v43  ;;  %v1563_v22 = vadd.f32 1.0, %v3253_v6  ;;  %v2897_v6 = vmul.f32 -1.442695, %v4157_v43 }
 0x180   :  { %v3257_v44 = vpop.eup %3256  ;;  %3272 = vrcp.f32 %v1562_v47 }
 0x181   :  { %2086 = vrot.lane.b32.xlu0 %v1990_v9, %s3669_s20  ;;  %2024 = vrot.lane.b32.xlu1 %v1991_v36, %s3670_s17  ;;  %v642_v9 = vadd.f32 %v626_v37, %v4152_v28  ;;  %v3259_v3 = vpop.eup %3258  ;;  %v2848_v37 = vmul.f32 -1.442695, %v643_v13  ;;  %3274 = vrcp.f32 %v1563_v22  ;;  %v704_v38 = vadd.f32 1.0, %v3257_v44 }
 0x182   :  { %v1074_v61 = vpop.permute.xlu1 %1073  ;;  %v3261_v40 = vpop.eup %3260 }
 0x183   :  { %v1119_v52 = vmul.f32 %v3249_v27, %v1074_v61  ;;  %v1992_v20 = vmul.f32 %v3255_v51, %v1074_v61  ;;  %v3263_v45 = vpop.eup %3262  ;;  %v3668_v27 = vld [vmem:[%s5194_s5] ss:$0 sm:$0xff]  ;;  %s3672_s5 = smov 8  }
 0x184   :  { %v1076_v14 = vpop.permute.xlu0 %1075  ;;  %v628_v41 = vmul.f32 %v3668_v27, %v3937_v53  ;;  %v3265_v61 = vpop.eup %3264 }
 0x185   :  { %1151 = vrot.lane.b32.xlu0 %v1118_v17, %s3670_s17  ;;  %2088 = vrot.lane.b32.xlu1 %v1991_v36, %s3669_s20  ;;  %v2847_v36 = vmul.f32 -1.442695, %v642_v9  ;;  %v1993_v46 = vmul.f32 %v3259_v3, %v1076_v14  ;;  %v629_v17 = vmul.f32 %v3668_v27, %v3947_v54  ;;  %v1120_v48 = vmul.f32 %v3263_v45, %v1076_v14  ;;  %v3267_v9 = vpop.eup %3266 }
 0x186   :  { %v644_v53 = vadd.f32 %v628_v41, %v4169_v19  ;;  %v1564_v44 = vadd.f32 1.0, %v3265_v61 }
 0x187   :  { %3276 = vpow2.f32 %v2847_v36  ;;  %v645_v47 = vadd.f32 %v629_v17, %v4173_v21 }
 0x188   :  { %3278 = vpow2.f32 %v2848_v37  ;;  %v630_v37 = vmul.f32 %v3668_v27, %v3952_v55  ;;  %v2898_v55 = vmul.f32 -1.442695, %v4169_v19 }
 0x189   :  { %2026 = vrot.lane.b32.xlu0 %v1992_v20, %s3670_s17  ;;  %1153 = vrot.lane.b32.xlu1 %v1119_v52, %s3670_s17  ;;  %v705_v52 = vadd.f32 1.0, %v3261_v40  ;;  %3280 = vrcp.f32 %v704_v38  ;;  %v631_v40 = vmul.f32 %v3668_v27, %v3967_v58  ;;  %v2849_v38 = vmul.f32 -1.442695, %v644_v53 }
 0x18a   :  { %v1078_v51 = vpop.permute.xlu1 %1077  ;;  %3282 = vpow2.f32 %v2896_v2  ;;  %v2850_v2 = vmul.f32 -1.442695, %v645_v47  ;;  %v632_v58 = vmul.f32 %v3668_v27, %v3972_v59 }
 0x18b   :  { %v1121_v14 = vmul.f32 %v3267_v9, %v1078_v51  ;;  %3284 = vpow2.f32 %v2897_v6  ;;  %v646_v6 = vadd.f32 %v630_v37, %v4185_v56 }
 0x18c   :  { %v1080_v13 = vpop.permute.xlu0 %1079  ;;  %3286 = vrcp.f32 %v705_v52  ;;  %v2899_v52 = vmul.f32 -1.442695, %v4173_v21 }
 0x18d   :  { %2090 = vrot.lane.b32.xlu0 %v1992_v20, %s3669_s20  ;;  %2028 = vrot.lane.b32.xlu1 %v1993_v46, %s3670_s17  ;;  %v3269_v20 = vpop.eup %3268  ;;  %3288 = vrcp.f32 %v1564_v44 }
 0x18e   :  { %v3271_v54 = vpop.eup %3270  ;;  %v1565_v36 = vadd.f32 1.0, %v3269_v20 }
 0x18f   :  { %v1122_v22 = vmul.f32 %v3271_v54, %v1080_v13  ;;  %v3273_v3 = vpop.eup %3272 }
 0x190   :  { %v1994_v41 = vmul.f32 %v3273_v3, %v1078_v51  ;;  %3290 = vrcp.f32 %v1565_v36  ;;  %v647_v51 = vadd.f32 %v631_v40, %v4190_v25 }
 0x191   :  { %1155 = vrot.lane.b32.xlu0 %v1120_v48, %s3670_s17  ;;  %2092 = vrot.lane.b32.xlu1 %v1993_v46, %s3669_s20  ;;  %v3275_v46 = vpop.eup %3274  ;;  %v633_v48 = vmul.f32 %v3668_v27, %v3981_v60  ;;  %3292 = vpow2.f32 %v2849_v38 }
 0x192   :  { %v3277_v45 = vpop.eup %3276  ;;  %v1995_v17 = vmul.f32 %v3275_v46, %v1080_v13  ;;  %3294 = vpow2.f32 %v2850_v2  ;;  %v1082_v60 = vpop.permute.xlu1 %1081  ;;  %v2852_v27 = vmul.f32 -1.442695, %v647_v51 }
 0x193   :  { %v3279_v61 = vpop.eup %3278  ;;  %v706_v9 = vadd.f32 1.0, %v3277_v45  ;;  %3296 = vpow2.f32 %v2898_v55  ;;  %v649_v44 = vadd.f32 %v633_v48, %v4208_v0 }
 0x194   :  { %v3281_v13 = vpop.eup %3280  ;;  %v1084_v54 = vpop.permute.xlu0 %1083  ;;  %v707_v53 = vadd.f32 1.0, %v3279_v61 }
 0x195   :  { %1157 = vrot.lane.b32.xlu0 %v1121_v14, %s3670_s17  ;;  %1159 = vrot.lane.b32.xlu1 %v1122_v22, %s3670_s17  ;;  %v3283_v20 = vpop.eup %3282  ;;  %v2851_v14 = vmul.f32 -1.442695, %v646_v6  ;;  %3298 = vrcp.f32 %v706_v9  ;;  %v648_v22 = vadd.f32 %v632_v58, %v4202_v49  ;;  %v1123_v36 = vmul.f32 %v3281_v13, %v1082_v60 }
 0x196   :  { %v3285_v47 = vpop.eup %3284  ;;  %v1566_v37 = vadd.f32 1.0, %v3283_v20  ;;  %3300 = vpow2.f32 %v2899_v52  ;;  %v2854_v2 = vmul.f32 -1.442695, %v649_v44 }
 0x197   :  { %v3287_v59 = vpop.eup %3286  ;;  %3302 = vrcp.f32 %v707_v53  ;;  %v1567_v46 = vadd.f32 1.0, %v3285_v47  ;;  %v2853_v45 = vmul.f32 -1.442695, %v648_v22 }
 0x198   :  { %v1124_v3 = vmul.f32 %v3287_v59, %v1084_v54  ;;  %v3289_v40 = vpop.eup %3288  ;;  %3304 = vpow2.f32 %v2851_v14 }
 0x199   :  { %2030 = vrot.lane.b32.xlu0 %v1994_v41, %s3670_s17  ;;  %2032 = vrot.lane.b32.xlu1 %v1995_v17, %s3670_s17  ;;  %3306 = vpow2.f32 %v2852_v27 }
 0x19a   :  { %v3291_v38 = vpop.eup %3290  ;;  %3308 = vrcp.f32 %v1566_v37  ;;  %v1086_v9 = vpop.permute.xlu1 %1085 }
 0x19b   :  { %v3293_v61 = vpop.eup %3292  ;;  %3310 = vrcp.f32 %v1567_v46 }
 0x19c   :  { %v3295_v48 = vpop.eup %3294  ;;  %3312 = vpow2.f32 %v2853_v45  ;;  %v708_v6 = vadd.f32 1.0, %v3293_v61  ;;  %v1088_v51 = vpop.permute.xlu0 %1087 }
 0x19d   :  { %2094 = vrot.lane.b32.xlu0 %v1994_v41, %s3669_s20  ;;  %2096 = vrot.lane.b32.xlu1 %v1995_v17, %s3669_s20  ;;  %v1996_v41 = vmul.f32 %v3289_v40, %v1082_v60  ;;  %v1997_v17 = vmul.f32 %v3291_v38, %v1084_v54  ;;  %v3297_v55 = vpop.eup %3296  ;;  %3314 = vpow2.f32 %v2854_v2  ;;  %v709_v13 = vadd.f32 1.0, %v3295_v48 }
 0x19e   :  { %3316 = vrcp.f32 %v708_v6  ;;  %v1568_v47 = vadd.f32 1.0, %v3297_v55 }
 0x19f   :  { %v3299_v58 = vpop.eup %3298  ;;  %3318 = vrcp.f32 %v709_v13 }
 0x1a0   :  { %v3301_v52 = vpop.eup %3300  ;;  %v1125_v54 = vmul.f32 %v3299_v58, %v1086_v9  ;;  %3320 = vrcp.f32 %v1568_v47 }
 0x1a1   :  { %1161 = vrot.lane.b32.xlu0 %v1123_v36, %s3670_s17  ;;  %1163 = vrot.lane.b32.xlu1 %v1124_v3, %s3670_s17  ;;  %v3303_v20 = vpop.eup %3302  ;;  %v1569_v59 = vadd.f32 1.0, %v3301_v52 }
 0x1a2   :  { %v3305_v60 = vpop.eup %3304  ;;  %v1126_v53 = vmul.f32 %v3303_v20, %v1088_v51  ;;  %v1090_v45 = vpop.permute.xlu1 %1089 }
 0x1a3   :  { %v3307_v14 = vpop.eup %3306  ;;  %v710_v3 = vadd.f32 1.0, %v3305_v60  ;;  %3322 = vrcp.f32 %v1569_v59 }
 0x1a4   :  { %v3309_v27 = vpop.eup %3308  ;;  %v711_v46 = vadd.f32 1.0, %v3307_v14 }
 0x1a5   :  { %2034 = vrot.lane.b32.xlu0 %v1996_v41, %s3670_s17  ;;  %2036 = vrot.lane.b32.xlu1 %v1997_v17, %s3670_s17  ;;  %v3311_v22 = vpop.eup %3310  ;;  %v1998_v44 = vmul.f32 %v3309_v27, %v1086_v9  ;;  %3324 = vrcp.f32 %v710_v3 }
 0x1a6   :  { %v1999_v36 = vmul.f32 %v3311_v22, %v1088_v51  ;;  %v3313_v37 = vpop.eup %3312  ;;  %3326 = vrcp.f32 %v711_v46  ;;  %v830_v46 = vadd.f32 %v4241_v4, %v4091_v63  ;;  %v834_v4 = vadd.f32 %v4256_v5, %v4121_v35 }
 0x1a7   :  { %v3315_v40 = vpop.eup %3314  ;;  %v712_v38 = vadd.f32 1.0, %v3313_v37 }
 0x1a8   :  { %v3317_v2 = vpop.eup %3316 }
 0x1a9   :  { %2098 = vrot.lane.b32.xlu0 %v1996_v41, %s3669_s20  ;;  %2100 = vrot.lane.b32.xlu1 %v1997_v17, %s3669_s20  ;;  %v1092_v41 = vpop.permute.xlu0 %1091  ;;  %v713_v17 = vadd.f32 1.0, %v3315_v40  ;;  %v3319_v61 = vpop.eup %3318  ;;  %v1127_v48 = vmul.f32 %v3317_v2, %v1090_v45  ;;  %3328 = vrcp.f32 %v712_v38  ;;  %v846_v40 = vadd.f32 0.01, %v830_v46 }
 0x1aa   :  { %v1128_v55 = vmul.f32 %v3319_v61, %v1092_v41  ;;  %v3321_v6 = vpop.eup %3320  ;;  %v4359_v13 = vpop.permute.xlu1 %1093  ;;  %v831_v38 = vadd.f32 %v4254_v26, %v4098_v12  ;;  %v833_v61 = vadd.f32 %v4259_v29, %v4116_v31  ;;  %v836_v29 = vadd.f32 %v4261_v39, %v4141_v11 }
 0x1ab   :  { %3330 = vrcp.f32 %v713_v17  ;;  %v2000_v9 = vmul.f32 %v3321_v6, %v1090_v45  ;;  %v2856_v45 = vmul.f32 -1.442695, %v846_v40  ;;  %v832_v17 = vadd.f32 %v4250_v8, %v4103_v16 }
 0x1ac   :  { %v849_v6 = vadd.f32 0.01, %v833_v61  ;;  %v837_v39 = vadd.f32 %v4276_v50, %v4152_v28 }
 0x1ad   :  { %1165 = vrot.lane.b32.xlu0 %v1125_v54, %s3670_s17  ;;  %1167 = vrot.lane.b32.xlu1 %v1126_v53, %s3670_s17  ;;  %v3323_v58 = vpop.eup %3322  ;;  %v4361_v52 = vpop.permute.xlu0 %1095 }
 0x1ae   :  { %v2001_v51 = vmul.f32 %v3323_v58, %v1092_v41  ;;  %v853_v50 = vadd.f32 0.01, %v837_v39 }
 0x1af   :  { %v3325_v20 = vpop.eup %3324 }
 0x1b0   :  { %v3327_v60 = vpop.eup %3326  ;;  %v1129_v54 = vmul.f32 %v3325_v20, %v4359_v13 }
 0x1b1   :  { %2038 = vrot.lane.b32.xlu0 %v1998_v44, %s3670_s17  ;;  %2040 = vrot.lane.b32.xlu1 %v1999_v36, %s3670_s17  ;;  %v1130_v53 = vmul.f32 %v3327_v60, %v4361_v52 }
 0x1b2   :  { %v4367_v47 = vpop.permute.xlu1 %1097 }
 0x1b3   :  { %v3329_v59 = vpop.eup %3328 }
 0x1b4   :  { %v4369_v14 = vpop.permute.xlu0 %1099  ;;  %v1131_v22 = vmul.f32 %v3329_v59, %v4367_v47 }
 0x1b5   :  { %2102 = vrot.lane.b32.xlu0 %v1998_v44, %s3669_s20  ;;  %2104 = vrot.lane.b32.xlu1 %v1999_v36, %s3669_s20  ;;  %v3331_v27 = vpop.eup %3330  ;;  %v829_v36 = vadd.f32 %v4248_v23, %v4086_v57  ;;  %v847_v23 = vadd.f32 0.01, %v831_v38 }
 0x1b6   :  { %v1132_v44 = vmul.f32 %v3331_v27, %v4369_v14  ;;  %v852_v27 = vadd.f32 0.01, %v836_v29 }
 0x1b7   :  { %v845_v3 = vadd.f32 0.01, %v829_v36  ;;  %v2857_v41 = vmul.f32 -1.442695, %v847_v23 }
 0x1b9   :  { %1169 = vrot.lane.b32.xlu0 %v1127_v48, %s3670_s17  ;;  %1171 = vrot.lane.b32.xlu1 %v1128_v55, %s3670_s17  ;;  %v2855_v37 = vmul.f32 -1.442695, %v845_v3  ;;  %v848_v48 = vadd.f32 0.01, %v832_v17  ;;  %v2862_v3 = vmul.f32 -1.442695, %v852_v27 }
 0x1bb   :  { %3332 = vpow2.f32 %v2855_v37  ;;  %v2858_v58 = vmul.f32 -1.442695, %v848_v48 }
 0x1bc   :  { %3334 = vpow2.f32 %v2856_v45  ;;  %v838_v45 = vadd.f32 %v4270_v32, %v4157_v43 }
 0x1bd   :  { %2042 = vrot.lane.b32.xlu0 %v2000_v9, %s3670_s17  ;;  %2044 = vrot.lane.b32.xlu1 %v2001_v51, %s3670_s17  ;;  %3336 = vpow2.f32 %v2857_v41 }
 0x1be   :  { %v854_v48 = vadd.f32 0.01, %v838_v45 }
 0x1c1   :  { %1173 = vrot.lane.b32.xlu0 %v1129_v54, %s3670_s17  ;;  %1175 = vrot.lane.b32.xlu1 %v1130_v53, %s3670_s17  ;;  %v835_v54 = vadd.f32 %v4266_v33, %v4136_v7 }
 0x1c3   :  { %v851_v5 = vadd.f32 0.01, %v835_v54 }
 0x1c5   :  { %1177 = vrot.lane.b32.xlu0 %v1131_v22, %s3670_s17  ;;  %1179 = vrot.lane.b32.xlu1 %v1132_v44, %s3670_s17  ;;  %v3333_v2 = vpop.eup %3332  ;;  %v2861_v44 = vmul.f32 -1.442695, %v851_v5 }
 0x1c6   :  { %v909_v55 = vadd.f32 1.0, %v3333_v2  ;;  %v3335_v26 = vpop.eup %3334 }
 0x1c7   :  { %v910_v20 = vadd.f32 1.0, %v3335_v26  ;;  %v3337_v60 = vpop.eup %3336 }
 0x1c8   :  { %3338 = vrcp.f32 %v909_v55  ;;  %v911_v53 = vadd.f32 1.0, %v3337_v60 }
 0x1c9   :  { %2106 = vrot.lane.b32.xlu0 %v2000_v9, %s3669_s20  ;;  %2108 = vrot.lane.b32.xlu1 %v2001_v51, %s3669_s20  ;;  %v850_v9 = vadd.f32 0.01, %v834_v4  ;;  %v2859_v51 = vmul.f32 -1.442695, %v849_v6  ;;  %3340 = vpow2.f32 %v2858_v58 }
 0x1cb   :  { %v2860_v8 = vmul.f32 -1.442695, %v850_v9  ;;  %3342 = vpow2.f32 %v2859_v51  ;;  %v2863_v9 = vmul.f32 -1.442695, %v853_v50  ;;  %v2864_v51 = vmul.f32 -1.442695, %v854_v48 }
 0x1cc   :  { %3344 = vrcp.f32 %v910_v20 }
 0x1cd   :  { %3346 = vpow2.f32 %v2860_v8 }
 0x1ce   :  { %3348 = vrcp.f32 %v911_v53 }
 0x1cf   :  { %3350 = vpow2.f32 %v2861_v44 }
 0x1d0   :  { %3352 = vpow2.f32 %v2862_v3 }
 0x1d2   :  { %v3339_v59 = vpop.eup %3338 }
 0x1d3   :  { %v3341_v22 = vpop.eup %3340  ;;  %v1037_v36 = vmul.f32 %v3339_v59, %v4089_v62  ;;  %v840_v59 = vadd.f32 %v4279_v24, %v4173_v21 }
 0x1d4   :  { %v912_v38 = vadd.f32 1.0, %v3341_v22 }
 0x1d5   :  { %v3343_v40 = vpop.eup %3342 }
 0x1d6   :  { %v3345_v41 = vpop.eup %3344  ;;  %v913_v61 = vadd.f32 1.0, %v3343_v40  ;;  %3354 = vrcp.f32 %v912_v38  ;;  %v856_v40 = vadd.f32 0.01, %v840_v59 }
 0x1d7   :  { %v3347_v2 = vpop.eup %3346  ;;  %v1038_v55 = vmul.f32 %v3345_v41, %v4094_v1  ;;  %v839_v1 = vadd.f32 %v4282_v30, %v4169_v19 }
 0x1d8   :  { %v3349_v32 = vpop.eup %3348  ;;  %v914_v4 = vadd.f32 1.0, %v3347_v2  ;;  %3356 = vrcp.f32 %v913_v61  ;;  %v2866_v61 = vmul.f32 -1.442695, %v856_v40 }
 0x1d9   :  { %v1039_v60 = vmul.f32 %v3349_v32, %v4101_v15  ;;  %v3351_v29 = vpop.eup %3350  ;;  %v855_v30 = vadd.f32 0.01, %v839_v1 }
 0x1da   :  { %v3353_v5 = vpop.eup %3352  ;;  %v915_v22 = vadd.f32 1.0, %v3351_v29 }
 0x1db   :  { %v916_v3 = vadd.f32 1.0, %v3353_v5  ;;  %v2865_v39 = vmul.f32 -1.442695, %v855_v30 }
 0x1e0   :  { %v3355_v27 = vpop.eup %3354 }
 0x1e1   :  { %v1040_v38 = vmul.f32 %v3355_v27, %v4105_v18 }
 0x1ef   :  { %v4396_v37 = vpop.permute.xlu0 %2022  ;;  %v1150_v46 = vpop.permute.xlu1 %1149 }
 0x1f0   :  { %v4398_v33 = vadd.f32 %v1150_v46, %v1037_v36  ;;  %v3357_v46 = vpop.eup %3356 }
 0x1f1   :  { %v1041_v18 = vmul.f32 %v3357_v46, %v4123_v42 }
 0x1f2   :  { %5248 = vst [vmem:[#allocation28_spill] sm:$0xff] %v4398_v33  ;;  %v1222_v23 = vmul.f32 %v4119_v34, %v4398_v33  ;;  %3358 = vtanh.f32 %v4398_v33  ;;  %v1787_v33 = vadd.f32 0.01, %v4121_v35 }
 0x1f3   :  { %v4406_v62 = vpop.permute.xlu0 %2086  ;;  %v4408_v17 = vpop.permute.xlu1 %2024  ;;  %3360 = vrcp.f32 %v914_v4 }
 0x1f4   :  { %5249 = vst [vmem:[#allocation29_spill] sm:$0xff] %v4406_v62  ;;  %1254 = vrot.lane.b32.xlu0 %v1222_v23, %s3672_s5  ;;  %3362 = vpow2.f32 %v2863_v9  ;;  %v5254_v9 = vld [vmem:[#allocation25_spill] sm:$0xff] }
 0x1f5   :  { %3364 = vpow2.f32 %v2864_v51  ;;  %v842_v51 = vadd.f32 %v5254_v9, %v4190_v25  ;;  %v5262_v9 = vld [vmem:[#allocation4_spill] sm:$0xff] }
 0x1f7   :  { %v1152_v6 = vpop.permute.xlu0 %1151  ;;  %v4412_v58 = vpop.permute.xlu1 %2088 }
 0x1f8   :  { %v4414_v26 = vadd.f32 %v1152_v6, %v1038_v55  ;;  %v841_v55 = vadd.f32 %v4288_v10, %v4185_v56 }
 0x1fa   :  { %5250 = vst [vmem:[#allocation30_spill] sm:$0xff] %v4414_v26  ;;  %v1223_v20 = vmul.f32 %v4119_v34, %v4414_v26  ;;  %3366 = vtanh.f32 %v4414_v26  ;;  %v857_v59 = vadd.f32 0.01, %v841_v55 }
 0x1fb   :  { %v4422_v8 = vpop.permute.xlu0 %2026  ;;  %v1154_v54 = vpop.permute.xlu1 %1153  ;;  %3368 = vrcp.f32 %v915_v22  ;;  %v858_v22 = vadd.f32 0.01, %v842_v51 }
 0x1fc   :  { %v4424_v53 = vadd.f32 %v1154_v54, %v1039_v60  ;;  %1256 = vrot.lane.b32.xlu1 %v1223_v20, %s3672_s5  ;;  %v3359_v24 = vpop.eup %3358  ;;  %3370 = vrcp.f32 %v916_v3  ;;  %v5256_v60 = vld [vmem:[#allocation2_spill] sm:$0xff]  ;;  %v5258_v3 = vld [vmem:[#allocation27_spill] sm:$0xff] }
 0x1fd   :  { %v3361_v2 = vpop.eup %3360  ;;  %v843_v46 = vadd.f32 %v5258_v3, %v4202_v49 }
 0x1fe   :  { %5251 = vst [vmem:[#allocation31_spill] sm:$0xff] %v4424_v53  ;;  %v1224_v15 = vmul.f32 %v4119_v34, %v4424_v53  ;;  %3372 = vtanh.f32 %v4424_v53  ;;  %v3363_v48 = vpop.eup %3362  ;;  %v1042_v1 = vmul.f32 %v3361_v2, %v5256_v60  ;;  %v2867_v2 = vmul.f32 -1.442695, %v857_v59 }
 0x1ff   :  { %v4431_v44 = vpop.permute.xlu0 %2090  ;;  %v4433_v36 = vpop.permute.xlu1 %2028  ;;  %3374 = vpow2.f32 %v2865_v39  ;;  %v917_v42 = vadd.f32 1.0, %v3363_v48  ;;  %v859_v55 = vadd.f32 0.01, %v843_v46 }
 0x200   :  { %1258 = vrot.lane.b32.xlu0 %v1224_v15, %s3672_s5  ;;  %v3365_v6 = vpop.eup %3364 }
 0x201   :  { %v918_v5 = vadd.f32 1.0, %v3365_v6 }
 0x203   :  { %v1156_v45 = vpop.permute.xlu0 %1155  ;;  %v4438_v23 = vpop.permute.xlu1 %2092 }
 0x204   :  { %5252 = vst [vmem:[#allocation32_spill] sm:$0xff] %v4438_v23  ;;  %v4440_v41 = vadd.f32 %v1156_v45, %v1040_v38  ;;  %1446 = vrot.lane.b32.xlu0 %v3359_v24, %s3672_s5  ;;  %v3367_v29 = vpop.eup %3366  ;;  %v5259_v38 = vld [vmem:[#allocation26_spill] sm:$0xff]  ;;  %v1789_v23 = vadd.f32 0.01, %v4141_v11 }
 0x205   :  { %v3369_v30 = vpop.eup %3368  ;;  %v844_v24 = vadd.f32 %v5259_v38, %v4208_v0 }
 0x206   :  { %5253 = vst [vmem:[#allocation33_spill] sm:$0xff] %v4440_v41  ;;  %v1225_v50 = vmul.f32 %v4119_v34, %v4440_v41  ;;  %3376 = vtanh.f32 %v4440_v41  ;;  %v3371_v40 = vpop.eup %3370 }
 0x207   :  { %v1158_v32 = vpop.permute.xlu0 %1157  ;;  %v1160_v4 = vpop.permute.xlu1 %1159  ;;  %3378 = vpow2.f32 %v2866_v61  ;;  %v1044_v51 = vmul.f32 %v3371_v40, %v5262_v9 }
 0x208   :  { %v4451_v20 = vadd.f32 %v1158_v32, %v1041_v18  ;;  %1260 = vrot.lane.b32.xlu1 %v1225_v50, %s3672_s5  ;;  %v4458_v10 = vadd.f32 %v1160_v4, %v1042_v1  ;;  %3380 = vrcp.f32 %v917_v42  ;;  %v3373_v45 = vpop.eup %3372  ;;  %v2868_v18 = vmul.f32 -1.442695, %v858_v22  ;;  %v5261_v4 = vld [vmem:[#allocation3_spill] sm:$0xff] }
 0x209   :  { %3382 = vrcp.f32 %v918_v5  ;;  %v3375_v48 = vpop.eup %3374  ;;  %v860_v32 = vadd.f32 0.01, %v844_v24  ;;  %v1043_v6 = vmul.f32 %v3369_v30, %v5261_v4  ;;  %v2869_v22 = vmul.f32 -1.442695, %v859_v55 }
 0x20a   :  { %5255 = vst [vmem:[#allocation25_spill] sm:$0xff] %v4451_v20  ;;  %v1226_v54 = vmul.f32 %v4119_v34, %v4451_v20  ;;  %5257 = vst [vmem:[#allocation2_spill] sm:$0xff] %v4458_v10  ;;  %v1227_v39 = vmul.f32 %v4119_v34, %v4458_v10  ;;  %3384 = vtanh.f32 %v4451_v20 }
 0x20b   :  { %v4460_v15 = vpop.permute.xlu0 %2030  ;;  %v4462_v27 = vpop.permute.xlu1 %2032  ;;  %3386 = vtanh.f32 %v4458_v10  ;;  %v2870_v3 = vmul.f32 -1.442695, %v860_v32 }
 0x20c   :  { %1448 = vrot.lane.b32.xlu1 %v3367_v29, %s3672_s5  ;;  %1262 = vrot.lane.b32.xlu0 %v1226_v54, %s3672_s5  ;;  %3388 = vpow2.f32 %v2867_v2  ;;  %v919_v29 = vadd.f32 1.0, %v3375_v48 }
 0x20d   :  { %3390 = vpow2.f32 %v2868_v18 }
 0x20e   :  { %3392 = vrcp.f32 %v919_v29 }
 0x20f   :  { %v4472_v61 = vpop.permute.xlu0 %2094  ;;  %v4474_v50 = vpop.permute.xlu1 %2096  ;;  %3394 = vpow2.f32 %v2869_v22 }
 0x210   :  { %5260 = vst [vmem:[#allocation27_spill] sm:$0xff] %v4472_v61  ;;  %1450 = vrot.lane.b32.xlu0 %v3373_v45, %s3672_s5  ;;  %1264 = vrot.lane.b32.xlu1 %v1227_v39, %s3672_s5  ;;  %v3377_v60 = vpop.eup %3376  ;;  %3396 = vpow2.f32 %v2870_v3 }
 0x211   :  { %v3379_v54 = vpop.eup %3378 }
 0x212   :  { %v920_v40 = vadd.f32 1.0, %v3379_v54  ;;  %v3381_v39 = vpop.eup %3380 }
 0x213   :  { %v1162_v1 = vpop.permute.xlu0 %1161  ;;  %v1164_v42 = vpop.permute.xlu1 %1163 }
 0x214   :  { %v4482_v5 = vadd.f32 %v1162_v1, %v1043_v6  ;;  %v4484_v59 = vadd.f32 %v1164_v42, %v1044_v51  ;;  %1452 = vrot.lane.b32.xlu1 %v3377_v60, %s3672_s5  ;;  %v3383_v45 = vpop.eup %3382  ;;  %3398 = vrcp.f32 %v920_v40  ;;  %v5266_v6 = vld [vmem:[#allocation5_spill] sm:$0xff]  ;;  %v5267_v51 = vld [vmem:[#allocation6_spill] sm:$0xff] }
 0x215   :  { %v3385_v2 = vpop.eup %3384  ;;  %v1045_v9 = vmul.f32 %v3381_v39, %v5266_v6  ;;  %v1046_v60 = vmul.f32 %v3383_v45, %v5267_v51 }
 0x216   :  { %5263 = vst [vmem:[#allocation26_spill] sm:$0xff] %v4482_v5  ;;  %5264 = vst [vmem:[#allocation3_spill] sm:$0xff] %v4484_v59  ;;  %v1228_v30 = vmul.f32 %v4119_v34, %v4482_v5  ;;  %v1229_v46 = vmul.f32 %v4119_v34, %v4484_v59  ;;  %v3387_v18 = vpop.eup %3386  ;;  %3400 = vtanh.f32 %v4482_v5 }
 0x217   :  { %v4491_v38 = vpop.permute.xlu0 %2034  ;;  %v4493_v24 = vpop.permute.xlu1 %2036  ;;  %3402 = vtanh.f32 %v4484_v59 }
 0x218   :  { %1266 = vrot.lane.b32.xlu0 %v1228_v30, %s3672_s5  ;;  %1268 = vrot.lane.b32.xlu1 %v1229_v46, %s3672_s5  ;;  %v3389_v32 = vpop.eup %3388 }
 0x219   :  { %v3391_v4 = vpop.eup %3390  ;;  %v921_v54 = vadd.f32 1.0, %v3389_v32 }
 0x21a   :  { %v922_v3 = vadd.f32 1.0, %v3391_v4  ;;  %v3393_v30 = vpop.eup %3392 }
 0x21b   :  { %v4497_v48 = vpop.permute.xlu0 %2098  ;;  %v4499_v55 = vpop.permute.xlu1 %2100  ;;  %3404 = vrcp.f32 %v921_v54  ;;  %v2901_v54 = vmul.f32 -1.442695, %v4190_v25 }
 0x21c   :  { %5265 = vst [vmem:[#allocation4_spill] sm:$0xff] %v4499_v55  ;;  %1454 = vrot.lane.b32.xlu0 %v3385_v2, %s3672_s5  ;;  %1456 = vrot.lane.b32.xlu1 %v3387_v18, %s3672_s5  ;;  %v3395_v2 = vpop.eup %3394  ;;  %3406 = vrcp.f32 %v922_v3  ;;  %v5272_v3 = vld [vmem:[#allocation7_spill] sm:$0xff] }
 0x21d   :  { %v3397_v45 = vpop.eup %3396  ;;  %v923_v6 = vadd.f32 1.0, %v3395_v2  ;;  %v5280_v55 = vld [vmem:[#allocation11_spill] sm:$0xff] }
 0x21e   :  { %v3399_v32 = vpop.eup %3398  ;;  %v924_v51 = vadd.f32 1.0, %v3397_v45  ;;  %v2902_v45 = vmul.f32 -1.442695, %v4202_v49 }
 0x21f   :  { %v1166_v1 = vpop.permute.xlu0 %1165  ;;  %v1168_v42 = vpop.permute.xlu1 %1167 }
 0x220   :  { %v4507_v29 = vadd.f32 %v1166_v1, %v1045_v9  ;;  %v4509_v22 = vadd.f32 %v1168_v42, %v1046_v60  ;;  %v3401_v4 = vpop.eup %3400  ;;  %v2900_v42 = vmul.f32 -1.442695, %v4185_v56 }
 0x221   :  { %v3403_v9 = vpop.eup %3402 }
 0x222   :  { %5268 = vst [vmem:[#allocation5_spill] sm:$0xff] %v4507_v29  ;;  %5269 = vst [vmem:[#allocation6_spill] sm:$0xff] %v4509_v22  ;;  %v1230_v46 = vmul.f32 %v4119_v34, %v4507_v29  ;;  %v1231_v40 = vmul.f32 %v4119_v34, %v4509_v22  ;;  %3408 = vtanh.f32 %v4507_v29 }
 0x223   :  { %v4515_v18 = vpop.permute.xlu0 %2038  ;;  %v4517_v39 = vpop.permute.xlu1 %2040  ;;  %3410 = vtanh.f32 %v4509_v22  ;;  %v5277_v22 = vld [vmem:[#allocation10_spill] sm:$0xff] }
 0x224   :  { %1270 = vrot.lane.b32.xlu0 %v1230_v46, %s3672_s5  ;;  %1272 = vrot.lane.b32.xlu1 %v1231_v40, %s3672_s5  ;;  %3412 = vrcp.f32 %v923_v6  ;;  %v1047_v46 = vmul.f32 %v3393_v30, %v5272_v3  ;;  %v5273_v40 = vld [vmem:[#allocation8_spill] sm:$0xff] }
 0x225   :  { %v1048_v2 = vmul.f32 %v3399_v32, %v5273_v40  ;;  %3414 = vrcp.f32 %v924_v51  ;;  %v1782_v32 = vadd.f32 0.01, %v4086_v57 }
 0x226   :  { %3416 = vpow2.f32 %v2900_v42  ;;  %v1785_v42 = vadd.f32 0.01, %v4103_v16 }
 0x227   :  { %v4521_v60 = vpop.permute.xlu0 %2102  ;;  %v4523_v1 = vpop.permute.xlu1 %2104  ;;  %3418 = vpow2.f32 %v2901_v54  ;;  %v2920_v41 = vmul.f32 -1.442695, %v1782_v32  ;;  %v1788_v32 = vadd.f32 0.01, %v4136_v7 }
 0x228   :  { %5270 = vst [vmem:[#allocation34_spill] sm:$0xff] %v4521_v60  ;;  %5271 = vst [vmem:[#allocation35_spill] sm:$0xff] %v4523_v1  ;;  %1458 = vrot.lane.b32.xlu0 %v3401_v4, %s3672_s5  ;;  %1460 = vrot.lane.b32.xlu1 %v3403_v9, %s3672_s5  ;;  %v3405_v9 = vpop.eup %3404  ;;  %3420 = vpow2.f32 %v2902_v45 }
 0x229   :  { %v3407_v3 = vpop.eup %3406 }
 0x22a   :  { %v1050_v10 = vmul.f32 %v3407_v3, %v5277_v22  ;;  %v2923_v3 = vmul.f32 -1.442695, %v1785_v42  ;;  %v5281_v42 = vld [vmem:[#allocation12_spill] sm:$0xff] }
 0x22b   :  { %v1170_v59 = vpop.permute.xlu0 %1169  ;;  %v1172_v29 = vpop.permute.xlu1 %1171 }
 0x22c   :  { %v4534_v5 = vadd.f32 %v1170_v59, %v1047_v46  ;;  %v4536_v4 = vadd.f32 %v1172_v29, %v1048_v2  ;;  %v1783_v59 = vadd.f32 0.01, %v4091_v63  ;;  %v1784_v29 = vadd.f32 0.01, %v4098_v12  ;;  %v3409_v54 = vpop.eup %3408  ;;  %v5276_v2 = vld [vmem:[#allocation9_spill] sm:$0xff] }
 0x22d   :  { %v2903_v46 = vmul.f32 -1.442695, %v4208_v0  ;;  %v1049_v45 = vmul.f32 %v3405_v9, %v5276_v2  ;;  %v3411_v20 = vpop.eup %3410 }
 0x22e   :  { %5274 = vst [vmem:[#allocation7_spill] sm:$0xff] %v4534_v5  ;;  %5275 = vst [vmem:[#allocation8_spill] sm:$0xff] %v4536_v4  ;;  %v1232_v6 = vmul.f32 %v4119_v34, %v4534_v5  ;;  %v1233_v30 = vmul.f32 %v4119_v34, %v4536_v4  ;;  %3422 = vtanh.f32 %v4534_v5  ;;  %v1786_v5 = vadd.f32 0.01, %v4116_v31 }
 0x22f   :  { %v4543_v51 = vpop.permute.xlu0 %2042  ;;  %v4545_v40 = vpop.permute.xlu1 %2044  ;;  %3424 = vtanh.f32 %v4536_v4  ;;  %v2921_v26 = vmul.f32 -1.442695, %v1783_v59  ;;  %v2922_v22 = vmul.f32 -1.442695, %v1784_v29 }
 0x230   :  { %1274 = vrot.lane.b32.xlu0 %v1232_v6, %s3672_s5  ;;  %1276 = vrot.lane.b32.xlu1 %v1233_v30, %s3672_s5  ;;  %v3413_v30 = vpop.eup %3412  ;;  %3426 = vpow2.f32 %v2903_v46 }
 0x231   :  { %v3415_v9 = vpop.eup %3414  ;;  %3428 = vpow2.f32 %v2920_v41  ;;  %v1051_v29 = vmul.f32 %v3413_v30, %v5280_v55  ;;  %v2926_v41 = vmul.f32 -1.442695, %v1788_v32  ;;  %v1790_v55 = vadd.f32 0.01, %v4152_v28 }
 0x232   :  { %3430 = vpow2.f32 %v2921_v26  ;;  %v1052_v46 = vmul.f32 %v3415_v9, %v5281_v42  ;;  %v1791_v9 = vadd.f32 0.01, %v4157_v43  ;;  %v1793_v32 = vadd.f32 0.01, %v4173_v21 }
 0x233   :  { %v1174_v6 = vpop.permute.xlu0 %1173  ;;  %v1176_v53 = vpop.permute.xlu1 %1175  ;;  %3432 = vpow2.f32 %v2922_v22  ;;  %v2927_v22 = vmul.f32 -1.442695, %v1789_v23 }
 0x234   :  { %v4559_v60 = vadd.f32 %v1174_v6, %v1049_v45  ;;  %v4561_v4 = vadd.f32 %v1176_v53, %v1050_v10  ;;  %1462 = vrot.lane.b32.xlu0 %v3409_v54, %s3672_s5  ;;  %1464 = vrot.lane.b32.xlu1 %v3411_v20, %s3672_s5  ;;  %v3417_v45 = vpop.eup %3416  ;;  %v2924_v53 = vmul.f32 -1.442695, %v1786_v5  ;;  %v2925_v20 = vmul.f32 -1.442695, %v1787_v33 }
 0x235   :  { %v3419_v54 = vpop.eup %3418  ;;  %3434 = vpow2.f32 %v2923_v3  ;;  %v1570_v30 = vadd.f32 1.0, %v3417_v45  ;;  %v1792_v3 = vadd.f32 0.01, %v4169_v19 }
 0x236   :  { %5278 = vst [vmem:[#allocation9_spill] sm:$0xff] %v4559_v60  ;;  %5279 = vst [vmem:[#allocation10_spill] sm:$0xff] %v4561_v4  ;;  %v1234_v2 = vmul.f32 %v4119_v34, %v4559_v60  ;;  %v1235_v59 = vmul.f32 %v4119_v34, %v4561_v4  ;;  %v3421_v61 = vpop.eup %3420  ;;  %v1571_v26 = vadd.f32 1.0, %v3419_v54  ;;  %3436 = vpow2.f32 %v2924_v53 }
 0x237   :  { %v1178_v10 = vpop.permute.xlu0 %1177  ;;  %v1180_v6 = vpop.permute.xlu1 %1179  ;;  %3438 = vpow2.f32 %v2925_v20  ;;  %v2928_v53 = vmul.f32 -1.442695, %v1790_v55  ;;  %v2931_v20 = vmul.f32 -1.442695, %v1793_v32  ;;  %v1909_v55 = vld [vmem:[%s5198_s2 + $0x78] sm:$0xff] }
 0x238   :  { %1278 = vrot.lane.b32.xlu0 %v1234_v2, %s3672_s5  ;;  %1280 = vrot.lane.b32.xlu1 %v1235_v59, %s3672_s5  ;;  %v3423_v62 = vpop.eup %3422  ;;  %v4575_v5 = vadd.f32 %v1178_v10, %v1051_v29  ;;  %v4577_v1 = vadd.f32 %v1180_v6, %v1052_v46  ;;  %3440 = vtanh.f32 %v4559_v60  ;;  %v1572_v2 = vadd.f32 1.0, %v3421_v61  ;;  %v1906_v61 = vld [vmem:[%s5198_s2 + $0x60] sm:$0xff] }
 0x239   :  { %v3425_v33 = vpop.eup %3424  ;;  %3442 = vpow2.f32 %v2926_v41  ;;  %v2929_v10 = vmul.f32 -1.442695, %v1791_v9  ;;  %v2930_v6 = vmul.f32 -1.442695, %v1792_v3 }
 0x23a   :  { %5282 = vst [vmem:[#allocation11_spill] sm:$0xff] %v4575_v5  ;;  %5283 = vst [vmem:[#allocation12_spill] sm:$0xff] %v4577_v1  ;;  %v1236_v59 = vmul.f32 %v4119_v34, %v4575_v5  ;;  %v1237_v45 = vmul.f32 %v4119_v34, %v4577_v1  ;;  %3444 = vrcp.f32 %v1571_v26  ;;  %v1907_v34 = vld [vmem:[%s5198_s2 + $0x68] sm:$0xff] }
 0x23b   :  { %3446 = vrcp.f32 %v1570_v30 }
 0x23c   :  { %1466 = vrot.lane.b32.xlu0 %v3423_v62, %s3672_s5  ;;  %1468 = vrot.lane.b32.xlu1 %v3425_v33, %s3672_s5  ;;  %v3427_v62 = vpop.eup %3426  ;;  %3448 = vpow2.f32 %v2927_v22 }
 0x23d   :  { %v3429_v23 = vpop.eup %3428  ;;  %3450 = vrcp.f32 %v1572_v2  ;;  %v1573_v42 = vadd.f32 1.0, %v3427_v62 }
 0x23e   :  { %v3431_v54 = vpop.eup %3430  ;;  %3452 = vpow2.f32 %v2928_v53  ;;  %v1846_v41 = vadd.f32 1.0, %v3429_v23 }
 0x23f   :  { %v3433_v29 = vpop.eup %3432  ;;  %3454 = vpow2.f32 %v2929_v10  ;;  %v1847_v26 = vadd.f32 1.0, %v3431_v54 }
 0x240   :  { %1282 = vrot.lane.b32.xlu0 %v1236_v59, %s3672_s5  ;;  %1284 = vrot.lane.b32.xlu1 %v1237_v45, %s3672_s5  ;;  %v3435_v46 = vpop.eup %3434  ;;  %3456 = vpow2.f32 %v2930_v6  ;;  %v1848_v9 = vadd.f32 1.0, %v3433_v29  ;;  %v1908_v45 = vld [vmem:[%s5198_s2 + $0x70] sm:$0xff]  ;;  %s3673_s2 = smov 64  }
 0x241   :  { %v3437_v33 = vpop.eup %3436  ;;  %3458 = vpow2.f32 %v2931_v20  ;;  %v1849_v3 = vadd.f32 1.0, %v3435_v46 }
 0x242   :  { %v3439_v30 = vpop.eup %3438  ;;  %3460 = vrcp.f32 %v1573_v42  ;;  %v1850_v2 = vadd.f32 1.0, %v3437_v33 }
 0x243   :  { %v3441_v22 = vpop.eup %3440  ;;  %3462 = vrcp.f32 %v1846_v41  ;;  %v1851_v10 = vadd.f32 1.0, %v3439_v30 }
 0x244   :  { %1950 = vrot.lane.b32.xlu0 %v1906_v61, %s3671_s11  ;;  %1952 = vrot.lane.b32.xlu1 %v1907_v34, %s3671_s11  ;;  %v3443_v32 = vpop.eup %3442  ;;  %3464 = vrcp.f32 %v1847_v26 }
 0x245   :  { %v3445_v59 = vpop.eup %3444  ;;  %3466 = vrcp.f32 %v1848_v9  ;;  %v1852_v6 = vadd.f32 1.0, %v3443_v32 }
 0x246   :  { %v3447_v53 = vpop.eup %3446  ;;  %v2003_v62 = vmul.f32 %v3445_v59, %v4361_v52  ;;  %3468 = vrcp.f32 %v1849_v3 }
 0x247   :  { %v3449_v23 = vpop.eup %3448  ;;  %3470 = vrcp.f32 %v1850_v2  ;;  %v2002_v20 = vmul.f32 %v3447_v53, %v4359_v13 }
 0x248   :  { %1470 = vrot.lane.b32.xlu0 %v3441_v22, %s3672_s5  ;;  %1956 = vrot.lane.b32.xlu1 %v1909_v55, %s3671_s11  ;;  %v3451_v61 = vpop.eup %3450  ;;  %3472 = vtanh.f32 %v4561_v4  ;;  %v1853_v29 = vadd.f32 1.0, %v3449_v23  ;;  %v5284_v23 = vld [vmem:[#allocation14_spill] sm:$0xff] }
 0x249   :  { %v3453_v34 = vpop.eup %3452  ;;  %3474 = vrcp.f32 %v1851_v10  ;;  %v2004_v2 = vmul.f32 %v3451_v61, %v4367_v47  ;;  %v5286_v61 = vld [vmem:[#allocation13_spill] sm:$0xff] }
 0x24a   :  { %v3455_v54 = vpop.eup %3454  ;;  %3476 = vrcp.f32 %v1852_v6  ;;  %v1854_v46 = vadd.f32 1.0, %v3453_v34  ;;  %v5285_v34 = vld [vmem:[#allocation16_spill] sm:$0xff] }
 0x24b   :  { %v3457_v52 = vpop.eup %3456  ;;  %3478 = vtanh.f32 %v4575_v5  ;;  %v1855_v33 = vadd.f32 1.0, %v3455_v54 }
 0x24c   :  { %1954 = vrot.lane.b32.xlu0 %v1908_v45, %s3671_s11  ;;  %2048 = vrot.lane.b32.xlu1 %v2003_v62, %s3670_s17  ;;  %v3459_v42 = vpop.eup %3458  ;;  %3480 = vtanh.f32 %v4577_v1  ;;  %v1856_v13 = vadd.f32 1.0, %v3457_v52  ;;  %v5287_v52 = vld [vmem:[#allocation15_spill] sm:$0xff] }
 0x24d   :  { %v3461_v41 = vpop.eup %3460  ;;  %3482 = vrcp.f32 %v1853_v29  ;;  %v1857_v9 = vadd.f32 1.0, %v3459_v42 }
 0x24e   :  { %v3463_v26 = vpop.eup %3462  ;;  %v2005_v55 = vmul.f32 %v3461_v41, %v4369_v14  ;;  %3484 = vrcp.f32 %v1854_v46 }
 0x24f   :  { %v3465_v30 = vpop.eup %3464  ;;  %3486 = vrcp.f32 %v1855_v33  ;;  %v5288_v33 = vld [vmem:[#allocation17_spill] sm:$0xff] }
 0x250   :  { %2046 = vrot.lane.b32.xlu0 %v2002_v20, %s3670_s17  ;;  %2112 = vrot.lane.b32.xlu1 %v2003_v62, %s3669_s20  ;;  %v3467_v22 = vpop.eup %3466  ;;  %3488 = vrcp.f32 %v1856_v13  ;;  %v1975_v6 = vmul.f32 %v3465_v30, %v5284_v23  ;;  %v5289_v30 = vld [vmem:[#allocation18_spill] sm:$0xff] }
 0x251   :  { %v3469_v3 = vpop.eup %3468  ;;  %3490 = vrcp.f32 %v1857_v9  ;;  %v1976_v42 = vmul.f32 %v3467_v22, %v5287_v52 }
 0x252   :  { %v3471_v32 = vpop.eup %3470  ;;  %v1977_v54 = vmul.f32 %v3469_v3, %v5285_v34  ;;  %v4629_v29 = vadd.f32 %v4408_v17, %v1975_v6  ;;  %v5290_v3 = vld [vmem:[#allocation19_spill] sm:$0xff] }
 0x253   :  { %v3473_v59 = vpop.eup %3472  ;;  %v1978_v13 = vmul.f32 %v3471_v32, %v5288_v33  ;;  %v4643_v17 = vadd.f32 %v4422_v8, %v1976_v42  ;;  %v5295_v6 = vld [vmem:[#allocation23_spill] sm:$0xff] }
 0x254   :  { %2110 = vrot.lane.b32.xlu0 %v2002_v20, %s3669_s20  ;;  %2052 = vrot.lane.b32.xlu1 %v2005_v55, %s3670_s17  ;;  %v3475_v45 = vpop.eup %3474  ;;  %v1974_v20 = vmul.f32 %v3463_v26, %v5286_v61  ;;  %v4633_v46 = vadd.f32 %v4433_v36, %v1977_v54 }
 0x255   :  { %v3477_v14 = vpop.eup %3476  ;;  %v1979_v9 = vmul.f32 %v3475_v45, %v5289_v30  ;;  %v4648_v22 = vadd.f32 %v4460_v15, %v1978_v13 }
 0x256   :  { %v3479_v53 = vpop.eup %3478  ;;  %v4640_v26 = vadd.f32 %v4396_v37, %v1974_v20 }
 0x257   :  { %v3481_v62 = vpop.eup %3480  ;;  %v4651_v32 = vadd.f32 %v4462_v27, %v1979_v9  ;;  %v5296_v27 = vld [vmem:[#allocation24_spill] sm:$0xff] }
 0x258   :  { %2050 = vrot.lane.b32.xlu0 %v2004_v2, %s3670_s17  ;;  %1472 = vrot.lane.b32.xlu1 %v3473_v59, %s3672_s5  ;;  %v3483_v10 = vpop.eup %3482  ;;  %v1980_v59 = vmul.f32 %v3477_v14, %v5290_v3  ;;  %v3092_v8 = vpack.i.bf16 %v4629_v29, %v4640_v26 }
 0x259   :  { %v3485_v47 = vpop.eup %3484 }
 0x25a   :  { %v3487_v41 = vpop.eup %3486  ;;  %v4654_v45 = vadd.f32 %v4491_v38, %v1980_v59  ;;  %v3102_v38 = vpack.i.bf16 %v4651_v32, %v4648_v22 }
 0x25b   :  { %v3489_v23 = vpop.eup %3488 }
 0x25c   :  { %1474 = vrot.lane.b32.xlu0 %v3479_v53, %s3672_s5  ;;  %1476 = vrot.lane.b32.xlu1 %v3481_v62, %s3672_s5  ;;  %v5291_v53 = vld [vmem:[#allocation20_spill] sm:$0xff]  ;;  %v3491_v36 = vpop.eup %3490  ;;  %5292 = vst [vmem:[#allocation14_spill] sm:$0xff] %v4654_v45  ;;  %v1984_v34 = vmul.f32 %v3489_v23, %v5295_v6 }
 0x25d   :  { %v1981_v62 = vmul.f32 %v3483_v10, %v5291_v53  ;;  %v5294_v10 = vld [vmem:[#allocation22_spill] sm:$0xff]  ;;  %v1985_v54 = vmul.f32 %v3491_v36, %v5296_v27 }
 0x25e   :  { %v1983_v15 = vmul.f32 %v3487_v41, %v5294_v10  ;;  %v4680_v20 = vadd.f32 %v4543_v51, %v1984_v34  ;;  %v4691_v41 = vpop.permute.xlu0 %2106 }
 0x25f   :  { %v4657_v37 = vadd.f32 %v4493_v24, %v1981_v62  ;;  %v4683_v52 = vadd.f32 %v4545_v40, %v1985_v54 }
 0x260   :  { %2114 = vrot.lane.b32.xlu0 %v2004_v2, %s3669_s20  ;;  %2116 = vrot.lane.b32.xlu1 %v2005_v55, %s3669_s20  ;;  %v3097_v2 = vpack.i.bf16 %v4633_v46, %v4643_v17  ;;  %v5293_v55 = vld [vmem:[#allocation21_spill] sm:$0xff]  ;;  %5298 = vst [vmem:[#allocation13_spill] sm:$0xff] %v4680_v20  ;;  %s3674_s20 = smov 104  }
 0x261   :  { %v1982_v14 = vmul.f32 %v3485_v47, %v5293_v55  ;;  %v3107_v24 = vpack.i.bf16 %v4657_v37, %v4654_v45  ;;  %v4677_v47 = vadd.f32 %v4517_v39, %v1983_v15  ;;  %v4693_v39 = vpop.permute.xlu1 %2108 }
 0x263   :  { %v4674_v61 = vadd.f32 %v4515_v18, %v1982_v14  ;;  %v3117_v18 = vpack.i.bf16 %v4683_v52, %v4680_v20 }
 0x264   :  { %3093 = vrot.lane.b32.xlu0 %v3092_v8, %s3673_s2  ;;  %3098 = vrot.lane.b32.xlu1 %v3097_v2, %s3673_s2 }
 0x265   :  { %5297 = vst [vmem:[#allocation16_spill] sm:$0xff] %v4674_v61  ;;  %v3112_v42 = vpack.i.bf16 %v4677_v47, %v4674_v61 }
 0x266   :  { %v1255_v51 = vpop.permute.xlu0 %1254 }
 0x268   :  { %3103 = vrot.lane.b32.xlu0 %v3102_v38, %s3673_s2  ;;  %3108 = vrot.lane.b32.xlu1 %v3107_v24, %s3673_s2 }
 0x26c   :  { %3113 = vrot.lane.b32.xlu0 %v3112_v42, %s3673_s2  ;;  %3118 = vrot.lane.b32.xlu1 %v3117_v18, %s3673_s2 }
 0x26e   :  { %v1257_v40 = vpop.permute.xlu1 %1256 }
 0x26f   :  { %v1303_v33 = vadd.f32 %v1257_v40, %v4091_v63 }
 0x271   :  { %v2873_v13 = vmul.f32 -1.442695, %v1303_v33 }
 0x272   :  { %v1259_v30 = vpop.permute.xlu0 %1258 }
 0x273   :  { %3492 = vpow2.f32 %v2873_v13  ;;  %v1304_v9 = vadd.f32 %v1259_v30, %v4098_v12 }
 0x275   :  { %v2874_v3 = vmul.f32 -1.442695, %v1304_v9 }
 0x276   :  { %v4699_v53 = vpop.permute.xlu0 %1446 }
 0x277   :  { %3494 = vpow2.f32 %v2874_v3 }
 0x27a   :  { %v1261_v59 = vpop.permute.xlu1 %1260 }
 0x27d   :  { %v3493_v62 = vpop.eup %3492 }
 0x27e   :  { %v1367_v23 = vadd.f32 1.0, %v3493_v62  ;;  %v1449_v36 = vpop.permute.xlu1 %1448  ;;  %v1263_v8 = vpop.permute.xlu0 %1262 }
 0x280   :  { %3496 = vrcp.f32 %v1367_v23 }
 0x281   :  { %v3495_v2 = vpop.eup %3494 }
 0x282   :  { %v1368_v55 = vadd.f32 1.0, %v3495_v2  ;;  %v1265_v14 = vpop.permute.xlu1 %1264  ;;  %v1451_v6 = vpop.permute.xlu0 %1450 }
 0x283   :  { %v1307_v10 = vadd.f32 %v1265_v14, %v4121_v35 }
 0x284   :  { %3498 = vrcp.f32 %v1368_v55 }
 0x285   :  { %v2877_v15 = vmul.f32 -1.442695, %v1307_v10 }
 0x286   :  { %v4702_v34 = vpop.permute.xlu1 %1452 }
 0x287   :  { %3500 = vpow2.f32 %v2877_v15  ;;  %v1794_v15 = vadd.f32 0.01, %v4185_v56 }
 0x28a   :  { %v3497_v27 = vpop.eup %3496  ;;  %v1267_v54 = vpop.permute.xlu0 %1266 }
 0x28b   :  { %v1495_v38 = vmul.f32 %v3497_v27, %v1449_v36  ;;  %v1308_v24 = vadd.f32 %v1267_v54, %v4136_v7  ;;  %v1269_v42 = vpop.permute.xlu1 %1268  ;;  %v1302_v27 = vadd.f32 %v1255_v51, %v4086_v57  ;;  %v3187_v51 = vld [vmem:[%s5200_s7] sm:$0xff]   ;;  %s3675_s7 = smov 96  }
 0x28c   :  { %3064 = vmatprep.subr.bf16.mxu1 %v3187_v51 }
 0x28d   :  { %v2135_v18 = vadd.f32 %v4412_v58, %v1495_v38  ;;  %v2878_v40 = vmul.f32 -1.442695, %v1308_v24  ;;  %v2932_v24 = vmul.f32 -1.442695, %v1794_v15  ;;  %3065 = vmatpush3.bf16.msra.mxu1 %v3187_v51 }
 0x28e   :  { %v3499_v33 = vpop.eup %3498  ;;  %v4709_v23 = vpop.permute.xlu0 %1454 }
 0x28f   :  { %v1496_v13 = vmul.f32 %v3499_v33, %v1451_v6  ;;  %3502 = vpow2.f32 %v2878_v40  ;;  %2168 = vrot.lane.b32.xlu1 %v2135_v18, %s3674_s20  ;;  %v1457_v62 = vpop.permute.xlu1 %1456  ;;  %v1795_v6 = vadd.f32 0.01, %v4190_v25 }
 0x291   :  { %v3501_v30 = vpop.eup %3500  ;;  %v2136_v9 = vadd.f32 %v4431_v44, %v1496_v13  ;;  %v2933_v40 = vmul.f32 -1.442695, %v1795_v6  ;;  %v2872_v13 = vmul.f32 -1.442695, %v1302_v27  ;;  %v1797_v6 = vadd.f32 0.01, %v4208_v0 }
 0x292   :  { %v1371_v3 = vadd.f32 1.0, %v3501_v30 }
 0x293   :  { %2170 = vrot.lane.b32.xlu1 %v2136_v9, %s3674_s20 }
 0x294   :  { %3504 = vrcp.f32 %v1371_v3  ;;  %v1305_v3 = vadd.f32 %v1261_v59, %v4103_v16 }
 0x296   :  { %v1273_v36 = vpop.permute.xlu1 %1272  ;;  %v1271_v2 = vpop.permute.xlu0 %1270  ;;  %v2875_v59 = vmul.f32 -1.442695, %v1305_v3 }
 0x297   :  { %v1311_v58 = vadd.f32 %v1273_v36, %v4157_v43 }
 0x299   :  { %v3503_v55 = vpop.eup %3502  ;;  %v2881_v14 = vmul.f32 -1.442695, %v1311_v58 }
 0x29a   :  { %v1372_v10 = vadd.f32 1.0, %v3503_v55  ;;  %v1459_v54 = vpop.permute.xlu0 %1458  ;;  %v4715_v38 = vpop.permute.xlu1 %1460 }
 0x29c   :  { %3506 = vrcp.f32 %v1372_v10 }
 0x29d   :  { %3508 = vpow2.f32 %v2881_v14 }
 0x29e   :  { %v3505_v44 = vpop.eup %3504  ;;  %3510 = vpow2.f32 %v2932_v24 }
 0x29f   :  { %v1499_v18 = vmul.f32 %v3505_v44, %v1457_v62  ;;  %3512 = vpow2.f32 %v2933_v40  ;;  %v1306_v62 = vadd.f32 %v1263_v8, %v4116_v31  ;;  %v1796_v8 = vadd.f32 0.01, %v4202_v49 }
 0x2a0   :  { %3514 = vpow2.f32 %v2872_v13 }
 0x2a1   :  { %v2139_v33 = vadd.f32 %v4474_v50, %v1499_v18  ;;  %v2876_v27 = vmul.f32 -1.442695, %v1306_v62  ;;  %v1309_v18 = vadd.f32 %v1269_v42, %v4141_v11 }
 0x2a2   :  { %v1275_v30 = vpop.permute.xlu0 %1274  ;;  %v1277_v9 = vpop.permute.xlu1 %1276 }
 0x2a3   :  { %v1312_v36 = vadd.f32 %v1275_v30, %v4169_v19  ;;  %2176 = vrot.lane.b32.xlu1 %v2139_v33, %s3674_s20  ;;  %v2879_v62 = vmul.f32 -1.442695, %v1309_v18 }
 0x2a5   :  { %v2882_v58 = vmul.f32 -1.442695, %v1312_v36  ;;  %v2934_v36 = vmul.f32 -1.442695, %v1796_v8  ;;  %v1313_v8 = vadd.f32 %v1277_v9, %v4173_v21 }
 0x2a6   :  { %v3507_v55 = vpop.eup %3506  ;;  %v4725_v50 = vpop.permute.xlu0 %1462 }
 0x2a7   :  { %v1465_v14 = vpop.permute.xlu1 %1464  ;;  %v3509_v10 = vpop.eup %3508  ;;  %v1500_v15 = vmul.f32 %v3507_v55, %v1459_v54  ;;  %3516 = vpow2.f32 %v2882_v58  ;;  %v2935_v54 = vmul.f32 -1.442695, %v1797_v6 }
 0x2a8   :  { %v1375_v44 = vadd.f32 1.0, %v3509_v10  ;;  %v3511_v30 = vpop.eup %3510 }
 0x2a9   :  { %v2140_v24 = vadd.f32 %v4497_v48, %v1500_v15  ;;  %v3513_v51 = vpop.eup %3512  ;;  %v1310_v48 = vadd.f32 %v1271_v2, %v4152_v28  ;;  %v1858_v42 = vadd.f32 1.0, %v3511_v30 }
 0x2aa   :  { %3518 = vrcp.f32 %v1375_v44  ;;  %v1279_v40 = vpop.permute.xlu0 %1278  ;;  %v3515_v10 = vpop.eup %3514  ;;  %v1859_v15 = vadd.f32 1.0, %v3513_v51 }
 0x2ab   :  { %v1281_v33 = vpop.permute.xlu1 %1280  ;;  %3520 = vpow2.f32 %v2875_v59  ;;  %2178 = vrot.lane.b32.xlu1 %v2140_v24, %s3674_s20  ;;  %v2880_v6 = vmul.f32 -1.442695, %v1310_v48  ;;  %v5299_v48 = vld [vmem:[#allocation35_spill] sm:$0xff]  ;;  %v1314_v1 = vadd.f32 %v1279_v40, %v4185_v56 }
 0x2ac   :  { %v1315_v13 = vadd.f32 %v1281_v33, %v4190_v25  ;;  %3522 = vpow2.f32 %v2876_v27  ;;  %v1366_v33 = vadd.f32 1.0, %v3515_v10 }
 0x2ad   :  { %3524 = vpow2.f32 %v2935_v54 }
 0x2ae   :  { %v2885_v3 = vmul.f32 -1.442695, %v1315_v13  ;;  %v1467_v58 = vpop.permute.xlu0 %1466 }
 0x2af   :  { %v4734_v55 = vpop.permute.xlu1 %1468 }
 0x2b0   :  { %3526 = vpow2.f32 %v2885_v3 }
 0x2b1   :  { %v3517_v59 = vpop.eup %3516  ;;  %3528 = vpow2.f32 %v2934_v36 }
 0x2b2   :  { %3530 = vpow2.f32 %v2879_v62  ;;  %v1376_v44 = vadd.f32 1.0, %v3517_v59  ;;  %v1283_v27 = vpop.permute.xlu0 %1282  ;;  %v2883_v62 = vmul.f32 -1.442695, %v1313_v8 }
 0x2b3   :  { %v1285_v24 = vpop.permute.xlu1 %1284  ;;  %v1316_v18 = vadd.f32 %v1283_v27, %v4202_v49  ;;  %3532 = vrcp.f32 %v1858_v42  ;;  %v2884_v27 = vmul.f32 -1.442695, %v1314_v1 }
 0x2b4   :  { %v3519_v2 = vpop.eup %3518  ;;  %3534 = vrcp.f32 %v1376_v44  ;;  %v1317_v40 = vadd.f32 %v1285_v24, %v4208_v0 }
 0x2b5   :  { %v3521_v13 = vpop.eup %3520  ;;  %v1503_v54 = vmul.f32 %v3519_v2, %v1465_v14  ;;  %v2886_v30 = vmul.f32 -1.442695, %v1316_v18  ;;  %3536 = vrcp.f32 %v1859_v15 }
 0x2b6   :  { %3538 = vpow2.f32 %v2880_v6  ;;  %v1951_v3 = vpop.permute.xlu0 %1950  ;;  %v3523_v51 = vpop.eup %3522  ;;  %v1369_v9 = vadd.f32 1.0, %v3521_v13  ;;  %v2887_v1 = vmul.f32 -1.442695, %v1317_v40 }
 0x2b7   :  { %v1953_v36 = vpop.permute.xlu1 %1952  ;;  %v2143_v59 = vadd.f32 %v5299_v48, %v1503_v54  ;;  %3540 = vpow2.f32 %v2886_v30  ;;  %v3525_v42 = vpop.eup %3524  ;;  %v1370_v44 = vadd.f32 1.0, %v3523_v51 }
 0x2b8   :  { %3542 = vrcp.f32 %v1366_v33 }
 0x2b9   :  { %2184 = vrot.lane.b32.xlu1 %v2143_v59, %s3674_s20  ;;  %3544 = vpow2.f32 %v2883_v62 }
 0x2ba   :  { %v3527_v10 = vpop.eup %3526  ;;  %v4741_v14 = vpop.permute.xlu0 %1470  ;;  %3546 = vrcp.f32 %v1369_v9 }
 0x2bb   :  { %v4743_v15 = vpop.permute.xlu1 %1956  ;;  %v3529_v6 = vpop.eup %3528  ;;  %v1379_v18 = vadd.f32 1.0, %v3527_v10  ;;  %3548 = vrcp.f32 %v1370_v44  ;;  %v1861_v44 = vadd.f32 1.0, %v3525_v42 }
 0x2bc   :  { %v3531_v8 = vpop.eup %3530  ;;  %3550 = vpow2.f32 %v2884_v27  ;;  %v1860_v20 = vadd.f32 1.0, %v3529_v6 }
 0x2bd   :  { %v3533_v2 = vpop.eup %3532  ;;  %v1373_v48 = vadd.f32 1.0, %v3531_v8  ;;  %3552 = vrcp.f32 %v1379_v18 }
 0x2be   :  { %v3535_v33 = vpop.eup %3534  ;;  %v1955_v13 = vpop.permute.xlu0 %1954  ;;  %v1986_v4 = vmul.f32 %v3533_v2, %v1951_v3  ;;  %v5300_v2 = vld [vmem:[#allocation29_spill] sm:$0xff] }
 0x2bf   :  { %v2049_v54 = vpop.permute.xlu1 %2048  ;;  %v3537_v30 = vpop.eup %3536  ;;  %v1504_v51 = vmul.f32 %v3535_v33, %v1467_v58  ;;  %3554 = vrcp.f32 %v1373_v48 }
 0x2c0   :  { %v3539_v59 = vpop.eup %3538  ;;  %v1987_v9 = vmul.f32 %v3537_v30, %v1953_v36 }
 0x2c1   :  { %v3541_v5 = vpop.eup %3540  ;;  %v2144_v62 = vadd.f32 %v4691_v41, %v1504_v51  ;;  %v1374_v58 = vadd.f32 1.0, %v3539_v59  ;;  %v5301_v51 = vld [vmem:[#allocation32_spill] sm:$0xff] }
 0x2c2   :  { %v3543_v10 = vpop.eup %3542  ;;  %v1380_v60 = vadd.f32 1.0, %v3541_v5  ;;  %v2047_v24 = vpop.permute.xlu0 %2046  ;;  %v4747_v45 = vadd.f32 %v2049_v54, %v1987_v9 }
 0x2c3   :  { %v2113_v61 = vpop.permute.xlu1 %2112  ;;  %v4749_v8 = vadd.f32 %v2047_v24, %v1986_v4  ;;  %2186 = vrot.lane.b32.xlu1 %v2144_v62, %s3674_s20  ;;  %v3545_v27 = vpop.eup %3544  ;;  %v1494_v41 = vmul.f32 %v3543_v10, %v4699_v53 }
 0x2c4   :  { %3556 = vrcp.f32 %v1380_v60  ;;  %v3547_v3 = vpop.eup %3546  ;;  %v1377_v42 = vadd.f32 1.0, %v3545_v27 }
 0x2c5   :  { %3558 = vpow2.f32 %v2887_v1  ;;  %v3122_v5 = vpack.i.bf16 %v4747_v45, %v4749_v8  ;;  %v3549_v4 = vpop.eup %3548  ;;  %v2134_v60 = vadd.f32 %v5300_v2, %v1494_v41  ;;  %v1497_v40 = vmul.f32 %v3547_v3, %v4702_v34 }
 0x2c6   :  { %3560 = vrcp.f32 %v1860_v20  ;;  %v2111_v36 = vpop.permute.xlu0 %2110  ;;  %v3551_v18 = vpop.eup %3550  ;;  %v1498_v62 = vmul.f32 %v3549_v4, %v4709_v23 }
 0x2c7   :  { %v2053_v6 = vpop.permute.xlu1 %2052  ;;  %3562 = vrcp.f32 %v1861_v44  ;;  %3123 = vrot.lane.b32.xlu0 %v3122_v5, %s3673_s2  ;;  %v3553_v53 = vpop.eup %3552  ;;  %v1378_v20 = vadd.f32 1.0, %v3551_v18  ;;  %v2137_v59 = vadd.f32 %v5301_v51, %v1497_v40 }
 0x2c8   :  { %3564 = vrcp.f32 %v1374_v58  ;;  %v5302_v58 = vld [vmem:[#allocation27_spill] sm:$0xff] }
 0x2c9   :  { %3566 = vrcp.f32 %v1377_v42  ;;  %v3555_v48 = vpop.eup %3554  ;;  %v2138_v27 = vadd.f32 %v5302_v58, %v1498_v62 }
 0x2ca   :  { %v2051_v33 = vpop.permute.xlu0 %2050  ;;  %3568 = vrcp.f32 %v1378_v20  ;;  %v1501_v41 = vmul.f32 %v3555_v48, %v4715_v38 }
 0x2cb   :  { %v1473_v54 = vpop.permute.xlu1 %1472  ;;  %2166 = vrot.lane.b32.xlu0 %v2134_v60, %s3674_s20  ;;  %v5303_v60 = vld [vmem:[#allocation4_spill] sm:$0xff] }
 0x2cc   :  { %v1507_v30 = vmul.f32 %v3553_v53, %v1473_v54  ;;  %v2141_v40 = vadd.f32 %v5303_v60, %v1501_v41 }
 0x2ce   :  { %v2147_v1 = vadd.f32 %v2113_v61, %v1507_v30  ;;  %v3557_v9 = vpop.eup %3556  ;;  %v1475_v10 = vpop.permute.xlu0 %1474 }
 0x2cf   :  { %v3559_v24 = vpop.eup %3558  ;;  %2172 = vrot.lane.b32.xlu0 %v2137_v59, %s3674_s20  ;;  %v1508_v3 = vmul.f32 %v3557_v9, %v1475_v10  ;;  %v1477_v48 = vpop.permute.xlu1 %1476 }
 0x2d0   :  { %2192 = vrot.lane.b32.xlu1 %v2147_v1, %s3674_s20  ;;  %v3561_v34 = vpop.eup %3560  ;;  %v1381_v18 = vadd.f32 1.0, %v3559_v24 }
 0x2d1   :  { %v3563_v44 = vpop.eup %3562  ;;  %v1988_v5 = vmul.f32 %v3561_v34, %v1955_v13  ;;  %v5304_v13 = vld [vmem:[#allocation34_spill] sm:$0xff] }
 0x2d2   :  { %v3565_v42 = vpop.eup %3564  ;;  %v2115_v23 = vpop.permute.xlu0 %2114  ;;  %v1989_v61 = vmul.f32 %v3563_v44, %v4743_v15  ;;  %3570 = vrcp.f32 %v1381_v18 }
 0x2d3   :  { %v2084_v4 = vadd.f32 %v2051_v33, %v1988_v5  ;;  %v2148_v2 = vadd.f32 %v2115_v23, %v1508_v3  ;;  %2174 = vrot.lane.b32.xlu0 %v2138_v27, %s3674_s20  ;;  %v1502_v53 = vmul.f32 %v3565_v42, %v4725_v50  ;;  %v3567_v30 = vpop.eup %3566 }
 0x2d4   :  { %v2085_v54 = vadd.f32 %v2053_v6, %v1989_v61  ;;  %v1505_v15 = vmul.f32 %v3567_v30, %v4734_v55  ;;  %v3569_v33 = vpop.eup %3568  ;;  %v2117_v55 = vpop.permute.xlu1 %2116 }
 0x2d5   :  { %2194 = vrot.lane.b32.xlu1 %v2148_v2, %s3674_s20  ;;  %v2142_v20 = vadd.f32 %v5304_v13, %v1502_v53  ;;  %v1506_v6 = vmul.f32 %v3569_v33, %v4741_v14 }
 0x2d6   :  { %v3127_v38 = vpack.i.bf16 %v2085_v54, %v2084_v4  ;;  %v2145_v50 = vadd.f32 %v4693_v39, %v1505_v15 }
 0x2d7   :  { %2180 = vrot.lane.b32.xlu0 %v2141_v40, %s3674_s20  ;;  %v2146_v59 = vadd.f32 %v2111_v36, %v1506_v6 }
 0x2d9   :  { %3128 = vrot.lane.b32.xlu1 %v3127_v38, %s3673_s2 }
 0x2db   :  { %2182 = vrot.lane.b32.xlu0 %v2142_v20, %s3674_s20 }
 0x2dc   :  { %v3571_v51 = vpop.eup %3570 }
 0x2dd   :  { %1624 = vrot.lane.b32.xlu1 %v4091_v63, %s3675_s7  ;;  %v1509_v62 = vmul.f32 %v3571_v51, %v1477_v48 }
 0x2df   :  { %2188 = vrot.lane.b32.xlu0 %v2145_v50, %s3674_s20  ;;  %v2149_v1 = vadd.f32 %v2117_v55, %v1509_v62 }
 0x2e1   :  { %1628 = vrot.lane.b32.xlu1 %v4103_v16, %s3675_s7 }
 0x2e3   :  { %2190 = vrot.lane.b32.xlu0 %v2146_v59, %s3674_s20 }
 0x2e5   :  { %1632 = vrot.lane.b32.xlu1 %v4121_v35, %s3675_s7 }
 0x2e7   :  { %2196 = vrot.lane.b32.xlu0 %v2149_v1, %s3674_s20 }
 0x2e9   :  { %1636 = vrot.lane.b32.xlu1 %v4141_v11, %s3675_s7 }
 0x2eb   :  { %1622 = vrot.lane.b32.xlu0 %v4086_v57, %s3675_s7 }
 0x2ed   :  { %1640 = vrot.lane.b32.xlu1 %v4157_v43, %s3675_s7 }
 0x2ef   :  { %1626 = vrot.lane.b32.xlu0 %v4098_v12, %s3675_s7 }
 0x2f1   :  { %1644 = vrot.lane.b32.xlu1 %v4173_v21, %s3675_s7 }
 0x2f3   :  { %1630 = vrot.lane.b32.xlu0 %v4116_v31, %s3675_s7 }
 0x2f5   :  { %1648 = vrot.lane.b32.xlu1 %v4190_v25, %s3675_s7 }
 0x2f7   :  { %1634 = vrot.lane.b32.xlu0 %v4136_v7, %s3675_s7 }
 0x2f9   :  { %1652 = vrot.lane.b32.xlu1 %v4208_v0, %s3675_s7 }
 0x2fb   :  { %1638 = vrot.lane.b32.xlu0 %v4152_v28, %s3675_s7 }
 0x2fd   :  { %2602 = vrot.lane.b32.xlu1 %v4629_v29, %s3671_s11  ;;  %v5305_v29 = vld [vmem:[#allocation14_spill] sm:$0xff] }
 0x2ff   :  { %1642 = vrot.lane.b32.xlu0 %v4169_v19, %s3675_s7 }
 0x301   :  { %2606 = vrot.lane.b32.xlu1 %v4633_v46, %s3671_s11  ;;  %v5306_v46 = vld [vmem:[#allocation16_spill] sm:$0xff] }
 0x303   :  { %1646 = vrot.lane.b32.xlu0 %v4185_v56, %s3675_s7 }
 0x305   :  { %2610 = vrot.lane.b32.xlu1 %v4651_v32, %s3671_s11 }
 0x307   :  { %1650 = vrot.lane.b32.xlu0 %v4202_v49, %s3675_s7 }
 0x309   :  { %2614 = vrot.lane.b32.xlu1 %v4657_v37, %s3671_s11 }
 0x30b   :  { %2600 = vrot.lane.b32.xlu0 %v4640_v26, %s3671_s11  ;;  %v3099_v26 = vpop.permute.xlu1 %3098 }
 0x30c   :  { %v3101_v27 = vunpack.i.h.bf16 %v3099_v26  ;;  %v3100_v41 = vunpack.i.l.bf16 %v3099_v26 }
 0x30d   :  { %2618 = vrot.lane.b32.xlu1 %v4677_v47, %s3671_s11 }
 0x30f   :  { %2604 = vrot.lane.b32.xlu0 %v4643_v17, %s3671_s11  ;;  %v5307_v17 = vld [vmem:[#allocation13_spill] sm:$0xff]  ;;  %v3109_v32 = vpop.permute.xlu1 %3108 }
 0x310   :  { %v3111_v30 = vunpack.i.h.bf16 %v3109_v32  ;;  %v3110_v38 = vunpack.i.l.bf16 %v3109_v32 }
 0x311   :  { %2622 = vrot.lane.b32.xlu1 %v4683_v52, %s3671_s11 }
 0x313   :  { %2608 = vrot.lane.b32.xlu0 %v4648_v22, %s3671_s11  ;;  %v3094_v22 = vpop.permute.xlu0 %3093 }
 0x314   :  { %v3096_v9 = vunpack.i.h.bf16 %v3094_v22  ;;  %v3095_v10 = vunpack.i.l.bf16 %v3094_v22 }
 0x315   :  { %2626 = vrot.lane.b32.xlu1 %v4747_v45, %s3671_s11  ;;  %v3119_v45 = vpop.permute.xlu1 %3118 }
 0x317   :  { %2612 = vrot.lane.b32.xlu0 %v5305_v29, %s3671_s11  ;;  %v3104_v37 = vpop.permute.xlu0 %3103  ;;  %v3121_v29 = vunpack.i.h.bf16 %v3119_v45 }
 0x318   :  { %v3106_v61 = vunpack.i.h.bf16 %v3104_v37 }
 0x319   :  { %2630 = vrot.lane.b32.xlu1 %v2085_v54, %s3671_s11  ;;  %v4826_v47 = vpop.permute.xlu1 %2168 }
 0x31a   :  { %v2280_v34 = vsel %vm2278_vm2, %v4826_v47, %v3096_v9 }
 0x31b   :  { %2616 = vrot.lane.b32.xlu0 %v5306_v46, %s3671_s11  ;;  %v3114_v52 = vpop.permute.xlu0 %3113  ;;  %v3120_v46 = vunpack.i.l.bf16 %v3119_v45 }
 0x31c   :  { %v3116_v50 = vunpack.i.h.bf16 %v3114_v52  ;;  %v3115_v6 = vunpack.i.l.bf16 %v3114_v52 }
 0x31d   :  { %v4828_v39 = vpop.permute.xlu1 %2170 }
 0x31e   :  { %v2281_v42 = vsel %vm2278_vm2, %v4828_v39, %v3100_v41 }
 0x31f   :  { %2620 = vrot.lane.b32.xlu0 %v5307_v17, %s3671_s11 }
 0x321   :  { %v4830_v14 = vpop.permute.xlu1 %2176 }
 0x322   :  { %v2284_v40 = vsel %vm2278_vm2, %v4830_v14, %v3106_v61 }
 0x323   :  { %2624 = vrot.lane.b32.xlu0 %v4749_v8, %s3671_s11 }
 0x325   :  { %v4832_v24 = vpop.permute.xlu1 %2178 }
 0x326   :  { %v2285_v15 = vsel %vm2278_vm2, %v4832_v24, %v3110_v38 }
 0x327   :  { %2628 = vrot.lane.b32.xlu0 %v2084_v4, %s3671_s11  ;;  %v3105_v4 = vunpack.i.l.bf16 %v3104_v37 }
 0x32b   :  { %v4840_v5 = vpop.permute.xlu1 %2184 }
 0x32c   :  { %v2288_v55 = vsel %vm2278_vm2, %v4840_v5, %v3116_v50 }
 0x335   :  { %v4849_v2 = vpop.permute.xlu1 %2186 }
 0x336   :  { %v2289_v17 = vsel %vm2278_vm2, %v4849_v2, %v3120_v46 }
 0x339   :  { %v3124_v36 = vpop.permute.xlu0 %3123 }
 0x33a   :  { %v3126_v52 = vunpack.i.h.bf16 %v3124_v36  ;;  %v3125_v9 = vunpack.i.l.bf16 %v3124_v36 }
 0x33d   :  { %v4834_v8 = vpop.permute.xlu0 %2166 }
 0x33e   :  { %v2279_v44 = vsel %vm2278_vm2, %v4834_v8, %v3095_v10 }
 0x33f   :  { %v2295_v58 = vpack.c.bf16 %v2280_v34, %v2279_v44 }
 0x341   :  { %v4842_v3 = vpop.permute.xlu0 %2172  ;;  %3066 = vmatprep.mubr.msk.bf16.mxu1 %vm2318_vm3, %v2295_v58 }
 0x342   :  { %v2282_v18 = vsel %vm2278_vm2, %v4842_v3, %v3101_v27  ;;  %v4858_v13 = vpop.permute.xlu1 %2192 }
 0x343   :  { %v2296_v23 = vpack.c.bf16 %v2282_v18, %v2281_v42  ;;  %v2292_v45 = vsel %vm2278_vm2, %v4858_v13, %v3126_v52 }
 0x345   :  { %v4851_v60 = vpop.permute.xlu0 %2174  ;;  %3067 = vmatmul.mubr.msk.bf16.vlgmr.msra.gmra.mrb[16].mxu1 %vm2318_vm3, %v2296_v23  ;;  %v4901_v23 = vld [vmem:[%s5201_s8] ss:$0 sm:$0xff]  ;;  %s3676_s8 = smov 48  }
 0x346   :  { %v2283_v53 = vsel %vm2278_vm2, %v4851_v60, %v3105_v4 }
 0x347   :  { %v2297_v54 = vpack.c.bf16 %v2284_v40, %v2283_v53  ;;  %v4867_v51 = vpop.permute.xlu1 %2194 }
 0x349   :  { %v4860_v20 = vpop.permute.xlu0 %2180  ;;  %3070 = vmatprep.mubr.msk.bf16.mxu1 %vm2318_vm3, %v2297_v54 }
 0x34a   :  { %v2286_v33 = vsel %vm2278_vm2, %v4860_v20, %v3111_v30 }
 0x34b   :  { %v2298_v48 = vpack.c.bf16 %v2286_v33, %v2285_v15  ;;  %v3129_v22 = vpop.permute.xlu1 %3128 }
 0x34c   :  { %v3130_v34 = vunpack.i.l.bf16 %v3129_v22  ;;  %v3131_v27 = vunpack.i.h.bf16 %v3129_v22 }
 0x34d   :  { %v4869_v59 = vpop.permute.xlu0 %2182  ;;  %3071 = vmatmul.mubr.msk.bf16.gmra.mrb[20].mxu1 %vm2318_vm3, %v2298_v48 }
 0x34e   :  { %v2287_v62 = vsel %vm2278_vm2, %v4869_v59, %v3115_v6  ;;  %v2293_v36 = vsel %vm2278_vm2, %v4867_v51, %v3130_v34 }
 0x34f   :  { %v2299_v1 = vpack.c.bf16 %v2288_v55, %v2287_v62 }
 0x351   :  { %v4876_v26 = vpop.permute.xlu0 %2188  ;;  %3074 = vmatprep.mubr.msk.bf16.mxu1 %vm2318_vm3, %v2299_v1 }
 0x352   :  { %v2290_v32 = vsel %vm2278_vm2, %v4876_v26, %v3121_v29 }
 0x353   :  { %v2300_v37 = vpack.c.bf16 %v2290_v32, %v2289_v17 }
 0x355   :  { %v4883_v10 = vpop.permute.xlu0 %2190  ;;  %3075 = vmatmul.mubr.msk.bf16.gmra.mrb[24].mxu1 %vm2318_vm3, %v2300_v37 }
 0x356   :  { %v2291_v44 = vsel %vm2278_vm2, %v4883_v10, %v3125_v9 }
 0x357   :  { %v2301_v58 = vpack.c.bf16 %v2292_v45, %v2291_v44 }
 0x359   :  { %v4890_v41 = vpop.permute.xlu0 %2196  ;;  %3078 = vmatprep.mubr.msk.bf16.mxu1 %vm2318_vm3, %v2301_v58 }
 0x35a   :  { %v2294_v42 = vsel %vm2278_vm2, %v4890_v41, %v3131_v27 }
 0x35b   :  { %v2302_v18 = vpack.c.bf16 %v2294_v42, %v2293_v36 }
 0x35d   :  { %3079 = vmatmul.mubr.msk.bf16.gmra.mrb[28].mxu1 %vm2318_vm3, %v2302_v18 }
 0x418   :  { %v3068_v61 = vpop.f32.mrb[16].mxu1 }
 0x419   :  { %v2386_v4 = vadd.f32 %v3068_v61, %v4901_v23  ;;  %v2377_v40 = vpop.f32.mrb[17].mxu1 }
 0x41a   :  { %v3069_v53 = vpop.f32.mrb[18].mxu1  ;;  %v2378_v54 = vadd.f32 %v4901_v23, %v2377_v40 }
 0x41b   :  { %3572 = vtanh.f32 %v2386_v4  ;;  %v2389_v30 = vadd.f32 %v3069_v53, %v4901_v23  ;;  %v2380_v38 = vpop.f32.mrb[19].mxu1 }
 0x41c   :  { %v2381_v15 = vadd.f32 %v4901_v23, %v2380_v38 }
 0x41d   :  { %3574 = vtanh.f32 %v2389_v30 }
 0x41e   :  { %3576 = vtanh.f32 %v2378_v54 }
 0x41f   :  { %3578 = vtanh.f32 %v2381_v15 }
 0x420   :  { %v3072_v33 = vpop.f32.mrb[20].mxu1 }
 0x421   :  { %v2402_v48 = vadd.f32 %v3072_v33, %v4901_v23  ;;  %v2393_v50 = vpop.f32.mrb[21].mxu1 }
 0x422   :  { %v3073_v6 = vpop.f32.mrb[22].mxu1  ;;  %v2394_v55 = vadd.f32 %v4901_v23, %v2393_v50 }
 0x423   :  { %3580 = vtanh.f32 %v2402_v48  ;;  %v2405_v62 = vadd.f32 %v3073_v6, %v4901_v23  ;;  %v2396_v1 = vpop.f32.mrb[23].mxu1 }
 0x424   :  { %v2397_v46 = vadd.f32 %v4901_v23, %v2396_v1  ;;  %v1625_v1 = vpop.permute.xlu1 %1624 }
 0x425   :  { %v3573_v29 = vpop.eup %3572  ;;  %3582 = vtanh.f32 %v2405_v62 }
 0x426   :  { %2476 = vrot.lane.b32.xlu0 %v3573_v29, %s3676_s8  ;;  %3584 = vtanh.f32 %v2394_v55  ;;  %v1623_v55 = vpop.permute.xlu0 %1622 }
 0x427   :  { %v3575_v17 = vpop.eup %3574  ;;  %3586 = vtanh.f32 %v2397_v46 }
 0x428   :  { %2478 = vrot.lane.b32.xlu1 %v3575_v17, %s3676_s8  ;;  %v3076_v32 = vpop.f32.mrb[24].mxu1  ;;  %v3577_v22 = vpop.eup %3576 }
 0x429   :  { %v2418_v37 = vadd.f32 %v3076_v32, %v4901_v23  ;;  %v2409_v52 = vpop.f32.mrb[25].mxu1  ;;  %v3579_v45 = vpop.eup %3578 }
 0x42a   :  { %v3077_v9 = vpop.f32.mrb[26].mxu1  ;;  %2472 = vrot.lane.b32.xlu0 %v3577_v22, %s3676_s8  ;;  %v2410_v34 = vadd.f32 %v4901_v23, %v2409_v52  ;;  %v1629_v32 = vpop.permute.xlu1 %1628  ;;  %v5308_v52 = vld [vmem:[#allocation28_spill] sm:$0xff] }
 0x42b   :  { %3588 = vtanh.f32 %v2418_v37  ;;  %v2421_v44 = vadd.f32 %v3077_v9, %v4901_v23  ;;  %v2412_v58 = vpop.f32.mrb[27].mxu1 }
 0x42c   :  { %2474 = vrot.lane.b32.xlu1 %v3579_v45, %s3676_s8  ;;  %v2413_v36 = vadd.f32 %v4901_v23, %v2412_v58  ;;  %v5309_v45 = vld [vmem:[#allocation30_spill] sm:$0xff]  ;;  %v5311_v58 = vld [vmem:[#allocation33_spill] sm:$0xff] }
 0x42d   :  { %v3581_v27 = vpop.eup %3580  ;;  %3590 = vtanh.f32 %v2421_v44 }
 0x42e   :  { %2484 = vrot.lane.b32.xlu0 %v3581_v27, %s3676_s8  ;;  %3592 = vtanh.f32 %v2410_v34  ;;  %v1633_v9 = vpop.permute.xlu1 %1632  ;;  %v5310_v34 = vld [vmem:[#allocation31_spill] sm:$0xff] }
 0x42f   :  { %v3583_v42 = vpop.eup %3582  ;;  %3594 = vtanh.f32 %v2413_v36  ;;  %v5312_v36 = vld [vmem:[#allocation25_spill] sm:$0xff] }
 0x430   :  { %v3080_v18 = vpop.f32.mrb[28].mxu1  ;;  %2486 = vrot.lane.b32.xlu1 %v3583_v42, %s3676_s8  ;;  %v3585_v61 = vpop.eup %3584  ;;  %v5313_v42 = vld [vmem:[#allocation2_spill] sm:$0xff] }
 0x431   :  { %v2434_v4 = vadd.f32 %v3080_v18, %v4901_v23  ;;  %v2425_v40 = vpop.f32.mrb[29].mxu1  ;;  %v3587_v54 = vpop.eup %3586 }
 0x432   :  { %v3081_v53 = vpop.f32.mrb[30].mxu1  ;;  %2480 = vrot.lane.b32.xlu0 %v3585_v61, %s3676_s8  ;;  %v2426_v30 = vadd.f32 %v4901_v23, %v2425_v40  ;;  %v1637_v27 = vpop.permute.xlu1 %1636  ;;  %v5314_v61 = vld [vmem:[#allocation26_spill] sm:$0xff]  ;;  %v5315_v40 = vld [vmem:[#allocation3_spill] sm:$0xff] }
 0x433   :  { %3596 = vtanh.f32 %v2434_v4  ;;  %v2437_v38 = vadd.f32 %v3081_v53, %v4901_v23  ;;  %v2428_v15 = vpop.f32.mrb[31].mxu1  ;;  %v5316_v53 = vld [vmem:[#allocation5_spill] sm:$0xff] }
 0x434   :  { %2482 = vrot.lane.b32.xlu1 %v3587_v54, %s3676_s8  ;;  %v2429_v48 = vadd.f32 %v4901_v23, %v2428_v15  ;;  %v1627_v23 = vpop.permute.xlu0 %1626  ;;  %v5318_v15 = vld [vmem:[#allocation7_spill] sm:$0xff] }
 0x435   :  { %v3589_v33 = vpop.eup %3588  ;;  %3598 = vtanh.f32 %v2437_v38 }
 0x436   :  { %2492 = vrot.lane.b32.xlu0 %v3589_v33, %s3676_s8  ;;  %3600 = vtanh.f32 %v2426_v30  ;;  %v1641_v4 = vpop.permute.xlu1 %1640  ;;  %v5317_v30 = vld [vmem:[#allocation6_spill] sm:$0xff]  ;;  %v5319_v33 = vld [vmem:[#allocation8_spill] sm:$0xff] }
 0x437   :  { %v3591_v50 = vpop.eup %3590  ;;  %3602 = vtanh.f32 %v2429_v48 }
 0x438   :  { %2494 = vrot.lane.b32.xlu1 %v3591_v50, %s3676_s8  ;;  %v3593_v6 = vpop.eup %3592  ;;  %v1631_v37 = vpop.permute.xlu0 %1630  ;;  %v5320_v50 = vld [vmem:[#allocation9_spill] sm:$0xff] }
 0x439   :  { %v3595_v62 = vpop.eup %3594 }
 0x43a   :  { %2488 = vrot.lane.b32.xlu0 %v3593_v6, %s3676_s8  ;;  %v1645_v38 = vpop.permute.xlu1 %1644 }
 0x43c   :  { %2490 = vrot.lane.b32.xlu1 %v3595_v62, %s3676_s8  ;;  %v1635_v44 = vpop.permute.xlu0 %1634  ;;  %v5321_v62 = vld [vmem:[#allocation10_spill] sm:$0xff] }
 0x43d   :  { %v3597_v29 = vpop.eup %3596 }
 0x43e   :  { %2500 = vrot.lane.b32.xlu0 %v3597_v29, %s3676_s8  ;;  %v4963_v6 = vpop.permute.xlu1 %1648 }
 0x43f   :  { %v3599_v46 = vpop.eup %3598 }
 0x440   :  { %2502 = vrot.lane.b32.xlu1 %v3599_v46, %s3676_s8  ;;  %v3601_v17 = vpop.eup %3600  ;;  %v1639_v18 = vpop.permute.xlu0 %1638 }
 0x441   :  { %v3603_v22 = vpop.eup %3602 }
 0x442   :  { %2496 = vrot.lane.b32.xlu0 %v3601_v17, %s3676_s8  ;;  %v1653_v46 = vpop.permute.xlu1 %1652 }
 0x444   :  { %2498 = vrot.lane.b32.xlu1 %v3603_v22, %s3676_s8  ;;  %v1643_v54 = vpop.permute.xlu0 %1642 }
 0x446   :  { %2664 = vrot.lane.b32.xlu0 %v5308_v52, %s3672_s5  ;;  %v4969_v22 = vpop.permute.xlu1 %2602 }
 0x448   :  { %2666 = vrot.lane.b32.xlu1 %v5309_v45, %s3672_s5  ;;  %v4959_v48 = vpop.permute.xlu0 %1646 }
 0x44a   :  { %2668 = vrot.lane.b32.xlu0 %v5310_v34, %s3672_s5  ;;  %v4973_v45 = vpop.permute.xlu1 %2606  ;;  %v1672_v34 = vadd.f32 %v1627_v23, %v4098_v12  ;;  %v1674_v23 = vadd.f32 %v1631_v37, %v4116_v31  ;;  %v1678_v37 = vadd.f32 %v1639_v18, %v4152_v28 }
 0x44c   :  { %2670 = vrot.lane.b32.xlu1 %v5311_v58, %s3672_s5  ;;  %v1651_v29 = vpop.permute.xlu0 %1650 }
 0x44e   :  { %2672 = vrot.lane.b32.xlu0 %v5312_v36, %s3672_s5  ;;  %v1673_v36 = vadd.f32 %v1629_v32, %v4103_v16  ;;  %v1677_v16 = vadd.f32 %v1637_v27, %v4141_v11  ;;  %v1681_v11 = vadd.f32 %v1645_v38, %v4173_v21  ;;  %v1684_v21 = vadd.f32 %v1651_v29, %v4202_v49 }
 0x450   :  { %2674 = vrot.lane.b32.xlu1 %v5313_v42, %s3672_s5  ;;  %v4967_v17 = vpop.permute.xlu0 %2600  ;;  %v4979_v42 = vpop.permute.xlu1 %2610 }
 0x452   :  { %2676 = vrot.lane.b32.xlu0 %v5314_v61, %s3672_s5  ;;  %v1670_v61 = vadd.f32 %v1623_v55, %v4086_v57 }
 0x454   :  { %2678 = vrot.lane.b32.xlu1 %v5315_v40, %s3672_s5  ;;  %v4971_v52 = vpop.permute.xlu0 %2604  ;;  %v2906_v40 = vmul.f32 -1.442695, %v1672_v34  ;;  %v2908_v34 = vmul.f32 -1.442695, %v1674_v23 }
 0x456   :  { %2680 = vrot.lane.b32.xlu0 %v5316_v53, %s3672_s5  ;;  %v1671_v53 = vadd.f32 %v1625_v1, %v4091_v63  ;;  %3604 = vpow2.f32 %v2906_v40  ;;  %v1675_v63 = vadd.f32 %v1633_v9, %v4121_v35  ;;  %v2911_v1 = vmul.f32 -1.442695, %v1677_v16 }
 0x458   :  { %2682 = vrot.lane.b32.xlu1 %v5317_v30, %s3672_s5  ;;  %v4976_v58 = vpop.permute.xlu0 %2608  ;;  %v2907_v30 = vmul.f32 -1.442695, %v1673_v36  ;;  %v2905_v12 = vmul.f32 -1.442695, %v1671_v53  ;;  %v2909_v36 = vmul.f32 -1.442695, %v1675_v63  ;;  %v1679_v53 = vadd.f32 %v1641_v4, %v4157_v43 }
 0x459   :  { %v1682_v4 = vadd.f32 %v4959_v48, %v4185_v56  ;;  %v1683_v63 = vadd.f32 %v4963_v6, %v4190_v25 }
 0x45a   :  { %2684 = vrot.lane.b32.xlu0 %v5318_v15, %s3672_s5  ;;  %3606 = vpow2.f32 %v2907_v30  ;;  %v2913_v18 = vmul.f32 -1.442695, %v1679_v53 }
 0x45b   :  { %v2917_v48 = vmul.f32 -1.442695, %v1683_v63 }
 0x45c   :  { %2686 = vrot.lane.b32.xlu1 %v5319_v33, %s3672_s5  ;;  %v4983_v15 = vpop.permute.xlu0 %2612  ;;  %v2904_v33 = vmul.f32 -1.442695, %v1670_v61 }
 0x45e   :  { %2688 = vrot.lane.b32.xlu0 %v5320_v50, %s3672_s5  ;;  %v1676_v50 = vadd.f32 %v1635_v44, %v4136_v7  ;;  %3608 = vpow2.f32 %v2904_v33  ;;  %v1680_v7 = vadd.f32 %v1643_v54, %v4169_v19  ;;  %v2915_v19 = vmul.f32 -1.442695, %v1681_v11 }
 0x45f   :  { %3610 = vpow2.f32 %v2905_v12  ;;  %v2912_v33 = vmul.f32 -1.442695, %v1678_v37  ;;  %v1685_v12 = vadd.f32 %v1653_v46, %v4208_v0 }
 0x460   :  { %2690 = vrot.lane.b32.xlu1 %v5321_v62, %s3672_s5  ;;  %v4986_v62 = vpop.permute.xlu1 %2614  ;;  %v2910_v57 = vmul.f32 -1.442695, %v1676_v50  ;;  %v4990_v55 = vpop.permute.xlu0 %2616  ;;  %v2914_v61 = vmul.f32 -1.442695, %v1680_v7  ;;  %v2916_v7 = vmul.f32 -1.442695, %v1682_v4 }
 0x461   :  { %v3605_v44 = vpop.eup %3604 }
 0x462   :  { %3612 = vpow2.f32 %v2910_v57  ;;  %v1736_v35 = vadd.f32 1.0, %v3605_v44  ;;  %v2918_v57 = vmul.f32 -1.442695, %v1684_v21 }
 0x463   :  { %3614 = vpow2.f32 %v2911_v1  ;;  %v2919_v1 = vmul.f32 -1.442695, %v1685_v12 }
 0x464   :  { %v4993_v32 = vpop.permute.xlu1 %2618  ;;  %v4997_v27 = vpop.permute.xlu0 %2620  ;;  %3616 = vpow2.f32 %v2908_v34 }
 0x465   :  { %v3607_v31 = vpop.eup %3606  ;;  %3618 = vpow2.f32 %v2909_v36 }
 0x466   :  { %v1737_v54 = vadd.f32 1.0, %v3607_v31  ;;  %3620 = vpow2.f32 %v2914_v61 }
 0x467   :  { %3622 = vrcp.f32 %v1736_v35 }
 0x468   :  { %v5000_v9 = vpop.permute.xlu1 %2622  ;;  %v3609_v40 = vpop.eup %3608  ;;  %3624 = vpow2.f32 %v2915_v19 }
 0x469   :  { %v3611_v30 = vpop.eup %3610  ;;  %v1734_v38 = vadd.f32 1.0, %v3609_v40  ;;  %v5004_v50 = vpop.permute.xlu0 %2624  ;;  %3626 = vrcp.f32 %v1737_v54 }
 0x46a   :  { %v1735_v16 = vadd.f32 1.0, %v3611_v30  ;;  %3628 = vpow2.f32 %v2912_v33 }
 0x46b   :  { %3630 = vrcp.f32 %v1734_v38 }
 0x46c   :  { %v3613_v28 = vpop.eup %3612  ;;  %v5007_v23 = vpop.permute.xlu1 %2626  ;;  %3632 = vpow2.f32 %v2913_v18 }
 0x46d   :  { %v3615_v43 = vpop.eup %3614  ;;  %v1740_v49 = vadd.f32 1.0, %v3613_v28  ;;  %3634 = vrcp.f32 %v1735_v16  ;;  %v5013_v46 = vpop.permute.xlu0 %2628 }
 0x46e   :  { %v3617_v29 = vpop.eup %3616  ;;  %v1741_v0 = vadd.f32 1.0, %v3615_v43  ;;  %3636 = vpow2.f32 %v2918_v57 }
 0x46f   :  { %v3619_v34 = vpop.eup %3618  ;;  %v1738_v44 = vadd.f32 1.0, %v3617_v29  ;;  %3638 = vrcp.f32 %v1740_v49 }
 0x470   :  { %v5015_v36 = vpop.permute.xlu1 %2630  ;;  %v3621_v56 = vpop.eup %3620  ;;  %3640 = vpow2.f32 %v2919_v1  ;;  %v1739_v31 = vadd.f32 1.0, %v3619_v34 }
 0x471   :  { %v3623_v11 = vpop.eup %3622  ;;  %3642 = vrcp.f32 %v1741_v0  ;;  %v1744_v35 = vadd.f32 1.0, %v3621_v56 }
 0x472   :  { %v3625_v25 = vpop.eup %3624  ;;  %3644 = vpow2.f32 %v2916_v7 }
 0x473   :  { %v3627_v61 = vpop.eup %3626  ;;  %3646 = vrcp.f32 %v1738_v44  ;;  %v1745_v30 = vadd.f32 1.0, %v3625_v25 }
 0x474   :  { %v3629_v53 = vpop.eup %3628  ;;  %3648 = vpow2.f32 %v2917_v48 }
 0x475   :  { %v3631_v54 = vpop.eup %3630  ;;  %3650 = vrcp.f32 %v1739_v31  ;;  %v1742_v18 = vadd.f32 1.0, %v3629_v53 }
 0x476   :  { %v3633_v21 = vpop.eup %3632  ;;  %3652 = vrcp.f32 %v1744_v35 }
 0x477   :  { %v3635_v28 = vpop.eup %3634  ;;  %v1743_v57 = vadd.f32 1.0, %v3633_v21  ;;  %3654 = vrcp.f32 %v1745_v30 }
 0x478   :  { %v3637_v16 = vpop.eup %3636  ;;  %3656 = vrcp.f32 %v1742_v18 }
 0x479   :  { %v3639_v4 = vpop.eup %3638  ;;  %v1748_v0 = vadd.f32 1.0, %v3637_v16  ;;  %3658 = vrcp.f32 %v1743_v57 }
 0x47a   :  { %v3641_v29 = vpop.eup %3640 }
 0x47b   :  { %v3643_v1 = vpop.eup %3642  ;;  %v1749_v48 = vadd.f32 1.0, %v3641_v29  ;;  %3660 = vrcp.f32 %v1748_v0 }
 0x47c   :  { %v3645_v7 = vpop.eup %3644 }
 0x47d   :  { %v3647_v56 = vpop.eup %3646  ;;  %3662 = vrcp.f32 %v1749_v48 }
 0x47e   :  { %v3649_v31 = vpop.eup %3648 }
 0x47f   :  { %v3651_v25 = vpop.eup %3650  ;;  %v1747_v53 = vadd.f32 1.0, %v3649_v31  ;;  %v5323_v31 = vld [vmem:[#allocation12_spill] sm:$0xff] }
 0x498   :  { %v2477_v37 = vpop.permute.xlu0 %2476 }
 0x499   :  { %v2522_v6 = vmul.f32 %v3623_v11, %v2477_v37 }
 0x49a   :  { %v2479_v40 = vpop.permute.xlu1 %2478 }
 0x49b   :  { %v2523_v19 = vmul.f32 %v3627_v61, %v2479_v40  ;;  %2556 = vrot.lane.b32.xlu0 %v2522_v6, %s3677_s30  ;;  %v1746_v6 = vadd.f32 1.0, %v3645_v7  ;;  %v3653_v40 = vpop.eup %3652 }
 0x49c   :  { %v2473_v33 = vpop.permute.xlu0 %2472  ;;  %v3655_v30 = vpop.eup %3654 }
 0x49d   :  { %v2520_v38 = vmul.f32 %v3631_v54, %v2473_v33  ;;  %2558 = vrot.lane.b32.xlu1 %v2523_v19, %s3677_s30  ;;  %3664 = vrcp.f32 %v1746_v6 }
 0x49e   :  { %v2475_v12 = vpop.permute.xlu1 %2474  ;;  %3666 = vrcp.f32 %v1747_v53 }
 0x49f   :  { %v2521_v43 = vmul.f32 %v3635_v28, %v2475_v12  ;;  %2552 = vrot.lane.b32.xlu0 %v2520_v38, %s3677_s30  ;;  %v3657_v38 = vpop.eup %3656 }
 0x4a0   :  { %v2485_v49 = vpop.permute.xlu0 %2484  ;;  %v3659_v12 = vpop.eup %3658 }
 0x4a1   :  { %v2526_v63 = vmul.f32 %v3639_v4, %v2485_v49  ;;  %2554 = vrot.lane.b32.xlu1 %v2521_v43, %s3677_s30  ;;  %v3661_v4 = vpop.eup %3660 }
 0x4a2   :  { %v2487_v34 = vpop.permute.xlu1 %2486  ;;  %v3663_v29 = vpop.eup %3662 }
 0x4a3   :  { %v2527_v44 = vmul.f32 %v3643_v1, %v2487_v34  ;;  %2564 = vrot.lane.b32.xlu0 %v2526_v63, %s3677_s30 }
 0x4a4   :  { %v2481_v11 = vpop.permute.xlu0 %2480 }
 0x4a5   :  { %v2524_v37 = vmul.f32 %v3647_v56, %v2481_v11  ;;  %2566 = vrot.lane.b32.xlu1 %v2527_v44, %s3677_s30  ;;  %v5322_v11 = vld [vmem:[#allocation11_spill] sm:$0xff] }
 0x4a6   :  { %v2483_v61 = vpop.permute.xlu1 %2482 }
 0x4a7   :  { %v2525_v35 = vmul.f32 %v3651_v25, %v2483_v61  ;;  %2560 = vrot.lane.b32.xlu0 %v2524_v37, %s3677_s30  ;;  %v3665_v0 = vpop.eup %3664 }
 0x4a8   :  { %v2493_v19 = vpop.permute.xlu0 %2492  ;;  %v3667_v44 = vpop.eup %3666 }
 0x4a9   :  { %v2530_v54 = vmul.f32 %v3653_v40, %v2493_v19  ;;  %2562 = vrot.lane.b32.xlu1 %v2525_v35, %s3677_s30 }
 0x4aa   :  { %v2495_v33 = vpop.permute.xlu1 %2494 }
 0x4ab   :  { %v2531_v21 = vmul.f32 %v3655_v30, %v2495_v33  ;;  %2572 = vrot.lane.b32.xlu0 %v2530_v54, %s3677_s30 }
 0x4ac   :  { %v2489_v28 = vpop.permute.xlu0 %2488 }
 0x4ad   :  { %v2528_v18 = vmul.f32 %v3657_v38, %v2489_v28  ;;  %2574 = vrot.lane.b32.xlu1 %v2531_v21, %s3677_s30 }
 0x4ae   :  { %v2491_v16 = vpop.permute.xlu1 %2490 }
 0x4af   :  { %v2529_v43 = vmul.f32 %v3659_v12, %v2491_v16  ;;  %2568 = vrot.lane.b32.xlu0 %v2528_v18, %s3677_s30 }
 0x4b0   :  { %v2501_v57 = vpop.permute.xlu0 %2500 }
 0x4b1   :  { %v2534_v49 = vmul.f32 %v3661_v4, %v2501_v57  ;;  %2570 = vrot.lane.b32.xlu1 %v2529_v43, %s3677_s30 }
 0x4b2   :  { %v2503_v63 = vpop.permute.xlu1 %2502 }
 0x4b3   :  { %v2535_v1 = vmul.f32 %v3663_v29, %v2503_v63  ;;  %2580 = vrot.lane.b32.xlu0 %v2534_v49, %s3677_s30 }
 0x4b4   :  { %v2497_v34 = vpop.permute.xlu0 %2496 }
 0x4b5   :  { %v2532_v7 = vmul.f32 %v3665_v0, %v2497_v34  ;;  %2582 = vrot.lane.b32.xlu1 %v2535_v1, %s3677_s30 }
 0x4b6   :  { %v2499_v56 = vpop.permute.xlu1 %2498 }
 0x4b7   :  { %v2533_v48 = vmul.f32 %v3667_v44, %v2499_v56  ;;  %2576 = vrot.lane.b32.xlu0 %v2532_v7, %s3677_s30 }
 0x4b8   :  { %v2665_v37 = vpop.permute.xlu0 %2664 }
 0x4b9   :  { %2578 = vrot.lane.b32.xlu1 %v2533_v48, %s3677_s30 }
 0x4ba   :  { %v2667_v25 = vpop.permute.xlu1 %2666 }
 0x4bb   :  { %2692 = vrot.lane.b32.xlu0 %v5322_v11, %s3672_s5 }
 0x4bc   :  { %v2669_v6 = vpop.permute.xlu0 %2668 }
 0x4bd   :  { %2694 = vrot.lane.b32.xlu1 %v5323_v31, %s3672_s5 }
 0x4be   :  { %v2671_v61 = vpop.permute.xlu1 %2670 }
 0x4c0   :  { %v2673_v35 = vpop.permute.xlu0 %2672 }
 0x4c2   :  { %v2675_v40 = vpop.permute.xlu1 %2674 }
 0x4c4   :  { %v2677_v53 = vpop.permute.xlu0 %2676 }
 0x4c6   :  { %v2679_v19 = vpop.permute.xlu1 %2678 }
 0x4c8   :  { %v5037_v54 = vpop.permute.xlu0 %2680 }
 0x4ca   :  { %v5039_v30 = vpop.permute.xlu1 %2682 }
 0x4cc   :  { %v2685_v33 = vpop.permute.xlu0 %2684 }
 0x4ce   :  { %v2687_v21 = vpop.permute.xlu1 %2686 }
 0x4d0   :  { %v5041_v38 = vpop.permute.xlu0 %2688 }
 0x4d2   :  { %v5043_v28 = vpop.permute.xlu1 %2690 }
 0x50d   :  { %v2557_v18 = vpop.permute.xlu0 %2556 }
 0x50e   :  { %v2714_v12 = vsel %vm2278_vm2, %v4828_v39, %v2557_v18 }
 0x50f   :  { %v2730_v16 = vsel %vm2318_vm3, %v2714_v12, %v4971_v52  ;;  %v2559_v43 = vpop.permute.xlu1 %2558 }
 0x510   :  { %v2747_v4 = vsel %vm2744_vm4, %v2730_v16, %v2669_v6  ;;  %v2715_v57 = vsel %vm2278_vm2, %v4842_v3, %v2559_v43 }
 0x511   :  { %2764 = vst.msk [vmem:[%s5202_s9 + $0x10] sm:$0xff] %vm2761_vm5, %v2747_v4  ;;  %v2731_v49 = vsel %vm2318_vm3, %v2715_v57, %v4973_v45  ;;  %v2553_v29 = vpop.permute.xlu0 %2552 }
 0x512   :  { %v2748_v39 = vsel %vm2744_vm4, %v2731_v49, %v2671_v61  ;;  %v2712_v52 = vsel %vm2278_vm2, %v4834_v8, %v2553_v29 }
 0x513   :  { %2765 = vst.msk [vmem:[%s5202_s9 + $0x18] sm:$0xff] %vm2761_vm5, %v2748_v39  ;;  %v2728_v3 = vsel %vm2318_vm3, %v2712_v52, %v4967_v17  ;;  %v2555_v63 = vpop.permute.xlu1 %2554 }
 0x514   :  { %v2745_v1 = vsel %vm2744_vm4, %v2728_v3, %v2665_v37  ;;  %v2713_v45 = vsel %vm2278_vm2, %v4826_v47, %v2555_v63 }
 0x515   :  { %2762 = vst.msk [vmem:[%s5202_s9] sm:$0xff] %vm2761_vm5, %v2745_v1  ;;  %v2729_v8 = vsel %vm2318_vm3, %v2713_v45, %v4969_v22  ;;  %v2565_v0 = vpop.permute.xlu0 %2564 }
 0x516   :  { %v2746_v34 = vsel %vm2744_vm4, %v2729_v8, %v2667_v25  ;;  %v2718_v17 = vsel %vm2278_vm2, %v4832_v24, %v2565_v0 }
 0x517   :  { %2763 = vst.msk [vmem:[%s5202_s9 + $0x8] sm:$0xff] %vm2761_vm5, %v2746_v34  ;;  %v2734_v47 = vsel %vm2318_vm3, %v2718_v17, %v4983_v15  ;;  %v2567_v7 = vpop.permute.xlu1 %2566 }
 0x518   :  { %v2751_v44 = vsel %vm2744_vm4, %v2734_v47, %v2677_v53  ;;  %v2719_v22 = vsel %vm2278_vm2, %v4860_v20, %v2567_v7 }
 0x519   :  { %2768 = vst.msk [vmem:[%s5202_s9 + $0x30] sm:$0xff] %vm2761_vm5, %v2751_v44  ;;  %v2735_v24 = vsel %vm2318_vm3, %v2719_v22, %v4986_v62  ;;  %v2561_v56 = vpop.permute.xlu0 %2560 }
 0x51a   :  { %v2752_v48 = vsel %vm2744_vm4, %v2735_v24, %v2679_v19  ;;  %v2716_v15 = vsel %vm2278_vm2, %v4851_v60, %v2561_v56 }
 0x51b   :  { %2769 = vst.msk [vmem:[%s5202_s9 + $0x38] sm:$0xff] %vm2761_vm5, %v2752_v48  ;;  %v2732_v20 = vsel %vm2318_vm3, %v2716_v15, %v4976_v58  ;;  %v2563_v11 = vpop.permute.xlu1 %2562 }
 0x51c   :  { %v2749_v31 = vsel %vm2744_vm4, %v2732_v20, %v2673_v35  ;;  %v2717_v62 = vsel %vm2278_vm2, %v4830_v14, %v2563_v11 }
 0x51d   :  { %2766 = vst.msk [vmem:[%s5202_s9 + $0x20] sm:$0xff] %vm2761_vm5, %v2749_v31  ;;  %v2733_v60 = vsel %vm2318_vm3, %v2717_v62, %v4979_v42  ;;  %v2573_v37 = vpop.permute.xlu0 %2572 }
 0x51e   :  { %v2750_v25 = vsel %vm2744_vm4, %v2733_v60, %v2675_v40  ;;  %v2722_v58 = vsel %vm2278_vm2, %v4849_v2, %v2573_v37 }
 0x51f   :  { %2767 = vst.msk [vmem:[%s5202_s9 + $0x28] sm:$0xff] %vm2761_vm5, %v2750_v25  ;;  %v2738_v14 = vsel %vm2318_vm3, %v2722_v58, %v4997_v27  ;;  %v2575_v6 = vpop.permute.xlu1 %2574 }
 0x520   :  { %v2755_v61 = vsel %vm2744_vm4, %v2738_v14, %v2685_v33  ;;  %v2723_v42 = vsel %vm2278_vm2, %v4876_v26, %v2575_v6 }
 0x521   :  { %2772 = vst.msk [vmem:[%s5202_s9 + $0x50] sm:$0xff] %vm2761_vm5, %v2755_v61  ;;  %v2739_v2 = vsel %vm2318_vm3, %v2723_v42, %v5000_v9  ;;  %v2569_v35 = vpop.permute.xlu0 %2568 }
 0x522   :  { %v2756_v40 = vsel %vm2744_vm4, %v2739_v2, %v2687_v21  ;;  %v2720_v27 = vsel %vm2278_vm2, %v4869_v59, %v2569_v35 }
 0x523   :  { %2773 = vst.msk [vmem:[%s5202_s9 + $0x58] sm:$0xff] %vm2761_vm5, %v2756_v40  ;;  %v2736_v26 = vsel %vm2318_vm3, %v2720_v27, %v4990_v55  ;;  %v2571_v53 = vpop.permute.xlu1 %2570 }
 0x524   :  { %v2753_v19 = vsel %vm2744_vm4, %v2736_v26, %v5037_v54  ;;  %v2721_v9 = vsel %vm2278_vm2, %v4840_v5, %v2571_v53 }
 0x525   :  { %2770 = vst.msk [vmem:[%s5202_s9 + $0x40] sm:$0xff] %vm2761_vm5, %v2753_v19  ;;  %v2737_v59 = vsel %vm2318_vm3, %v2721_v9, %v4993_v32  ;;  %v2581_v33 = vpop.permute.xlu0 %2580 }
 0x526   :  { %v2754_v21 = vsel %vm2744_vm4, %v2737_v59, %v5039_v30  ;;  %v2726_v5 = vsel %vm2278_vm2, %v4867_v51, %v2581_v33 }
 0x527   :  { %2771 = vst.msk [vmem:[%s5202_s9 + $0x48] sm:$0xff] %vm2761_vm5, %v2754_v21  ;;  %v2583_v55 = vpop.permute.xlu1 %2582 }
 0x528   :  { %v2727_v30 = vsel %vm2278_vm2, %v4890_v41, %v2583_v55 }
 0x529   :  { %v2577_v54 = vpop.permute.xlu0 %2576 }
 0x52a   :  { %v2724_v18 = vsel %vm2278_vm2, %v4883_v10, %v2577_v54  ;;  %v2742_v10 = vsel %vm2318_vm3, %v2726_v5, %v5013_v46 }
 0x52b   :  { %v2740_v32 = vsel %vm2318_vm3, %v2724_v18, %v5004_v50  ;;  %v2579_v12 = vpop.permute.xlu1 %2578 }
 0x52c   :  { %v2757_v16 = vsel %vm2744_vm4, %v2740_v32, %v5041_v38  ;;  %v2725_v43 = vsel %vm2278_vm2, %v4858_v13, %v2579_v12  ;;  %v2743_v13 = vsel %vm2318_vm3, %v2727_v30, %v5015_v36 }
 0x52d   :  { %2774 = vst.msk [vmem:[%s5202_s9 + $0x60] sm:$0xff] %vm2761_vm5, %v2757_v16  ;;  %v2741_v51 = vsel %vm2318_vm3, %v2725_v43, %v5007_v23  ;;  %v2693_v50 = vpop.permute.xlu0 %2692 }
 0x52e   :  { %v2758_v41 = vsel %vm2744_vm4, %v2741_v51, %v5043_v28  ;;  %v2759_v38 = vsel %vm2744_vm4, %v2742_v10, %v2693_v50 }
 0x52f   :  { %2775 = vst.msk [vmem:[%s5202_s9 + $0x68] sm:$0xff] %vm2761_vm5, %v2758_v41  ;;  %2776 = vst.msk [vmem:[%s5202_s9 + $0x70] sm:$0xff] %vm2761_vm5, %v2759_v38  ;;  %v2695_v23 = vpop.permute.xlu1 %2694 }
 0x530   :  { %v2760_v46 = vsel %vm2744_vm4, %v2743_v13, %v2695_v23 }
 0x531   :  { %2777 = vst.msk [vmem:[%s5202_s9 + $0x78] sm:$0xff] %vm2761_vm5, %v2760_v46 }

</bundles_post_ra>
